<compile_context>
chip_gen: v5e
topology: v5e:2x2
jax: 0.10.0
libtpu: 0.0.40
codegen_flags: <defaults>
</compile_context>

<pallas_src>
import math
from functools import partial

import jax
import jax.numpy as jnp
from jax.experimental import pallas as pl
from jax.experimental.pallas import tpu as pltpu

COMPUTE_DTYPE = jnp.bfloat16   # MXU-native matmul inputs; accumulation stays f32
NEG_SLOPE = 0.1                # LeakyReLU slope used throughout the model


# ------------------------------ Pallas kernel --------------------------------

def _make_conv_kernel(branch_meta, num_branches, has_bias, has_residual):
    """branch_meta: tuple of (tap_offsets, apply_lrelu, cout_b) per branch."""

    def kernel(*refs):
        i = 0
        x_ref = refs[i]; i += 1
        w_refs = refs[i:i + num_branches]; i += num_branches
        bias_ref = refs[i] if has_bias else None
        i += int(has_bias)
        res_ref = refs[i] if has_residual else None
        i += int(has_residual)
        o_ref = refs[i]

        j_len = o_ref.shape[-1]            # flattened (H * Wp) spatial extent
        outs = []
        co = 0
        for b, (offsets, lrelu, cout_b) in enumerate(branch_meta):
            # in-kernel im2col: static lane-offset slices of the padded image.
            # (upcast to f32 so the sublane concat works on aligned 8-row tiles,
            #  then feed the MXU in bf16 -- casts are cheap VPU work.)
            taps = [x_ref[0, :, pl.ds(off, j_len)].astype(jnp.float32)
                    for off in offsets]
            xt = taps[0] if len(taps) == 1 else jnp.concatenate(taps, axis=0)
            acc = jnp.dot(w_refs[b][...], xt.astype(COMPUTE_DTYPE),
                          preferred_element_type=jnp.float32)     # (cout_b, J)
            if has_bias:
                acc = acc + bias_ref[pl.ds(co, cout_b), :]
            if lrelu:
                acc = jnp.where(acc >= 0.0, acc, NEG_SLOPE * acc)  # LeakyReLU(0.1)
            outs.append(acc)
            co += cout_b
        out = outs[0] if len(outs) == 1 else jnp.concatenate(outs, axis=0)
        if has_residual:
            out = out + res_ref[0].astype(jnp.float32)
        o_ref[0] = out.astype(o_ref.dtype)

    return kernel


# ------------------------- generic fused conv layer ---------------------------

def conv_block(x, branches, residual=None, out_dtype=None):
    """Fused multi-branch 'same' convolution layer (stride 1).

    x        : (N, Cin, H, W) channels-first activation.
    branches : list of dicts {'w': (Cout_b, Cin, KH, KW) OIHW weight,
                              'dil': dilation (padding = dil*(KH//2)),
                              'lrelu': bool, 'bias': optional (Cout_b,)}.
               All branches read the same input; outputs are concatenated along
               the channel axis (torch.cat semantics).
    residual : optional (N, sum(Cout_b), H, W) tensor added to the output.
    Returns  : (N, sum(Cout_b), H, W).
    """
    N, Cin, H, W = x.shape
    out_dtype = COMPUTE_DTYPE if out_dtype is None else out_dtype

    # Shared padding for all branches: pc = max 'same' column padding; one extra
    # guard row (pr = pc + 1) keeps every in-kernel tap slice statically in-bounds.
    pc = 0
    for br in branches:
        khs = br['w'].shape[2]
        pc = max(pc, br.get('dil', 1) * (khs // 2))
    pr = pc + 1 if pc > 0 else 0
    Hp, Wp = H + 2 * pr, W + 2 * pc
    L, J = Hp * Wp, H * Wp

    xflat = jnp.pad(x.astype(COMPUTE_DTYPE),
                    ((0, 0), (0, 0), (pr, pr), (pc, pc))).reshape(N, Cin, L)

    branch_meta, w_folds, biases = [], [], []
    any_bias = any(br.get('bias') is not None for br in branches)
    cout_total = 0
    for br in branches:
        w = br['w']
        cout_b, cin_b, KH, KW = w.shape
        assert cin_b == Cin
        d = br.get('dil', 1)
        offsets = tuple(
            pr * Wp + (kh - KH // 2) * d * Wp + (kw - KW // 2) * d
            for kh in range(KH) for kw in range(KW))
        # fold taps into the contraction: (Cout, KH*KW*Cin), col = t*Cin + ci
        w_folds.append(jnp.transpose(w, (0, 2, 3, 1))
                       .reshape(cout_b, KH * KW * Cin).astype(COMPUTE_DTYPE))
        branch_meta.append((offsets, bool(br.get('lrelu', False)), cout_b))
        bvec = br.get('bias')
        biases.append(jnp.zeros((cout_b,), jnp.float32) if bvec is None
                      else bvec.astype(jnp.float32))
        cout_total += cout_b

    inputs = [xflat] + w_folds
    in_specs = [pl.BlockSpec((1, Cin, L), lambda i: (i, 0, 0))]
    # weights stay resident in VMEM: index_map ignores the grid index
    in_specs += [pl.BlockSpec(wf.shape, lambda i: (0, 0)) for wf in w_folds]
    if any_bias:
        inputs.append(jnp.concatenate(biases, axis=0).reshape(cout_total, 1))
        in_specs.append(pl.BlockSpec((cout_total, 1), lambda i: (0, 0)))
    has_res = residual is not None
    if has_res:
        res = jnp.pad(residual.astype(COMPUTE_DTYPE),
                      ((0, 0), (0, 0), (0, 0), (pc, pc))).reshape(N, cout_total, J)
        inputs.append(res)
        in_specs.append(pl.BlockSpec((1, cout_total, J), lambda i: (i, 0, 0)))

    out_flat = pl.pallas_call(
        _make_conv_kernel(tuple(branch_meta), len(branches), any_bias, has_res),
        out_shape=jax.ShapeDtypeStruct((N, cout_total, J), out_dtype),
        grid=(N,),
        in_specs=in_specs,
        out_specs=pl.BlockSpec((1, cout_total, J), lambda i: (i, 0, 0)),
        compiler_params=pltpu.CompilerParams(
            dimension_semantics=("parallel",),
            vmem_limit_bytes=32 * 1024 * 1024),
    )(*inputs)

    out = out_flat.reshape(N, cout_total, H, Wp)
    if pc:
        out = out[:, :, :, pc:pc + W]     # drop the don't-care padded columns
    return out


# ------------------------------- model blocks ---------------------------------

def res_aspp(x, p):
    # three dilated 3x3 branches fused into ONE kernel (reads x once, writes 3C)
    cat = conv_block(x, [{'w': p['conv1'], 'dil': 1, 'lrelu': True},
                         {'w': p['conv2'], 'dil': 2, 'lrelu': True},
                         {'w': p['conv3'], 'dil': 4, 'lrelu': True}])
    return conv_block(cat, [{'w': p['convt'], 'dil': 1}], residual=x)


def rb_block(x, p):
    buf = conv_block(x, [{'w': p['conv01'], 'dil': 1, 'lrelu': True}])
    return conv_block(buf, [{'w': p['conv02'], 'dil': 1}], residual=x)


def fea_extract(x, p):
    buf = conv_block(x, [{'w': p['feconv'], 'dil': 1}])   # 1x1 FEconv
    buf = res_aspp(buf, p['ferb1'])
    buf = rb_block(buf, p['ferb2'])
    buf = res_aspp(buf, p['ferb3'])
    buf = rb_block(buf, p['ferb4'])
    return buf


def rdb_block(x, p):
    buf = x
    for cp in p['convs']:                                   # one_conv layers
        out = conv_block(buf, [{'w': cp['w'], 'dil': 1, 'lrelu': True,
                                'bias': cp['b']}])
        buf = jnp.concatenate([buf, out], axis=1)           # cat(x, output)
    return conv_block(buf, [{'w': p['lff_w'], 'dil': 1, 'bias': p['lff_b']}],
                      residual=x)                           # LFF + x


def rdg_block(x, p):
    buf = x
    feats = []
    for rp in p['rdbs']:
        buf = rdb_block(buf, rp)
        feats.append(buf)
    cat = jnp.concatenate(feats, axis=1)
    return conv_block(cat, [{'w': p['conv_w'], 'dil': 1, 'bias': p['conv_b']}])


def pixel_shuffle(x, r):
    N, crr, H, W = x.shape
    c = crr // (r * r)
    x = x.reshape(N, c, r, r, H, W).transpose(0, 1, 4, 2, 5, 3)
    return x.reshape(N, c, H * r, W * r)


def upsample_spi(x, p, b, n, factor):
    y = conv_block(x, [{'w': p['up1'], 'dil': 1}])          # 1x1 -> C*f*f
    y = pixel_shuffle(y, factor)                            # data rearrangement
    y = conv_block(y, [{'w': p['up2'], 'dil': 1}], out_dtype=jnp.float32)  # -> 1ch
    N, c1, Hf, Wf = y.shape
    return y.reshape(b, n, c1, Hf, Wf)


def sisr_forward(x_sv, x_sv_upscale, params, *, factor):
    b, n, c, h, w = x_sv.shape
    x = x_sv.reshape(b * n, c, h, w)
    feat = fea_extract(x, params['fea'])
    x1 = rdg_block(feat, params['recons'])
    out = upsample_spi(x1, params['up'], b, n, factor)
    return out.astype(jnp.float32) + x_sv_upscale


# --------------------------- deterministic params ------------------------------

class _KeyGen:
    def __init__(self, key):
        self._key = key

    def __call__(self):
        self._key, sub = jax.random.split(self._key)
        return sub


def _uniform(key, shape, fan_in):
    bound = 1.0 / math.sqrt(float(fan_in))
    return jax.random.uniform(key, shape, jnp.float32, -bound, bound)


def init_sisr_params(key, in_channel, out_channel, factor, C=4, G=24, n_rdb=4):
    kg = _KeyGen(key)
    Co = out_channel

    def w(cout, cin, k):
        return _uniform(kg(), (cout, cin, k, k), cin * k * k)

    def bias(cout, cin, k):
        return _uniform(kg(), (cout,), cin * k * k)

    def res_aspp_p(c):
        return {'conv1': w(c, c, 3), 'conv2': w(c, c, 3), 'conv3': w(c, c, 3),
                'convt': w(c, 3 * c, 3)}

    def rb_p(c):
        return {'conv01': w(c, c, 3), 'conv02': w(c, c, 3)}

    fea = {'feconv': w(Co, in_channel, 1),
           'ferb1': res_aspp_p(Co), 'ferb2': rb_p(Co),
           'ferb3': res_aspp_p(Co), 'ferb4': rb_p(Co)}

    def rdb_p():
        convs = []
        for i in range(C):
            cin = Co + i * G
            convs.append({'w': w(G, cin, 3), 'b': bias(G, cin, 3)})
        cin_lff = Co + C * G
        return {'convs': convs,
                'lff_w': w(Co, cin_lff, 1), 'lff_b': bias(Co, cin_lff, 1)}

    recons = {'rdbs': [rdb_p() for _ in range(n_rdb)],
              'conv_w': w(Co, Co * n_rdb, 1), 'conv_b': bias(Co, Co * n_rdb, 1)}

    up = {'up1': w(Co * factor * factor, Co, 1),
          'up2': w(1, Co, 1)}

    return {'fea': fea, 'recons': recons, 'up': up}


# ----------------------------------- main --------------------------------------

if __name__ == "__main__":
    key = jax.random.PRNGKey(0)
    kx, ku, kp = jax.random.split(key, 3)

    b, n, in_channel, h, w = 2, 2, 4, 16, 16
    out_channel, factor = 8, 2

    x_sv = jax.random.normal(kx, (b, n, in_channel, h, w), jnp.float32)
    x_sv_upscale = jax.random.normal(
        ku, (b, n, 1, h * factor, w * factor), jnp.float32)
    params = init_sisr_params(kp, in_channel, out_channel, factor)

    fwd = jax.jit(partial(sisr_forward, factor=factor))
    out = jax.block_until_ready(fwd(x_sv, x_sv_upscale, params))

    assert out.shape == (b, n, 1, h * factor, w * factor), out.shape
    assert bool(jnp.isfinite(out).all())
    print("KERNEL_OK")
</pallas_src>

<mosaic_0001>
module attributes {stable_mosaic.version = 11 : i64} {
  func.func @kernel(%arg0: i32, %arg1: memref<1x4x256xbf16, #tpu.memory_space<vmem>>, %arg2: memref<8x4xbf16, #tpu.memory_space<vmem>>, %arg3: memref<1x8x256xbf16, #tpu.memory_space<vmem>>) attributes {dimension_semantics = [#tpu.dimension_semantics<parallel>], iteration_bounds = array<i64: 4>, scalar_prefetch = 0 : i64, scratch_operands = 0 : i64, tpu.core_type = #tpu.core_type<tc>, window_params = [{transform_indices = @transform_0, window_bounds = array<i64: 1, 4, 256>}, {pipeline_mode = #tpu.pipeline_mode<synchronous>, transform_indices = @transform_1, window_bounds = array<i64: 8, 4>}, {transform_indices = @transform_2, window_bounds = array<i64: 1, 8, 256>}]} {
    %c0 = arith.constant 0 : index
    %c0_0 = arith.constant 0 : index
    %c0_1 = arith.constant 0 : index
    %0 = vector.load %arg1[%c0, %c0_0, %c0_1] : memref<1x4x256xbf16, #tpu.memory_space<vmem>>, vector<1x4x256xbf16>
    %1 = vector.shape_cast %0 : vector<1x4x256xbf16> to vector<4x256xbf16>
    %2 = arith.extf %1 : vector<4x256xbf16> to vector<4x256xf32>
    %c0_2 = arith.constant 0 : index
    %c0_3 = arith.constant 0 : index
    %3 = vector.load %arg2[%c0_2, %c0_3] : memref<8x4xbf16, #tpu.memory_space<vmem>>, vector<8x4xbf16>
    %4 = arith.truncf %2 : vector<4x256xf32> to vector<4x256xbf16>
    %cst = arith.constant dense<0.000000e+00> : vector<8x256xf32>
    %5 = tpu.matmul %3, %4, %cst {dimension_numbers = #tpu.dot_dimension_numbers<[1], [0], [0], [1], [0, 0, 1, 1], [], []>} : vector<8x4xbf16>, vector<4x256xbf16>, vector<8x256xf32> -> vector<8x256xf32>
    %6 = arith.truncf %5 : vector<8x256xf32> to vector<8x256xbf16>
    %c0_4 = arith.constant 0 : index
    %c0_5 = arith.constant 0 : index
    %c0_6 = arith.constant 0 : index
    %7 = vector.load %arg3[%c0_4, %c0_5, %c0_6] : memref<1x8x256xbf16, #tpu.memory_space<vmem>>, vector<1x8x256xbf16>
    %8 = vector.shape_cast %7 : vector<1x8x256xbf16> to vector<8x256xbf16>
    %9 = vector.shape_cast %6 : vector<8x256xbf16> to vector<1x8x256xbf16>
    tpu.vector_store %arg3[%c0_4, %c0_5, %c0_6], %9 {strides = array<i32>} : memref<1x8x256xbf16, #tpu.memory_space<vmem>>, vector<1x8x256xbf16>,
    return
  }
  func.func @transform_0(%arg0: i32) -> (i32, i32, i32) {
    %c0_i32 = arith.constant 0 : i32
    %c0_i32_0 = arith.constant 0 : i32
    %c0_i32_1 = arith.constant 0 : i32
    return %arg0, %c0_i32, %c0_i32_0 : i32, i32, i32
  }
  func.func @transform_1(%arg0: i32) -> (i32, i32) {
    %c0_i32 = arith.constant 0 : i32
    %c0_i32_0 = arith.constant 0 : i32
    %c0_i32_1 = arith.constant 0 : i32
    return %c0_i32, %c0_i32_0 : i32, i32
  }
  func.func @transform_2(%arg0: i32) -> (i32, i32, i32) {
    %c0_i32 = arith.constant 0 : i32
    %c0_i32_0 = arith.constant 0 : i32
    %c0_i32_1 = arith.constant 0 : i32
    return %arg0, %c0_i32, %c0_i32_0 : i32, i32, i32
  }
}

module attributes {stable_mosaic.version = 11 : i64} {
  func.func @kernel(%arg0: i32, %arg1: memref<1x8x624xbf16, #tpu.memory_space<vmem>>, %arg2: memref<8x72xbf16, #tpu.memory_space<vmem>>, %arg3: memref<8x72xbf16, #tpu.memory_space<vmem>>, %arg4: memref<8x72xbf16, #tpu.memory_space<vmem>>, %arg5: memref<1x24x384xbf16, #tpu.memory_space<vmem>>) attributes {dimension_semantics = [#tpu.dimension_semantics<parallel>], iteration_bounds = array<i64: 4>, scalar_prefetch = 0 : i64, scratch_operands = 0 : i64, tpu.core_type = #tpu.core_type<tc>, window_params = [{transform_indices = @transform_0, window_bounds = array<i64: 1, 8, 624>}, {pipeline_mode = #tpu.pipeline_mode<synchronous>, transform_indices = @transform_1, window_bounds = array<i64: 8, 72>}, {pipeline_mode = #tpu.pipeline_mode<synchronous>, transform_indices = @transform_2, window_bounds = array<i64: 8, 72>}, {pipeline_mode = #tpu.pipeline_mode<synchronous>, transform_indices = @transform_3, window_bounds = array<i64: 8, 72>}, {transform_indices = @transform_4, window_bounds = array<i64: 1, 24, 384>}]} {
    %c0 = arith.constant 0 : index
    %c0_0 = arith.constant 0 : index
    %c95 = arith.constant 95 : index
    %0 = vector.load %arg1[%c0, %c0_0, %c95] : memref<1x8x624xbf16, #tpu.memory_space<vmem>>, vector<1x8x384xbf16>
    %1 = vector.shape_cast %0 : vector<1x8x384xbf16> to vector<8x384xbf16>
    %2 = arith.extf %1 : vector<8x384xbf16> to vector<8x384xf32>
    %c0_1 = arith.constant 0 : index
    %c0_2 = arith.constant 0 : index
    %c96 = arith.constant 96 : index
    %3 = vector.load %arg1[%c0_1, %c0_2, %c96] : memref<1x8x624xbf16, #tpu.memory_space<vmem>>, vector<1x8x384xbf16>
    %4 = vector.shape_cast %3 : vector<1x8x384xbf16> to vector<8x384xbf16>
    %5 = arith.extf %4 : vector<8x384xbf16> to vector<8x384xf32>
    %c0_3 = arith.constant 0 : index
    %c0_4 = arith.constant 0 : index
    %c97 = arith.constant 97 : index
    %6 = vector.load %arg1[%c0_3, %c0_4, %c97] : memref<1x8x624xbf16, #tpu.memory_space<vmem>>, vector<1x8x384xbf16>
    %7 = vector.shape_cast %6 : vector<1x8x384xbf16> to vector<8x384xbf16>
    %8 = arith.extf %7 : vector<8x384xbf16> to vector<8x384xf32>
    %c0_5 = arith.constant 0 : index
    %c0_6 = arith.constant 0 : index
    %c119 = arith.constant 119 : index
    %9 = vector.load %arg1[%c0_5, %c0_6, %c119] : memref<1x8x624xbf16, #tpu.memory_space<vmem>>, vector<1x8x384xbf16>
    %10 = vector.shape_cast %9 : vector<1x8x384xbf16> to vector<8x384xbf16>
    %11 = arith.extf %10 : vector<8x384xbf16> to vector<8x384xf32>
    %c0_7 = arith.constant 0 : index
    %c0_8 = arith.constant 0 : index
    %c120 = arith.constant 120 : index
    %12 = vector.load %arg1[%c0_7, %c0_8, %c120] : memref<1x8x624xbf16, #tpu.memory_space<vmem>>, vector<1x8x384xbf16>
    %13 = vector.shape_cast %12 : vector<1x8x384xbf16> to vector<8x384xbf16>
    %14 = arith.extf %13 : vector<8x384xbf16> to vector<8x384xf32>
    %c0_9 = arith.constant 0 : index
    %c0_10 = arith.constant 0 : index
    %c121 = arith.constant 121 : index
    %15 = vector.load %arg1[%c0_9, %c0_10, %c121] : memref<1x8x624xbf16, #tpu.memory_space<vmem>>, vector<1x8x384xbf16>
    %16 = vector.shape_cast %15 : vector<1x8x384xbf16> to vector<8x384xbf16>
    %17 = arith.extf %16 : vector<8x384xbf16> to vector<8x384xf32>
    %c0_11 = arith.constant 0 : index
    %c0_12 = arith.constant 0 : index
    %c143 = arith.constant 143 : index
    %18 = vector.load %arg1[%c0_11, %c0_12, %c143] : memref<1x8x624xbf16, #tpu.memory_space<vmem>>, vector<1x8x384xbf16>
    %19 = vector.shape_cast %18 : vector<1x8x384xbf16> to vector<8x384xbf16>
    %20 = arith.extf %19 : vector<8x384xbf16> to vector<8x384xf32>
    %c0_13 = arith.constant 0 : index
    %c0_14 = arith.constant 0 : index
    %c144 = arith.constant 144 : index
    %21 = vector.load %arg1[%c0_13, %c0_14, %c144] : memref<1x8x624xbf16, #tpu.memory_space<vmem>>, vector<1x8x384xbf16>
    %22 = vector.shape_cast %21 : vector<1x8x384xbf16> to vector<8x384xbf16>
    %23 = arith.extf %22 : vector<8x384xbf16> to vector<8x384xf32>
    %c0_15 = arith.constant 0 : index
    %c0_16 = arith.constant 0 : index
    %c145 = arith.constant 145 : index
    %24 = vector.load %arg1[%c0_15, %c0_16, %c145] : memref<1x8x624xbf16, #tpu.memory_space<vmem>>, vector<1x8x384xbf16>
    %25 = vector.shape_cast %24 : vector<1x8x384xbf16> to vector<8x384xbf16>
    %26 = arith.extf %25 : vector<8x384xbf16> to vector<8x384xf32>
    %27 = tpu.concatenate %2, %5, %8, %11, %14, %17, %20, %23, %26 in 0 : vector<8x384xf32>, vector<8x384xf32>, vector<8x384xf32>, vector<8x384xf32>, vector<8x384xf32>, vector<8x384xf32>, vector<8x384xf32>, vector<8x384xf32>, vector<8x384xf32> -> vector<72x384xf32>
    %c0_17 = arith.constant 0 : index
    %c0_18 = arith.constant 0 : index
    %28 = vector.load %arg2[%c0_17, %c0_18] : memref<8x72xbf16, #tpu.memory_space<vmem>>, vector<8x72xbf16>
    %29 = arith.truncf %27 : vector<72x384xf32> to vector<72x384xbf16>
    %cst = arith.constant dense<0.000000e+00> : vector<8x384xf32>
    %30 = tpu.matmul %28, %29, %cst {dimension_numbers = #tpu.dot_dimension_numbers<[1], [0], [0], [1], [0, 0, 1, 1], [], []>} : vector<8x72xbf16>, vector<72x384xbf16>, vector<8x384xf32> -> vector<8x384xf32>
    %cst_19 = arith.constant 0.000000e+00 : f32
    %31 = vector.broadcast %cst_19 : f32 to vector<8x384xf32>
    %32 = arith.cmpf oge, %30, %31 : vector<8x384xf32>
    %cst_20 = arith.constant 1.000000e-01 : f32
    %33 = vector.broadcast %cst_20 : f32 to vector<8x384xf32>
    %34 = arith.mulf %33, %30 : vector<8x384xf32>
    %35 = arith.select %32, %30, %34 : vector<8x384xi1>, vector<8x384xf32>
    %c0_21 = arith.constant 0 : index
    %c0_22 = arith.constant 0 : index
    %c70 = arith.constant 70 : index
    %36 = vector.load %arg1[%c0_21, %c0_22, %c70] : memref<1x8x624xbf16, #tpu.memory_space<vmem>>, vector<1x8x384xbf16>
    %37 = vector.shape_cast %36 : vector<1x8x384xbf16> to vector<8x384xbf16>
    %38 = arith.extf %37 : vector<8x384xbf16> to vector<8x384xf32>
    %c0_23 = arith.constant 0 : index
    %c0_24 = arith.constant 0 : index
    %c72 = arith.constant 72 : index
    %39 = vector.load %arg1[%c0_23, %c0_24, %c72] : memref<1x8x624xbf16, #tpu.memory_space<vmem>>, vector<1x8x384xbf16>
    %40 = vector.shape_cast %39 : vector<1x8x384xbf16> to vector<8x384xbf16>
    %41 = arith.extf %40 : vector<8x384xbf16> to vector<8x384xf32>
    %c0_25 = arith.constant 0 : index
    %c0_26 = arith.constant 0 : index
    %c74 = arith.constant 74 : index
    %42 = vector.load %arg1[%c0_25, %c0_26, %c74] : memref<1x8x624xbf16, #tpu.memory_space<vmem>>, vector<1x8x384xbf16>
    %43 = vector.shape_cast %42 : vector<1x8x384xbf16> to vector<8x384xbf16>
    %44 = arith.extf %43 : vector<8x384xbf16> to vector<8x384xf32>
    %c0_27 = arith.constant 0 : index
    %c0_28 = arith.constant 0 : index
    %c118 = arith.constant 118 : index
    %45 = vector.load %arg1[%c0_27, %c0_28, %c118] : memref<1x8x624xbf16, #tpu.memory_space<vmem>>, vector<1x8x384xbf16>
    %46 = vector.shape_cast %45 : vector<1x8x384xbf16> to vector<8x384xbf16>
    %47 = arith.extf %46 : vector<8x384xbf16> to vector<8x384xf32>
    %c0_29 = arith.constant 0 : index
    %c0_30 = arith.constant 0 : index
    %c120_31 = arith.constant 120 : index
    %48 = vector.load %arg1[%c0_29, %c0_30, %c120_31] : memref<1x8x624xbf16, #tpu.memory_space<vmem>>, vector<1x8x384xbf16>
    %49 = vector.shape_cast %48 : vector<1x8x384xbf16> to vector<8x384xbf16>
    %50 = arith.extf %49 : vector<8x384xbf16> to vector<8x384xf32>
    %c0_32 = arith.constant 0 : index
    %c0_33 = arith.constant 0 : index
    %c122 = arith.constant 122 : index
    %51 = vector.load %arg1[%c0_32, %c0_33, %c122] : memref<1x8x624xbf16, #tpu.memory_space<vmem>>, vector<1x8x384xbf16>
    %52 = vector.shape_cast %51 : vector<1x8x384xbf16> to vector<8x384xbf16>
    %53 = arith.extf %52 : vector<8x384xbf16> to vector<8x384xf32>
    %c0_34 = arith.constant 0 : index
    %c0_35 = arith.constant 0 : index
    %c166 = arith.constant 166 : index
    %54 = vector.load %arg1[%c0_34, %c0_35, %c166] : memref<1x8x624xbf16, #tpu.memory_space<vmem>>, vector<1x8x384xbf16>
    %55 = vector.shape_cast %54 : vector<1x8x384xbf16> to vector<8x384xbf16>
    %56 = arith.extf %55 : vector<8x384xbf16> to vector<8x384xf32>
    %c0_36 = arith.constant 0 : index
    %c0_37 = arith.constant 0 : index
    %c168 = arith.constant 168 : index
    %57 = vector.load %arg1[%c0_36, %c0_37, %c168] : memref<1x8x624xbf16, #tpu.memory_space<vmem>>, vector<1x8x384xbf16>
    %58 = vector.shape_cast %57 : vector<1x8x384xbf16> to vector<8x384xbf16>
    %59 = arith.extf %58 : vector<8x384xbf16> to vector<8x384xf32>
    %c0_38 = arith.constant 0 : index
    %c0_39 = arith.constant 0 : index
    %c170 = arith.constant 170 : index
    %60 = vector.load %arg1[%c0_38, %c0_39, %c170] : memref<1x8x624xbf16, #tpu.memory_space<vmem>>, vector<1x8x384xbf16>
    %61 = vector.shape_cast %60 : vector<1x8x384xbf16> to vector<8x384xbf16>
    %62 = arith.extf %61 : vector<8x384xbf16> to vector<8x384xf32>
    %63 = tpu.concatenate %38, %41, %44, %47, %50, %53, %56, %59, %62 in 0 : vector<8x384xf32>, vector<8x384xf32>, vector<8x384xf32>, vector<8x384xf32>, vector<8x384xf32>, vector<8x384xf32>, vector<8x384xf32>, vector<8x384xf32>, vector<8x384xf32> -> vector<72x384xf32>
    %c0_40 = arith.constant 0 : index
    %c0_41 = arith.constant 0 : index
    %64 = vector.load %arg3[%c0_40, %c0_41] : memref<8x72xbf16, #tpu.memory_space<vmem>>, vector<8x72xbf16>
    %65 = arith.truncf %63 : vector<72x384xf32> to vector<72x384xbf16>
    %cst_42 = arith.constant dense<0.000000e+00> : vector<8x384xf32>
    %66 = tpu.matmul %64, %65, %cst_42 {dimension_numbers = #tpu.dot_dimension_numbers<[1], [0], [0], [1], [0, 0, 1, 1], [], []>} : vector<8x72xbf16>, vector<72x384xbf16>, vector<8x384xf32> -> vector<8x384xf32>
    %cst_43 = arith.constant 0.000000e+00 : f32
    %67 = vector.broadcast %cst_43 : f32 to vector<8x384xf32>
    %68 = arith.cmpf oge, %66, %67 : vector<8x384xf32>
    %cst_44 = arith.constant 1.000000e-01 : f32
    %69 = vector.broadcast %cst_44 : f32 to vector<8x384xf32>
    %70 = arith.mulf %69, %66 : vector<8x384xf32>
    %71 = arith.select %68, %66, %70 : vector<8x384xi1>, vector<8x384xf32>
    %c0_45 = arith.constant 0 : index
    %c0_46 = arith.constant 0 : index
    %c20 = arith.constant 20 : index
    %72 = vector.load %arg1[%c0_45, %c0_46, %c20] : memref<1x8x624xbf16, #tpu.memory_space<vmem>>, vector<1x8x384xbf16>
    %73 = vector.shape_cast %72 : vector<1x8x384xbf16> to vector<8x384xbf16>
    %74 = arith.extf %73 : vector<8x384xbf16> to vector<8x384xf32>
    %c0_47 = arith.constant 0 : index
    %c0_48 = arith.constant 0 : index
    %c24 = arith.constant 24 : index
    %75 = vector.load %arg1[%c0_47, %c0_48, %c24] : memref<1x8x624xbf16, #tpu.memory_space<vmem>>, vector<1x8x384xbf16>
    %76 = vector.shape_cast %75 : vector<1x8x384xbf16> to vector<8x384xbf16>
    %77 = arith.extf %76 : vector<8x384xbf16> to vector<8x384xf32>
    %c0_49 = arith.constant 0 : index
    %c0_50 = arith.constant 0 : index
    %c28 = arith.constant 28 : index
    %78 = vector.load %arg1[%c0_49, %c0_50, %c28] : memref<1x8x624xbf16, #tpu.memory_space<vmem>>, vector<1x8x384xbf16>
    %79 = vector.shape_cast %78 : vector<1x8x384xbf16> to vector<8x384xbf16>
    %80 = arith.extf %79 : vector<8x384xbf16> to vector<8x384xf32>
    %c0_51 = arith.constant 0 : index
    %c0_52 = arith.constant 0 : index
    %c116 = arith.constant 116 : index
    %81 = vector.load %arg1[%c0_51, %c0_52, %c116] : memref<1x8x624xbf16, #tpu.memory_space<vmem>>, vector<1x8x384xbf16>
    %82 = vector.shape_cast %81 : vector<1x8x384xbf16> to vector<8x384xbf16>
    %83 = arith.extf %82 : vector<8x384xbf16> to vector<8x384xf32>
    %c0_53 = arith.constant 0 : index
    %c0_54 = arith.constant 0 : index
    %c120_55 = arith.constant 120 : index
    %84 = vector.load %arg1[%c0_53, %c0_54, %c120_55] : memref<1x8x624xbf16, #tpu.memory_space<vmem>>, vector<1x8x384xbf16>
    %85 = vector.shape_cast %84 : vector<1x8x384xbf16> to vector<8x384xbf16>
    %86 = arith.extf %85 : vector<8x384xbf16> to vector<8x384xf32>
    %c0_56 = arith.constant 0 : index
    %c0_57 = arith.constant 0 : index
    %c124 = arith.constant 124 : index
    %87 = vector.load %arg1[%c0_56, %c0_57, %c124] : memref<1x8x624xbf16, #tpu.memory_space<vmem>>, vector<1x8x384xbf16>
    %88 = vector.shape_cast %87 : vector<1x8x384xbf16> to vector<8x384xbf16>
    %89 = arith.extf %88 : vector<8x384xbf16> to vector<8x384xf32>
    %c0_58 = arith.constant 0 : index
    %c0_59 = arith.constant 0 : index
    %c212 = arith.constant 212 : index
    %90 = vector.load %arg1[%c0_58, %c0_59, %c212] : memref<1x8x624xbf16, #tpu.memory_space<vmem>>, vector<1x8x384xbf16>
    %91 = vector.shape_cast %90 : vector<1x8x384xbf16> to vector<8x384xbf16>
    %92 = arith.extf %91 : vector<8x384xbf16> to vector<8x384xf32>
    %c0_60 = arith.constant 0 : index
    %c0_61 = arith.constant 0 : index
    %c216 = arith.constant 216 : index
    %93 = vector.load %arg1[%c0_60, %c0_61, %c216] : memref<1x8x624xbf16, #tpu.memory_space<vmem>>, vector<1x8x384xbf16>
    %94 = vector.shape_cast %93 : vector<1x8x384xbf16> to vector<8x384xbf16>
    %95 = arith.extf %94 : vector<8x384xbf16> to vector<8x384xf32>
    %c0_62 = arith.constant 0 : index
    %c0_63 = arith.constant 0 : index
    %c220 = arith.constant 220 : index
    %96 = vector.load %arg1[%c0_62, %c0_63, %c220] : memref<1x8x624xbf16, #tpu.memory_space<vmem>>, vector<1x8x384xbf16>
    %97 = vector.shape_cast %96 : vector<1x8x384xbf16> to vector<8x384xbf16>
    %98 = arith.extf %97 : vector<8x384xbf16> to vector<8x384xf32>
    %99 = tpu.concatenate %74, %77, %80, %83, %86, %89, %92, %95, %98 in 0 : vector<8x384xf32>, vector<8x384xf32>, vector<8x384xf32>, vector<8x384xf32>, vector<8x384xf32>, vector<8x384xf32>, vector<8x384xf32>, vector<8x384xf32>, vector<8x384xf32> -> vector<72x384xf32>
    %c0_64 = arith.constant 0 : index
    %c0_65 = arith.constant 0 : index
    %100 = vector.load %arg4[%c0_64, %c0_65] : memref<8x72xbf16, #tpu.memory_space<vmem>>, vector<8x72xbf16>
    %101 = arith.truncf %99 : vector<72x384xf32> to vector<72x384xbf16>
    %cst_66 = arith.constant dense<0.000000e+00> : vector<8x384xf32>
    %102 = tpu.matmul %100, %101, %cst_66 {dimension_numbers = #tpu.dot_dimension_numbers<[1], [0], [0], [1], [0, 0, 1, 1], [], []>} : vector<8x72xbf16>, vector<72x384xbf16>, vector<8x384xf32> -> vector<8x384xf32>
    %cst_67 = arith.constant 0.000000e+00 : f32
    %103 = vector.broadcast %cst_67 : f32 to vector<8x384xf32>
    %104 = arith.cmpf oge, %102, %103 : vector<8x384xf32>
    %cst_68 = arith.constant 1.000000e-01 : f32
    %105 = vector.broadcast %cst_68 : f32 to vector<8x384xf32>
    %106 = arith.mulf %105, %102 : vector<8x384xf32>
    %107 = arith.select %104, %102, %106 : vector<8x384xi1>, vector<8x384xf32>
    %108 = tpu.concatenate %35, %71, %107 in 0 : vector<8x384xf32>, vector<8x384xf32>, vector<8x384xf32> -> vector<24x384xf32>
    %109 = arith.truncf %108 : vector<24x384xf32> to vector<24x384xbf16>
    %c0_69 = arith.constant 0 : index
    %c0_70 = arith.constant 0 : index
    %c0_71 = arith.constant 0 : index
    %110 = vector.load %arg5[%c0_69, %c0_70, %c0_71] : memref<1x24x384xbf16, #tpu.memory_space<vmem>>, vector<1x24x384xbf16>
    %111 = vector.shape_cast %110 : vector<1x24x384xbf16> to vector<24x384xbf16>
    %112 = vector.shape_cast %109 : vector<24x384xbf16> to vector<1x24x384xbf16>
    tpu.vector_store %arg5[%c0_69, %c0_70, %c0_71], %112 {strides = array<i32>} : memref<1x24x384xbf16, #tpu.memory_space<vmem>>, vector<1x24x384xbf16>,
    return
  }
  func.func @transform_0(%arg0: i32) -> (i32, i32, i32) {
    %c0_i32 = arith.constant 0 : i32
    %c0_i32_0 = arith.constant 0 : i32
    %c0_i32_1 = arith.constant 0 : i32
    return %arg0, %c0_i32, %c0_i32_0 : i32, i32, i32
  }
  func.func @transform_1(%arg0: i32) -> (i32, i32) {
    %c0_i32 = arith.constant 0 : i32
    %c0_i32_0 = arith.constant 0 : i32
    %c0_i32_1 = arith.constant 0 : i32
    return %c0_i32, %c0_i32_0 : i32, i32
  }
  func.func @transform_2(%arg0: i32) -> (i32, i32) {
    %c0_i32 = arith.constant 0 : i32
    %c0_i32_0 = arith.constant 0 : i32
    %c0_i32_1 = arith.constant 0 : i32
    return %c0_i32, %c0_i32_0 : i32, i32
  }
  func.func @transform_3(%arg0: i32) -> (i32, i32) {
    %c0_i32 = arith.constant 0 : i32
    %c0_i32_0 = arith.constant 0 : i32
    %c0_i32_1 = arith.constant 0 : i32
    return %c0_i32, %c0_i32_0 : i32, i32
  }
  func.func @transform_4(%arg0: i32) -> (i32, i32, i32) {
    %c0_i32 = arith.constant 0 : i32
    %c0_i32_0 = arith.constant 0 : i32
    %c0_i32_1 = arith.constant 0 : i32
    return %arg0, %c0_i32, %c0_i32_0 : i32, i32, i32
  }
}

module attributes {stable_mosaic.version = 11 : i64} {
  func.func @kernel(%arg0: i32, %arg1: memref<1x24x360xbf16, #tpu.memory_space<vmem>>, %arg2: memref<8x216xbf16, #tpu.memory_space<vmem>>, %arg3: memref<1x8x288xbf16, #tpu.memory_space<vmem>>, %arg4: memref<1x8x288xbf16, #tpu.memory_space<vmem>>) attributes {dimension_semantics = [#tpu.dimension_semantics<parallel>], iteration_bounds = array<i64: 4>, scalar_prefetch = 0 : i64, scratch_operands = 0 : i64, tpu.core_type = #tpu.core_type<tc>, window_params = [{transform_indices = @transform_0, window_bounds = array<i64: 1, 24, 360>}, {pipeline_mode = #tpu.pipeline_mode<synchronous>, transform_indices = @transform_1, window_bounds = array<i64: 8, 216>}, {transform_indices = @transform_2, window_bounds = array<i64: 1, 8, 288>}, {transform_indices = @transform_3, window_bounds = array<i64: 1, 8, 288>}]} {
    %c0 = arith.constant 0 : index
    %c0_0 = arith.constant 0 : index
    %c17 = arith.constant 17 : index
    %0 = vector.load %arg1[%c0, %c0_0, %c17] : memref<1x24x360xbf16, #tpu.memory_space<vmem>>, vector<1x24x288xbf16>
    %1 = vector.shape_cast %0 : vector<1x24x288xbf16> to vector<24x288xbf16>
    %2 = arith.extf %1 : vector<24x288xbf16> to vector<24x288xf32>
    %c0_1 = arith.constant 0 : index
    %c0_2 = arith.constant 0 : index
    %c18 = arith.constant 18 : index
    %3 = vector.load %arg1[%c0_1, %c0_2, %c18] : memref<1x24x360xbf16, #tpu.memory_space<vmem>>, vector<1x24x288xbf16>
    %4 = vector.shape_cast %3 : vector<1x24x288xbf16> to vector<24x288xbf16>
    %5 = arith.extf %4 : vector<24x288xbf16> to vector<24x288xf32>
    %c0_3 = arith.constant 0 : index
    %c0_4 = arith.constant 0 : index
    %c19 = arith.constant 19 : index
    %6 = vector.load %arg1[%c0_3, %c0_4, %c19] : memref<1x24x360xbf16, #tpu.memory_space<vmem>>, vector<1x24x288xbf16>
    %7 = vector.shape_cast %6 : vector<1x24x288xbf16> to vector<24x288xbf16>
    %8 = arith.extf %7 : vector<24x288xbf16> to vector<24x288xf32>
    %c0_5 = arith.constant 0 : index
    %c0_6 = arith.constant 0 : index
    %c35 = arith.constant 35 : index
    %9 = vector.load %arg1[%c0_5, %c0_6, %c35] : memref<1x24x360xbf16, #tpu.memory_space<vmem>>, vector<1x24x288xbf16>
    %10 = vector.shape_cast %9 : vector<1x24x288xbf16> to vector<24x288xbf16>
    %11 = arith.extf %10 : vector<24x288xbf16> to vector<24x288xf32>
    %c0_7 = arith.constant 0 : index
    %c0_8 = arith.constant 0 : index
    %c36 = arith.constant 36 : index
    %12 = vector.load %arg1[%c0_7, %c0_8, %c36] : memref<1x24x360xbf16, #tpu.memory_space<vmem>>, vector<1x24x288xbf16>
    %13 = vector.shape_cast %12 : vector<1x24x288xbf16> to vector<24x288xbf16>
    %14 = arith.extf %13 : vector<24x288xbf16> to vector<24x288xf32>
    %c0_9 = arith.constant 0 : index
    %c0_10 = arith.constant 0 : index
    %c37 = arith.constant 37 : index
    %15 = vector.load %arg1[%c0_9, %c0_10, %c37] : memref<1x24x360xbf16, #tpu.memory_space<vmem>>, vector<1x24x288xbf16>
    %16 = vector.shape_cast %15 : vector<1x24x288xbf16> to vector<24x288xbf16>
    %17 = arith.extf %16 : vector<24x288xbf16> to vector<24x288xf32>
    %c0_11 = arith.constant 0 : index
    %c0_12 = arith.constant 0 : index
    %c53 = arith.constant 53 : index
    %18 = vector.load %arg1[%c0_11, %c0_12, %c53] : memref<1x24x360xbf16, #tpu.memory_space<vmem>>, vector<1x24x288xbf16>
    %19 = vector.shape_cast %18 : vector<1x24x288xbf16> to vector<24x288xbf16>
    %20 = arith.extf %19 : vector<24x288xbf16> to vector<24x288xf32>
    %c0_13 = arith.constant 0 : index
    %c0_14 = arith.constant 0 : index
    %c54 = arith.constant 54 : index
    %21 = vector.load %arg1[%c0_13, %c0_14, %c54] : memref<1x24x360xbf16, #tpu.memory_space<vmem>>, vector<1x24x288xbf16>
    %22 = vector.shape_cast %21 : vector<1x24x288xbf16> to vector<24x288xbf16>
    %23 = arith.extf %22 : vector<24x288xbf16> to vector<24x288xf32>
    %c0_15 = arith.constant 0 : index
    %c0_16 = arith.constant 0 : index
    %c55 = arith.constant 55 : index
    %24 = vector.load %arg1[%c0_15, %c0_16, %c55] : memref<1x24x360xbf16, #tpu.memory_space<vmem>>, vector<1x24x288xbf16>
    %25 = vector.shape_cast %24 : vector<1x24x288xbf16> to vector<24x288xbf16>
    %26 = arith.extf %25 : vector<24x288xbf16> to vector<24x288xf32>
    %27 = tpu.concatenate %2, %5, %8, %11, %14, %17, %20, %23, %26 in 0 : vector<24x288xf32>, vector<24x288xf32>, vector<24x288xf32>, vector<24x288xf32>, vector<24x288xf32>, vector<24x288xf32>, vector<24x288xf32>, vector<24x288xf32>, vector<24x288xf32> -> vector<216x288xf32>
    %c0_17 = arith.constant 0 : index
    %c0_18 = arith.constant 0 : index
    %28 = vector.load %arg2[%c0_17, %c0_18] : memref<8x216xbf16, #tpu.memory_space<vmem>>, vector<8x216xbf16>
    %29 = arith.truncf %27 : vector<216x288xf32> to vector<216x288xbf16>
    %cst = arith.constant dense<0.000000e+00> : vector<8x288xf32>
    %30 = tpu.matmul %28, %29, %cst {dimension_numbers = #tpu.dot_dimension_numbers<[1], [0], [0], [1], [0, 0, 1, 1], [], []>} : vector<8x216xbf16>, vector<216x288xbf16>, vector<8x288xf32> -> vector<8x288xf32>
    %c0_19 = arith.constant 0 : index
    %c0_20 = arith.constant 0 : index
    %c0_21 = arith.constant 0 : index
    %31 = vector.load %arg3[%c0_19, %c0_20, %c0_21] : memref<1x8x288xbf16, #tpu.memory_space<vmem>>, vector<1x8x288xbf16>
    %32 = vector.shape_cast %31 : vector<1x8x288xbf16> to vector<8x288xbf16>
    %33 = arith.extf %32 : vector<8x288xbf16> to vector<8x288xf32>
    %34 = arith.addf %30, %33 : vector<8x288xf32>
    %35 = arith.truncf %34 : vector<8x288xf32> to vector<8x288xbf16>
    %c0_22 = arith.constant 0 : index
    %c0_23 = arith.constant 0 : index
    %c0_24 = arith.constant 0 : index
    %36 = vector.load %arg4[%c0_22, %c0_23, %c0_24] : memref<1x8x288xbf16, #tpu.memory_space<vmem>>, vector<1x8x288xbf16>
    %37 = vector.shape_cast %36 : vector<1x8x288xbf16> to vector<8x288xbf16>
    %38 = vector.shape_cast %35 : vector<8x288xbf16> to vector<1x8x288xbf16>
    tpu.vector_store %arg4[%c0_22, %c0_23, %c0_24], %38 {strides = array<i32>} : memref<1x8x288xbf16, #tpu.memory_space<vmem>>, vector<1x8x288xbf16>,
    return
  }
  func.func @transform_0(%arg0: i32) -> (i32, i32, i32) {
    %c0_i32 = arith.constant 0 : i32
    %c0_i32_0 = arith.constant 0 : i32
    %c0_i32_1 = arith.constant 0 : i32
    return %arg0, %c0_i32, %c0_i32_0 : i32, i32, i32
  }
  func.func @transform_1(%arg0: i32) -> (i32, i32) {
    %c0_i32 = arith.constant 0 : i32
    %c0_i32_0 = arith.constant 0 : i32
    %c0_i32_1 = arith.constant 0 : i32
    return %c0_i32, %c0_i32_0 : i32, i32
  }
  func.func @transform_2(%arg0: i32) -> (i32, i32, i32) {
    %c0_i32 = arith.constant 0 : i32
    %c0_i32_0 = arith.constant 0 : i32
    %c0_i32_1 = arith.constant 0 : i32
    return %arg0, %c0_i32, %c0_i32_0 : i32, i32, i32
  }
  func.func @transform_3(%arg0: i32) -> (i32, i32, i32) {
    %c0_i32 = arith.constant 0 : i32
    %c0_i32_0 = arith.constant 0 : i32
    %c0_i32_1 = arith.constant 0 : i32
    return %arg0, %c0_i32, %c0_i32_0 : i32, i32, i32
  }
}

module attributes {stable_mosaic.version = 11 : i64} {
  func.func @kernel(%arg0: i32, %arg1: memref<1x8x360xbf16, #tpu.memory_space<vmem>>, %arg2: memref<8x72xbf16, #tpu.memory_space<vmem>>, %arg3: memref<1x8x288xbf16, #tpu.memory_space<vmem>>) attributes {dimension_semantics = [#tpu.dimension_semantics<parallel>], iteration_bounds = array<i64: 4>, scalar_prefetch = 0 : i64, scratch_operands = 0 : i64, tpu.core_type = #tpu.core_type<tc>, window_params = [{transform_indices = @transform_0, window_bounds = array<i64: 1, 8, 360>}, {pipeline_mode = #tpu.pipeline_mode<synchronous>, transform_indices = @transform_1, window_bounds = array<i64: 8, 72>}, {transform_indices = @transform_2, window_bounds = array<i64: 1, 8, 288>}]} {
    %c0 = arith.constant 0 : index
    %c0_0 = arith.constant 0 : index
    %c17 = arith.constant 17 : index
    %0 = vector.load %arg1[%c0, %c0_0, %c17] : memref<1x8x360xbf16, #tpu.memory_space<vmem>>, vector<1x8x288xbf16>
    %1 = vector.shape_cast %0 : vector<1x8x288xbf16> to vector<8x288xbf16>
    %2 = arith.extf %1 : vector<8x288xbf16> to vector<8x288xf32>
    %c0_1 = arith.constant 0 : index
    %c0_2 = arith.constant 0 : index
    %c18 = arith.constant 18 : index
    %3 = vector.load %arg1[%c0_1, %c0_2, %c18] : memref<1x8x360xbf16, #tpu.memory_space<vmem>>, vector<1x8x288xbf16>
    %4 = vector.shape_cast %3 : vector<1x8x288xbf16> to vector<8x288xbf16>
    %5 = arith.extf %4 : vector<8x288xbf16> to vector<8x288xf32>
    %c0_3 = arith.constant 0 : index
    %c0_4 = arith.constant 0 : index
    %c19 = arith.constant 19 : index
    %6 = vector.load %arg1[%c0_3, %c0_4, %c19] : memref<1x8x360xbf16, #tpu.memory_space<vmem>>, vector<1x8x288xbf16>
    %7 = vector.shape_cast %6 : vector<1x8x288xbf16> to vector<8x288xbf16>
    %8 = arith.extf %7 : vector<8x288xbf16> to vector<8x288xf32>
    %c0_5 = arith.constant 0 : index
    %c0_6 = arith.constant 0 : index
    %c35 = arith.constant 35 : index
    %9 = vector.load %arg1[%c0_5, %c0_6, %c35] : memref<1x8x360xbf16, #tpu.memory_space<vmem>>, vector<1x8x288xbf16>
    %10 = vector.shape_cast %9 : vector<1x8x288xbf16> to vector<8x288xbf16>
    %11 = arith.extf %10 : vector<8x288xbf16> to vector<8x288xf32>
    %c0_7 = arith.constant 0 : index
    %c0_8 = arith.constant 0 : index
    %c36 = arith.constant 36 : index
    %12 = vector.load %arg1[%c0_7, %c0_8, %c36] : memref<1x8x360xbf16, #tpu.memory_space<vmem>>, vector<1x8x288xbf16>
    %13 = vector.shape_cast %12 : vector<1x8x288xbf16> to vector<8x288xbf16>
    %14 = arith.extf %13 : vector<8x288xbf16> to vector<8x288xf32>
    %c0_9 = arith.constant 0 : index
    %c0_10 = arith.constant 0 : index
    %c37 = arith.constant 37 : index
    %15 = vector.load %arg1[%c0_9, %c0_10, %c37] : memref<1x8x360xbf16, #tpu.memory_space<vmem>>, vector<1x8x288xbf16>
    %16 = vector.shape_cast %15 : vector<1x8x288xbf16> to vector<8x288xbf16>
    %17 = arith.extf %16 : vector<8x288xbf16> to vector<8x288xf32>
    %c0_11 = arith.constant 0 : index
    %c0_12 = arith.constant 0 : index
    %c53 = arith.constant 53 : index
    %18 = vector.load %arg1[%c0_11, %c0_12, %c53] : memref<1x8x360xbf16, #tpu.memory_space<vmem>>, vector<1x8x288xbf16>
    %19 = vector.shape_cast %18 : vector<1x8x288xbf16> to vector<8x288xbf16>
    %20 = arith.extf %19 : vector<8x288xbf16> to vector<8x288xf32>
    %c0_13 = arith.constant 0 : index
    %c0_14 = arith.constant 0 : index
    %c54 = arith.constant 54 : index
    %21 = vector.load %arg1[%c0_13, %c0_14, %c54] : memref<1x8x360xbf16, #tpu.memory_space<vmem>>, vector<1x8x288xbf16>
    %22 = vector.shape_cast %21 : vector<1x8x288xbf16> to vector<8x288xbf16>
    %23 = arith.extf %22 : vector<8x288xbf16> to vector<8x288xf32>
    %c0_15 = arith.constant 0 : index
    %c0_16 = arith.constant 0 : index
    %c55 = arith.constant 55 : index
    %24 = vector.load %arg1[%c0_15, %c0_16, %c55] : memref<1x8x360xbf16, #tpu.memory_space<vmem>>, vector<1x8x288xbf16>
    %25 = vector.shape_cast %24 : vector<1x8x288xbf16> to vector<8x288xbf16>
    %26 = arith.extf %25 : vector<8x288xbf16> to vector<8x288xf32>
    %27 = tpu.concatenate %2, %5, %8, %11, %14, %17, %20, %23, %26 in 0 : vector<8x288xf32>, vector<8x288xf32>, vector<8x288xf32>, vector<8x288xf32>, vector<8x288xf32>, vector<8x288xf32>, vector<8x288xf32>, vector<8x288xf32>, vector<8x288xf32> -> vector<72x288xf32>
    %c0_17 = arith.constant 0 : index
    %c0_18 = arith.constant 0 : index
    %28 = vector.load %arg2[%c0_17, %c0_18] : memref<8x72xbf16, #tpu.memory_space<vmem>>, vector<8x72xbf16>
    %29 = arith.truncf %27 : vector<72x288xf32> to vector<72x288xbf16>
    %cst = arith.constant dense<0.000000e+00> : vector<8x288xf32>
    %30 = tpu.matmul %28, %29, %cst {dimension_numbers = #tpu.dot_dimension_numbers<[1], [0], [0], [1], [0, 0, 1, 1], [], []>} : vector<8x72xbf16>, vector<72x288xbf16>, vector<8x288xf32> -> vector<8x288xf32>
    %cst_19 = arith.constant 0.000000e+00 : f32
    %31 = vector.broadcast %cst_19 : f32 to vector<8x288xf32>
    %32 = arith.cmpf oge, %30, %31 : vector<8x288xf32>
    %cst_20 = arith.constant 1.000000e-01 : f32
    %33 = vector.broadcast %cst_20 : f32 to vector<8x288xf32>
    %34 = arith.mulf %33, %30 : vector<8x288xf32>
    %35 = arith.select %32, %30, %34 : vector<8x288xi1>, vector<8x288xf32>
    %36 = arith.truncf %35 : vector<8x288xf32> to vector<8x288xbf16>
    %c0_21 = arith.constant 0 : index
    %c0_22 = arith.constant 0 : index
    %c0_23 = arith.constant 0 : index
    %37 = vector.load %arg3[%c0_21, %c0_22, %c0_23] : memref<1x8x288xbf16, #tpu.memory_space<vmem>>, vector<1x8x288xbf16>
    %38 = vector.shape_cast %37 : vector<1x8x288xbf16> to vector<8x288xbf16>
    %39 = vector.shape_cast %36 : vector<8x288xbf16> to vector<1x8x288xbf16>
    tpu.vector_store %arg3[%c0_21, %c0_22, %c0_23], %39 {strides = array<i32>} : memref<1x8x288xbf16, #tpu.memory_space<vmem>>, vector<1x8x288xbf16>,
    return
  }
  func.func @transform_0(%arg0: i32) -> (i32, i32, i32) {
    %c0_i32 = arith.constant 0 : i32
    %c0_i32_0 = arith.constant 0 : i32
    %c0_i32_1 = arith.constant 0 : i32
    return %arg0, %c0_i32, %c0_i32_0 : i32, i32, i32
  }
  func.func @transform_1(%arg0: i32) -> (i32, i32) {
    %c0_i32 = arith.constant 0 : i32
    %c0_i32_0 = arith.constant 0 : i32
    %c0_i32_1 = arith.constant 0 : i32
    return %c0_i32, %c0_i32_0 : i32, i32
  }
  func.func @transform_2(%arg0: i32) -> (i32, i32, i32) {
    %c0_i32 = arith.constant 0 : i32
    %c0_i32_0 = arith.constant 0 : i32
    %c0_i32_1 = arith.constant 0 : i32
    return %arg0, %c0_i32, %c0_i32_0 : i32, i32, i32
  }
}

module attributes {stable_mosaic.version = 11 : i64} {
  func.func @kernel(%arg0: i32, %arg1: memref<1x8x360xbf16, #tpu.memory_space<vmem>>, %arg2: memref<8x72xbf16, #tpu.memory_space<vmem>>, %arg3: memref<1x8x288xbf16, #tpu.memory_space<vmem>>, %arg4: memref<1x8x288xbf16, #tpu.memory_space<vmem>>) attributes {dimension_semantics = [#tpu.dimension_semantics<parallel>], iteration_bounds = array<i64: 4>, scalar_prefetch = 0 : i64, scratch_operands = 0 : i64, tpu.core_type = #tpu.core_type<tc>, window_params = [{transform_indices = @transform_0, window_bounds = array<i64: 1, 8, 360>}, {pipeline_mode = #tpu.pipeline_mode<synchronous>, transform_indices = @transform_1, window_bounds = array<i64: 8, 72>}, {transform_indices = @transform_2, window_bounds = array<i64: 1, 8, 288>}, {transform_indices = @transform_3, window_bounds = array<i64: 1, 8, 288>}]} {
    %c0 = arith.constant 0 : index
    %c0_0 = arith.constant 0 : index
    %c17 = arith.constant 17 : index
    %0 = vector.load %arg1[%c0, %c0_0, %c17] : memref<1x8x360xbf16, #tpu.memory_space<vmem>>, vector<1x8x288xbf16>
    %1 = vector.shape_cast %0 : vector<1x8x288xbf16> to vector<8x288xbf16>
    %2 = arith.extf %1 : vector<8x288xbf16> to vector<8x288xf32>
    %c0_1 = arith.constant 0 : index
    %c0_2 = arith.constant 0 : index
    %c18 = arith.constant 18 : index
    %3 = vector.load %arg1[%c0_1, %c0_2, %c18] : memref<1x8x360xbf16, #tpu.memory_space<vmem>>, vector<1x8x288xbf16>
    %4 = vector.shape_cast %3 : vector<1x8x288xbf16> to vector<8x288xbf16>
    %5 = arith.extf %4 : vector<8x288xbf16> to vector<8x288xf32>
    %c0_3 = arith.constant 0 : index
    %c0_4 = arith.constant 0 : index
    %c19 = arith.constant 19 : index
    %6 = vector.load %arg1[%c0_3, %c0_4, %c19] : memref<1x8x360xbf16, #tpu.memory_space<vmem>>, vector<1x8x288xbf16>
    %7 = vector.shape_cast %6 : vector<1x8x288xbf16> to vector<8x288xbf16>
    %8 = arith.extf %7 : vector<8x288xbf16> to vector<8x288xf32>
    %c0_5 = arith.constant 0 : index
    %c0_6 = arith.constant 0 : index
    %c35 = arith.constant 35 : index
    %9 = vector.load %arg1[%c0_5, %c0_6, %c35] : memref<1x8x360xbf16, #tpu.memory_space<vmem>>, vector<1x8x288xbf16>
    %10 = vector.shape_cast %9 : vector<1x8x288xbf16> to vector<8x288xbf16>
    %11 = arith.extf %10 : vector<8x288xbf16> to vector<8x288xf32>
    %c0_7 = arith.constant 0 : index
    %c0_8 = arith.constant 0 : index
    %c36 = arith.constant 36 : index
    %12 = vector.load %arg1[%c0_7, %c0_8, %c36] : memref<1x8x360xbf16, #tpu.memory_space<vmem>>, vector<1x8x288xbf16>
    %13 = vector.shape_cast %12 : vector<1x8x288xbf16> to vector<8x288xbf16>
    %14 = arith.extf %13 : vector<8x288xbf16> to vector<8x288xf32>
    %c0_9 = arith.constant 0 : index
    %c0_10 = arith.constant 0 : index
    %c37 = arith.constant 37 : index
    %15 = vector.load %arg1[%c0_9, %c0_10, %c37] : memref<1x8x360xbf16, #tpu.memory_space<vmem>>, vector<1x8x288xbf16>
    %16 = vector.shape_cast %15 : vector<1x8x288xbf16> to vector<8x288xbf16>
    %17 = arith.extf %16 : vector<8x288xbf16> to vector<8x288xf32>
    %c0_11 = arith.constant 0 : index
    %c0_12 = arith.constant 0 : index
    %c53 = arith.constant 53 : index
    %18 = vector.load %arg1[%c0_11, %c0_12, %c53] : memref<1x8x360xbf16, #tpu.memory_space<vmem>>, vector<1x8x288xbf16>
    %19 = vector.shape_cast %18 : vector<1x8x288xbf16> to vector<8x288xbf16>
    %20 = arith.extf %19 : vector<8x288xbf16> to vector<8x288xf32>
    %c0_13 = arith.constant 0 : index
    %c0_14 = arith.constant 0 : index
    %c54 = arith.constant 54 : index
    %21 = vector.load %arg1[%c0_13, %c0_14, %c54] : memref<1x8x360xbf16, #tpu.memory_space<vmem>>, vector<1x8x288xbf16>
    %22 = vector.shape_cast %21 : vector<1x8x288xbf16> to vector<8x288xbf16>
    %23 = arith.extf %22 : vector<8x288xbf16> to vector<8x288xf32>
    %c0_15 = arith.constant 0 : index
    %c0_16 = arith.constant 0 : index
    %c55 = arith.constant 55 : index
    %24 = vector.load %arg1[%c0_15, %c0_16, %c55] : memref<1x8x360xbf16, #tpu.memory_space<vmem>>, vector<1x8x288xbf16>
    %25 = vector.shape_cast %24 : vector<1x8x288xbf16> to vector<8x288xbf16>
    %26 = arith.extf %25 : vector<8x288xbf16> to vector<8x288xf32>
    %27 = tpu.concatenate %2, %5, %8, %11, %14, %17, %20, %23, %26 in 0 : vector<8x288xf32>, vector<8x288xf32>, vector<8x288xf32>, vector<8x288xf32>, vector<8x288xf32>, vector<8x288xf32>, vector<8x288xf32>, vector<8x288xf32>, vector<8x288xf32> -> vector<72x288xf32>
    %c0_17 = arith.constant 0 : index
    %c0_18 = arith.constant 0 : index
    %28 = vector.load %arg2[%c0_17, %c0_18] : memref<8x72xbf16, #tpu.memory_space<vmem>>, vector<8x72xbf16>
    %29 = arith.truncf %27 : vector<72x288xf32> to vector<72x288xbf16>
    %cst = arith.constant dense<0.000000e+00> : vector<8x288xf32>
    %30 = tpu.matmul %28, %29, %cst {dimension_numbers = #tpu.dot_dimension_numbers<[1], [0], [0], [1], [0, 0, 1, 1], [], []>} : vector<8x72xbf16>, vector<72x288xbf16>, vector<8x288xf32> -> vector<8x288xf32>
    %c0_19 = arith.constant 0 : index
    %c0_20 = arith.constant 0 : index
    %c0_21 = arith.constant 0 : index
    %31 = vector.load %arg3[%c0_19, %c0_20, %c0_21] : memref<1x8x288xbf16, #tpu.memory_space<vmem>>, vector<1x8x288xbf16>
    %32 = vector.shape_cast %31 : vector<1x8x288xbf16> to vector<8x288xbf16>
    %33 = arith.extf %32 : vector<8x288xbf16> to vector<8x288xf32>
    %34 = arith.addf %30, %33 : vector<8x288xf32>
    %35 = arith.truncf %34 : vector<8x288xf32> to vector<8x288xbf16>
    %c0_22 = arith.constant 0 : index
    %c0_23 = arith.constant 0 : index
    %c0_24 = arith.constant 0 : index
    %36 = vector.load %arg4[%c0_22, %c0_23, %c0_24] : memref<1x8x288xbf16, #tpu.memory_space<vmem>>, vector<1x8x288xbf16>
    %37 = vector.shape_cast %36 : vector<1x8x288xbf16> to vector<8x288xbf16>
    %38 = vector.shape_cast %35 : vector<8x288xbf16> to vector<1x8x288xbf16>
    tpu.vector_store %arg4[%c0_22, %c0_23, %c0_24], %38 {strides = array<i32>} : memref<1x8x288xbf16, #tpu.memory_space<vmem>>, vector<1x8x288xbf16>,
    return
  }
  func.func @transform_0(%arg0: i32) -> (i32, i32, i32) {
    %c0_i32 = arith.constant 0 : i32
    %c0_i32_0 = arith.constant 0 : i32
    %c0_i32_1 = arith.constant 0 : i32
    return %arg0, %c0_i32, %c0_i32_0 : i32, i32, i32
  }
  func.func @transform_1(%arg0: i32) -> (i32, i32) {
    %c0_i32 = arith.constant 0 : i32
    %c0_i32_0 = arith.constant 0 : i32
    %c0_i32_1 = arith.constant 0 : i32
    return %c0_i32, %c0_i32_0 : i32, i32
  }
  func.func @transform_2(%arg0: i32) -> (i32, i32, i32) {
    %c0_i32 = arith.constant 0 : i32
    %c0_i32_0 = arith.constant 0 : i32
    %c0_i32_1 = arith.constant 0 : i32
    return %arg0, %c0_i32, %c0_i32_0 : i32, i32, i32
  }
  func.func @transform_3(%arg0: i32) -> (i32, i32, i32) {
    %c0_i32 = arith.constant 0 : i32
    %c0_i32_0 = arith.constant 0 : i32
    %c0_i32_1 = arith.constant 0 : i32
    return %arg0, %c0_i32, %c0_i32_0 : i32, i32, i32
  }
}

module attributes {stable_mosaic.version = 11 : i64} {
  func.func @kernel(%arg0: i32, %arg1: memref<1x8x360xbf16, #tpu.memory_space<vmem>>, %arg2: memref<24x72xbf16, #tpu.memory_space<vmem>>, %arg3: memref<24x1xf32, #tpu.memory_space<vmem>>, %arg4: memref<1x24x288xbf16, #tpu.memory_space<vmem>>) attributes {dimension_semantics = [#tpu.dimension_semantics<parallel>], iteration_bounds = array<i64: 4>, scalar_prefetch = 0 : i64, scratch_operands = 0 : i64, tpu.core_type = #tpu.core_type<tc>, window_params = [{transform_indices = @transform_0, window_bounds = array<i64: 1, 8, 360>}, {pipeline_mode = #tpu.pipeline_mode<synchronous>, transform_indices = @transform_1, window_bounds = array<i64: 24, 72>}, {pipeline_mode = #tpu.pipeline_mode<synchronous>, transform_indices = @transform_2, window_bounds = array<i64: 24, 1>}, {transform_indices = @transform_3, window_bounds = array<i64: 1, 24, 288>}]} {
    %c0 = arith.constant 0 : index
    %c0_0 = arith.constant 0 : index
    %c17 = arith.constant 17 : index
    %0 = vector.load %arg1[%c0, %c0_0, %c17] : memref<1x8x360xbf16, #tpu.memory_space<vmem>>, vector<1x8x288xbf16>
    %1 = vector.shape_cast %0 : vector<1x8x288xbf16> to vector<8x288xbf16>
    %2 = arith.extf %1 : vector<8x288xbf16> to vector<8x288xf32>
    %c0_1 = arith.constant 0 : index
    %c0_2 = arith.constant 0 : index
    %c18 = arith.constant 18 : index
    %3 = vector.load %arg1[%c0_1, %c0_2, %c18] : memref<1x8x360xbf16, #tpu.memory_space<vmem>>, vector<1x8x288xbf16>
    %4 = vector.shape_cast %3 : vector<1x8x288xbf16> to vector<8x288xbf16>
    %5 = arith.extf %4 : vector<8x288xbf16> to vector<8x288xf32>
    %c0_3 = arith.constant 0 : index
    %c0_4 = arith.constant 0 : index
    %c19 = arith.constant 19 : index
    %6 = vector.load %arg1[%c0_3, %c0_4, %c19] : memref<1x8x360xbf16, #tpu.memory_space<vmem>>, vector<1x8x288xbf16>
    %7 = vector.shape_cast %6 : vector<1x8x288xbf16> to vector<8x288xbf16>
    %8 = arith.extf %7 : vector<8x288xbf16> to vector<8x288xf32>
    %c0_5 = arith.constant 0 : index
    %c0_6 = arith.constant 0 : index
    %c35 = arith.constant 35 : index
    %9 = vector.load %arg1[%c0_5, %c0_6, %c35] : memref<1x8x360xbf16, #tpu.memory_space<vmem>>, vector<1x8x288xbf16>
    %10 = vector.shape_cast %9 : vector<1x8x288xbf16> to vector<8x288xbf16>
    %11 = arith.extf %10 : vector<8x288xbf16> to vector<8x288xf32>
    %c0_7 = arith.constant 0 : index
    %c0_8 = arith.constant 0 : index
    %c36 = arith.constant 36 : index
    %12 = vector.load %arg1[%c0_7, %c0_8, %c36] : memref<1x8x360xbf16, #tpu.memory_space<vmem>>, vector<1x8x288xbf16>
    %13 = vector.shape_cast %12 : vector<1x8x288xbf16> to vector<8x288xbf16>
    %14 = arith.extf %13 : vector<8x288xbf16> to vector<8x288xf32>
    %c0_9 = arith.constant 0 : index
    %c0_10 = arith.constant 0 : index
    %c37 = arith.constant 37 : index
    %15 = vector.load %arg1[%c0_9, %c0_10, %c37] : memref<1x8x360xbf16, #tpu.memory_space<vmem>>, vector<1x8x288xbf16>
    %16 = vector.shape_cast %15 : vector<1x8x288xbf16> to vector<8x288xbf16>
    %17 = arith.extf %16 : vector<8x288xbf16> to vector<8x288xf32>
    %c0_11 = arith.constant 0 : index
    %c0_12 = arith.constant 0 : index
    %c53 = arith.constant 53 : index
    %18 = vector.load %arg1[%c0_11, %c0_12, %c53] : memref<1x8x360xbf16, #tpu.memory_space<vmem>>, vector<1x8x288xbf16>
    %19 = vector.shape_cast %18 : vector<1x8x288xbf16> to vector<8x288xbf16>
    %20 = arith.extf %19 : vector<8x288xbf16> to vector<8x288xf32>
    %c0_13 = arith.constant 0 : index
    %c0_14 = arith.constant 0 : index
    %c54 = arith.constant 54 : index
    %21 = vector.load %arg1[%c0_13, %c0_14, %c54] : memref<1x8x360xbf16, #tpu.memory_space<vmem>>, vector<1x8x288xbf16>
    %22 = vector.shape_cast %21 : vector<1x8x288xbf16> to vector<8x288xbf16>
    %23 = arith.extf %22 : vector<8x288xbf16> to vector<8x288xf32>
    %c0_15 = arith.constant 0 : index
    %c0_16 = arith.constant 0 : index
    %c55 = arith.constant 55 : index
    %24 = vector.load %arg1[%c0_15, %c0_16, %c55] : memref<1x8x360xbf16, #tpu.memory_space<vmem>>, vector<1x8x288xbf16>
    %25 = vector.shape_cast %24 : vector<1x8x288xbf16> to vector<8x288xbf16>
    %26 = arith.extf %25 : vector<8x288xbf16> to vector<8x288xf32>
    %27 = tpu.concatenate %2, %5, %8, %11, %14, %17, %20, %23, %26 in 0 : vector<8x288xf32>, vector<8x288xf32>, vector<8x288xf32>, vector<8x288xf32>, vector<8x288xf32>, vector<8x288xf32>, vector<8x288xf32>, vector<8x288xf32>, vector<8x288xf32> -> vector<72x288xf32>
    %c0_17 = arith.constant 0 : index
    %c0_18 = arith.constant 0 : index
    %28 = vector.load %arg2[%c0_17, %c0_18] : memref<24x72xbf16, #tpu.memory_space<vmem>>, vector<24x72xbf16>
    %29 = arith.truncf %27 : vector<72x288xf32> to vector<72x288xbf16>
    %cst = arith.constant dense<0.000000e+00> : vector<24x288xf32>
    %30 = tpu.matmul %28, %29, %cst {dimension_numbers = #tpu.dot_dimension_numbers<[1], [0], [0], [1], [0, 0, 1, 1], [], []>} : vector<24x72xbf16>, vector<72x288xbf16>, vector<24x288xf32> -> vector<24x288xf32>
    %c0_19 = arith.constant 0 : index
    %c0_20 = arith.constant 0 : index
    %31 = vector.load %arg3[%c0_19, %c0_20] : memref<24x1xf32, #tpu.memory_space<vmem>>, vector<24x1xf32>
    %32 = vector.broadcast %31 : vector<24x1xf32> to vector<24x288xf32>
    %33 = arith.addf %30, %32 : vector<24x288xf32>
    %cst_21 = arith.constant 0.000000e+00 : f32
    %34 = vector.broadcast %cst_21 : f32 to vector<24x288xf32>
    %35 = arith.cmpf oge, %33, %34 : vector<24x288xf32>
    %cst_22 = arith.constant 1.000000e-01 : f32
    %36 = vector.broadcast %cst_22 : f32 to vector<24x288xf32>
    %37 = arith.mulf %36, %33 : vector<24x288xf32>
    %38 = arith.select %35, %33, %37 : vector<24x288xi1>, vector<24x288xf32>
    %39 = arith.truncf %38 : vector<24x288xf32> to vector<24x288xbf16>
    %c0_23 = arith.constant 0 : index
    %c0_24 = arith.constant 0 : index
    %c0_25 = arith.constant 0 : index
    %40 = vector.load %arg4[%c0_23, %c0_24, %c0_25] : memref<1x24x288xbf16, #tpu.memory_space<vmem>>, vector<1x24x288xbf16>
    %41 = vector.shape_cast %40 : vector<1x24x288xbf16> to vector<24x288xbf16>
    %42 = vector.shape_cast %39 : vector<24x288xbf16> to vector<1x24x288xbf16>
    tpu.vector_store %arg4[%c0_23, %c0_24, %c0_25], %42 {strides = array<i32>} : memref<1x24x288xbf16, #tpu.memory_space<vmem>>, vector<1x24x288xbf16>,
    return
  }
  func.func @transform_0(%arg0: i32) -> (i32, i32, i32) {
    %c0_i32 = arith.constant 0 : i32
    %c0_i32_0 = arith.constant 0 : i32
    %c0_i32_1 = arith.constant 0 : i32
    return %arg0, %c0_i32, %c0_i32_0 : i32, i32, i32
  }
  func.func @transform_1(%arg0: i32) -> (i32, i32) {
    %c0_i32 = arith.constant 0 : i32
    %c0_i32_0 = arith.constant 0 : i32
    %c0_i32_1 = arith.constant 0 : i32
    return %c0_i32, %c0_i32_0 : i32, i32
  }
  func.func @transform_2(%arg0: i32) -> (i32, i32) {
    %c0_i32 = arith.constant 0 : i32
    %c0_i32_0 = arith.constant 0 : i32
    %c0_i32_1 = arith.constant 0 : i32
    return %c0_i32, %c0_i32_0 : i32, i32
  }
  func.func @transform_3(%arg0: i32) -> (i32, i32, i32) {
    %c0_i32 = arith.constant 0 : i32
    %c0_i32_0 = arith.constant 0 : i32
    %c0_i32_1 = arith.constant 0 : i32
    return %arg0, %c0_i32, %c0_i32_0 : i32, i32, i32
  }
}

module attributes {stable_mosaic.version = 11 : i64} {
  func.func @kernel(%arg0: i32, %arg1: memref<1x32x360xbf16, #tpu.memory_space<vmem>>, %arg2: memref<24x288xbf16, #tpu.memory_space<vmem>>, %arg3: memref<24x1xf32, #tpu.memory_space<vmem>>, %arg4: memref<1x24x288xbf16, #tpu.memory_space<vmem>>) attributes {dimension_semantics = [#tpu.dimension_semantics<parallel>], iteration_bounds = array<i64: 4>, scalar_prefetch = 0 : i64, scratch_operands = 0 : i64, tpu.core_type = #tpu.core_type<tc>, window_params = [{transform_indices = @transform_0, window_bounds = array<i64: 1, 32, 360>}, {pipeline_mode = #tpu.pipeline_mode<synchronous>, transform_indices = @transform_1, window_bounds = array<i64: 24, 288>}, {pipeline_mode = #tpu.pipeline_mode<synchronous>, transform_indices = @transform_2, window_bounds = array<i64: 24, 1>}, {transform_indices = @transform_3, window_bounds = array<i64: 1, 24, 288>}]} {
    %c0 = arith.constant 0 : index
    %c0_0 = arith.constant 0 : index
    %c17 = arith.constant 17 : index
    %0 = vector.load %arg1[%c0, %c0_0, %c17] : memref<1x32x360xbf16, #tpu.memory_space<vmem>>, vector<1x32x288xbf16>
    %1 = vector.shape_cast %0 : vector<1x32x288xbf16> to vector<32x288xbf16>
    %2 = arith.extf %1 : vector<32x288xbf16> to vector<32x288xf32>
    %c0_1 = arith.constant 0 : index
    %c0_2 = arith.constant 0 : index
    %c18 = arith.constant 18 : index
    %3 = vector.load %arg1[%c0_1, %c0_2, %c18] : memref<1x32x360xbf16, #tpu.memory_space<vmem>>, vector<1x32x288xbf16>
    %4 = vector.shape_cast %3 : vector<1x32x288xbf16> to vector<32x288xbf16>
    %5 = arith.extf %4 : vector<32x288xbf16> to vector<32x288xf32>
    %c0_3 = arith.constant 0 : index
    %c0_4 = arith.constant 0 : index
    %c19 = arith.constant 19 : index
    %6 = vector.load %arg1[%c0_3, %c0_4, %c19] : memref<1x32x360xbf16, #tpu.memory_space<vmem>>, vector<1x32x288xbf16>
    %7 = vector.shape_cast %6 : vector<1x32x288xbf16> to vector<32x288xbf16>
    %8 = arith.extf %7 : vector<32x288xbf16> to vector<32x288xf32>
    %c0_5 = arith.constant 0 : index
    %c0_6 = arith.constant 0 : index
    %c35 = arith.constant 35 : index
    %9 = vector.load %arg1[%c0_5, %c0_6, %c35] : memref<1x32x360xbf16, #tpu.memory_space<vmem>>, vector<1x32x288xbf16>
    %10 = vector.shape_cast %9 : vector<1x32x288xbf16> to vector<32x288xbf16>
    %11 = arith.extf %10 : vector<32x288xbf16> to vector<32x288xf32>
    %c0_7 = arith.constant 0 : index
    %c0_8 = arith.constant 0 : index
    %c36 = arith.constant 36 : index
    %12 = vector.load %arg1[%c0_7, %c0_8, %c36] : memref<1x32x360xbf16, #tpu.memory_space<vmem>>, vector<1x32x288xbf16>
    %13 = vector.shape_cast %12 : vector<1x32x288xbf16> to vector<32x288xbf16>
    %14 = arith.extf %13 : vector<32x288xbf16> to vector<32x288xf32>
    %c0_9 = arith.constant 0 : index
    %c0_10 = arith.constant 0 : index
    %c37 = arith.constant 37 : index
    %15 = vector.load %arg1[%c0_9, %c0_10, %c37] : memref<1x32x360xbf16, #tpu.memory_space<vmem>>, vector<1x32x288xbf16>
    %16 = vector.shape_cast %15 : vector<1x32x288xbf16> to vector<32x288xbf16>
    %17 = arith.extf %16 : vector<32x288xbf16> to vector<32x288xf32>
    %c0_11 = arith.constant 0 : index
    %c0_12 = arith.constant 0 : index
    %c53 = arith.constant 53 : index
    %18 = vector.load %arg1[%c0_11, %c0_12, %c53] : memref<1x32x360xbf16, #tpu.memory_space<vmem>>, vector<1x32x288xbf16>
    %19 = vector.shape_cast %18 : vector<1x32x288xbf16> to vector<32x288xbf16>
    %20 = arith.extf %19 : vector<32x288xbf16> to vector<32x288xf32>
    %c0_13 = arith.constant 0 : index
    %c0_14 = arith.constant 0 : index
    %c54 = arith.constant 54 : index
    %21 = vector.load %arg1[%c0_13, %c0_14, %c54] : memref<1x32x360xbf16, #tpu.memory_space<vmem>>, vector<1x32x288xbf16>
    %22 = vector.shape_cast %21 : vector<1x32x288xbf16> to vector<32x288xbf16>
    %23 = arith.extf %22 : vector<32x288xbf16> to vector<32x288xf32>
    %c0_15 = arith.constant 0 : index
    %c0_16 = arith.constant 0 : index
    %c55 = arith.constant 55 : index
    %24 = vector.load %arg1[%c0_15, %c0_16, %c55] : memref<1x32x360xbf16, #tpu.memory_space<vmem>>, vector<1x32x288xbf16>
    %25 = vector.shape_cast %24 : vector<1x32x288xbf16> to vector<32x288xbf16>
    %26 = arith.extf %25 : vector<32x288xbf16> to vector<32x288xf32>
    %27 = tpu.concatenate %2, %5, %8, %11, %14, %17, %20, %23, %26 in 0 : vector<32x288xf32>, vector<32x288xf32>, vector<32x288xf32>, vector<32x288xf32>, vector<32x288xf32>, vector<32x288xf32>, vector<32x288xf32>, vector<32x288xf32>, vector<32x288xf32> -> vector<288x288xf32>
    %c0_17 = arith.constant 0 : index
    %c0_18 = arith.constant 0 : index
    %28 = vector.load %arg2[%c0_17, %c0_18] : memref<24x288xbf16, #tpu.memory_space<vmem>>, vector<24x288xbf16>
    %29 = arith.truncf %27 : vector<288x288xf32> to vector<288x288xbf16>
    %cst = arith.constant dense<0.000000e+00> : vector<24x288xf32>
    %30 = tpu.matmul %28, %29, %cst {dimension_numbers = #tpu.dot_dimension_numbers<[1], [0], [0], [1], [0, 0, 1, 1], [], []>} : vector<24x288xbf16>, vector<288x288xbf16>, vector<24x288xf32> -> vector<24x288xf32>
    %c0_19 = arith.constant 0 : index
    %c0_20 = arith.constant 0 : index
    %31 = vector.load %arg3[%c0_19, %c0_20] : memref<24x1xf32, #tpu.memory_space<vmem>>, vector<24x1xf32>
    %32 = vector.broadcast %31 : vector<24x1xf32> to vector<24x288xf32>
    %33 = arith.addf %30, %32 : vector<24x288xf32>
    %cst_21 = arith.constant 0.000000e+00 : f32
    %34 = vector.broadcast %cst_21 : f32 to vector<24x288xf32>
    %35 = arith.cmpf oge, %33, %34 : vector<24x288xf32>
    %cst_22 = arith.constant 1.000000e-01 : f32
    %36 = vector.broadcast %cst_22 : f32 to vector<24x288xf32>
    %37 = arith.mulf %36, %33 : vector<24x288xf32>
    %38 = arith.select %35, %33, %37 : vector<24x288xi1>, vector<24x288xf32>
    %39 = arith.truncf %38 : vector<24x288xf32> to vector<24x288xbf16>
    %c0_23 = arith.constant 0 : index
    %c0_24 = arith.constant 0 : index
    %c0_25 = arith.constant 0 : index
    %40 = vector.load %arg4[%c0_23, %c0_24, %c0_25] : memref<1x24x288xbf16, #tpu.memory_space<vmem>>, vector<1x24x288xbf16>
    %41 = vector.shape_cast %40 : vector<1x24x288xbf16> to vector<24x288xbf16>
    %42 = vector.shape_cast %39 : vector<24x288xbf16> to vector<1x24x288xbf16>
    tpu.vector_store %arg4[%c0_23, %c0_24, %c0_25], %42 {strides = array<i32>} : memref<1x24x288xbf16, #tpu.memory_space<vmem>>, vector<1x24x288xbf16>,
    return
  }
  func.func @transform_0(%arg0: i32) -> (i32, i32, i32) {
    %c0_i32 = arith.constant 0 : i32
    %c0_i32_0 = arith.constant 0 : i32
    %c0_i32_1 = arith.constant 0 : i32
    return %arg0, %c0_i32, %c0_i32_0 : i32, i32, i32
  }
  func.func @transform_1(%arg0: i32) -> (i32, i32) {
    %c0_i32 = arith.constant 0 : i32
    %c0_i32_0 = arith.constant 0 : i32
    %c0_i32_1 = arith.constant 0 : i32
    return %c0_i32, %c0_i32_0 : i32, i32
  }
  func.func @transform_2(%arg0: i32) -> (i32, i32) {
    %c0_i32 = arith.constant 0 : i32
    %c0_i32_0 = arith.constant 0 : i32
    %c0_i32_1 = arith.constant 0 : i32
    return %c0_i32, %c0_i32_0 : i32, i32
  }
  func.func @transform_3(%arg0: i32) -> (i32, i32, i32) {
    %c0_i32 = arith.constant 0 : i32
    %c0_i32_0 = arith.constant 0 : i32
    %c0_i32_1 = arith.constant 0 : i32
    return %arg0, %c0_i32, %c0_i32_0 : i32, i32, i32
  }
}

module attributes {stable_mosaic.version = 11 : i64} {
  func.func @kernel(%arg0: i32, %arg1: memref<1x56x360xbf16, #tpu.memory_space<vmem>>, %arg2: memref<24x504xbf16, #tpu.memory_space<vmem>>, %arg3: memref<24x1xf32, #tpu.memory_space<vmem>>, %arg4: memref<1x24x288xbf16, #tpu.memory_space<vmem>>) attributes {dimension_semantics = [#tpu.dimension_semantics<parallel>], iteration_bounds = array<i64: 4>, scalar_prefetch = 0 : i64, scratch_operands = 0 : i64, tpu.core_type = #tpu.core_type<tc>, window_params = [{transform_indices = @transform_0, window_bounds = array<i64: 1, 56, 360>}, {pipeline_mode = #tpu.pipeline_mode<synchronous>, transform_indices = @transform_1, window_bounds = array<i64: 24, 504>}, {pipeline_mode = #tpu.pipeline_mode<synchronous>, transform_indices = @transform_2, window_bounds = array<i64: 24, 1>}, {transform_indices = @transform_3, window_bounds = array<i64: 1, 24, 288>}]} {
    %c0 = arith.constant 0 : index
    %c0_0 = arith.constant 0 : index
    %c17 = arith.constant 17 : index
    %0 = vector.load %arg1[%c0, %c0_0, %c17] : memref<1x56x360xbf16, #tpu.memory_space<vmem>>, vector<1x56x288xbf16>
    %1 = vector.shape_cast %0 : vector<1x56x288xbf16> to vector<56x288xbf16>
    %2 = arith.extf %1 : vector<56x288xbf16> to vector<56x288xf32>
    %c0_1 = arith.constant 0 : index
    %c0_2 = arith.constant 0 : index
    %c18 = arith.constant 18 : index
    %3 = vector.load %arg1[%c0_1, %c0_2, %c18] : memref<1x56x360xbf16, #tpu.memory_space<vmem>>, vector<1x56x288xbf16>
    %4 = vector.shape_cast %3 : vector<1x56x288xbf16> to vector<56x288xbf16>
    %5 = arith.extf %4 : vector<56x288xbf16> to vector<56x288xf32>
    %c0_3 = arith.constant 0 : index
    %c0_4 = arith.constant 0 : index
    %c19 = arith.constant 19 : index
    %6 = vector.load %arg1[%c0_3, %c0_4, %c19] : memref<1x56x360xbf16, #tpu.memory_space<vmem>>, vector<1x56x288xbf16>
    %7 = vector.shape_cast %6 : vector<1x56x288xbf16> to vector<56x288xbf16>
    %8 = arith.extf %7 : vector<56x288xbf16> to vector<56x288xf32>
    %c0_5 = arith.constant 0 : index
    %c0_6 = arith.constant 0 : index
    %c35 = arith.constant 35 : index
    %9 = vector.load %arg1[%c0_5, %c0_6, %c35] : memref<1x56x360xbf16, #tpu.memory_space<vmem>>, vector<1x56x288xbf16>
    %10 = vector.shape_cast %9 : vector<1x56x288xbf16> to vector<56x288xbf16>
    %11 = arith.extf %10 : vector<56x288xbf16> to vector<56x288xf32>
    %c0_7 = arith.constant 0 : index
    %c0_8 = arith.constant 0 : index
    %c36 = arith.constant 36 : index
    %12 = vector.load %arg1[%c0_7, %c0_8, %c36] : memref<1x56x360xbf16, #tpu.memory_space<vmem>>, vector<1x56x288xbf16>
    %13 = vector.shape_cast %12 : vector<1x56x288xbf16> to vector<56x288xbf16>
    %14 = arith.extf %13 : vector<56x288xbf16> to vector<56x288xf32>
    %c0_9 = arith.constant 0 : index
    %c0_10 = arith.constant 0 : index
    %c37 = arith.constant 37 : index
    %15 = vector.load %arg1[%c0_9, %c0_10, %c37] : memref<1x56x360xbf16, #tpu.memory_space<vmem>>, vector<1x56x288xbf16>
    %16 = vector.shape_cast %15 : vector<1x56x288xbf16> to vector<56x288xbf16>
    %17 = arith.extf %16 : vector<56x288xbf16> to vector<56x288xf32>
    %c0_11 = arith.constant 0 : index
    %c0_12 = arith.constant 0 : index
    %c53 = arith.constant 53 : index
    %18 = vector.load %arg1[%c0_11, %c0_12, %c53] : memref<1x56x360xbf16, #tpu.memory_space<vmem>>, vector<1x56x288xbf16>
    %19 = vector.shape_cast %18 : vector<1x56x288xbf16> to vector<56x288xbf16>
    %20 = arith.extf %19 : vector<56x288xbf16> to vector<56x288xf32>
    %c0_13 = arith.constant 0 : index
    %c0_14 = arith.constant 0 : index
    %c54 = arith.constant 54 : index
    %21 = vector.load %arg1[%c0_13, %c0_14, %c54] : memref<1x56x360xbf16, #tpu.memory_space<vmem>>, vector<1x56x288xbf16>
    %22 = vector.shape_cast %21 : vector<1x56x288xbf16> to vector<56x288xbf16>
    %23 = arith.extf %22 : vector<56x288xbf16> to vector<56x288xf32>
    %c0_15 = arith.constant 0 : index
    %c0_16 = arith.constant 0 : index
    %c55 = arith.constant 55 : index
    %24 = vector.load %arg1[%c0_15, %c0_16, %c55] : memref<1x56x360xbf16, #tpu.memory_space<vmem>>, vector<1x56x288xbf16>
    %25 = vector.shape_cast %24 : vector<1x56x288xbf16> to vector<56x288xbf16>
    %26 = arith.extf %25 : vector<56x288xbf16> to vector<56x288xf32>
    %27 = tpu.concatenate %2, %5, %8, %11, %14, %17, %20, %23, %26 in 0 : vector<56x288xf32>, vector<56x288xf32>, vector<56x288xf32>, vector<56x288xf32>, vector<56x288xf32>, vector<56x288xf32>, vector<56x288xf32>, vector<56x288xf32>, vector<56x288xf32> -> vector<504x288xf32>
    %c0_17 = arith.constant 0 : index
    %c0_18 = arith.constant 0 : index
    %28 = vector.load %arg2[%c0_17, %c0_18] : memref<24x504xbf16, #tpu.memory_space<vmem>>, vector<24x504xbf16>
    %29 = arith.truncf %27 : vector<504x288xf32> to vector<504x288xbf16>
    %cst = arith.constant dense<0.000000e+00> : vector<24x288xf32>
    %30 = tpu.matmul %28, %29, %cst {dimension_numbers = #tpu.dot_dimension_numbers<[1], [0], [0], [1], [0, 0, 1, 1], [], []>} : vector<24x504xbf16>, vector<504x288xbf16>, vector<24x288xf32> -> vector<24x288xf32>
    %c0_19 = arith.constant 0 : index
    %c0_20 = arith.constant 0 : index
    %31 = vector.load %arg3[%c0_19, %c0_20] : memref<24x1xf32, #tpu.memory_space<vmem>>, vector<24x1xf32>
    %32 = vector.broadcast %31 : vector<24x1xf32> to vector<24x288xf32>
    %33 = arith.addf %30, %32 : vector<24x288xf32>
    %cst_21 = arith.constant 0.000000e+00 : f32
    %34 = vector.broadcast %cst_21 : f32 to vector<24x288xf32>
    %35 = arith.cmpf oge, %33, %34 : vector<24x288xf32>
    %cst_22 = arith.constant 1.000000e-01 : f32
    %36 = vector.broadcast %cst_22 : f32 to vector<24x288xf32>
    %37 = arith.mulf %36, %33 : vector<24x288xf32>
    %38 = arith.select %35, %33, %37 : vector<24x288xi1>, vector<24x288xf32>
    %39 = arith.truncf %38 : vector<24x288xf32> to vector<24x288xbf16>
    %c0_23 = arith.constant 0 : index
    %c0_24 = arith.constant 0 : index
    %c0_25 = arith.constant 0 : index
    %40 = vector.load %arg4[%c0_23, %c0_24, %c0_25] : memref<1x24x288xbf16, #tpu.memory_space<vmem>>, vector<1x24x288xbf16>
    %41 = vector.shape_cast %40 : vector<1x24x288xbf16> to vector<24x288xbf16>
    %42 = vector.shape_cast %39 : vector<24x288xbf16> to vector<1x24x288xbf16>
    tpu.vector_store %arg4[%c0_23, %c0_24, %c0_25], %42 {strides = array<i32>} : memref<1x24x288xbf16, #tpu.memory_space<vmem>>, vector<1x24x288xbf16>,
    return
  }
  func.func @transform_0(%arg0: i32) -> (i32, i32, i32) {
    %c0_i32 = arith.constant 0 : i32
    %c0_i32_0 = arith.constant 0 : i32
    %c0_i32_1 = arith.constant 0 : i32
    return %arg0, %c0_i32, %c0_i32_0 : i32, i32, i32
  }
  func.func @transform_1(%arg0: i32) -> (i32, i32) {
    %c0_i32 = arith.constant 0 : i32
    %c0_i32_0 = arith.constant 0 : i32
    %c0_i32_1 = arith.constant 0 : i32
    return %c0_i32, %c0_i32_0 : i32, i32
  }
  func.func @transform_2(%arg0: i32) -> (i32, i32) {
    %c0_i32 = arith.constant 0 : i32
    %c0_i32_0 = arith.constant 0 : i32
    %c0_i32_1 = arith.constant 0 : i32
    return %c0_i32, %c0_i32_0 : i32, i32
  }
  func.func @transform_3(%arg0: i32) -> (i32, i32, i32) {
    %c0_i32 = arith.constant 0 : i32
    %c0_i32_0 = arith.constant 0 : i32
    %c0_i32_1 = arith.constant 0 : i32
    return %arg0, %c0_i32, %c0_i32_0 : i32, i32, i32
  }
}

module attributes {stable_mosaic.version = 11 : i64} {
  func.func @kernel(%arg0: i32, %arg1: memref<1x80x360xbf16, #tpu.memory_space<vmem>>, %arg2: memref<24x720xbf16, #tpu.memory_space<vmem>>, %arg3: memref<24x1xf32, #tpu.memory_space<vmem>>, %arg4: memref<1x24x288xbf16, #tpu.memory_space<vmem>>) attributes {dimension_semantics = [#tpu.dimension_semantics<parallel>], iteration_bounds = array<i64: 4>, scalar_prefetch = 0 : i64, scratch_operands = 0 : i64, tpu.core_type = #tpu.core_type<tc>, window_params = [{transform_indices = @transform_0, window_bounds = array<i64: 1, 80, 360>}, {pipeline_mode = #tpu.pipeline_mode<synchronous>, transform_indices = @transform_1, window_bounds = array<i64: 24, 720>}, {pipeline_mode = #tpu.pipeline_mode<synchronous>, transform_indices = @transform_2, window_bounds = array<i64: 24, 1>}, {transform_indices = @transform_3, window_bounds = array<i64: 1, 24, 288>}]} {
    %c0 = arith.constant 0 : index
    %c0_0 = arith.constant 0 : index
    %c17 = arith.constant 17 : index
    %0 = vector.load %arg1[%c0, %c0_0, %c17] : memref<1x80x360xbf16, #tpu.memory_space<vmem>>, vector<1x80x288xbf16>
    %1 = vector.shape_cast %0 : vector<1x80x288xbf16> to vector<80x288xbf16>
    %2 = arith.extf %1 : vector<80x288xbf16> to vector<80x288xf32>
    %c0_1 = arith.constant 0 : index
    %c0_2 = arith.constant 0 : index
    %c18 = arith.constant 18 : index
    %3 = vector.load %arg1[%c0_1, %c0_2, %c18] : memref<1x80x360xbf16, #tpu.memory_space<vmem>>, vector<1x80x288xbf16>
    %4 = vector.shape_cast %3 : vector<1x80x288xbf16> to vector<80x288xbf16>
    %5 = arith.extf %4 : vector<80x288xbf16> to vector<80x288xf32>
    %c0_3 = arith.constant 0 : index
    %c0_4 = arith.constant 0 : index
    %c19 = arith.constant 19 : index
    %6 = vector.load %arg1[%c0_3, %c0_4, %c19] : memref<1x80x360xbf16, #tpu.memory_space<vmem>>, vector<1x80x288xbf16>
    %7 = vector.shape_cast %6 : vector<1x80x288xbf16> to vector<80x288xbf16>
    %8 = arith.extf %7 : vector<80x288xbf16> to vector<80x288xf32>
    %c0_5 = arith.constant 0 : index
    %c0_6 = arith.constant 0 : index
    %c35 = arith.constant 35 : index
    %9 = vector.load %arg1[%c0_5, %c0_6, %c35] : memref<1x80x360xbf16, #tpu.memory_space<vmem>>, vector<1x80x288xbf16>
    %10 = vector.shape_cast %9 : vector<1x80x288xbf16> to vector<80x288xbf16>
    %11 = arith.extf %10 : vector<80x288xbf16> to vector<80x288xf32>
    %c0_7 = arith.constant 0 : index
    %c0_8 = arith.constant 0 : index
    %c36 = arith.constant 36 : index
    %12 = vector.load %arg1[%c0_7, %c0_8, %c36] : memref<1x80x360xbf16, #tpu.memory_space<vmem>>, vector<1x80x288xbf16>
    %13 = vector.shape_cast %12 : vector<1x80x288xbf16> to vector<80x288xbf16>
    %14 = arith.extf %13 : vector<80x288xbf16> to vector<80x288xf32>
    %c0_9 = arith.constant 0 : index
    %c0_10 = arith.constant 0 : index
    %c37 = arith.constant 37 : index
    %15 = vector.load %arg1[%c0_9, %c0_10, %c37] : memref<1x80x360xbf16, #tpu.memory_space<vmem>>, vector<1x80x288xbf16>
    %16 = vector.shape_cast %15 : vector<1x80x288xbf16> to vector<80x288xbf16>
    %17 = arith.extf %16 : vector<80x288xbf16> to vector<80x288xf32>
    %c0_11 = arith.constant 0 : index
    %c0_12 = arith.constant 0 : index
    %c53 = arith.constant 53 : index
    %18 = vector.load %arg1[%c0_11, %c0_12, %c53] : memref<1x80x360xbf16, #tpu.memory_space<vmem>>, vector<1x80x288xbf16>
    %19 = vector.shape_cast %18 : vector<1x80x288xbf16> to vector<80x288xbf16>
    %20 = arith.extf %19 : vector<80x288xbf16> to vector<80x288xf32>
    %c0_13 = arith.constant 0 : index
    %c0_14 = arith.constant 0 : index
    %c54 = arith.constant 54 : index
    %21 = vector.load %arg1[%c0_13, %c0_14, %c54] : memref<1x80x360xbf16, #tpu.memory_space<vmem>>, vector<1x80x288xbf16>
    %22 = vector.shape_cast %21 : vector<1x80x288xbf16> to vector<80x288xbf16>
    %23 = arith.extf %22 : vector<80x288xbf16> to vector<80x288xf32>
    %c0_15 = arith.constant 0 : index
    %c0_16 = arith.constant 0 : index
    %c55 = arith.constant 55 : index
    %24 = vector.load %arg1[%c0_15, %c0_16, %c55] : memref<1x80x360xbf16, #tpu.memory_space<vmem>>, vector<1x80x288xbf16>
    %25 = vector.shape_cast %24 : vector<1x80x288xbf16> to vector<80x288xbf16>
    %26 = arith.extf %25 : vector<80x288xbf16> to vector<80x288xf32>
    %27 = tpu.concatenate %2, %5, %8, %11, %14, %17, %20, %23, %26 in 0 : vector<80x288xf32>, vector<80x288xf32>, vector<80x288xf32>, vector<80x288xf32>, vector<80x288xf32>, vector<80x288xf32>, vector<80x288xf32>, vector<80x288xf32>, vector<80x288xf32> -> vector<720x288xf32>
    %c0_17 = arith.constant 0 : index
    %c0_18 = arith.constant 0 : index
    %28 = vector.load %arg2[%c0_17, %c0_18] : memref<24x720xbf16, #tpu.memory_space<vmem>>, vector<24x720xbf16>
    %29 = arith.truncf %27 : vector<720x288xf32> to vector<720x288xbf16>
    %cst = arith.constant dense<0.000000e+00> : vector<24x288xf32>
    %30 = tpu.matmul %28, %29, %cst {dimension_numbers = #tpu.dot_dimension_numbers<[1], [0], [0], [1], [0, 0, 1, 1], [], []>} : vector<24x720xbf16>, vector<720x288xbf16>, vector<24x288xf32> -> vector<24x288xf32>
    %c0_19 = arith.constant 0 : index
    %c0_20 = arith.constant 0 : index
    %31 = vector.load %arg3[%c0_19, %c0_20] : memref<24x1xf32, #tpu.memory_space<vmem>>, vector<24x1xf32>
    %32 = vector.broadcast %31 : vector<24x1xf32> to vector<24x288xf32>
    %33 = arith.addf %30, %32 : vector<24x288xf32>
    %cst_21 = arith.constant 0.000000e+00 : f32
    %34 = vector.broadcast %cst_21 : f32 to vector<24x288xf32>
    %35 = arith.cmpf oge, %33, %34 : vector<24x288xf32>
    %cst_22 = arith.constant 1.000000e-01 : f32
    %36 = vector.broadcast %cst_22 : f32 to vector<24x288xf32>
    %37 = arith.mulf %36, %33 : vector<24x288xf32>
    %38 = arith.select %35, %33, %37 : vector<24x288xi1>, vector<24x288xf32>
    %39 = arith.truncf %38 : vector<24x288xf32> to vector<24x288xbf16>
    %c0_23 = arith.constant 0 : index
    %c0_24 = arith.constant 0 : index
    %c0_25 = arith.constant 0 : index
    %40 = vector.load %arg4[%c0_23, %c0_24, %c0_25] : memref<1x24x288xbf16, #tpu.memory_space<vmem>>, vector<1x24x288xbf16>
    %41 = vector.shape_cast %40 : vector<1x24x288xbf16> to vector<24x288xbf16>
    %42 = vector.shape_cast %39 : vector<24x288xbf16> to vector<1x24x288xbf16>
    tpu.vector_store %arg4[%c0_23, %c0_24, %c0_25], %42 {strides = array<i32>} : memref<1x24x288xbf16, #tpu.memory_space<vmem>>, vector<1x24x288xbf16>,
    return
  }
  func.func @transform_0(%arg0: i32) -> (i32, i32, i32) {
    %c0_i32 = arith.constant 0 : i32
    %c0_i32_0 = arith.constant 0 : i32
    %c0_i32_1 = arith.constant 0 : i32
    return %arg0, %c0_i32, %c0_i32_0 : i32, i32, i32
  }
  func.func @transform_1(%arg0: i32) -> (i32, i32) {
    %c0_i32 = arith.constant 0 : i32
    %c0_i32_0 = arith.constant 0 : i32
    %c0_i32_1 = arith.constant 0 : i32
    return %c0_i32, %c0_i32_0 : i32, i32
  }
  func.func @transform_2(%arg0: i32) -> (i32, i32) {
    %c0_i32 = arith.constant 0 : i32
    %c0_i32_0 = arith.constant 0 : i32
    %c0_i32_1 = arith.constant 0 : i32
    return %c0_i32, %c0_i32_0 : i32, i32
  }
  func.func @transform_3(%arg0: i32) -> (i32, i32, i32) {
    %c0_i32 = arith.constant 0 : i32
    %c0_i32_0 = arith.constant 0 : i32
    %c0_i32_1 = arith.constant 0 : i32
    return %arg0, %c0_i32, %c0_i32_0 : i32, i32, i32
  }
}

module attributes {stable_mosaic.version = 11 : i64} {
  func.func @kernel(%arg0: i32, %arg1: memref<1x104x256xbf16, #tpu.memory_space<vmem>>, %arg2: memref<8x104xbf16, #tpu.memory_space<vmem>>, %arg3: memref<8x1xf32, #tpu.memory_space<vmem>>, %arg4: memref<1x8x256xbf16, #tpu.memory_space<vmem>>, %arg5: memref<1x8x256xbf16, #tpu.memory_space<vmem>>) attributes {dimension_semantics = [#tpu.dimension_semantics<parallel>], iteration_bounds = array<i64: 4>, scalar_prefetch = 0 : i64, scratch_operands = 0 : i64, tpu.core_type = #tpu.core_type<tc>, window_params = [{transform_indices = @transform_0, window_bounds = array<i64: 1, 104, 256>}, {pipeline_mode = #tpu.pipeline_mode<synchronous>, transform_indices = @transform_1, window_bounds = array<i64: 8, 104>}, {pipeline_mode = #tpu.pipeline_mode<synchronous>, transform_indices = @transform_2, window_bounds = array<i64: 8, 1>}, {transform_indices = @transform_3, window_bounds = array<i64: 1, 8, 256>}, {transform_indices = @transform_4, window_bounds = array<i64: 1, 8, 256>}]} {
    %c0 = arith.constant 0 : index
    %c0_0 = arith.constant 0 : index
    %c0_1 = arith.constant 0 : index
    %0 = vector.load %arg1[%c0, %c0_0, %c0_1] : memref<1x104x256xbf16, #tpu.memory_space<vmem>>, vector<1x104x256xbf16>
    %1 = vector.shape_cast %0 : vector<1x104x256xbf16> to vector<104x256xbf16>
    %2 = arith.extf %1 : vector<104x256xbf16> to vector<104x256xf32>
    %c0_2 = arith.constant 0 : index
    %c0_3 = arith.constant 0 : index
    %3 = vector.load %arg2[%c0_2, %c0_3] : memref<8x104xbf16, #tpu.memory_space<vmem>>, vector<8x104xbf16>
    %4 = arith.truncf %2 : vector<104x256xf32> to vector<104x256xbf16>
    %cst = arith.constant dense<0.000000e+00> : vector<8x256xf32>
    %5 = tpu.matmul %3, %4, %cst {dimension_numbers = #tpu.dot_dimension_numbers<[1], [0], [0], [1], [0, 0, 1, 1], [], []>} : vector<8x104xbf16>, vector<104x256xbf16>, vector<8x256xf32> -> vector<8x256xf32>
    %c0_4 = arith.constant 0 : index
    %c0_5 = arith.constant 0 : index
    %6 = vector.load %arg3[%c0_4, %c0_5] : memref<8x1xf32, #tpu.memory_space<vmem>>, vector<8x1xf32>
    %7 = vector.broadcast %6 : vector<8x1xf32> to vector<8x256xf32>
    %8 = arith.addf %5, %7 : vector<8x256xf32>
    %c0_6 = arith.constant 0 : index
    %c0_7 = arith.constant 0 : index
    %c0_8 = arith.constant 0 : index
    %9 = vector.load %arg4[%c0_6, %c0_7, %c0_8] : memref<1x8x256xbf16, #tpu.memory_space<vmem>>, vector<1x8x256xbf16>
    %10 = vector.shape_cast %9 : vector<1x8x256xbf16> to vector<8x256xbf16>
    %11 = arith.extf %10 : vector<8x256xbf16> to vector<8x256xf32>
    %12 = arith.addf %8, %11 : vector<8x256xf32>
    %13 = arith.truncf %12 : vector<8x256xf32> to vector<8x256xbf16>
    %c0_9 = arith.constant 0 : index
    %c0_10 = arith.constant 0 : index
    %c0_11 = arith.constant 0 : index
    %14 = vector.load %arg5[%c0_9, %c0_10, %c0_11] : memref<1x8x256xbf16, #tpu.memory_space<vmem>>, vector<1x8x256xbf16>
    %15 = vector.shape_cast %14 : vector<1x8x256xbf16> to vector<8x256xbf16>
    %16 = vector.shape_cast %13 : vector<8x256xbf16> to vector<1x8x256xbf16>
    tpu.vector_store %arg5[%c0_9, %c0_10, %c0_11], %16 {strides = array<i32>} : memref<1x8x256xbf16, #tpu.memory_space<vmem>>, vector<1x8x256xbf16>,
    return
  }
  func.func @transform_0(%arg0: i32) -> (i32, i32, i32) {
    %c0_i32 = arith.constant 0 : i32
    %c0_i32_0 = arith.constant 0 : i32
    %c0_i32_1 = arith.constant 0 : i32
    return %arg0, %c0_i32, %c0_i32_0 : i32, i32, i32
  }
  func.func @transform_1(%arg0: i32) -> (i32, i32) {
    %c0_i32 = arith.constant 0 : i32
    %c0_i32_0 = arith.constant 0 : i32
    %c0_i32_1 = arith.constant 0 : i32
    return %c0_i32, %c0_i32_0 : i32, i32
  }
  func.func @transform_2(%arg0: i32) -> (i32, i32) {
    %c0_i32 = arith.constant 0 : i32
    %c0_i32_0 = arith.constant 0 : i32
    %c0_i32_1 = arith.constant 0 : i32
    return %c0_i32, %c0_i32_0 : i32, i32
  }
  func.func @transform_3(%arg0: i32) -> (i32, i32, i32) {
    %c0_i32 = arith.constant 0 : i32
    %c0_i32_0 = arith.constant 0 : i32
    %c0_i32_1 = arith.constant 0 : i32
    return %arg0, %c0_i32, %c0_i32_0 : i32, i32, i32
  }
  func.func @transform_4(%arg0: i32) -> (i32, i32, i32) {
    %c0_i32 = arith.constant 0 : i32
    %c0_i32_0 = arith.constant 0 : i32
    %c0_i32_1 = arith.constant 0 : i32
    return %arg0, %c0_i32, %c0_i32_0 : i32, i32, i32
  }
}

module attributes {stable_mosaic.version = 11 : i64} {
  func.func @kernel(%arg0: i32, %arg1: memref<1x32x256xbf16, #tpu.memory_space<vmem>>, %arg2: memref<8x32xbf16, #tpu.memory_space<vmem>>, %arg3: memref<8x1xf32, #tpu.memory_space<vmem>>, %arg4: memref<1x8x256xbf16, #tpu.memory_space<vmem>>) attributes {dimension_semantics = [#tpu.dimension_semantics<parallel>], iteration_bounds = array<i64: 4>, scalar_prefetch = 0 : i64, scratch_operands = 0 : i64, tpu.core_type = #tpu.core_type<tc>, window_params = [{transform_indices = @transform_0, window_bounds = array<i64: 1, 32, 256>}, {pipeline_mode = #tpu.pipeline_mode<synchronous>, transform_indices = @transform_1, window_bounds = array<i64: 8, 32>}, {pipeline_mode = #tpu.pipeline_mode<synchronous>, transform_indices = @transform_2, window_bounds = array<i64: 8, 1>}, {transform_indices = @transform_3, window_bounds = array<i64: 1, 8, 256>}]} {
    %c0 = arith.constant 0 : index
    %c0_0 = arith.constant 0 : index
    %c0_1 = arith.constant 0 : index
    %0 = vector.load %arg1[%c0, %c0_0, %c0_1] : memref<1x32x256xbf16, #tpu.memory_space<vmem>>, vector<1x32x256xbf16>
    %1 = vector.shape_cast %0 : vector<1x32x256xbf16> to vector<32x256xbf16>
    %2 = arith.extf %1 : vector<32x256xbf16> to vector<32x256xf32>
    %c0_2 = arith.constant 0 : index
    %c0_3 = arith.constant 0 : index
    %3 = vector.load %arg2[%c0_2, %c0_3] : memref<8x32xbf16, #tpu.memory_space<vmem>>, vector<8x32xbf16>
    %4 = arith.truncf %2 : vector<32x256xf32> to vector<32x256xbf16>
    %cst = arith.constant dense<0.000000e+00> : vector<8x256xf32>
    %5 = tpu.matmul %3, %4, %cst {dimension_numbers = #tpu.dot_dimension_numbers<[1], [0], [0], [1], [0, 0, 1, 1], [], []>} : vector<8x32xbf16>, vector<32x256xbf16>, vector<8x256xf32> -> vector<8x256xf32>
    %c0_4 = arith.constant 0 : index
    %c0_5 = arith.constant 0 : index
    %6 = vector.load %arg3[%c0_4, %c0_5] : memref<8x1xf32, #tpu.memory_space<vmem>>, vector<8x1xf32>
    %7 = vector.broadcast %6 : vector<8x1xf32> to vector<8x256xf32>
    %8 = arith.addf %5, %7 : vector<8x256xf32>
    %9 = arith.truncf %8 : vector<8x256xf32> to vector<8x256xbf16>
    %c0_6 = arith.constant 0 : index
    %c0_7 = arith.constant 0 : index
    %c0_8 = arith.constant 0 : index
    %10 = vector.load %arg4[%c0_6, %c0_7, %c0_8] : memref<1x8x256xbf16, #tpu.memory_space<vmem>>, vector<1x8x256xbf16>
    %11 = vector.shape_cast %10 : vector<1x8x256xbf16> to vector<8x256xbf16>
    %12 = vector.shape_cast %9 : vector<8x256xbf16> to vector<1x8x256xbf16>
    tpu.vector_store %arg4[%c0_6, %c0_7, %c0_8], %12 {strides = array<i32>} : memref<1x8x256xbf16, #tpu.memory_space<vmem>>, vector<1x8x256xbf16>,
    return
  }
  func.func @transform_0(%arg0: i32) -> (i32, i32, i32) {
    %c0_i32 = arith.constant 0 : i32
    %c0_i32_0 = arith.constant 0 : i32
    %c0_i32_1 = arith.constant 0 : i32
    return %arg0, %c0_i32, %c0_i32_0 : i32, i32, i32
  }
  func.func @transform_1(%arg0: i32) -> (i32, i32) {
    %c0_i32 = arith.constant 0 : i32
    %c0_i32_0 = arith.constant 0 : i32
    %c0_i32_1 = arith.constant 0 : i32
    return %c0_i32, %c0_i32_0 : i32, i32
  }
  func.func @transform_2(%arg0: i32) -> (i32, i32) {
    %c0_i32 = arith.constant 0 : i32
    %c0_i32_0 = arith.constant 0 : i32
    %c0_i32_1 = arith.constant 0 : i32
    return %c0_i32, %c0_i32_0 : i32, i32
  }
  func.func @transform_3(%arg0: i32) -> (i32, i32, i32) {
    %c0_i32 = arith.constant 0 : i32
    %c0_i32_0 = arith.constant 0 : i32
    %c0_i32_1 = arith.constant 0 : i32
    return %arg0, %c0_i32, %c0_i32_0 : i32, i32, i32
  }
}

module attributes {stable_mosaic.version = 11 : i64} {
  func.func @kernel(%arg0: i32, %arg1: memref<1x8x256xbf16, #tpu.memory_space<vmem>>, %arg2: memref<32x8xbf16, #tpu.memory_space<vmem>>, %arg3: memref<1x32x256xbf16, #tpu.memory_space<vmem>>) attributes {dimension_semantics = [#tpu.dimension_semantics<parallel>], iteration_bounds = array<i64: 4>, scalar_prefetch = 0 : i64, scratch_operands = 0 : i64, tpu.core_type = #tpu.core_type<tc>, window_params = [{transform_indices = @transform_0, window_bounds = array<i64: 1, 8, 256>}, {pipeline_mode = #tpu.pipeline_mode<synchronous>, transform_indices = @transform_1, window_bounds = array<i64: 32, 8>}, {transform_indices = @transform_2, window_bounds = array<i64: 1, 32, 256>}]} {
    %c0 = arith.constant 0 : index
    %c0_0 = arith.constant 0 : index
    %c0_1 = arith.constant 0 : index
    %0 = vector.load %arg1[%c0, %c0_0, %c0_1] : memref<1x8x256xbf16, #tpu.memory_space<vmem>>, vector<1x8x256xbf16>
    %1 = vector.shape_cast %0 : vector<1x8x256xbf16> to vector<8x256xbf16>
    %2 = arith.extf %1 : vector<8x256xbf16> to vector<8x256xf32>
    %c0_2 = arith.constant 0 : index
    %c0_3 = arith.constant 0 : index
    %3 = vector.load %arg2[%c0_2, %c0_3] : memref<32x8xbf16, #tpu.memory_space<vmem>>, vector<32x8xbf16>
    %4 = arith.truncf %2 : vector<8x256xf32> to vector<8x256xbf16>
    %cst = arith.constant dense<0.000000e+00> : vector<32x256xf32>
    %5 = tpu.matmul %3, %4, %cst {dimension_numbers = #tpu.dot_dimension_numbers<[1], [0], [0], [1], [0, 0, 1, 1], [], []>} : vector<32x8xbf16>, vector<8x256xbf16>, vector<32x256xf32> -> vector<32x256xf32>
    %6 = arith.truncf %5 : vector<32x256xf32> to vector<32x256xbf16>
    %c0_4 = arith.constant 0 : index
    %c0_5 = arith.constant 0 : index
    %c0_6 = arith.constant 0 : index
    %7 = vector.load %arg3[%c0_4, %c0_5, %c0_6] : memref<1x32x256xbf16, #tpu.memory_space<vmem>>, vector<1x32x256xbf16>
    %8 = vector.shape_cast %7 : vector<1x32x256xbf16> to vector<32x256xbf16>
    %9 = vector.shape_cast %6 : vector<32x256xbf16> to vector<1x32x256xbf16>
    tpu.vector_store %arg3[%c0_4, %c0_5, %c0_6], %9 {strides = array<i32>} : memref<1x32x256xbf16, #tpu.memory_space<vmem>>, vector<1x32x256xbf16>,
    return
  }
  func.func @transform_0(%arg0: i32) -> (i32, i32, i32) {
    %c0_i32 = arith.constant 0 : i32
    %c0_i32_0 = arith.constant 0 : i32
    %c0_i32_1 = arith.constant 0 : i32
    return %arg0, %c0_i32, %c0_i32_0 : i32, i32, i32
  }
  func.func @transform_1(%arg0: i32) -> (i32, i32) {
    %c0_i32 = arith.constant 0 : i32
    %c0_i32_0 = arith.constant 0 : i32
    %c0_i32_1 = arith.constant 0 : i32
    return %c0_i32, %c0_i32_0 : i32, i32
  }
  func.func @transform_2(%arg0: i32) -> (i32, i32, i32) {
    %c0_i32 = arith.constant 0 : i32
    %c0_i32_0 = arith.constant 0 : i32
    %c0_i32_1 = arith.constant 0 : i32
    return %arg0, %c0_i32, %c0_i32_0 : i32, i32, i32
  }
}

module attributes {stable_mosaic.version = 11 : i64} {
  func.func @kernel(%arg0: i32, %arg1: memref<1x8x1024xbf16, #tpu.memory_space<vmem>>, %arg2: memref<1x8xbf16, #tpu.memory_space<vmem>>, %arg3: memref<1x1x1024xf32, #tpu.memory_space<vmem>>) attributes {dimension_semantics = [#tpu.dimension_semantics<parallel>], iteration_bounds = array<i64: 4>, scalar_prefetch = 0 : i64, scratch_operands = 0 : i64, tpu.core_type = #tpu.core_type<tc>, window_params = [{transform_indices = @transform_0, window_bounds = array<i64: 1, 8, 1024>}, {pipeline_mode = #tpu.pipeline_mode<synchronous>, transform_indices = @transform_1, window_bounds = array<i64: 1, 8>}, {transform_indices = @transform_2, window_bounds = array<i64: 1, 1, 1024>}]} {
    %c0 = arith.constant 0 : index
    %c0_0 = arith.constant 0 : index
    %c0_1 = arith.constant 0 : index
    %0 = vector.load %arg1[%c0, %c0_0, %c0_1] : memref<1x8x1024xbf16, #tpu.memory_space<vmem>>, vector<1x8x1024xbf16>
    %1 = vector.shape_cast %0 : vector<1x8x1024xbf16> to vector<8x1024xbf16>
    %2 = arith.extf %1 : vector<8x1024xbf16> to vector<8x1024xf32>
    %c0_2 = arith.constant 0 : index
    %c0_3 = arith.constant 0 : index
    %3 = vector.load %arg2[%c0_2, %c0_3] : memref<1x8xbf16, #tpu.memory_space<vmem>>, vector<1x8xbf16>
    %4 = arith.truncf %2 : vector<8x1024xf32> to vector<8x1024xbf16>
    %cst = arith.constant dense<0.000000e+00> : vector<1x1024xf32>
    %5 = tpu.matmul %3, %4, %cst {dimension_numbers = #tpu.dot_dimension_numbers<[1], [0], [0], [1], [0, 0, 1, 1], [], []>} : vector<1x8xbf16>, vector<8x1024xbf16>, vector<1x1024xf32> -> vector<1x1024xf32>
    %c0_4 = arith.constant 0 : index
    %c0_5 = arith.constant 0 : index
    %c0_6 = arith.constant 0 : index
    %6 = vector.load %arg3[%c0_4, %c0_5, %c0_6] : memref<1x1x1024xf32, #tpu.memory_space<vmem>>, vector<1x1x1024xf32>
    %7 = vector.shape_cast %6 : vector<1x1x1024xf32> to vector<1x1024xf32>
    %8 = vector.shape_cast %5 : vector<1x1024xf32> to vector<1x1x1024xf32>
    tpu.vector_store %arg3[%c0_4, %c0_5, %c0_6], %8 {strides = array<i32>} : memref<1x1x1024xf32, #tpu.memory_space<vmem>>, vector<1x1x1024xf32>,
    return
  }
  func.func @transform_0(%arg0: i32) -> (i32, i32, i32) {
    %c0_i32 = arith.constant 0 : i32
    %c0_i32_0 = arith.constant 0 : i32
    %c0_i32_1 = arith.constant 0 : i32
    return %arg0, %c0_i32, %c0_i32_0 : i32, i32, i32
  }
  func.func @transform_1(%arg0: i32) -> (i32, i32) {
    %c0_i32 = arith.constant 0 : i32
    %c0_i32_0 = arith.constant 0 : i32
    %c0_i32_1 = arith.constant 0 : i32
    return %c0_i32, %c0_i32_0 : i32, i32
  }
  func.func @transform_2(%arg0: i32) -> (i32, i32, i32) {
    %c0_i32 = arith.constant 0 : i32
    %c0_i32_0 = arith.constant 0 : i32
    %c0_i32_1 = arith.constant 0 : i32
    return %arg0, %c0_i32, %c0_i32_0 : i32, i32, i32
  }
}

</mosaic_0001>

<bundles_post_ra>
// kernel: sisr_forward.32
= control target key start
LH: loop header
LB: loop body
LE: loop exit
PB: predicated region body
PF: predicated region fallthrough
CT: control target
= control target key end

     0   :  { %s289_s9 = smov 0   ;;  %s309_s0 = inlined_call_operand.vmem [shape: bf16[4,4,256], index: 0, kind: input, shape index: {}]   ;;  %s310_s1 = inlined_call_operand.vmem [shape: bf16[8,4], index: 1, kind: input, shape index: {}]   ;;  %s311_s2 = inlined_call_operand.vmem [shape: bf16[4,8,256], index: 2, kind: output, shape index: {}]  }
   0x1 LB: > { %s243_s10 = sadd.s32 4294967295, %s272_s9   ;;  %p247_p0 = scmp.ge.s32.totalorder %s272_s9, 1  ;;  %s272_s9 = sphi %s289_s9, %s12_s9  }
   0x2   : > { %p112_p1 = scmp.lt.s32.totalorder %s272_s9, 5 }
   0x4   : > { %p113_p2 = pnand %p247_p0, %p112_p1 }
   0x5   : > { %p134_p3 = scmp.lt.s32.totalorder (!%p113_p2), %s243_s10, 3 }
   0x6   : > { %116 = sbr.rel (%p113_p2) target bundleno = 161 (0xa1), region = 28 }
   0xb   : > { %s313_s10 = smov (!%p134_p3, %s243_s10), 3  ;;  %vm155_vm0 = vcmask 1041408   ;;  %v146_v5 = vld [vmem:[%s310_s1] sm:$0xf]  ;;  %vm151_vm1 = vcmask 31744  }
   0xc   : > { %s256_s11 = sshll.u32 %s313_s10, 2  ;;  %s257_s17 = sshll.u32 %s313_s10, 3 }
   0xd   : > { %s138_s14 = scalar_lea.vmem %s309_s0, %s256_s11  ;;  %s143_s20 = scalar_lea.vmem %s311_s2, %s257_s17 }
   0xe   : > { %v145_v0 = vld [vmem:[%s138_s14] sm:$0xf] }
   0xf   : > { %148 = vst [vmem:[#allocation1] ss:$4 sm:$0xff] %v145_v0 }
  0x16   : > { %v149_v1 = vld.sshfl [vmem:[#allocation1] sm:$0xff pattern:$0x73625140]  ;;  %v150_v2 = vld.sshfl [vmem:[#allocation1 + $0x8] sm:$0xff pattern:$0x73625140] }
  0x17   : > { %v156_v3 = vsel %vm155_vm0, %v149_v1, 0  ;;  %v158_v4 = vsel %vm155_vm0, %v150_v2, 0 }
  0x18   : > { %167 = vmatpush.bf16.msra.mxu0 %v156_v3  ;;  %180 = vmatpush.bf16.msra.mxu1 %v158_v4 }
  0x1b   : > { %252 = vmatmul.msk.bf16.vlgmr.msra.gmra.mxu0 %vm151_vm1, %v146_v5  ;;  %253 = vmatmul.msk.bf16.vlgmr.msra.gmra.mxu1 %vm151_vm1, %v146_v5 }
  0x98   : > { %v169_v6 = vpop.f32.mrf.mxu0  ;;  %v182_v7 = vpop.f32.mrf.mxu1 }
  0x99   : > { %v186_v8 = vpack.c.bf16 %v182_v7, %v169_v6 }
  0x9b   : > { %187 = vst [vmem:[%s143_s20] sm:$0xff] %v186_v8 }
  0xa0   : > { %v171_v9 = vpop.f32.mrf.mxu0  ;;  %v184_v10 = vpop.f32.mrf.mxu1 }
  0xa1 PF: > { %s12_s9 = sadd.s32 1, %s272_s9  }
  0xa2   : > { %p9_p4 = scmp.ge.s32.totalorder %s12_s9, 6  }
  0xa4   :  { %11 = sbr.rel (!%p9_p4) target bundleno = 1 (0x1), region = 58 }

// kernel: sisr_forward.33
= control target key start
LH: loop header
LB: loop body
LE: loop exit
PB: predicated region body
PF: predicated region fallthrough
CT: control target
= control target key end

     0   :  { %s1466_s15 = smov 0   ;;  %s2055_s0 = inlined_call_operand.vmem [shape: bf16[4,8,624], index: 0, kind: input, shape index: {}]   ;;  %s2056_s1 = inlined_call_operand.vmem [shape: bf16[8,72], index: 1, kind: input, shape index: {}]   ;;  %s2057_s2 = inlined_call_operand.vmem [shape: bf16[8,72], index: 2, kind: input, shape index: {}]   ;;  %s2058_s3 = inlined_call_operand.vmem [shape: bf16[8,72], index: 3, kind: input, shape index: {}]   ;;  %s2059_s4 = inlined_call_operand.vmem [shape: bf16[4,24,384], index: 4, kind: output, shape index: {}]  }
   0x1 LB: > { %s1143_s16 = sadd.s32 4294967295, %s1418_s15   ;;  %p1147_p0 = scmp.ge.s32.totalorder %s1418_s15, 1  ;;  %s1418_s15 = sphi %s1466_s15, %s14_s15  }
   0x2   : > { %p162_p1 = scmp.lt.s32.totalorder %s1418_s15, 5 }
   0x4   : > { %p163_p2 = pnand %p1147_p0, %p162_p1 }
   0x5   : > { %p188_p3 = scmp.lt.s32.totalorder (!%p163_p2), %s1143_s16, 3  ;;  %s1420_s21 = smov (!%p163_p2), 126  }
   0x6   : > { %166 = sbr.rel (%p163_p2) target bundleno = 656 (0x290), region = 36  ;;  %s1421_s22 = smov (!%p163_p2), 127  }
   0x7   : > { %s1422_s23 = smov (!%p163_p2), 104   ;;  %s1423_s24 = smov (!%p163_p2), 103  }
   0x8   : > { %s1424_s25 = smov (!%p163_p2), 102   ;;  %s1425_s26 = smov (!%p163_p2), 80  }
   0x9   : > { %s1426_s27 = smov (!%p163_p2), 79   ;;  %s1427_s28 = smov (!%p163_p2), 78  }
   0xa   : > { %s1428_s29 = smov (!%p163_p2), 124   ;;  %s1429_s30 = smov (!%p163_p2), 32  }
   0xb   : > { %s2061_s16 = smov (!%p188_p3, %s1143_s16), 3  ;;  %s1430_s5 = smov 30   ;;  %vm223_vm0 = vcmask 1039360   ;;  %vm239_vm1 = vcmask 1031168   ;;  %vm255_vm2 = vcmask 850944   ;;  %vm271_vm3 = vcmask 842752  }
   0xc   : > { %s1161_s17 = smul.u32 20, %s2061_s16  ;;  %s1431_s6 = smov 28   ;;  %vm287_vm4 = vcmask 834560   ;;  %vm307_vm5 = vcmask 654336   ;;  %vm323_vm6 = vcmask 646144   ;;  %vm339_vm7 = vcmask 637952  }
   0xd   : > { %s1432_s7 = smov 76   ;;  %s1433_s8 = smov 56   ;;  %vm526_vm8 = vcmask 1014784   ;;  %vm620_vm9 = vcmask 228352   ;;  %vm588_vm10 = vcmask 261120   ;;  %vm604_vm11 = vcmask 244736  }
   0xe   : > { %s192_s20 = scalar_lea.vmem %s2055_s0, %s1161_s17  ;;  %s1434_s9 = smov 33   ;;  %vm572_vm12 = vcmask 621568   ;;  %vm899_vm13 = vcmask 457728   ;;  %vm460_vm14 = vcmask 1043456   ;;  %vm428_vm15 = vcmask 269312  }
   0xf   : > { %v199_v0 = vld [vmem:[%s192_s20] sm:$0xff]  ;;  %v200_v3 = vld [vmem:[%s192_s20 + $0x8] sm:$0xff]  ;;  %s1435_s10 = smov 64   ;;  %s1436_s11 = smov 60  }
  0x10   : > { %v1480_v1 = vunpack.c.l.bf16 %v199_v0  ;;  %v1482_v2 = vunpack.c.h.bf16 %v199_v0  ;;  %v1490_v5 = vunpack.c.l.bf16 %v200_v3  ;;  %v1492_v6 = vunpack.c.h.bf16 %v200_v3  ;;  %v205_v8 = vld [vmem:[%s192_s20 + $0x4] sm:$0xff]  ;;  %v206_v9 = vld [vmem:[%s192_s20 + $0xc] sm:$0xff]  ;;  %s1437_s12 = smov 24   ;;  %s1438_s13 = smov 120  }
  0x11   : > { %v207_v10 = vunpack.c.l.bf16 %v205_v8  ;;  %v208_v11 = vunpack.c.h.bf16 %v205_v8  ;;  %v209_v12 = vunpack.c.l.bf16 %v206_v9  ;;  %v210_v13 = vunpack.c.h.bf16 %v206_v9  ;;  %s1439_s14 = smov 58   ;;  %s1440_s17 = smov 108  }
  0x12   : > { %v1486_v4 = vpack.i.bf16 %v1482_v2, %v1480_v1  ;;  %v1497_v7 = vpack.i.bf16 %v1492_v6, %v1490_v5 }
  0x13   : > { %v1505_v14 = vpack.i.bf16 %v208_v11, %v207_v10  ;;  %v1507_v15 = vpack.i.bf16 %v210_v13, %v209_v12 }
  0x14   : > { %1203 = vrot.lane.b32.xlu1 %v1486_v4, %s1420_s21  ;;  %1193 = vrot.lane.b32.xlu0 %v1486_v4, %s1421_s22 }
  0x15   : > { %1213 = vrot.lane.b32.xlu2 %v1486_v4, %s1422_s23 }
  0x1c   : > { %1208 = vrot.lane.b32.xlu1 %v1497_v7, %s1420_s21  ;;  %1198 = vrot.lane.b32.xlu0 %v1497_v7, %s1421_s22 }
  0x1d   : > { %1218 = vrot.lane.b32.xlu2 %v1497_v7, %s1422_s23 }
  0x24   : > { %1228 = vrot.lane.b32.xlu1 %v1497_v7, %s1423_s24  ;;  %1223 = vrot.lane.b32.xlu0 %v1486_v4, %s1423_s24  ;;  %s1162_s24 = smul.u32 36, %s2061_s16 }
  0x25   : > { %1233 = vrot.lane.b32.xlu2 %v1486_v4, %s1424_s25 }
  0x2c   : > { %1243 = vrot.lane.b32.xlu1 %v1505_v14, %s1425_s26  ;;  %1238 = vrot.lane.b32.xlu0 %v1497_v7, %s1424_s25 }
  0x2d   : > { %1248 = vrot.lane.b32.xlu2 %v1507_v15, %s1425_s26 }
  0x34   : > { %1258 = vrot.lane.b32.xlu1 %v1507_v15, %s1426_s27  ;;  %1253 = vrot.lane.b32.xlu0 %v1505_v14, %s1426_s27  ;;  %s2044_s27 = scalar_lea.vmem %s2059_s4, %s1162_s24 }
  0x35   : > { %1263 = vrot.lane.b32.xlu2 %v1505_v14, %s1427_s28 }
  0x3c   : > { %1268 = vrot.lane.b32.xlu0 %v1507_v15, %s1427_s28  ;;  %1278 = vrot.lane.b32.xlu1 %v1497_v7, %s1428_s29 }
  0x3d   : > { %1283 = vrot.lane.b32.xlu2 %v1486_v4, %s1425_s26 }
  0x44   : > { %1273 = vrot.lane.b32.xlu0 %v1486_v4, %s1428_s29  ;;  %1293 = vrot.lane.b32.xlu1 %v1486_v4, %s1427_s28 }
  0x45   : > { %1298 = vrot.lane.b32.xlu2 %v1497_v7, %s1427_s28 }
  0x4c   : > { %1288 = vrot.lane.b32.xlu0 %v1497_v7, %s1425_s26  ;;  %1308 = vrot.lane.b32.xlu1 %v1505_v14, %s1429_s30 }
  0x4d   : > { %1313 = vrot.lane.b32.xlu2 %v1505_v14, %s1430_s5 }
  0x54   : > { %1303 = vrot.lane.b32.xlu0 %v1505_v14, %s1431_s6  ;;  %1323 = vrot.lane.b32.xlu1 %v1486_v4, %s1432_s7 }
  0x55   : > { %1328 = vrot.lane.b32.xlu2 %v1497_v7, %s1432_s7 }
  0x5c   : > { %1318 = vrot.lane.b32.xlu0 %v1507_v15, %s1431_s6  ;;  %1338 = vrot.lane.b32.xlu1 %v1507_v15, %s1430_s5 }
  0x5d   : > { %1343 = vrot.lane.b32.xlu2 %v1505_v14, %s1433_s8 }
  0x64   : > { %1333 = vrot.lane.b32.xlu0 %v1507_v15, %s1429_s30 }
  0x6f   : > { %v1536_v16 = vpop.permute.xlu2 %1213 }
  0x70   : > { %v1216_v42 = vunpack.i.h.bf16 %v1536_v16  ;;  %v1215_v43 = vunpack.i.l.bf16 %v1536_v16 }
  0x72   : > { %v256_v53 = vsel %vm255_vm2, %v1215_v43, %v1216_v42 }
  0x77   : > { %v1538_v17 = vpop.permute.xlu2 %1218 }
  0x78   : > { %v1221_v22 = vunpack.i.h.bf16 %v1538_v17  ;;  %v1220_v56 = vunpack.i.l.bf16 %v1538_v17 }
  0x7a   : > { %v257_v0 = vsel %vm255_vm2, %v1216_v42, %v1220_v56 }
  0x7f   : > { %v1540_v18 = vpop.permute.xlu2 %1233 }
  0x80   : > { %v1236_v11 = vunpack.i.h.bf16 %v1540_v18  ;;  %v1235_v16 = vunpack.i.l.bf16 %v1540_v18 }
  0x86   : > { %v1204_v19 = vpop.permute.xlu1 %1203  ;;  %v1194_v20 = vpop.permute.xlu0 %1193 }
  0x87   : > { %v1542_v21 = vpop.permute.xlu2 %1248  ;;  %v1196_v35 = vunpack.i.h.bf16 %v1194_v20  ;;  %v1206_v44 = vunpack.i.h.bf16 %v1204_v19  ;;  %v1205_v45 = vunpack.i.l.bf16 %v1204_v19  ;;  %v1195_v57 = vunpack.i.l.bf16 %v1194_v20 }
  0x89   : > { %v1588_v52 = vsel %vm239_vm1, %v1205_v45, %v1206_v44  ;;  %v224_v3 = vsel %vm223_vm0, %v1195_v57, %v1196_v35 }
  0x8a   : > { %v352_v59 = vpack.c.bf16 %v256_v53, %v1588_v52  ;;  %v348_v13 = vpack.c.bf16 %v224_v3, %v1480_v1 }
  0x8e   : > { %v1545_v23 = vpop.permute.xlu1 %1208  ;;  %v1199_v24 = vpop.permute.xlu0 %1198 }
  0x8f   : > { %v1548_v25 = vunpack.i.h.bf16 %v1545_v23  ;;  %v1201_v26 = vunpack.i.h.bf16 %v1199_v24  ;;  %v1550_v27 = vpop.permute.xlu2 %1263  ;;  %v1200_v33 = vunpack.i.l.bf16 %v1199_v24  ;;  %v1210_v58 = vunpack.i.l.bf16 %v1545_v23 }
  0x90   : > { %v1559_v30 = vunpack.i.l.bf16 %v1550_v27 }
  0x91   : > { %v351_v28 = vpack.c.bf16 %v1201_v26, %v1492_v6  ;;  %v355_v29 = vpack.c.bf16 %v1221_v22, %v1548_v25  ;;  %v225_v38 = vsel %vm223_vm0, %v1196_v35, %v1200_v33  ;;  %v226_v50 = vsel %vm223_vm0, %v1200_v33, %v1201_v26 }
  0x92   : > { %v364_v32 = vpack.c.bf16 %v1559_v30, %v1559_v30  ;;  %v349_v41 = vpack.c.bf16 %v225_v38, %v1482_v2  ;;  %v350_v55 = vpack.c.bf16 %v226_v50, %v1490_v5  ;;  %v1603_v63 = vsel %vm239_vm1, %v1206_v44, %v1210_v58 }
  0x93   : > { %402 = vrot.lane.b32.xlu2 %v355_v29, %s1434_s9  ;;  %394 = vrot.lane.b32.xlu1 %v351_v28, %s1434_s9  ;;  %v353_v12 = vpack.c.bf16 %v257_v0, %v1603_v63  ;;  %v258_v33 = vsel %vm255_vm2, %v1220_v56, %v1221_v22  ;;  %v1266_v56 = vunpack.i.h.bf16 %v1550_v27  ;;  %vm709_vm0 = vcmask 474112  }
  0x94   : > { %vm883_vm2 = vcmask 490496  }
  0x95   : > { %v340_v27 = vsel %vm339_vm7, %v1559_v30, %v1266_v56 }
  0x96   : > { %v1561_v31 = vpop.permute.xlu0 %1223  ;;  %v1565_v34 = vpop.permute.xlu1 %1228 }
  0x97   : > { %v1231_v36 = vunpack.i.h.bf16 %v1565_v34  ;;  %v1580_v47 = vpop.permute.xlu2 %1283  ;;  %v1230_v62 = vunpack.i.l.bf16 %v1565_v34  ;;  %v1226_v19 = vunpack.i.h.bf16 %v1561_v31  ;;  %v1225_v20 = vunpack.i.l.bf16 %v1561_v31 }
  0x98   : > { %v288_v31 = vsel %vm287_vm4, %v1235_v16, %v1236_v11 }
  0x99   : > { %v274_v9 = vsel %vm271_vm3, %v1230_v62, %v1231_v36  ;;  %v272_v18 = vsel %vm271_vm3, %v1225_v20, %v1226_v19 }
  0x9b   : > { %420 = vrot.lane.b32.xlu2 %v364_v32, %s1434_s9  ;;  %v1628_v32 = vsel %vm239_vm1, %v1210_v58, %v1548_v25  ;;  %v273_v58 = vsel %vm271_vm3, %v1226_v19, %v1230_v62  ;;  %vm867_vm1 = vcmask 523264   ;;  %vm851_vm3 = vcmask 195584  }
  0x9c   : > { %v354_v38 = vpack.c.bf16 %v258_v33, %v1628_v32 }
  0x9e   : > { %v1569_v37 = vpop.permute.xlu0 %1238  ;;  %v1578_v46 = vpop.permute.xlu1 %1243 }
  0x9f   : > { %v1241_v39 = vunpack.i.h.bf16 %v1569_v37  ;;  %v1245_v48 = vunpack.i.l.bf16 %v1578_v46  ;;  %v1240_v60 = vunpack.i.l.bf16 %v1569_v37  ;;  %v1599_v61 = vpop.permute.xlu2 %1298  ;;  %v1246_v24 = vunpack.i.h.bf16 %v1578_v46 }
  0xa0   : > { %v356_v37 = vpack.c.bf16 %v288_v31, %v272_v18  ;;  %v1301_v17 = vunpack.i.h.bf16 %v1599_v61 }
  0xa1   : > { %v359_v40 = vpack.c.bf16 %v1241_v39, %v1231_v36  ;;  %v290_v10 = vsel %vm287_vm4, %v1240_v60, %v1241_v39  ;;  %v308_v35 = vsel %vm307_vm5, %v1245_v48, %v1246_v24 }
  0xa2   : > { %v358_v23 = vpack.c.bf16 %v290_v10, %v274_v9  ;;  %v365_v10 = vpack.c.bf16 %v340_v27, %v340_v27 }
  0xa3   : > { %410 = vrot.lane.b32.xlu0 %v359_v40, %s1434_s9  ;;  %390 = vrot.lane.b32.xlu2 %v349_v41, %s1434_s9  ;;  %v1250_v41 = vunpack.i.l.bf16 %v1542_v21 }
  0xa6   : > { %v1583_v49 = vpop.permute.xlu0 %1253  ;;  %v1259_v28 = vpop.permute.xlu1 %1258 }
  0xa7   : > { %v1255_v51 = vunpack.i.l.bf16 %v1583_v49  ;;  %v1256_v26 = vunpack.i.h.bf16 %v1583_v49  ;;  %v1622_v29 = vpop.permute.xlu2 %1313  ;;  %v1260_v42 = vunpack.i.l.bf16 %v1259_v28  ;;  %v309_v49 = vsel %vm307_vm5, %v1246_v24, %v1250_v41 }
  0xa9   : > { %v360_v54 = vpack.c.bf16 %v1255_v51, %v1245_v48  ;;  %v324_v36 = vsel %vm323_vm6, %v1255_v51, %v1256_v26  ;;  %v325_v50 = vsel %vm323_vm6, %v1256_v26, %v1260_v42  ;;  %v289_v51 = vsel %vm287_vm4, %v1236_v11, %v1240_v60 }
  0xaa   : > { %v361_v43 = vpack.c.bf16 %v324_v36, %v308_v35  ;;  %v357_v0 = vpack.c.bf16 %v289_v51, %v273_v58  ;;  %v1251_v60 = vunpack.i.h.bf16 %v1542_v21  ;;  %vm805_vm4 = vcmask 982016  }
  0xab   : > { %412 = vrot.lane.b32.xlu1 %v360_v54, %s1434_s9  ;;  %392 = vrot.lane.b32.xlu0 %v350_v55, %s1434_s9 }
  0xac   : > { %396 = vrot.lane.b32.xlu2 %v352_v59, %s1434_s9  ;;  %v362_v59 = vpack.c.bf16 %v325_v50, %v309_v49  ;;  %v310_v9 = vsel %vm307_vm5, %v1250_v41, %v1251_v60 }
  0xae   : > { %v1607_v8 = vpop.permute.xlu0 %1268  ;;  %v1645_v22 = vpop.permute.xlu1 %1278 }
  0xaf   : > { %v1271_v39 = vunpack.i.h.bf16 %v1607_v8  ;;  %v1270_v40 = vunpack.i.l.bf16 %v1607_v8  ;;  %v1647_v44 = vpop.permute.xlu2 %1328  ;;  %v1651_v46 = vunpack.i.h.bf16 %v1645_v22  ;;  %v1261_v8 = vunpack.i.h.bf16 %v1259_v28 }
  0xb0   : > { %v1331_v48 = vunpack.i.h.bf16 %v1647_v44 }
  0xb1   : > { %v342_v45 = vsel %vm339_vm7, %v1270_v40, %v1271_v39  ;;  %v326_v62 = vsel %vm323_vm6, %v1260_v42, %v1261_v8  ;;  %v341_v21 = vsel %vm339_vm7, %v1266_v56, %v1270_v40  ;;  %vm988_vm6 = vcmask 883712  }
  0xb2   : > { %v1663_v54 = vpack.c.bf16 %v1331_v48, %v1301_v17  ;;  %v367_v57 = vpack.c.bf16 %v342_v45, %v342_v45  ;;  %v363_v11 = vpack.c.bf16 %v326_v62, %v310_v9  ;;  %v366_v16 = vpack.c.bf16 %v341_v21, %v341_v21 }
  0xb3   : > { %398 = vrot.lane.b32.xlu0 %v353_v12, %s1434_s9  ;;  %388 = vrot.lane.b32.xlu1 %v348_v13, %s1434_s9  ;;  %v1280_v13 = vunpack.i.l.bf16 %v1645_v22 }
  0xb4   : > { %408 = vrot.lane.b32.xlu2 %v358_v23, %s1434_s9 }
  0xb5   : > { %v1694_v19 = vsel %vm526_vm8, %v1280_v13, %v1651_v46 }
  0xb6   : > { %v1633_v34 = vpop.permute.xlu0 %1273  ;;  %v1683_v12 = vpop.permute.xlu1 %1293 }
  0xb7   : > { %v1715_v35 = vpop.permute.xlu2 %1343 }
  0xbb   : > { %404 = vrot.lane.b32.xlu0 %v356_v37, %s1434_s9  ;;  %400 = vrot.lane.b32.xlu1 %v354_v38, %s1434_s9 }
  0xbc   : > { %414 = vrot.lane.b32.xlu2 %v361_v43, %s1434_s9 }
  0xbe   : > { %v1657_v53 = vpop.permute.xlu0 %1288  ;;  %v1705_v24 = vpop.permute.xlu1 %1308 }
  0xbf   : > { %v1291_v55 = vunpack.i.h.bf16 %v1657_v53  ;;  %v1290_v30 = vunpack.i.l.bf16 %v1657_v53 }
  0xc1   : > { %v1669_v3 = vpack.c.bf16 %v1291_v55, %v1651_v46  ;;  %v1699_v20 = vsel %vm307_vm5, %v1290_v30, %v1291_v55  ;;  %v1316_v55 = vunpack.i.h.bf16 %v1622_v29 }
  0xc2   : > { %v635_v23 = vpack.c.bf16 %v1699_v20, %v1694_v19 }
  0xc3   : > { %416 = vrot.lane.b32.xlu0 %v362_v59, %s1434_s9  ;;  %406 = vrot.lane.b32.xlu1 %v357_v0, %s1434_s9  ;;  %v1315_v59 = vunpack.i.l.bf16 %v1622_v29  ;;  %v1310_v0 = vunpack.i.l.bf16 %v1705_v24  ;;  %v1296_v29 = vunpack.i.h.bf16 %v1683_v12 }
  0xc4   : > { %426 = vrot.lane.b32.xlu2 %v367_v57, %s1434_s9 }
  0xc5   : > { %v641_v9 = vpack.c.bf16 %v1315_v59, %v1310_v0 }
  0xc6   : > { %v1304_v26 = vpop.permute.xlu0 %1303  ;;  %v1710_v31 = vpop.permute.xlu1 %1323 }
  0xc7   : > { %v1306_v28 = vunpack.i.h.bf16 %v1304_v26  ;;  %v1305_v18 = vunpack.i.l.bf16 %v1304_v26  ;;  %v1326_v21 = vunpack.i.h.bf16 %v1710_v31 }
  0xc9   : > { %v645_v62 = vpack.c.bf16 %v1305_v18, %v1305_v18 }
  0xcb   : > { %422 = vrot.lane.b32.xlu0 %v365_v10, %s1434_s9  ;;  %418 = vrot.lane.b32.xlu1 %v363_v11, %s1434_s9  ;;  %v1295_v11 = vunpack.i.l.bf16 %v1683_v12 }
  0xcc   : > { %1358 = vrot.lane.b32.xlu2 %v1507_v15, %s1435_s10 }
  0xce   : > { %v1319_v33 = vpop.permute.xlu0 %1318 }
  0xcf   : > { %v1321_v36 = vunpack.i.h.bf16 %v1319_v33  ;;  %v1320_v37 = vunpack.i.l.bf16 %v1319_v33  ;;  %v557_v33 = vsel %vm339_vm7, %v1295_v11, %v1296_v29 }
  0xd1   : > { %v1721_v39 = vsel %vm620_vm9, %v1320_v37, %v1321_v36  ;;  %v622_v42 = vsel %vm620_vm9, %v1306_v28, %v1320_v37 }
  0xd2   : > { %v647_v51 = vpack.c.bf16 %v622_v42, %v622_v42  ;;  %v1276_v42 = vunpack.i.h.bf16 %v1633_v34 }
  0xd3   : > { %1348 = vrot.lane.b32.xlu0 %v1507_v15, %s1433_s8  ;;  %424 = vrot.lane.b32.xlu1 %v366_v16, %s1434_s9  ;;  %v1325_v16 = vunpack.i.l.bf16 %v1710_v31 }
  0xd4   : > { %1373 = vrot.lane.b32.xlu2 %v1486_v4, %s1431_s6 }
  0xd6   : > { %v1334_v40 = vpop.permute.xlu0 %1333 }
  0xd7   : > { %v1336_v45 = vunpack.i.h.bf16 %v1334_v40  ;;  %v1335_v50 = vunpack.i.l.bf16 %v1334_v40  ;;  %v1285_v40 = vunpack.i.l.bf16 %v1580_v47 }
  0xd9   : > { %v1732_v56 = vsel %vm588_vm10, %v1335_v50, %v1336_v45  ;;  %v1346_v45 = vunpack.i.h.bf16 %v1715_v35 }
  0xdb   : > { %1363 = vrot.lane.b32.xlu0 %v1505_v14, %s1436_s11  ;;  %1353 = vrot.lane.b32.xlu1 %v1505_v14, %s1435_s10  ;;  %v621_v14 = vsel %vm620_vm9, %v1305_v18, %v1306_v28  ;;  %v605_v28 = vsel %vm604_vm11, %v1315_v59, %v1316_v55 }
  0xdc   : > { %1388 = vrot.lane.b32.xlu2 %v1497_v7, %s1437_s12  ;;  %v646_v38 = vpack.c.bf16 %v621_v14, %v621_v14  ;;  %v573_v14 = vsel %vm572_vm12, %v1325_v16, %v1326_v21 }
  0xe3   : > { %1378 = vrot.lane.b32.xlu0 %v1497_v7, %s1431_s6  ;;  %1368 = vrot.lane.b32.xlu1 %v1507_v15, %s1436_s11  ;;  %v1339_v15 = vpop.permute.xlu1 %1338 }
  0xe4   : > { %1403 = vrot.lane.b32.xlu2 %v1486_v4, %s1429_s30  ;;  %v1341_v43 = vunpack.i.h.bf16 %v1339_v15  ;;  %v1340_v49 = vunpack.i.l.bf16 %v1339_v15  ;;  %v1286_v15 = vunpack.i.h.bf16 %v1580_v47 }
  0xe6   : > { %v1735_v57 = vsel %vm604_vm11, %v1340_v49, %v1341_v43  ;;  %v606_v27 = vsel %vm604_vm11, %v1316_v55, %v1340_v49 }
  0xe7   : > { %v644_v58 = vpack.c.bf16 %v1735_v57, %v1732_v56 }
  0xeb   : > { %1393 = vrot.lane.b32.xlu0 %v1486_v4, %s1438_s13  ;;  %1383 = vrot.lane.b32.xlu1 %v1486_v4, %s1437_s12  ;;  %v1311_v4 = vunpack.i.h.bf16 %v1705_v24  ;;  %v1330_v24 = vunpack.i.l.bf16 %v1647_v44 }
  0xec   : > { %703 = vrot.lane.b32.xlu2 %v646_v38, %s1439_s14  ;;  %v637_v38 = vpack.c.bf16 %v573_v14, %v557_v33 }
  0xed   : > { %v1726_v41 = vpop.permute.xlu2 %402  ;;  %v590_v8 = vsel %vm588_vm10, %v1311_v4, %v1335_v50  ;;  %v589_v26 = vsel %vm588_vm10, %v1310_v0, %v1311_v4  ;;  %v575_v31 = vsel %vm572_vm12, %v1330_v24, %v1331_v48  ;;  %v542_v48 = vsel %vm307_vm5, %v1285_v40, %v1286_v15 }
  0xee   : > { %v643_v10 = vpack.c.bf16 %v606_v27, %v590_v8  ;;  %v642_v36 = vpack.c.bf16 %v605_v28, %v589_v26  ;;  %v574_v47 = vsel %vm572_vm12, %v1326_v21, %v1330_v24  ;;  %v1796_v4 = vsel %vm526_vm8, %v1276_v42, %v1280_v13 }
  0xef   : > { %v629_v13 = vpack.c.bf16 %v1588_v52, %v1480_v1 }
  0xf3   : > { %1408 = vrot.lane.b32.xlu0 %v1497_v7, %s1429_s30  ;;  %1398 = vrot.lane.b32.xlu1 %v1497_v7, %s1438_s13  ;;  %v1300_v7 = vunpack.i.l.bf16 %v1599_v61  ;;  %v1275_v61 = vunpack.i.l.bf16 %v1633_v34  ;;  %v1345_v34 = vunpack.i.l.bf16 %v1715_v35  ;;  %v543_v35 = vsel %vm307_vm5, %v1286_v15, %v1290_v30 }
  0xf4   : > { %705 = vrot.lane.b32.xlu2 %v647_v51, %s1439_s14  ;;  %v634_v0 = vpack.c.bf16 %v543_v35, %v1796_v4  ;;  %vm456_vm5 = vcmask 588800  }
  0xf5   : > { %v1745_v60 = vpop.permute.xlu2 %420  ;;  %v559_v18 = vsel %vm339_vm7, %v1300_v7, %v1301_v17  ;;  %v1780_v44 = vsel %vm526_vm8, %v1275_v61, %v1276_v42  ;;  %v558_v43 = vsel %vm339_vm7, %v1296_v29, %v1300_v7  ;;  %v900_v51 = vsel %vm899_vm13, %v1345_v34, %v1346_v45 }
  0xf6   : > { %v639_v37 = vpack.c.bf16 %v575_v31, %v559_v18  ;;  %v633_v49 = vpack.c.bf16 %v542_v48, %v1780_v44  ;;  %v638_v50 = vpack.c.bf16 %v574_v47, %v558_v43  ;;  %v924_v59 = vpack.c.bf16 %v900_v51, %v900_v51 }
  0xfb   : > { %693 = vrot.lane.b32.xlu0 %v641_v9, %s1439_s14  ;;  %701 = vrot.lane.b32.xlu1 %v645_v62, %s1439_s14 }
  0xfc   : > { %697 = vrot.lane.b32.xlu2 %v643_v10, %s1439_s14 }
  0xfd   : > { %v1760_v12 = vpop.permute.xlu2 %390 }
 0x103   : > { %685 = vrot.lane.b32.xlu0 %v637_v38, %s1439_s14  ;;  %695 = vrot.lane.b32.xlu1 %v642_v36, %s1439_s14 }
 0x104   : > { %689 = vrot.lane.b32.xlu2 %v639_v37, %s1439_s14 }
 0x105   : > { %v1804_v8 = vpop.permute.xlu1 %394 }
 0x106   : > { %v1777_v17 = vpop.permute.xlu2 %396 }
 0x10b   : > { %677 = vrot.lane.b32.xlu0 %v633_v49, %s1439_s14  ;;  %687 = vrot.lane.b32.xlu1 %v638_v50, %s1439_s14 }
 0x10e   : > { %v1791_v55 = vpop.permute.xlu2 %408 }
 0x113   : > { %980 = vrot.lane.b32.xlu0 %v924_v59, %s1440_s17  ;;  %679 = vrot.lane.b32.xlu1 %v634_v0, %s1439_s14 }
 0x115   : > { %v1806_v27 = vpop.permute.xlu0 %410 }
 0x116   : > { %v415_v22 = vpop.permute.xlu2 %414 }
 0x11b   : > { %669 = vrot.lane.b32.xlu0 %v629_v13, %s1439_s14 }
 0x11d   : > { %v413_v53 = vpop.permute.xlu1 %412  ;;  %v1811_v30 = vpop.permute.xlu0 %392 }
 0x11e   : > { %v427_v9 = vpop.permute.xlu2 %426  ;;  %v438_v14 = vsel %vm428_vm15, %v413_v53, %v415_v22 }
 0x125   : > { %v1813_v62 = vpop.permute.xlu0 %398  ;;  %v389_v10 = vpop.permute.xlu1 %388 }
 0x126   : > { %v1815_v29 = vpop.permute.xlu2 %1358  ;;  %v432_v51 = vsel %vm428_vm15, %v1777_v17, %v1813_v62  ;;  %v429_v17 = vsel %vm428_vm15, %v389_v10, %v1760_v12  ;;  %v630_v10 = vpack.c.bf16 %v1603_v63, %v1482_v2 }
 0x12d   : > { %v405_v11 = vpop.permute.xlu0 %404  ;;  %v1817_v21 = vpop.permute.xlu1 %400 }
 0x12e   : > { %v1819_v16 = vpop.permute.xlu2 %1373  ;;  %v434_v63 = vsel %vm428_vm15, %v1817_v21, %v1726_v41  ;;  %v431_v41 = vsel %vm428_vm15, %v1811_v30, %v1804_v8 }
 0x135   : > { %v417_v7 = vpop.permute.xlu0 %416  ;;  %v407_v24 = vpop.permute.xlu1 %406 }
 0x136   : > { %v1821_v26 = vpop.permute.xlu2 %1388  ;;  %v435_v48 = vsel %vm428_vm15, %v405_v11, %v407_v24  ;;  %v439_v35 = vsel %vm428_vm15, %v415_v22, %v417_v7  ;;  %v436_v22 = vsel %vm428_vm15, %v407_v24, %v1791_v55 }
 0x13d   : > { %v423_v52 = vpop.permute.xlu0 %422  ;;  %v419_v28 = vpop.permute.xlu1 %418 }
 0x13e   : > { %v1823_v18 = vpop.permute.xlu2 %1403  ;;  %v441_v31 = vsel %vm428_vm15, %v1745_v60, %v423_v52  ;;  %v440_v59 = vsel %vm428_vm15, %v417_v7, %v419_v28  ;;  %v437_v28 = vsel %vm428_vm15, %v1791_v55, %v1806_v27  ;;  %v433_v55 = vsel %vm428_vm15, %v1813_v62, %v1817_v21 }
 0x13f   : > { %v462_v33 = vsel %vm460_vm14, %v441_v31, 0  ;;  %v1360_v27 = vunpack.i.l.bf16 %v1815_v29 }
 0x140   : > { %473 = vmatpush.bf16.msra.mxu0 %v462_v33 }
 0x144   : > { %474 = vmatpush.bf16.msra.mxu0 %v438_v14 }
 0x145   : > { %v1349_v36 = vpop.permute.xlu0 %1348  ;;  %v425_v37 = vpop.permute.xlu1 %424 }
 0x146   : > { %v1829_v38 = vunpack.i.h.bf16 %v1349_v36  ;;  %v1350_v15 = vunpack.i.l.bf16 %v1349_v36  ;;  %v1831_v40 = vpop.permute.xlu2 %703  ;;  %v442_v42 = vsel %vm428_vm15, %v423_v52, %v425_v37  ;;  %v443_v61 = vsel %vm428_vm15, %v425_v37, %v427_v9 }
 0x147   : > { %v465_v60 = vsel %vm460_vm14, %v442_v42, 0  ;;  %v468_v43 = vsel %vm460_vm14, %v443_v61, 0  ;;  %v1361_v36 = vunpack.i.h.bf16 %v1815_v29  ;;  %v430_v42 = vsel %vm428_vm15, %v1760_v12, %v1811_v30 }
 0x148   : > { %475 = vmatpush.bf16.msra.mxu0 %v435_v48  ;;  %486 = vmatpush.bf16.msra.mxu1 %v465_v60  ;;  %v902_v47 = vsel %vm899_vm13, %v1350_v15, %v1829_v38  ;;  %v901_v34 = vsel %vm899_vm13, %v1346_v45, %v1350_v15  ;;  %v1375_v12 = vunpack.i.l.bf16 %v1819_v16 }
 0x149   : > { %499 = vmatpush.bf16.msra.mxu2 %v468_v43  ;;  %v926_v49 = vpack.c.bf16 %v902_v47, %v902_v47  ;;  %v925_v50 = vpack.c.bf16 %v901_v34, %v901_v34  ;;  %v870_v62 = vsel %vm867_vm1, %v1360_v27, %v1361_v36  ;;  %v1376_v47 = vunpack.i.h.bf16 %v1819_v16 }
 0x14a   : > { %v648_v34 = vpack.c.bf16 %v1721_v39, %v1721_v39  ;;  %v927_v39 = vpack.c.bf16 %v1829_v38, %v1829_v38 }
 0x14b   : > { %984 = vrot.lane.b32.xlu2 %v926_v49, %s1440_s17  ;;  %982 = vrot.lane.b32.xlu1 %v925_v50, %s1440_s17 }
 0x14c   : > { %476 = vmatpush.bf16.msra.mxu0 %v432_v51  ;;  %487 = vmatpush.bf16.msra.mxu1 %v439_v35  ;;  %v836_v51 = vsel %vm620_vm9, %v1375_v12, %v1376_v47  ;;  %v1391_v35 = vunpack.i.h.bf16 %v1821_v26 }
 0x14d   : > { %500 = vmatpush.bf16.msra.mxu2 %v440_v59  ;;  %v1364_v45 = vpop.permute.xlu0 %1363  ;;  %v1354_v0 = vpop.permute.xlu1 %1353 }
 0x14e   : > { %v1366_v13 = vunpack.i.h.bf16 %v1364_v45  ;;  %v1365_v53 = vunpack.i.l.bf16 %v1364_v45  ;;  %v1848_v9 = vpop.permute.xlu2 %705  ;;  %v1356_v11 = vunpack.i.h.bf16 %v1354_v0  ;;  %v1355_v52 = vunpack.i.l.bf16 %v1354_v0 }
 0x14f   : > { %v723_v7 = vsel %vm709_vm0, %v1831_v40, %v1848_v9  ;;  %v631_v45 = vpack.c.bf16 %v1628_v32, %v1490_v5 }
 0x150   : > { %477 = vmatpush.bf16.msra.mxu0 %v429_v17  ;;  %488 = vmatpush.bf16.msra.mxu1 %v436_v22  ;;  %v868_v31 = vsel %vm867_vm1, %v1355_v52, %v1356_v11  ;;  %v884_v33 = vsel %vm883_vm2, %v1365_v53, %v1366_v13  ;;  %v744_v14 = vsel %vm460_vm14, %v723_v7, 0  ;;  %v869_v61 = vsel %vm867_vm1, %v1356_v11, %v1360_v27 }
 0x151   : > { %501 = vmatpush.bf16.msra.mxu2 %v437_v28  ;;  %v920_v24 = vpack.c.bf16 %v884_v33, %v868_v31  ;;  %v1406_v7 = vunpack.i.h.bf16 %v1823_v18  ;;  %v1405_v28 = vunpack.i.l.bf16 %v1823_v18 }
 0x153   : > { %681 = vrot.lane.b32.xlu2 %v635_v23, %s1439_s14  ;;  %671 = vrot.lane.b32.xlu1 %v630_v10, %s1439_s14  ;;  %v821_v18 = vsel %vm588_vm10, %v1405_v28, %v1406_v7 }
 0x154   : > { %765 = vmatpush.bf16.msrb.mxu0 %v744_v14  ;;  %972 = vrot.lane.b32.xlu0 %v920_v24, %s1440_s17 }
 0x155   : > { %489 = vmatpush.bf16.msra.mxu1 %v433_v55  ;;  %502 = vmatpush.bf16.msra.mxu2 %v434_v63  ;;  %v1879_v37 = vpop.permute.xlu0 %1378  ;;  %v1881_v20 = vpop.permute.xlu1 %1368 }
 0x156   : > { %v1371_v23 = vunpack.i.h.bf16 %v1881_v20  ;;  %v1370_v15 = vunpack.i.l.bf16 %v1881_v20  ;;  %v1381_v16 = vunpack.i.h.bf16 %v1879_v37  ;;  %v1380_v53 = vunpack.i.l.bf16 %v1879_v37 }
 0x158   : > { %v886_v21 = vsel %vm883_vm2, %v1370_v15, %v1371_v23  ;;  %v885_v48 = vsel %vm883_vm2, %v1366_v13, %v1370_v15  ;;  %v1390_v13 = vunpack.i.l.bf16 %v1821_v26  ;;  %v838_v11 = vsel %vm620_vm9, %v1380_v53, %v1381_v16 }
 0x159   : > { %490 = vmatpush.bf16.msra.mxu1 %v430_v42  ;;  %503 = vmatpush.bf16.msra.mxu2 %v431_v41  ;;  %v922_v60 = vpack.c.bf16 %v886_v21, %v870_v62  ;;  %v921_v43 = vpack.c.bf16 %v885_v48, %v869_v61  ;;  %v837_v38 = vsel %vm620_vm9, %v1376_v47, %v1380_v53  ;;  %v1946_v61 = vpop.permute.xlu2 %697 }
 0x15a   : > { %v854_v52 = vsel %vm851_vm3, %v1390_v13, %v1391_v35  ;;  %v923_v57 = vpack.c.bf16 %v1371_v23, %v1361_v36  ;;  %v919_v20 = vpack.c.bf16 %v1391_v35, %v1381_v16 }
 0x15b   : > { %976 = vrot.lane.b32.xlu2 %v922_v60, %s1440_s17  ;;  %974 = vrot.lane.b32.xlu1 %v921_v43, %s1440_s17  ;;  %v918_v26 = vpack.c.bf16 %v854_v52, %v838_v11 }
 0x15c   : > { %707 = vrot.lane.b32.xlu0 %v648_v34, %s1439_s14 }
 0x15d   : > { %v1394_v8 = vpop.permute.xlu0 %1393  ;;  %v1384_v30 = vpop.permute.xlu1 %1383 }
 0x15e   : > { %v1386_v49 = vunpack.i.h.bf16 %v1384_v30  ;;  %v1385_v50 = vunpack.i.l.bf16 %v1384_v30  ;;  %v1396_v31 = vunpack.i.h.bf16 %v1394_v8  ;;  %v1395_v33 = vunpack.i.l.bf16 %v1394_v8 }
 0x15f   : > { %v909_v30 = vpack.c.bf16 %v1796_v4, %v1482_v2  ;;  %v632_v2 = vpack.c.bf16 %v1548_v25, %v1492_v6 }
 0x160   : > { %v852_v59 = vsel %vm851_vm3, %v1385_v50, %v1386_v49  ;;  %v853_v32 = vsel %vm851_vm3, %v1386_v49, %v1390_v13  ;;  %v806_v55 = vsel %vm805_vm4, %v1395_v33, %v1396_v31  ;;  %v910_v49 = vpack.c.bf16 %v1694_v19, %v1490_v5 }
 0x161   : > { %v916_v0 = vpack.c.bf16 %v852_v59, %v836_v51  ;;  %v917_v24 = vpack.c.bf16 %v853_v32, %v837_v38  ;;  %v912_v42 = vpack.c.bf16 %v821_v18, %v806_v55  ;;  %v1960_v47 = vpop.permute.xlu2 %689  ;;  %v628_v38 = vld [vmem:[%s2057_s2] sm:$0xf] }
 0x163   : > { %673 = vrot.lane.b32.xlu2 %v631_v45, %s1439_s14  ;;  %986 = vrot.lane.b32.xlu1 %v927_v39, %s1440_s17 }
 0x164   : > { %964 = vrot.lane.b32.xlu0 %v916_v0, %s1440_s17 }
 0x165   : > { %v1921_v17 = vpop.permute.xlu1 %1398  ;;  %v1409_v22 = vpop.permute.xlu0 %1408 }
 0x166   : > { %v1410_v14 = vunpack.i.l.bf16 %v1409_v22  ;;  %v1400_v10 = vunpack.i.l.bf16 %v1921_v17  ;;  %v1411_v41 = vunpack.i.h.bf16 %v1409_v22  ;;  %v1401_v21 = vunpack.i.h.bf16 %v1921_v17 }
 0x168   : > { %v807_v63 = vsel %vm805_vm4, %v1396_v31, %v1400_v10  ;;  %v822_v37 = vsel %vm588_vm10, %v1406_v7, %v1410_v14  ;;  %v823_v48 = vsel %vm588_vm10, %v1410_v14, %v1411_v41  ;;  %v915_v16 = vpack.c.bf16 %v1411_v41, %v1401_v21 }
 0x169   : > { %v913_v56 = vpack.c.bf16 %v822_v37, %v807_v63 }
 0x16b   : > { %968 = vrot.lane.b32.xlu2 %v918_v26, %s1440_s17  ;;  %966 = vrot.lane.b32.xlu1 %v917_v24, %s1440_s17 }
 0x16c   : > { %699 = vrot.lane.b32.xlu0 %v644_v58, %s1439_s14 }
 0x16d   : > { %v702_v27 = vpop.permute.xlu1 %701  ;;  %v694_v58 = vpop.permute.xlu0 %693 }
 0x16e   : > { %v722_v15 = vsel %vm709_vm0, %v702_v27, %v1831_v40  ;;  %v808_v40 = vsel %vm805_vm4, %v1400_v10, %v1401_v21 }
 0x16f   : > { %v741_v62 = vsel %vm460_vm14, %v722_v15, 0  ;;  %v914_v36 = vpack.c.bf16 %v823_v48, %v808_v40 }
 0x170   : > { %752 = vmatpush.bf16.msra.mxu3 %v741_v62 }
 0x173   : > { %956 = vrot.lane.b32.xlu2 %v912_v42, %s1440_s17  ;;  %978 = vrot.lane.b32.xlu1 %v923_v57, %s1440_s17 }
 0x174   : > { %958 = vrot.lane.b32.xlu0 %v913_v56, %s1440_s17 }
 0x175   : > { %v696_v60 = vpop.permute.xlu1 %695  ;;  %v686_v23 = vpop.permute.xlu0 %685 }
 0x176   : > { %v719_v43 = vsel %vm709_vm0, %v694_v58, %v696_v60  ;;  %v720_v29 = vsel %vm709_vm0, %v696_v60, %v1946_v61 }
 0x177   : > { %753 = vmatpush.bf16.msra.mxu3 %v719_v43  ;;  %766 = vmatpush.bf16.msrb.mxu0 %v720_v29 }
 0x17b   : > { %691 = vrot.lane.b32.xlu2 %v1663_v54, %s1439_s14  ;;  %960 = vrot.lane.b32.xlu1 %v914_v36, %s1440_s17  ;;  %v908_v54 = vpack.c.bf16 %v1780_v44, %v1480_v1  ;;  %v911_v1 = vpack.c.bf16 %v1651_v46, %v1492_v6 }
 0x17c   : > { %970 = vrot.lane.b32.xlu0 %v919_v20, %s1440_s17 }
 0x17d   : > { %v688_v12 = vpop.permute.xlu1 %687  ;;  %v678_v50 = vpop.permute.xlu0 %677 }
 0x17e   : > { %v716_v34 = vsel %vm709_vm0, %v686_v23, %v688_v12  ;;  %v717_v8 = vsel %vm709_vm0, %v688_v12, %v1960_v47  ;;  %v907_v12 = vld [vmem:[%s2058_s3] sm:$0xf] }
 0x17f   : > { %754 = vmatpush.bf16.msra.mxu3 %v716_v34  ;;  %767 = vmatpush.bf16.msrb.mxu0 %v717_v8 }
 0x183   : > { %950 = vrot.lane.b32.xlu2 %v909_v30, %s1440_s17  ;;  %948 = vrot.lane.b32.xlu1 %v908_v54, %s1440_s17 }
 0x184   : > { %952 = vrot.lane.b32.xlu0 %v910_v49, %s1440_s17 }
 0x185   : > { %v680_v51 = vpop.permute.xlu1 %679  ;;  %v981_v25 = vpop.permute.xlu0 %980 }
 0x186   : > { %v713_v35 = vsel %vm709_vm0, %v678_v50, %v680_v51 }
 0x187   : > { %755 = vmatpush.bf16.msra.mxu3 %v713_v35 }
 0x18b   : > { %962 = vrot.lane.b32.xlu2 %v915_v16, %s1440_s17  ;;  %683 = vrot.lane.b32.xlu1 %v1669_v3, %s1439_s14  ;;  %v347_v3 = vld [vmem:[%s2056_s1] sm:$0xf] }
 0x18c   : > { %675 = vrot.lane.b32.xlu0 %v632_v2, %s1439_s14  ;;  %1150 = vmatmul.msk.bf16.vlgmr.msra.gmra.mxu0 %vm456_vm5, %v347_v3 }
 0x18d   : > { %1151 = vmatmul.msk.bf16.vlgmr.msra.gmra.mxu1 %vm456_vm5, %v347_v3  ;;  %1152 = vmatmul.msk.bf16.vlgmr.msra.gmra.mxu2 %vm456_vm5, %v347_v3  ;;  %v670_v46 = vpop.permute.xlu0 %669 }
 0x193   : > { %954 = vrot.lane.b32.xlu1 %v911_v1, %s1440_s17 }
 0x1a5   : > { %v985_v5 = vpop.permute.xlu2 %984 }
 0x1ad   : > { %v1984_v19 = vpop.permute.xlu2 %681 }
 0x1ae   : > { %v714_v44 = vsel %vm709_vm0, %v680_v51, %v1984_v19 }
 0x1af   : > { %768 = vmatpush.bf16.msrb.mxu0 %v714_v44 }
 0x1b5   : > { %v977_v4 = vpop.permute.xlu2 %976 }
 0x1bd   : > { %v983_v6 = vpop.permute.xlu1 %982  ;;  %v1996_v45 = vpop.permute.xlu2 %673 }
 0x1be   : > { %v1001_v59 = vsel %vm988_vm6, %v981_v25, %v983_v6  ;;  %v1002_v0 = vsel %vm988_vm6, %v983_v6, %v985_v5 }
 0x1bf   : > { %v1020_v39 = vsel %vm460_vm14, %v1001_v59, 0  ;;  %v1023_v17 = vsel %vm460_vm14, %v1002_v0, 0 }
 0x1c0   : > { %1031 = vmatpush.bf16.msrb.mxu2 %v1020_v39 }
 0x1c5   : > { %v672_v13 = vpop.permute.xlu1 %671  ;;  %v969_v32 = vpop.permute.xlu2 %968 }
 0x1c6   : > { %v973_v53 = vpop.permute.xlu0 %972  ;;  %v710_v11 = vsel %vm709_vm0, %v670_v46, %v672_v13  ;;  %v711_v52 = vsel %vm709_vm0, %v672_v13, %v1996_v45 }
 0x1c7   : > { %756 = vmatpush.bf16.msra.mxu3 %v710_v11  ;;  %769 = vmatpush.bf16.msrb.mxu0 %v711_v52 }
 0x1ca   : > { %1153 = vmatmul.msk.bf16.vlgmr.msra.gmra.mxu3 %vm456_vm5, %v628_v38  ;;  %1154 = vmatmul.msk.bf16.vlgmr.msrb.gmra.mxu0 %vm456_vm5, %v628_v38 }
 0x1cb   : > { %1044 = vmatpush.bf16.msrb.mxu3 %v1023_v17 }
 0x1cd   : > { %v975_v22 = vpop.permute.xlu1 %974  ;;  %v957_v14 = vpop.permute.xlu2 %956 }
 0x1ce   : > { %v708_v26 = vpop.permute.xlu0 %707  ;;  %v998_v7 = vsel %vm988_vm6, %v973_v53, %v975_v22  ;;  %v999_v28 = vsel %vm988_vm6, %v975_v22, %v977_v4 }
 0x1cf   : > { %1032 = vmatpush.bf16.msrb.mxu2 %v998_v7  ;;  %1045 = vmatpush.bf16.msrb.mxu3 %v999_v28  ;;  %v724_v31 = vsel %vm709_vm0, %v1848_v9, %v708_v26 }
 0x1d0   : > { %v747_v33 = vsel %vm460_vm14, %v724_v31, 0 }
 0x1d1   : > { %778 = vmatpush.bf16.msrb.mxu1 %v747_v33 }
 0x1d5   : > { %v987_v10 = vpop.permute.xlu1 %986  ;;  %v692_v63 = vpop.permute.xlu2 %691 }
 0x1d6   : > { %v1003_v24 = vsel %vm988_vm6, %v985_v5, %v987_v10  ;;  %v965_v55 = vpop.permute.xlu0 %964  ;;  %v718_v42 = vsel %vm709_vm0, %v1960_v47, %v692_v63 }
 0x1d7   : > { %v1026_v18 = vsel %vm460_vm14, %v1003_v24, 0 }
 0x1d8   : > { %1057 = vmatpush.bf16.msra.mxu0 %v1026_v18 }
 0x1dd   : > { %v967_v27 = vpop.permute.xlu1 %966  ;;  %v951_v58 = vpop.permute.xlu2 %950 }
 0x1de   : > { %v700_v37 = vpop.permute.xlu0 %699  ;;  %v995_v15 = vsel %vm988_vm6, %v965_v55, %v967_v27  ;;  %v996_v62 = vsel %vm988_vm6, %v967_v27, %v969_v32 }
 0x1df   : > { %v721_v9 = vsel %vm709_vm0, %v1946_v61, %v700_v37  ;;  %1033 = vmatpush.bf16.msrb.mxu2 %v995_v15  ;;  %1046 = vmatpush.bf16.msrb.mxu3 %v996_v62 }
 0x1e0   : > { %779 = vmatpush.bf16.msrb.mxu1 %v721_v9 }
 0x1e4   : > { %780 = vmatpush.bf16.msrb.mxu1 %v718_v42 }
 0x1e5   : > { %v979_v41 = vpop.permute.xlu1 %978  ;;  %v963_v43 = vpop.permute.xlu2 %962 }
 0x1e6   : > { %v959_v21 = vpop.permute.xlu0 %958  ;;  %v1000_v56 = vsel %vm988_vm6, %v977_v4, %v979_v41 }
 0x1e7   : > { %v992_v57 = vsel %vm988_vm6, %v957_v14, %v959_v21  ;;  %1058 = vmatpush.bf16.msra.mxu0 %v1000_v56 }
 0x1e8   : > { %1034 = vmatpush.bf16.msrb.mxu2 %v992_v57 }
 0x1ed   : > { %v961_v40 = vpop.permute.xlu1 %960 }
 0x1ee   : > { %v971_v48 = vpop.permute.xlu0 %970  ;;  %v993_v61 = vsel %vm988_vm6, %v959_v21, %v961_v40  ;;  %v994_v29 = vsel %vm988_vm6, %v961_v40, %v963_v43 }
 0x1ef   : > { %1047 = vmatpush.bf16.msrb.mxu3 %v993_v61  ;;  %v997_v60 = vsel %vm988_vm6, %v969_v32, %v971_v48 }
 0x1f0   : > { %1059 = vmatpush.bf16.msra.mxu0 %v997_v60 }
 0x1f4   : > { %1060 = vmatpush.bf16.msra.mxu0 %v994_v29 }
 0x1f5   : > { %v949_v36 = vpop.permute.xlu1 %948 }
 0x1f6   : > { %v953_v20 = vpop.permute.xlu0 %952  ;;  %v989_v23 = vsel %vm988_vm6, %v949_v36, %v951_v58 }
 0x1f7   : > { %1035 = vmatpush.bf16.msrb.mxu2 %v989_v23  ;;  %v990_v47 = vsel %vm988_vm6, %v951_v58, %v953_v20 }
 0x1f8   : > { %1048 = vmatpush.bf16.msrb.mxu3 %v990_v47 }
 0x1fa   : > { %1156 = vmatmul.msk.bf16.vlgmr.msrb.gmra.mxu2 %vm456_vm5, %v907_v12 }
 0x1fb   : > { %1157 = vmatmul.msk.bf16.vlgmr.msrb.gmra.mxu3 %vm456_vm5, %v907_v12 }
 0x1fd   : > { %v684_v34 = vpop.permute.xlu1 %683 }
 0x1fe   : > { %v715_v8 = vsel %vm709_vm0, %v1984_v19, %v684_v34  ;;  %v676_v30 = vpop.permute.xlu0 %675 }
 0x1ff   : > { %781 = vmatpush.bf16.msrb.mxu1 %v715_v8  ;;  %v712_v54 = vsel %vm709_vm0, %v1996_v45, %v676_v30 }
 0x203   : > { %782 = vmatpush.bf16.msrb.mxu1 %v712_v54 }
 0x205   : > { %v955_v49 = vpop.permute.xlu1 %954 }
 0x206   : > { %1155 = vmatmul.msk.bf16.vlgmr.msrb.gmra.mxu1 %vm456_vm5, %v628_v38  ;;  %v991_v50 = vsel %vm988_vm6, %v953_v20, %v955_v49 }
 0x207   : > { %1061 = vmatpush.bf16.msra.mxu0 %v991_v50 }
 0x209   : > { %v479_v51 = vpop.f32.mrf.mxu0 }
 0x20a   : > { %1158 = vmatmul.msk.bf16.vlgmr.msra.gmra.mxu0 %vm456_vm5, %v907_v12  ;;  %v492_v35 = vpop.f32.mrf.mxu1  ;;  %vm509_vm7 = vcmp.ge.f32.partialorder %v479_v51, 0.0  ;;  %v512_v16 = vmul.f32 0.1, %v479_v51 }
 0x20b   : > { %vm510_vm8 = vcmp.ge.f32.partialorder %v492_v35, 0.0  ;;  %v513_v2 = vmul.f32 0.1, %v492_v35 }
 0x20c   : > { %v515_v1 = vsel %vm509_vm7, %v479_v51, %v512_v16 }
 0x20d   : > { %v516_v5 = vsel %vm510_vm8, %v492_v35, %v513_v2 }
 0x20e   : > { %v1076_v19 = vpack.c.bf16 %v516_v5, %v515_v1 }
 0x210   : > { %1082 = vst [vmem:[%s2044_s27] sm:$0xff] %v1076_v19  ;;  %v505_v44 = vpop.f32.mrf.mxu2 }
 0x211   : > { %v481_v25 = vpop.f32.mrf.mxu0  ;;  %vm511_vm9 = vcmp.ge.f32.partialorder %v505_v44, 0.0  ;;  %v514_v4 = vmul.f32 0.1, %v505_v44 }
 0x212   : > { %v494_v3 = vpop.f32.mrf.mxu1 }
 0x213   : > { %v517_v6 = vsel %vm511_vm9, %v505_v44, %v514_v4 }
 0x214   : > { %v1077_v46 = vpack.c.bf16 %v517_v6, %v517_v6 }
 0x216   : > { %1083 = vst [vmem:[%s2044_s27 + $0x8] sm:$0xf] %v1077_v46 }
 0x218   : > { %v507_v59 = vpop.f32.mrf.mxu2 }
 0x247   : > { %v771_v39 = vpop.f32.mrf.mxu0 }
 0x248   : > { %v792_v45 = vmul.f32 0.1, %v771_v39  ;;  %vm789_vm10 = vcmp.ge.f32.partialorder %v771_v39, 0.0 }
 0x24a   : > { %v795_v53 = vsel %vm789_vm10, %v771_v39, %v792_v45 }
 0x24d   : > { %v758_v0 = vpop.f32.mrf.mxu3 }
 0x24e   : > { %vm788_vm11 = vcmp.ge.f32.partialorder %v758_v0, 0.0  ;;  %v791_v13 = vmul.f32 0.1, %v758_v0 }
 0x24f   : > { %v773_v11 = vpop.f32.mrf.mxu0 }
 0x250   : > { %v794_v52 = vsel %vm788_vm11, %v758_v0, %v791_v13 }
 0x251   : > { %v1078_v17 = vpack.c.bf16 %v795_v53, %v794_v52 }
 0x253   : > { %1084 = vst [vmem:[%s2044_s27 + $0xc] sm:$0xff] %v1078_v17 }
 0x255   : > { %v760_v38 = vpop.f32.mrf.mxu3 }
 0x27d   : > { %v1037_v32 = vpop.f32.mrf.mxu2 }
 0x27e   : > { %vm1067_vm12 = vcmp.ge.f32.partialorder %v1037_v32, 0.0  ;;  %v1070_v22 = vmul.f32 0.1, %v1037_v32  ;;  %v1050_v26 = vpop.f32.mrf.mxu3 }
 0x27f   : > { %vm1068_vm13 = vcmp.ge.f32.partialorder %v1050_v26, 0.0  ;;  %v1071_v7 = vmul.f32 0.1, %v1050_v26 }
 0x280   : > { %v1073_v28 = vsel %vm1067_vm12, %v1037_v32, %v1070_v22 }
 0x281   : > { %v1074_v31 = vsel %vm1068_vm13, %v1050_v26, %v1071_v7 }
 0x282   : > { %v1080_v33 = vpack.c.bf16 %v1074_v31, %v1073_v28 }
 0x283   : > { %v784_v14 = vpop.f32.mrf.mxu1 }
 0x284   : > { %1086 = vst [vmem:[%s2044_s27 + $0x18] sm:$0xff] %v1080_v33  ;;  %vm790_vm14 = vcmp.ge.f32.partialorder %v784_v14, 0.0  ;;  %v793_v10 = vmul.f32 0.1, %v784_v14 }
 0x285   : > { %v1039_v24 = vpop.f32.mrf.mxu2 }
 0x286   : > { %v796_v55 = vsel %vm790_vm14, %v784_v14, %v793_v10  ;;  %v1052_v18 = vpop.f32.mrf.mxu3 }
 0x287   : > { %v1079_v27 = vpack.c.bf16 %v796_v55, %v796_v55  ;;  %v1063_v63 = vpop.f32.mrf.mxu0 }
 0x288   : > { %vm1069_vm15 = vcmp.ge.f32.partialorder %v1063_v63, 0.0  ;;  %v1072_v37 = vmul.f32 0.1, %v1063_v63 }
 0x289   : > { %1085 = vst [vmem:[%s2044_s27 + $0x14] sm:$0xf] %v1079_v27 }
 0x28a   : > { %v1075_v15 = vsel %vm1069_vm15, %v1063_v63, %v1072_v37 }
 0x28b   : > { %v1081_v62 = vpack.c.bf16 %v1075_v15, %v1075_v15  ;;  %v786_v9 = vpop.f32.mrf.mxu1 }
 0x28d   : > { %1087 = vst [vmem:[%s2044_s27 + $0x20] sm:$0xf] %v1081_v62 }
 0x28f   : > { %v1065_v42 = vpop.f32.mrf.mxu0 }
 0x290 PF: > { %s14_s15 = sadd.s32 1, %s1418_s15  }
 0x291   : > { %p11_p4 = scmp.ge.s32.totalorder %s14_s15, 6  }
 0x293   :  { %13 = sbr.rel (!%p11_p4) target bundleno = 1 (0x1), region = 66 }

// kernel: sisr_forward.34
= control target key start
LH: loop header
LB: loop body
LE: loop exit
PB: predicated region body
PF: predicated region fallthrough
CT: control target
= control target key end

     0   :  { %s1129_s12 = smov 0   ;;  %s1532_s0 = inlined_call_operand.vmem [shape: bf16[4,24,360], index: 0, kind: input, shape index: {}]   ;;  %s1533_s1 = inlined_call_operand.vmem [shape: bf16[8,216], index: 1, kind: input, shape index: {}]   ;;  %s1534_s2 = inlined_call_operand.vmem [shape: bf16[4,8,288], index: 2, kind: input, shape index: {}]   ;;  %s1535_s3 = inlined_call_operand.vmem [shape: bf16[4,8,288], index: 3, kind: output, shape index: {}]  }
   0x1 LB: > { %s900_s13 = sadd.s32 4294967295, %s1098_s12   ;;  %p904_p0 = scmp.ge.s32.totalorder %s1098_s12, 1  ;;  %s1098_s12 = sphi %s1129_s12, %s13_s12  }
   0x2   : > { %p147_p1 = scmp.lt.s32.totalorder %s1098_s12, 5 }
   0x4   : > { %p148_p2 = pnand %p904_p0, %p147_p1 }
   0x5   : > { %p176_p3 = scmp.lt.s32.totalorder (!%p148_p2), %s900_s13, 3  ;;  %s1100_s18 = smov (!%p148_p2), 127  }
   0x6   : > { %151 = sbr.rel (%p148_p2) target bundleno = 552 (0x228), region = 32  ;;  %s1101_s19 = smov (!%p148_p2), 126  }
   0x7   : > { %s1102_s20 = smov (!%p148_p2), 110   ;;  %s1103_s21 = smov (!%p148_p2), 90  }
   0x8   : > { %s1104_s22 = smov (!%p148_p2), 109   ;;  %s1105_s23 = smov (!%p148_p2), 108  }
   0x9   : > { %s1106_s24 = smov (!%p148_p2), 91   ;;  %s1107_s25 = smov (!%p148_p2), 92  }
   0xa   : > { %s1108_s26 = smov (!%p148_p2), 111  }
   0xb   : > { %s1551_s13 = smov (!%p176_p3, %s900_s13), 3  ;;  %vm234_vm0 = vcmask 1039360   ;;  %vm268_vm1 = vcmask 1031168   ;;  %vm302_vm2 = vcmask 900096   ;;  %vm472_vm3 = vcmask 736256  }
   0xc   : > { %s913_s14 = smul.u32 36, %s1551_s13  ;;  %vm438_vm4 = vcmask 744448   ;;  %vm336_vm5 = vcmask 891904   ;;  %vm370_vm6 = vcmask 883712   ;;  %vm404_vm7 = vcmask 752640  }
   0xd   : > { %vm668_vm8 = vcmask 908288   ;;  %vm740_vm9 = vcmask 1043456   ;;  %vm736_vm10 = vcmask 719872   ;;  %s914_s29 = smul.u32 12, %s1551_s13  ;;  %vm831_vm11 = vcmask 257024  }
   0xe   : > { %s180_s17 = scalar_lea.vmem %s1532_s0, %s913_s14 }
   0xf   : > { %v194_v0 = vld [vmem:[%s180_s17 + $0xc] sm:$0xff]  ;;  %v195_v1 = vld [vmem:[%s180_s17 + $0x14] sm:$0xf]  ;;  %v192_v2 = vld [vmem:[%s180_s17] sm:$0xff]  ;;  %s185_s5 = scalar_lea.vmem %s1534_s2, %s914_s29  ;;  %s190_s8 = scalar_lea.vmem %s1535_s3, %s914_s29 }
  0x10   : > { %v1143_v3 = vunpack.c.h.bf16 %v194_v0  ;;  %v1145_v4 = vunpack.c.l.bf16 %v195_v1  ;;  %v1147_v5 = vunpack.c.l.bf16 %v192_v2  ;;  %v197_v6 = vld [vmem:[%s180_s17 + $0x20] sm:$0xf]  ;;  %v1149_v7 = vunpack.c.h.bf16 %v192_v2  ;;  %v196_v8 = vld [vmem:[%s180_s17 + $0x18] sm:$0xff]  ;;  %v193_v10 = vld [vmem:[%s180_s17 + $0x8] sm:$0xf] }
  0x11   : > { %v1153_v11 = vunpack.c.l.bf16 %v197_v6  ;;  %v1157_v13 = vunpack.c.l.bf16 %v196_v8  ;;  %v1159_v14 = vunpack.c.h.bf16 %v196_v8  ;;  %v1162_v15 = vunpack.c.l.bf16 %v194_v0 }
  0x12   : > { %v942_v9 = vpack.i.bf16 %v1145_v4, %v1143_v3  ;;  %v932_v12 = vpack.i.bf16 %v1149_v7, %v1147_v5  ;;  %v1164_v16 = vunpack.c.l.bf16 %v193_v10  ;;  %v1057_v22 = vpack.i.bf16 %v1143_v3, %v1147_v5 }
  0x13   : > { %232 = vrot.lane.b32.xlu2 %v1153_v11, %s1100_s18  ;;  %v947_v17 = vpack.i.bf16 %v1159_v14, %v1157_v13  ;;  %v992_v20 = vpack.i.bf16 %v1153_v11, %v1159_v14  ;;  %v1007_v21 = vpack.i.bf16 %v1147_v5, %v1157_v13  ;;  %v1062_v23 = vpack.i.bf16 %v1157_v13, %v1162_v15 }
  0x14   : > { %943 = vrot.lane.b32.xlu1 %v942_v9, %s1100_s18  ;;  %933 = vrot.lane.b32.xlu0 %v932_v12, %s1100_s18  ;;  %v937_v18 = vpack.i.bf16 %v1162_v15, %v1164_v16  ;;  %v997_v19 = vpack.i.bf16 %v1164_v16, %v1149_v7  ;;  %v1087_v24 = vpack.i.bf16 %v1162_v15, %v1153_v11 }
  0x15   : > { %v1082_v25 = vpack.i.bf16 %v1159_v14, %v1145_v4 }
  0x1b   : > { %953 = vrot.lane.b32.xlu2 %v932_v12, %s1101_s19 }
  0x1c   : > { %948 = vrot.lane.b32.xlu1 %v947_v17, %s1100_s18  ;;  %938 = vrot.lane.b32.xlu0 %v937_v18, %s1100_s18 }
  0x23   : > { %968 = vrot.lane.b32.xlu2 %v947_v17, %s1101_s19 }
  0x24   : > { %963 = vrot.lane.b32.xlu1 %v942_v9, %s1101_s19  ;;  %958 = vrot.lane.b32.xlu0 %v937_v18, %s1101_s19 }
  0x2b   : > { %978 = vrot.lane.b32.xlu2 %v937_v18, %s1102_s20 }
  0x2c   : > { %973 = vrot.lane.b32.xlu1 %v932_v12, %s1102_s20  ;;  %266 = vrot.lane.b32.xlu0 %v1153_v11, %s1101_s19 }
  0x33   : > { %300 = vrot.lane.b32.xlu2 %v1153_v11, %s1102_s20 }
  0x34   : > { %988 = vrot.lane.b32.xlu1 %v947_v17, %s1102_s20  ;;  %983 = vrot.lane.b32.xlu0 %v942_v9, %s1102_s20 }
  0x3b   : > { %1003 = vrot.lane.b32.xlu2 %v942_v9, %s1103_s21 }
  0x3c   : > { %998 = vrot.lane.b32.xlu1 %v997_v19, %s1103_s21  ;;  %993 = vrot.lane.b32.xlu0 %v992_v20, %s1103_s21 }
  0x43   : > { %1018 = vrot.lane.b32.xlu2 %v997_v19, %s1105_s23 }
  0x44   : > { %1013 = vrot.lane.b32.xlu1 %v992_v20, %s1104_s22  ;;  %1008 = vrot.lane.b32.xlu0 %v1007_v21, %s1103_s21 }
  0x4b   : > { %460 = vrot.lane.b32.xlu2 %v1162_v15, %s1103_s21 }
  0x4c   : > { %1028 = vrot.lane.b32.xlu1 %v992_v20, %s1106_s24  ;;  %1023 = vrot.lane.b32.xlu0 %v942_v9, %s1106_s24 }
  0x53   : > { %1043 = vrot.lane.b32.xlu2 %v992_v20, %s1107_s25 }
  0x54   : > { %1038 = vrot.lane.b32.xlu1 %v942_v9, %s1104_s22  ;;  %1033 = vrot.lane.b32.xlu0 %v997_v19, %s1104_s22 }
  0x5b   : > { %1058 = vrot.lane.b32.xlu2 %v1057_v22, %s1105_s23 }
  0x5c   : > { %1053 = vrot.lane.b32.xlu1 %v1007_v21, %s1104_s22  ;;  %1048 = vrot.lane.b32.xlu0 %v997_v19, %s1106_s24 }
  0x63   : > { %1073 = vrot.lane.b32.xlu2 %v942_v9, %s1107_s25 }
  0x64   : > { %1068 = vrot.lane.b32.xlu1 %v997_v19, %s1107_s25  ;;  %1063 = vrot.lane.b32.xlu0 %v1062_v23, %s1106_s24 }
  0x6b   : > { %420 = vrot.lane.b32.xlu2 %v1147_v5, %s1106_s24 }
  0x6c   : > { %1078 = vrot.lane.b32.xlu1 %v1007_v21, %s1107_s25  ;;  %324 = vrot.lane.b32.xlu0 %v1162_v15, %s1104_s22 }
  0x6d   : > { %v233_v26 = vpop.permute.xlu2 %232 }
  0x73   : > { %392 = vrot.lane.b32.xlu2 %v1162_v15, %s1107_s25 }
  0x74   : > { %1088 = vrot.lane.b32.xlu1 %v1087_v24, %s1105_s23  ;;  %1083 = vrot.lane.b32.xlu0 %v1082_v25, %s1105_s23 }
  0x75   : > { %v954_v27 = vpop.permute.xlu2 %953 }
  0x76   : > { %v956_v48 = vunpack.i.h.bf16 %v954_v27  ;;  %v955_v49 = vunpack.i.l.bf16 %v954_v27 }
  0x78   : > { %v1224_v57 = vsel %vm268_vm1, %v955_v49, %v956_v48 }
  0x7c   : > { %364 = vrot.lane.b32.xlu0 %v1157_v13, %s1105_s23 }
  0x7d   : > { %v969_v32 = vpop.permute.xlu2 %968 }
  0x7e   : > { %v970_v62 = vunpack.i.l.bf16 %v969_v32  ;;  %v971_v1 = vunpack.i.h.bf16 %v969_v32 }
  0x80   : > { %v1244_v17 = vsel %vm268_vm1, %v970_v62, %v971_v1 }
  0x85   : > { %v979_v50 = vpop.permute.xlu2 %978 }
  0x86   : > { %v944_v28 = vpop.permute.xlu1 %943  ;;  %v1191_v30 = vpop.permute.xlu0 %933  ;;  %v980_v2 = vunpack.i.l.bf16 %v979_v50  ;;  %v981_v24 = vunpack.i.h.bf16 %v979_v50 }
  0x87   : > { %v946_v29 = vunpack.i.h.bf16 %v944_v28  ;;  %v945_v33 = vunpack.i.l.bf16 %v944_v28  ;;  %v1536_v38 = vunpack.i.h.bf16 %v1191_v30 }
  0x89   : > { %v1193_v31 = vpack.c.bf16 %v233_v26, %v946_v29  ;;  %v1201_v41 = vsel %vm234_vm0, %v945_v33, %v946_v29 }
  0x8d   : > { %v1241_v6 = vpop.permute.xlu2 %300 }
  0x8e   : > { %v949_v34 = vpop.permute.xlu1 %948  ;;  %v1195_v37 = vpop.permute.xlu0 %938 }
  0x8f   : > { %v951_v35 = vunpack.i.h.bf16 %v949_v34  ;;  %v950_v36 = vunpack.i.l.bf16 %v949_v34  ;;  %v941_v39 = vunpack.i.h.bf16 %v1195_v37  ;;  %v1537_v40 = vunpack.i.l.bf16 %v1195_v37 }
  0x91   : > { %v1204_v42 = vsel %vm234_vm0, %v951_v35, %v233_v26  ;;  %v1207_v43 = vsel %vm234_vm0, %v950_v36, %v951_v35  ;;  %v1212_v45 = vsel %vm234_vm0, %v941_v39, %v945_v33  ;;  %v1219_v46 = vsel %vm234_vm0, %v1536_v38, %v1537_v40 }
  0x95   : > { %v1004_v29 = vpop.permute.xlu2 %1003 }
  0x96   : > { %v964_v51 = vpop.permute.xlu1 %963  ;;  %v959_v54 = vpop.permute.xlu0 %958  ;;  %v1006_v36 = vunpack.i.h.bf16 %v1004_v29 }
  0x97   : > { %v966_v52 = vunpack.i.h.bf16 %v964_v51  ;;  %v965_v53 = vunpack.i.l.bf16 %v964_v51  ;;  %v961_v55 = vunpack.i.h.bf16 %v959_v54  ;;  %v960_v56 = vunpack.i.l.bf16 %v959_v54 }
  0x99   : > { %v1227_v58 = vsel %vm268_vm1, %v965_v53, %v966_v52  ;;  %v1229_v59 = vpack.c.bf16 %v966_v52, %v960_v56  ;;  %v1232_v60 = vsel %vm268_vm1, %v956_v48, %v960_v56  ;;  %v1235_v61 = vsel %vm268_vm1, %v961_v55, %v965_v53 }
  0x9d   : > { %v1280_v52 = vpop.permute.xlu2 %1018 }
  0x9e   : > { %v974_v8 = vpop.permute.xlu1 %973  ;;  %v267_v12 = vpop.permute.xlu0 %266  ;;  %v1021_v54 = vunpack.i.h.bf16 %v1280_v52  ;;  %v1020_v35 = vunpack.i.l.bf16 %v1280_v52 }
  0x9f   : > { %v976_v9 = vunpack.i.h.bf16 %v974_v8  ;;  %v975_v10 = vunpack.i.l.bf16 %v974_v8  ;;  %v1247_v18 = vsel %vm268_vm1, %v971_v1, %v267_v12  ;;  %v1249_v19 = vpack.c.bf16 %v980_v2, %v267_v12 }
  0xa1   : > { %v1252_v20 = vsel %vm302_vm2, %v976_v9, %v980_v2  ;;  %v1255_v21 = vsel %vm302_vm2, %v975_v10, %v976_v9 }
  0xa2   : > { %v502_v22 = vpack.c.bf16 %v1252_v20, %v1247_v18 }
  0xa5   : > { %v461_v12 = vpop.permute.xlu2 %460 }
  0xa6   : > { %v1261_v25 = vpop.permute.xlu1 %988  ;;  %v1265_v28 = vpop.permute.xlu0 %983 }
  0xa7   : > { %v991_v26 = vunpack.i.h.bf16 %v1261_v25  ;;  %v990_v27 = vunpack.i.l.bf16 %v1261_v25  ;;  %v985_v32 = vunpack.i.l.bf16 %v1265_v28 }
  0xa9   : > { %v1271_v33 = vsel %vm302_vm2, %v990_v27, %v991_v26  ;;  %v1276_v34 = vsel %vm302_vm2, %v981_v24, %v985_v32 }
  0xad   : > { %v1310_v0 = vpop.permute.xlu2 %1043 }
  0xae   : > { %v999_v39 = vpop.permute.xlu1 %998  ;;  %v994_v49 = vpop.permute.xlu0 %993 }
  0xaf   : > { %v1001_v48 = vunpack.i.h.bf16 %v999_v39  ;;  %v996_v50 = vunpack.i.h.bf16 %v994_v49  ;;  %v995_v1 = vunpack.i.l.bf16 %v994_v49  ;;  %v1000_v44 = vunpack.i.l.bf16 %v999_v39 }
  0xb1   : > { %v527_v51 = vpack.c.bf16 %v1006_v36, %v1001_v48  ;;  %v530_v53 = vpack.c.bf16 %v996_v50, %v996_v50  ;;  %v478_v27 = vsel %vm472_vm3, %v995_v1, %v996_v50  ;;  %v474_v39 = vsel %vm472_vm3, %v1000_v44, %v1001_v48 }
  0xb2   : > { %v1046_v48 = vunpack.i.h.bf16 %v1310_v0 }
  0xb3   : > { %660 = vrot.lane.b32.xlu1 %v527_v51, %s1108_s26  ;;  %666 = vrot.lane.b32.xlu2 %v530_v53, %s1108_s26 }
  0xb6   : > { %v1285_v55 = vpop.permute.xlu1 %1013  ;;  %v1009_v62 = vpop.permute.xlu0 %1008 }
  0xb7   : > { %v1016_v56 = vunpack.i.h.bf16 %v1285_v55  ;;  %v1010_v2 = vunpack.i.l.bf16 %v1009_v62 }
  0xb9   : > { %v512_v8 = vpack.c.bf16 %v1021_v54, %v1016_v56  ;;  %v477_v9 = vsel %vm472_vm3, %v1010_v2, %v995_v1  ;;  %v1005_v1 = vunpack.i.l.bf16 %v1004_v29 }
  0xba   : > { %v528_v10 = vpack.c.bf16 %v477_v9, %v477_v9 }
  0xbb   : > { %630 = vrot.lane.b32.xlu1 %v512_v8, %s1108_s26  ;;  %v529_v8 = vpack.c.bf16 %v478_v27, %v478_v27  ;;  %v475_v27 = vsel %vm472_vm3, %v461_v12, %v1005_v1 }
  0xbc   : > { %662 = vrot.lane.b32.xlu2 %v528_v10, %s1108_s26  ;;  %v1011_v10 = vunpack.i.h.bf16 %v1009_v62 }
  0xbe   : > { %v1291_v24 = vpop.permute.xlu1 %1028  ;;  %v1296_v53 = vpop.permute.xlu0 %1023  ;;  %v473_v62 = vsel %vm472_vm3, %v1011_v10, %v1000_v44  ;;  %v1015_v44 = vunpack.i.l.bf16 %v1285_v55  ;;  %v372_v55 = vsel %vm370_vm6, %v1020_v35, %v1021_v54 }
  0xbf   : > { %v1031_v51 = vunpack.i.h.bf16 %v1291_v24  ;;  %v1030_v49 = vunpack.i.l.bf16 %v1291_v24  ;;  %v1026_v38 = vunpack.i.h.bf16 %v1296_v53  ;;  %v1025_v2 = vunpack.i.l.bf16 %v1296_v53 }
  0xc0   : > { %v342_v52 = vsel %vm336_vm5, %v1015_v44, %v1016_v56 }
  0xc1   : > { %v444_v9 = vsel %vm438_vm4, %v1030_v49, %v1031_v51  ;;  %v524_v47 = vpack.c.bf16 %v1031_v51, %v1026_v38  ;;  %v442_v50 = vsel %vm438_vm4, %v1025_v2, %v1026_v38 }
  0xc2   : > { %v523_v40 = vpack.c.bf16 %v444_v9, %v442_v50 }
  0xc3   : > { %664 = vrot.lane.b32.xlu1 %v529_v8, %s1108_s26  ;;  %654 = vrot.lane.b32.xlu0 %v524_v47, %s1108_s26  ;;  %v476_v47 = vsel %vm472_vm3, %v1005_v1, %v1006_v36  ;;  %v525_v8 = vpack.c.bf16 %v475_v27, %v473_v62  ;;  %v1045_v1 = vunpack.i.l.bf16 %v1310_v0 }
  0xc4   : > { %652 = vrot.lane.b32.xlu2 %v523_v40, %s1108_s26  ;;  %v526_v10 = vpack.c.bf16 %v476_v47, %v474_v39  ;;  %v1340_v39 = vpop.permute.xlu2 %1058 }
  0xc6   : > { %v1312_v23 = vpop.permute.xlu1 %1038  ;;  %v1317_v29 = vpop.permute.xlu0 %1033 }
  0xc7   : > { %v1041_v51 = vunpack.i.h.bf16 %v1312_v23  ;;  %v1539_v38 = vunpack.i.l.bf16 %v1312_v23  ;;  %v1036_v40 = vunpack.i.h.bf16 %v1317_v29  ;;  %v1538_v12 = vunpack.i.l.bf16 %v1317_v29 }
  0xc9   : > { %v340_v9 = vsel %vm336_vm5, %v1539_v38, %v1041_v51  ;;  %v338_v50 = vsel %vm336_vm5, %v1538_v12, %v1036_v40 }
  0xca   : > { %v508_v36 = vpack.c.bf16 %v340_v9, %v338_v50  ;;  %v410_v9 = vsel %vm404_vm7, %v1045_v1, %v1046_v48  ;;  %v511_v50 = vpack.c.bf16 %v372_v55, %v342_v52  ;;  %v308_v52 = vsel %vm302_vm2, %v991_v26, %v1241_v6 }
  0xcb   : > { %656 = vrot.lane.b32.xlu1 %v525_v8, %s1108_s26  ;;  %658 = vrot.lane.b32.xlu0 %v526_v10, %s1108_s26  ;;  %v509_v55 = vpack.c.bf16 %v1041_v51, %v1036_v40  ;;  %v1060_v26 = vunpack.i.l.bf16 %v1340_v39 }
  0xcc   : > { %622 = vrot.lane.b32.xlu2 %v508_v36, %s1108_s26  ;;  %v986_v36 = vunpack.i.h.bf16 %v1265_v28  ;;  %v1074_v12 = vpop.permute.xlu2 %1073 }
  0xcd   : > { %v371_v40 = vsel %vm370_vm6, %v1060_v26, %v1020_v35 }
  0xce   : > { %v1336_v27 = vpop.permute.xlu1 %1053  ;;  %v1049_v62 = vpop.permute.xlu0 %1048 }
  0xcf   : > { %v1051_v47 = vunpack.i.h.bf16 %v1049_v62  ;;  %v1050_v8 = vunpack.i.l.bf16 %v1049_v62 }
  0xd1   : > { %v521_v0 = vpack.c.bf16 %v1051_v47, %v1046_v48  ;;  %v440_v10 = vsel %vm438_vm4, %v1050_v8, %v1051_v47  ;;  %v306_v48 = vsel %vm302_vm2, %v985_v32, %v986_v36  ;;  %v1076_v47 = vunpack.i.h.bf16 %v1074_v12 }
  0xd2   : > { %v520_v63 = vpack.c.bf16 %v440_v10, %v410_v9  ;;  %v1055_v32 = vunpack.i.l.bf16 %v1336_v27  ;;  %v505_v10 = vpack.c.bf16 %v308_v52, %v306_v48 }
  0xd3   : > { %628 = vrot.lane.b32.xlu0 %v511_v50, %s1108_s26 }
  0xd4   : > { %646 = vrot.lane.b32.xlu1 %v520_v63, %s1108_s26  ;;  %648 = vrot.lane.b32.xlu2 %v521_v0, %s1108_s26  ;;  %v1075_v63 = vunpack.i.l.bf16 %v1074_v12 }
  0xd6   : > { %v1348_v54 = vpop.permute.xlu1 %1068  ;;  %v1064_v56 = vpop.permute.xlu0 %1063 }
  0xd7   : > { %v1066_v62 = vunpack.i.h.bf16 %v1064_v56  ;;  %v1065_v38 = vunpack.i.l.bf16 %v1064_v56  ;;  %v1071_v9 = vunpack.i.h.bf16 %v1348_v54  ;;  %v1070_v0 = vunpack.i.l.bf16 %v1348_v54 }
  0xd9   : > { %v441_v50 = vsel %vm438_vm4, %v1065_v38, %v1025_v2  ;;  %v443_v28 = vsel %vm438_vm4, %v1066_v62, %v1030_v49  ;;  %v406_v53 = vsel %vm404_vm7, %v1070_v0, %v1071_v9  ;;  %v408_v2 = vsel %vm404_vm7, %v1075_v63, %v1076_v47  ;;  %v421_v62 = vpop.permute.xlu2 %420 }
  0xda   : > { %v522_v25 = vpack.c.bf16 %v443_v28, %v441_v50  ;;  %v341_v49 = vsel %vm336_vm5, %v1055_v32, %v1015_v44  ;;  %v518_v38 = vpack.c.bf16 %v1076_v47, %v1071_v9  ;;  %v517_v12 = vpack.c.bf16 %v408_v2, %v406_v53 }
  0xdb   : > { %624 = vrot.lane.b32.xlu0 %v509_v55, %s1108_s26  ;;  %v510_v54 = vpack.c.bf16 %v371_v40, %v341_v49  ;;  %v506_v50 = vpack.c.bf16 %v1241_v6, %v986_v36  ;;  %v439_v44 = vsel %vm438_vm4, %v421_v62, %v1050_v8  ;;  %v1056_v32 = vunpack.i.h.bf16 %v1336_v27 }
  0xdc   : > { %650 = vrot.lane.b32.xlu1 %v522_v25, %s1108_s26  ;;  %616 = vrot.lane.b32.xlu2 %v505_v10, %s1108_s26  ;;  %v1540_v6 = vunpack.i.l.bf16 %v1312_v23  ;;  %v1541_v10 = vunpack.i.l.bf16 %v1317_v29 }
  0xde   : > { %v1079_v51 = vpop.permute.xlu1 %1078  ;;  %v325_v24 = vpop.permute.xlu0 %324  ;;  %v337_v27 = vsel %vm336_vm5, %v1056_v32, %v1541_v10 }
  0xdf   : > { %v1080_v56 = vunpack.i.l.bf16 %v1079_v51  ;;  %v339_v8 = vsel %vm336_vm5, %v325_v24, %v1540_v6  ;;  %v1081_v49 = vunpack.i.h.bf16 %v1079_v51 }
  0xe0   : > { %v507_v53 = vpack.c.bf16 %v339_v8, %v337_v27 }
  0xe1   : > { %v409_v48 = vsel %vm404_vm7, %v1080_v56, %v1045_v1  ;;  %v1061_v1 = vunpack.i.h.bf16 %v1340_v39  ;;  %v393_v18 = vpop.permute.xlu2 %392  ;;  %v405_v20 = vsel %vm404_vm7, %v1081_v49, %v1070_v0  ;;  %v1542_v39 = vpack.c.bf16 %v1227_v58, %v1232_v60  ;;  %v1493_v49 = vld [vmem:[%s1533_s1] sm:$0xff] }
  0xe2   : > { %v519_v47 = vpack.c.bf16 %v439_v44, %v409_v48  ;;  %v1545_v58 = vpack.c.bf16 %v1235_v61, %v1224_v57  ;;  %v1549_v61 = vunpack.i.h.bf16 %v1191_v30 }
  0xe3   : > { %626 = vrot.lane.b32.xlu0 %v510_v54, %s1108_s26 }
  0xe4   : > { %640 = vrot.lane.b32.xlu1 %v517_v12, %s1108_s26  ;;  %642 = vrot.lane.b32.xlu2 %v518_v38, %s1108_s26 }
  0xe6   : > { %v1089_v52 = vpop.permute.xlu1 %1088  ;;  %v1084_v55 = vpop.permute.xlu0 %1083 }
  0xe7   : > { %v1090_v35 = vunpack.i.l.bf16 %v1089_v52  ;;  %v1086_v9 = vunpack.i.h.bf16 %v1084_v55  ;;  %v1085_v28 = vunpack.i.l.bf16 %v1084_v55  ;;  %v1091_v51 = vunpack.i.h.bf16 %v1089_v52 }
  0xe9   : > { %v374_v36 = vsel %vm370_vm6, %v1061_v1, %v1085_v28  ;;  %v376_v25 = vsel %vm370_vm6, %v1086_v9, %v1090_v35  ;;  %v515_v26 = vpack.c.bf16 %v1090_v35, %v1085_v28  ;;  %v373_v38 = vsel %vm370_vm6, %v1091_v51, %v1061_v1 }
  0xea   : > { %v514_v2 = vpack.c.bf16 %v376_v25, %v374_v36 }
  0xeb   : > { %618 = vrot.lane.b32.xlu0 %v506_v50, %s1108_s26 }
  0xec   : > { %644 = vrot.lane.b32.xlu1 %v519_v47, %s1108_s26  ;;  %610 = vrot.lane.b32.xlu2 %v502_v22, %s1108_s26  ;;  %v407_v22 = vsel %vm404_vm7, %v393_v18, %v1075_v63  ;;  %v1543_v63 = vpack.c.bf16 %v1271_v33, %v1276_v34  ;;  %v1546_v33 = vunpack.i.l.bf16 %v1195_v37  ;;  %v493_v34 = vpack.c.bf16 %v1219_v46, %v1159_v14 }
  0xed   : > { %v516_v23 = vpack.c.bf16 %v407_v22, %v405_v20  ;;  %v538_v18 = vunpack.c.h.b16 %v1493_v49 }
  0xee   : > { %v365_v29 = vpop.permute.xlu0 %364 }
  0xef   : > { %v375_v24 = vsel %vm370_vm6, %v365_v29, %v1086_v9  ;;  %v540_v51 = vpack.c.b16 %v538_v18, %v538_v18 }
  0xf0   : > { %v513_v0 = vpack.c.bf16 %v375_v24, %v373_v38 }
  0xf3   : > { %620 = vrot.lane.b32.xlu0 %v507_v53, %s1108_s26 }
  0xf4   : > { %634 = vrot.lane.b32.xlu1 %v514_v2, %s1108_s26  ;;  %636 = vrot.lane.b32.xlu2 %v515_v26, %s1108_s26 }
  0xfb   : > { %612 = vrot.lane.b32.xlu0 %v1249_v19, %s1108_s26  ;;  %v1544_v19 = vpack.c.bf16 %v1255_v21, %v1244_v17  ;;  %v494_v17 = vpack.c.bf16 %v1546_v33, %v1153_v11  ;;  %v935_v21 = vunpack.i.l.bf16 %v1191_v30  ;;  %v491_v11 = vpack.c.bf16 %v1145_v4, %v1164_v16 }
  0xfc   : > { %638 = vrot.lane.b32.xlu1 %v516_v23, %s1108_s26  ;;  %604 = vrot.lane.b32.xlu2 %v1542_v39, %s1108_s26  ;;  %v490_v30 = vpack.c.bf16 %v1143_v3, %v1149_v7  ;;  %v489_v4 = vpack.c.bf16 %v1162_v15, %v1147_v5 }
  0xfd   : > { %v235_v37 = vsel %vm234_vm0, %v935_v21, %v1549_v61 }
 0x103   : > { %614 = vrot.lane.b32.xlu0 %v1543_v63, %s1108_s26 }
 0x104   : > { %608 = vrot.lane.b32.xlu1 %v1544_v19, %s1108_s26  ;;  %632 = vrot.lane.b32.xlu2 %v513_v0, %s1108_s26 }
 0x10b   : > { %606 = vrot.lane.b32.xlu0 %v1229_v59, %s1108_s26  ;;  %v1547_v59 = vpack.c.bf16 %v1204_v42, %v1201_v41  ;;  %v492_v41 = vpack.c.bf16 %v235_v37, %v1157_v13 }
 0x10c   : > { %600 = vrot.lane.b32.xlu1 %v1193_v31, %s1108_s26  ;;  %602 = vrot.lane.b32.xlu2 %v1545_v58, %s1108_s26  ;;  %v1548_v31 = vpack.c.bf16 %v1207_v43, %v1212_v45 }
 0x10d   : > { %v1427_v60 = vpop.permute.xlu2 %666 }
 0x10e   : > { %v748_v24 = vsel %vm740_vm9, %v1427_v60, 0 }
 0x113   : > { %598 = vrot.lane.b32.xlu0 %v1547_v59, %s1108_s26 }
 0x114   : > { %596 = vrot.lane.b32.xlu2 %v1548_v31, %s1108_s26  ;;  %594 = vrot.lane.b32.xlu1 %v494_v17, %s1108_s26 }
 0x116   : > { %v663_v57 = vpop.permute.xlu2 %662 }
 0x11b   : > { %592 = vrot.lane.b32.xlu0 %v493_v34, %s1108_s26 }
 0x11c   : > { %590 = vrot.lane.b32.xlu2 %v492_v41, %s1108_s26  ;;  %588 = vrot.lane.b32.xlu1 %v491_v11, %s1108_s26 }
 0x11e   : > { %v653_v42 = vpop.permute.xlu2 %652 }
 0x123   : > { %586 = vrot.lane.b32.xlu0 %v490_v30, %s1108_s26 }
 0x125   : > { %v1456_v43 = vpop.permute.xlu1 %660 }
 0x126   : > { %v623_v14 = vpop.permute.xlu2 %622 }
 0x12b   : > { %584 = vrot.lane.b32.xlu0 %v489_v4, %s1108_s26  ;;  %v537_v4 = vunpack.c.l.b16 %v1493_v49 }
 0x12d   : > { %v1461_v13 = vpop.permute.xlu1 %630 }
 0x12e   : > { %v1463_v16 = vpop.permute.xlu2 %648 }
 0x135   : > { %v665_v45 = vpop.permute.xlu1 %664  ;;  %v1465_v46 = vpop.permute.xlu0 %654 }
 0x136   : > { %v695_v3 = vsel %vm668_vm8, %v663_v57, %v665_v45  ;;  %v696_v7 = vsel %vm668_vm8, %v665_v45, %v1427_v60  ;;  %v1472_v12 = vpop.permute.xlu2 %616  ;;  %v692_v48 = vsel %vm668_vm8, %v653_v42, %v1465_v46 }
 0x137   : > { %v742_v40 = vsel %vm740_vm9, %v695_v3, 0  ;;  %v745_v5 = vsel %vm740_vm9, %v696_v7, 0  ;;  %v539_v3 = vpack.c.b16 %v537_v4, %v537_v4 }
 0x138   : > { %765 = vmatpush.bf16.msra.mxu1 %v742_v40  ;;  %791 = vmatpush.bf16.msra.mxu3 %v745_v5 }
 0x13d   : > { %v657_v15 = vpop.permute.xlu1 %656  ;;  %v659_v54 = vpop.permute.xlu0 %658 }
 0x13e   : > { %v693_v56 = vsel %vm668_vm8, %v657_v15, %v659_v54  ;;  %v694_v62 = vsel %vm668_vm8, %v659_v54, %v1456_v43  ;;  %v643_v44 = vpop.permute.xlu2 %642 }
 0x13f   : > { %766 = vmatpush.bf16.msra.mxu1 %v693_v56  ;;  %792 = vmatpush.bf16.msra.mxu3 %v694_v62 }
 0x143   : > { %793 = vmatpush.bf16.msra.mxu3 %v692_v48 }
 0x145   : > { %v629_v52 = vpop.permute.xlu0 %628 }
 0x146   : > { %v647_v55 = vpop.permute.xlu1 %646  ;;  %v684_v50 = vsel %vm668_vm8, %v629_v52, %v1461_v13  ;;  %v611_v1 = vpop.permute.xlu2 %610 }
 0x147   : > { %776 = vmatpush.bf16.msra.mxu2 %v684_v50  ;;  %v690_v47 = vsel %vm668_vm8, %v647_v55, %v1463_v16 }
 0x148   : > { %794 = vmatpush.bf16.msra.mxu3 %v690_v47 }
 0x14d   : > { %v625_v35 = vpop.permute.xlu0 %624 }
 0x14e   : > { %v651_v9 = vpop.permute.xlu1 %650  ;;  %v682_v28 = vsel %vm668_vm8, %v623_v14, %v625_v35  ;;  %v637_v10 = vpop.permute.xlu2 %636 }
 0x14f   : > { %777 = vmatpush.bf16.msra.mxu2 %v682_v28  ;;  %v691_v32 = vsel %vm668_vm8, %v651_v9, %v653_v42  ;;  %v531_v28 = vld [vmem:[%s185_s5] sm:$0xff] }
 0x150   : > { %767 = vmatpush.bf16.msra.mxu1 %v691_v32 }
 0x155   : > { %v627_v6 = vpop.permute.xlu0 %626 }
 0x156   : > { %v641_v8 = vpop.permute.xlu1 %640  ;;  %v683_v36 = vsel %vm668_vm8, %v627_v6, %v629_v52  ;;  %v605_v20 = vpop.permute.xlu2 %604  ;;  %v532_v52 = vld [vmem:[%s185_s5 + $0x8] sm:$0xf]  ;;  %v533_v6 = vunpack.c.l.bf16 %v531_v28 }
 0x157   : > { %750 = vmatpush.bf16.msra.mxu0 %v683_v36  ;;  %v688_v25 = vsel %vm668_vm8, %v641_v8, %v643_v44  ;;  %v535_v50 = vunpack.c.l.bf16 %v532_v52 }
 0x158   : > { %795 = vmatpush.bf16.msra.mxu3 %v688_v25 }
 0x15d   : > { %v619_v27 = vpop.permute.xlu0 %618 }
 0x15e   : > { %v645_v26 = vpop.permute.xlu1 %644  ;;  %v680_v53 = vsel %vm668_vm8, %v1472_v12, %v619_v27  ;;  %v633_v19 = vpop.permute.xlu2 %632 }
 0x15f   : > { %778 = vmatpush.bf16.msra.mxu2 %v680_v53  ;;  %v689_v2 = vsel %vm668_vm8, %v645_v26, %v647_v55 }
 0x160   : > { %768 = vmatpush.bf16.msra.mxu1 %v689_v2 }
 0x165   : > { %v621_v22 = vpop.permute.xlu0 %620 }
 0x166   : > { %v635_v23 = vpop.permute.xlu1 %634  ;;  %v681_v29 = vsel %vm668_vm8, %v621_v22, %v623_v14  ;;  %v603_v59 = vpop.permute.xlu2 %602 }
 0x167   : > { %751 = vmatpush.bf16.msra.mxu0 %v681_v29  ;;  %v686_v39 = vsel %vm668_vm8, %v635_v23, %v637_v10  ;;  %v685_v33 = vsel %vm668_vm8, %v633_v19, %v635_v23  ;;  %v675_v37 = vsel %vm668_vm8, %v603_v59, %v605_v20 }
 0x168   : > { %796 = vmatpush.bf16.msra.mxu3 %v686_v39 }
 0x16b   : > { %909 = vmatmul.msk.bf16.vlgmr.msra.gmra.mxu3 %vm736_vm10, %v540_v51 }
 0x16c   : > { %817 = vmatpush.bf16.msrb.mxu3 %v748_v24 }
 0x16d   : > { %v613_v38 = vpop.permute.xlu0 %612 }
 0x16e   : > { %v639_v0 = vpop.permute.xlu1 %638  ;;  %v678_v63 = vsel %vm668_vm8, %v611_v1, %v613_v38  ;;  %v597_v34 = vpop.permute.xlu2 %596 }
 0x16f   : > { %779 = vmatpush.bf16.msra.mxu2 %v678_v63  ;;  %v687_v58 = vsel %vm668_vm8, %v639_v0, %v641_v8 }
 0x170   : > { %818 = vmatpush.bf16.msrb.mxu3 %v1456_v43  ;;  %769 = vmatpush.bf16.msra.mxu1 %v687_v58 }
 0x174   : > { %819 = vmatpush.bf16.msrb.mxu3 %v1465_v46  ;;  %770 = vmatpush.bf16.msra.mxu1 %v685_v33 }
 0x175   : > { %v615_v60 = vpop.permute.xlu0 %614 }
 0x176   : > { %v609_v17 = vpop.permute.xlu1 %608  ;;  %v679_v21 = vsel %vm668_vm8, %v615_v60, %v1472_v12  ;;  %v591_v14 = vpop.permute.xlu2 %590 }
 0x177   : > { %752 = vmatpush.bf16.msra.mxu0 %v679_v21  ;;  %908 = vmatmul.msk.bf16.vlgmr.msra.gmra.mxu1 %vm736_vm10, %v540_v51  ;;  %v677_v31 = vsel %vm668_vm8, %v609_v17, %v611_v1  ;;  %v534_v1 = vunpack.c.h.bf16 %v531_v28 }
 0x178   : > { %820 = vmatpush.bf16.msrb.mxu3 %v1463_v16  ;;  %802 = vmatpush.bf16.msrb.mxu1 %v1461_v13 }
 0x17b   : > { %753 = vmatpush.bf16.msra.mxu0 %v677_v31 }
 0x17c   : > { %803 = vmatpush.bf16.msrb.mxu1 %v625_v35  ;;  %821 = vmatpush.bf16.msrb.mxu3 %v643_v44 }
 0x17d   : > { %v607_v57 = vpop.permute.xlu0 %606 }
 0x17e   : > { %v601_v61 = vpop.permute.xlu1 %600  ;;  %v676_v11 = vsel %vm668_vm8, %v605_v20, %v607_v57 }
 0x17f   : > { %754 = vmatpush.bf16.msra.mxu0 %v675_v37  ;;  %780 = vmatpush.bf16.msra.mxu2 %v676_v11 }
 0x180   : > { %822 = vmatpush.bf16.msrb.mxu3 %v637_v10  ;;  %804 = vmatpush.bf16.msrb.mxu1 %v619_v27 }
 0x183   : > { %910 = vmatmul.msk.bf16.vlgmr.msrb.gmra.mxu3 %vm736_vm10, %v540_v51 }
 0x184   : > { %805 = vmatpush.bf16.msrb.mxu1 %v613_v38 }
 0x185   : > { %v599_v41 = vpop.permute.xlu0 %598 }
 0x186   : > { %v595_v42 = vpop.permute.xlu1 %594  ;;  %v673_v30 = vsel %vm668_vm8, %v597_v34, %v599_v41  ;;  %v674_v43 = vsel %vm668_vm8, %v599_v41, %v601_v61 }
 0x187   : > { %755 = vmatpush.bf16.msra.mxu0 %v673_v30  ;;  %781 = vmatpush.bf16.msra.mxu2 %v674_v43 }
 0x188   : > { %806 = vmatpush.bf16.msrb.mxu1 %v607_v57 }
 0x18c   : > { %807 = vmatpush.bf16.msrb.mxu1 %v601_v61 }
 0x18d   : > { %v593_v13 = vpop.permute.xlu0 %592 }
 0x18e   : > { %v671_v16 = vsel %vm668_vm8, %v591_v14, %v593_v13  ;;  %v672_v45 = vsel %vm668_vm8, %v593_v13, %v595_v42  ;;  %v589_v46 = vpop.permute.xlu1 %588 }
 0x18f   : > { %756 = vmatpush.bf16.msra.mxu0 %v671_v16  ;;  %782 = vmatpush.bf16.msra.mxu2 %v672_v45 }
 0x190   : > { %808 = vmatpush.bf16.msrb.mxu1 %v595_v42 }
 0x194   : > { %809 = vmatpush.bf16.msrb.mxu1 %v589_v46 }
 0x195   : > { %v587_v7 = vpop.permute.xlu0 %586 }
 0x196   : > { %v670_v40 = vsel %vm668_vm8, %v587_v7, %v589_v46 }
 0x197   : > { %810 = vmatmul.bf16.vlgmr.msrb.gmra.mxu1 %v539_v3  ;;  %783 = vmatpush.bf16.msra.mxu2 %v670_v40 }
 0x19a   : > { %784 = vmatmul.bf16.vlgmr.msra.gmra.mxu2 %v539_v3 }
 0x19d   : > { %v585_v5 = vpop.permute.xlu0 %584 }
 0x19e   : > { %v669_v15 = vsel %vm668_vm8, %v585_v5, %v587_v7 }
 0x19f   : > { %757 = vmatpush.bf16.msra.mxu0 %v669_v15 }
 0x1a2   : > { %758 = vmatmul.bf16.vlgmr.msra.gmra.mxu0 %v539_v3 }
 0x1ee   : > { %v798_v12 = vpop.f32.mrf.mxu3 }
 0x1f4   : > { %v772_v54 = vpop.f32.mrf.mxu1 }
 0x1f6   : > { %v800_v56 = vpop.f32.mrf.mxu3 }
 0x1fc   : > { %v774_v62 = vpop.f32.mrf.mxu1 }
 0x206   : > { %v824_v48 = vpop.f32.mrf.mxu3 }
 0x20e   : > { %v826_v55 = vpop.f32.mrf.mxu3 }
 0x214   : > { %v811_v44 = vpop.f32.mrf.mxu1 }
 0x215   : > { %v812_v47 = vadd.f32 %v811_v44, %v535_v50 }
 0x217   : > { %v825_v35 = vadd.f32 %v824_v48, %v812_v47 }
 0x219   : > { %v829_v9 = vpack.c.bf16 %v825_v35, %v825_v35 }
 0x21b   : > { %832 = vst.msk [vmem:[%s190_s8 + $0x8] sm:$0xf] %vm831_vm11, %v829_v9 }
 0x21c   : > { %v813_v32 = vpop.f32.mrf.mxu1 }
 0x21d   : > { %v785_v8 = vpop.f32.mrf.mxu2 }
 0x21e   : > { %v786_v36 = vadd.f32 %v785_v8, %v534_v1 }
 0x21f   : > { %v759_v25 = vpop.f32.mrf.mxu0 }
 0x220   : > { %v760_v10 = vadd.f32 %v759_v25, %v533_v6  ;;  %v799_v27 = vadd.f32 %v798_v12, %v786_v36 }
 0x222   : > { %v773_v26 = vadd.f32 %v772_v54, %v760_v10 }
 0x224   : > { %v828_v53 = vpack.c.bf16 %v799_v27, %v773_v26 }
 0x225   : > { %v787_v2 = vpop.f32.mrf.mxu2 }
 0x226   : > { %830 = vst [vmem:[%s190_s8] sm:$0xff] %v828_v53 }
 0x227   : > { %v761_v49 = vpop.f32.mrf.mxu0 }
 0x228 PF: > { %s13_s12 = sadd.s32 1, %s1098_s12  }
 0x229   : > { %p10_p4 = scmp.ge.s32.totalorder %s13_s12, 6  }
 0x22b   :  { %12 = sbr.rel (!%p10_p4) target bundleno = 1 (0x1), region = 65 }

// kernel: sisr_forward.35
= control target key start
LH: loop header
LB: loop body
LE: loop exit
PB: predicated region body
PF: predicated region fallthrough
CT: control target
= control target key end

     0   :  { %s557_s9 = smov 0   ;;  %s638_s0 = inlined_call_operand.vmem [shape: bf16[4,8,360], index: 0, kind: input, shape index: {}]   ;;  %s639_s1 = inlined_call_operand.vmem [shape: bf16[8,72], index: 1, kind: input, shape index: {}]   ;;  %s640_s2 = inlined_call_operand.vmem [shape: bf16[4,8,288], index: 2, kind: output, shape index: {}]  }
   0x1 LB: > { %s455_s10 = sadd.s32 4294967295, %s531_s9   ;;  %p459_p0 = scmp.ge.s32.totalorder %s531_s9, 1  ;;  %s531_s9 = sphi %s557_s9, %s12_s9  }
   0x2   : > { %p112_p1 = scmp.lt.s32.totalorder %s531_s9, 5 }
   0x4   : > { %p113_p2 = pnand %p459_p0, %p112_p1 }
   0x5   : > { %p134_p3 = scmp.lt.s32.totalorder (!%p113_p2), %s455_s10, 3  ;;  %s533_s15 = smov (!%p113_p2), 92  }
   0x6   : > { %116 = sbr.rel (%p113_p2) target bundleno = 431 (0x1af), region = 28  ;;  %s534_s16 = smov (!%p113_p2), 90  }
   0x7   : > { %s535_s17 = smov (!%p113_p2), 109   ;;  %s536_s18 = smov (!%p113_p2), 91  }
   0x8   : > { %s537_s19 = smov (!%p113_p2), 108   ;;  %s538_s20 = smov (!%p113_p2), 126  }
   0x9   : > { %s539_s21 = smov (!%p113_p2), 110   ;;  %s540_s22 = smov (!%p113_p2), 127  }
   0xa   : > { %s541_s23 = smov (!%p113_p2), 111  }
   0xb   : > { %s642_s10 = smov (!%p134_p3, %s455_s10), 3  ;;  %vm243_vm0 = vcmask 736256   ;;  %vm231_vm1 = vcmask 744448   ;;  %vm219_vm2 = vcmask 752640   ;;  %vm207_vm3 = vcmask 883712  }
   0xc   : > { %s467_s11 = smul.u32 12, %s642_s10  ;;  %vm195_vm4 = vcmask 891904   ;;  %vm183_vm5 = vcmask 900096   ;;  %vm171_vm6 = vcmask 1031168   ;;  %vm159_vm7 = vcmask 1039360  }
   0xd   : > { %vm337_vm8 = vcmask 1043456   ;;  %vm310_vm9 = vcmask 908288   ;;  %vm333_vm10 = vcmask 588800   ;;  %vm398_vm12 = vcmask 257024  }
   0xe   : > { %s138_s14 = scalar_lea.vmem %s638_s0, %s467_s11  ;;  %s143_s28 = scalar_lea.vmem %s640_s2, %s467_s11 }
   0xf   : > { %v573_v0 = vld [vmem:[%s138_s14] sm:$0xff]  ;;  %v575_v1 = vld [vmem:[%s138_s14 + $0x8] sm:$0xf] }
  0x10   : > { %v147_v2 = vunpack.c.l.bf16 %v573_v0  ;;  %v149_v3 = vunpack.c.l.bf16 %v575_v1  ;;  %v584_v5 = vunpack.c.h.bf16 %v573_v0 }
  0x12   : > { %v490_v4 = vpack.i.bf16 %v147_v2, %v149_v3 }
  0x14   : > { %491 = vrot.lane.b32.xlu1 %v490_v4, %s533_s15  ;;  %486 = vrot.lane.b32.xlu0 %v490_v4, %s534_s16 }
  0x15   : > { %501 = vrot.lane.b32.xlu2 %v490_v4, %s535_s17 }
  0x1c   : > { %496 = vrot.lane.b32.xlu1 %v490_v4, %s536_s18  ;;  %239 = vrot.lane.b32.xlu0 %v584_v5, %s534_s16 }
  0x1d   : > { %506 = vrot.lane.b32.xlu2 %v490_v4, %s537_s19 }
  0x24   : > { %227 = vrot.lane.b32.xlu1 %v584_v5, %s536_s18  ;;  %215 = vrot.lane.b32.xlu0 %v584_v5, %s533_s15 }
  0x25   : > { %511 = vrot.lane.b32.xlu2 %v490_v4, %s538_s20 }
  0x2c   : > { %191 = vrot.lane.b32.xlu1 %v584_v5, %s535_s17  ;;  %516 = vrot.lane.b32.xlu0 %v490_v4, %s539_s21 }
  0x2d   : > { %203 = vrot.lane.b32.xlu2 %v584_v5, %s537_s19 }
  0x34   : > { %167 = vrot.lane.b32.xlu1 %v584_v5, %s538_s20  ;;  %521 = vrot.lane.b32.xlu0 %v490_v4, %s540_s22 }
  0x35   : > { %179 = vrot.lane.b32.xlu2 %v584_v5, %s539_s21 }
  0x3c   : > { %155 = vrot.lane.b32.xlu0 %v584_v5, %s540_s22 }
  0x6f   : > { %v502_v6 = vpop.permute.xlu2 %501 }
  0x70   : > { %v503_v23 = vunpack.i.l.bf16 %v502_v6  ;;  %v504_v38 = vunpack.i.h.bf16 %v502_v6 }
  0x77   : > { %v507_v9 = vpop.permute.xlu2 %506 }
  0x78   : > { %v508_v24 = vunpack.i.l.bf16 %v507_v9  ;;  %v509_v36 = vunpack.i.h.bf16 %v507_v9 }
  0x7a   : > { %v258_v35 = vpack.c.bf16 %v508_v24, %v503_v23 }
  0x7f   : > { %v512_v21 = vpop.permute.xlu2 %511 }
  0x80   : > { %v513_v39 = vunpack.i.l.bf16 %v512_v21  ;;  %v514_v52 = vunpack.i.h.bf16 %v512_v21  ;;  %v249_v21 = vld [vmem:[%s639_s1] sm:$0xf] }
  0x86   : > { %v492_v7 = vpop.permute.xlu1 %491  ;;  %v487_v8 = vpop.permute.xlu0 %486 }
  0x87   : > { %v488_v10 = vunpack.i.l.bf16 %v487_v8  ;;  %v489_v12 = vunpack.i.h.bf16 %v487_v8  ;;  %v493_v15 = vunpack.i.l.bf16 %v492_v7  ;;  %v494_v25 = vunpack.i.h.bf16 %v492_v7  ;;  %v204_v37 = vpop.permute.xlu2 %203 }
  0x88   : > { %v208_v40 = vsel %vm207_vm3, %v509_v36, %v204_v37  ;;  %v209_v43 = vsel %vm207_vm3, %v204_v37, %v508_v24 }
  0x89   : > { %v264_v11 = vpack.c.bf16 %v488_v10, %v488_v10 }
  0x8b   : > { %308 = vrot.lane.b32.xlu1 %v264_v11, %s541_s23 }
  0x8e   : > { %v497_v13 = vpop.permute.xlu1 %496  ;;  %v240_v14 = vpop.permute.xlu0 %239 }
  0x8f   : > { %v498_v16 = vunpack.i.l.bf16 %v497_v13  ;;  %v244_v17 = vsel %vm243_vm0, %v489_v12, %v240_v14  ;;  %v245_v18 = vsel %vm243_vm0, %v240_v14, %v488_v10  ;;  %v499_v26 = vunpack.i.h.bf16 %v497_v13  ;;  %v180_v51 = vpop.permute.xlu2 %179 }
  0x90   : > { %v262_v19 = vpack.c.bf16 %v244_v17, %v244_v17  ;;  %v263_v20 = vpack.c.bf16 %v245_v18, %v245_v18 }
  0x91   : > { %v261_v22 = vpack.c.bf16 %v498_v16, %v493_v15 }
  0x92   : > { %304 = vrot.lane.b32.xlu0 %v262_v19, %s541_s23 }
  0x93   : > { %302 = vrot.lane.b32.xlu2 %v261_v22, %s541_s23  ;;  %306 = vrot.lane.b32.xlu1 %v263_v20, %s541_s23 }
  0x96   : > { %v228_v27 = vpop.permute.xlu1 %227  ;;  %v216_v28 = vpop.permute.xlu0 %215 }
  0x97   : > { %v232_v29 = vsel %vm231_vm1, %v499_v26, %v228_v27  ;;  %v233_v30 = vsel %vm231_vm1, %v228_v27, %v498_v16  ;;  %v220_v31 = vsel %vm219_vm2, %v494_v25, %v216_v28  ;;  %v221_v32 = vsel %vm219_vm2, %v216_v28, %v493_v15 }
  0x98   : > { %v259_v33 = vpack.c.bf16 %v232_v29, %v220_v31  ;;  %v260_v34 = vpack.c.bf16 %v233_v30, %v221_v32 }
  0x9a   : > { %298 = vrot.lane.b32.xlu0 %v259_v33, %s541_s23 }
  0x9b   : > { %296 = vrot.lane.b32.xlu2 %v258_v35, %s541_s23  ;;  %300 = vrot.lane.b32.xlu1 %v260_v34, %s541_s23 }
  0x9e   : > { %v192_v41 = vpop.permute.xlu1 %191  ;;  %v517_v42 = vpop.permute.xlu0 %516 }
  0x9f   : > { %v196_v44 = vsel %vm195_vm4, %v504_v38, %v192_v41  ;;  %v197_v45 = vsel %vm195_vm4, %v192_v41, %v503_v23  ;;  %v518_v46 = vunpack.i.l.bf16 %v517_v42  ;;  %v519_v50 = vunpack.i.h.bf16 %v517_v42 }
  0xa0   : > { %v256_v47 = vpack.c.bf16 %v208_v40, %v196_v44  ;;  %v257_v48 = vpack.c.bf16 %v209_v43, %v197_v45 }
  0xa1   : > { %v255_v49 = vpack.c.bf16 %v518_v46, %v513_v39  ;;  %v184_v53 = vsel %vm183_vm5, %v519_v50, %v180_v51  ;;  %v185_v56 = vsel %vm183_vm5, %v180_v51, %v518_v46 }
  0xa2   : > { %292 = vrot.lane.b32.xlu0 %v256_v47, %s541_s23 }
  0xa3   : > { %290 = vrot.lane.b32.xlu2 %v255_v49, %s541_s23  ;;  %294 = vrot.lane.b32.xlu1 %v257_v48, %s541_s23 }
  0xa6   : > { %v168_v54 = vpop.permute.xlu1 %167  ;;  %v522_v55 = vpop.permute.xlu0 %521 }
  0xa7   : > { %v172_v57 = vsel %vm171_vm6, %v514_v52, %v168_v54  ;;  %v173_v58 = vsel %vm171_vm6, %v168_v54, %v513_v39  ;;  %v523_v59 = vunpack.i.l.bf16 %v522_v55  ;;  %v524_v63 = vunpack.i.h.bf16 %v522_v55 }
  0xa8   : > { %v253_v60 = vpack.c.bf16 %v184_v53, %v172_v57  ;;  %v254_v61 = vpack.c.bf16 %v185_v56, %v173_v58 }
  0xa9   : > { %v252_v62 = vpack.c.bf16 %v523_v59, %v149_v3 }
  0xaa   : > { %286 = vrot.lane.b32.xlu0 %v253_v60, %s541_s23 }
  0xab   : > { %284 = vrot.lane.b32.xlu2 %v252_v62, %s541_s23  ;;  %288 = vrot.lane.b32.xlu1 %v254_v61, %s541_s23 }
  0xae   : > { %v156_v4 = vpop.permute.xlu0 %155 }
  0xaf   : > { %v160_v6 = vsel %vm159_vm7, %v524_v63, %v156_v4  ;;  %v161_v7 = vsel %vm159_vm7, %v156_v4, %v523_v59 }
  0xb0   : > { %v250_v8 = vpack.c.bf16 %v160_v6, %v147_v2  ;;  %v251_v9 = vpack.c.bf16 %v161_v7, %v584_v5 }
  0xb2   : > { %282 = vrot.lane.b32.xlu0 %v251_v9, %s541_s23 }
  0xb3   : > { %280 = vrot.lane.b32.xlu2 %v250_v8, %s541_s23 }
  0xed   : > { %v303_v1 = vpop.permute.xlu2 %302 }
  0xf5   : > { %v297_v3 = vpop.permute.xlu2 %296 }
  0xfd   : > { %v309_v10 = vpop.permute.xlu1 %308  ;;  %v291_v13 = vpop.permute.xlu2 %290 }
  0xfe   : > { %v345_v11 = vsel %vm337_vm8, %v309_v10, 0 }
  0xff   : > { %376 = vmatpush.bf16.msra.mxu2 %v345_v11 }
 0x103   : > { %377 = vmatpush.bf16.msra.mxu2 %v303_v1 }
 0x104   : > { %v305_v12 = vpop.permute.xlu0 %304 }
 0x105   : > { %v307_v14 = vpop.permute.xlu1 %306  ;;  %v285_v20 = vpop.permute.xlu2 %284 }
 0x106   : > { %v319_v0 = vsel %vm310_vm9, %v305_v12, %v307_v14  ;;  %v320_v2 = vsel %vm310_vm9, %v307_v14, %v309_v10 }
 0x107   : > { %378 = vmatpush.bf16.msra.mxu2 %v297_v3  ;;  %v339_v5 = vsel %vm337_vm8, %v319_v0, 0  ;;  %v342_v15 = vsel %vm337_vm8, %v320_v2, 0 }
 0x108   : > { %350 = vmatpush.bf16.msra.mxu0 %v339_v5  ;;  %363 = vmatpush.bf16.msra.mxu1 %v342_v15 }
 0x10b   : > { %379 = vmatpush.bf16.msra.mxu2 %v291_v13 }
 0x10c   : > { %v299_v16 = vpop.permute.xlu0 %298 }
 0x10d   : > { %v301_v17 = vpop.permute.xlu1 %300  ;;  %v281_v30 = vpop.permute.xlu2 %280 }
 0x10e   : > { %v317_v18 = vsel %vm310_vm9, %v299_v16, %v301_v17  ;;  %v318_v19 = vsel %vm310_vm9, %v301_v17, %v303_v1 }
 0x10f   : > { %351 = vmatpush.bf16.msra.mxu0 %v317_v18  ;;  %364 = vmatpush.bf16.msra.mxu1 %v318_v19 }
 0x110   : > { %380 = vmatpush.bf16.msra.mxu2 %v285_v20 }
 0x113   : > { %464 = vmatmul.msk.bf16.vlgmr.msra.gmra.mxu2 %vm333_vm10, %v249_v21 }
 0x114   : > { %v293_v22 = vpop.permute.xlu0 %292 }
 0x115   : > { %v295_v23 = vpop.permute.xlu1 %294 }
 0x116   : > { %v315_v24 = vsel %vm310_vm9, %v293_v22, %v295_v23  ;;  %v316_v25 = vsel %vm310_vm9, %v295_v23, %v297_v3 }
 0x117   : > { %352 = vmatpush.bf16.msra.mxu0 %v315_v24  ;;  %365 = vmatpush.bf16.msra.mxu1 %v316_v25 }
 0x11c   : > { %v287_v26 = vpop.permute.xlu0 %286 }
 0x11d   : > { %v289_v27 = vpop.permute.xlu1 %288 }
 0x11e   : > { %v313_v28 = vsel %vm310_vm9, %v287_v26, %v289_v27  ;;  %v314_v29 = vsel %vm310_vm9, %v289_v27, %v291_v13 }
 0x11f   : > { %353 = vmatpush.bf16.msra.mxu0 %v313_v28  ;;  %366 = vmatpush.bf16.msra.mxu1 %v314_v29 }
 0x124   : > { %v283_v31 = vpop.permute.xlu0 %282 }
 0x125   : > { %v311_v32 = vsel %vm310_vm9, %v281_v30, %v283_v31  ;;  %v312_v33 = vsel %vm310_vm9, %v283_v31, %v285_v20 }
 0x126   : > { %354 = vmatpush.bf16.msra.mxu0 %v311_v32  ;;  %367 = vmatpush.bf16.msra.mxu1 %v312_v33 }
 0x129   : > { %462 = vmatmul.msk.bf16.vlgmr.msra.gmra.mxu0 %vm333_vm10, %v249_v21  ;;  %463 = vmatmul.msk.bf16.vlgmr.msra.gmra.mxu1 %vm333_vm10, %v249_v21 }
 0x196   : > { %v382_v34 = vpop.f32.mrf.mxu2 }
 0x197   : > { %vm388_vm11 = vcmp.ge.f32.partialorder %v382_v34, 0.0  ;;  %v391_v35 = vmul.f32 0.1, %v382_v34 }
 0x199   : > { %v394_v36 = vsel %vm388_vm11, %v382_v34, %v391_v35 }
 0x19a   : > { %v396_v37 = vpack.c.bf16 %v394_v36, %v394_v36 }
 0x19c   : > { %399 = vst.msk [vmem:[%s143_s28 + $0x8] sm:$0xf] %vm398_vm12, %v396_v37 }
 0x19e   : > { %v384_v38 = vpop.f32.mrf.mxu2 }
 0x1a6   : > { %v356_v39 = vpop.f32.mrf.mxu0  ;;  %v369_v40 = vpop.f32.mrf.mxu1 }
 0x1a7   : > { %vm386_vm13 = vcmp.ge.f32.partialorder %v356_v39, 0.0  ;;  %v389_v41 = vmul.f32 0.1, %v356_v39  ;;  %vm387_vm14 = vcmp.ge.f32.partialorder %v369_v40, 0.0  ;;  %v390_v42 = vmul.f32 0.1, %v369_v40 }
 0x1a9   : > { %v392_v43 = vsel %vm386_vm13, %v356_v39, %v389_v41  ;;  %v393_v44 = vsel %vm387_vm14, %v369_v40, %v390_v42 }
 0x1aa   : > { %v395_v45 = vpack.c.bf16 %v393_v44, %v392_v43 }
 0x1ac   : > { %397 = vst [vmem:[%s143_s28] sm:$0xff] %v395_v45 }
 0x1ae   : > { %v358_v46 = vpop.f32.mrf.mxu0  ;;  %v371_v47 = vpop.f32.mrf.mxu1 }
 0x1af PF: > { %s12_s9 = sadd.s32 1, %s531_s9  }
 0x1b0   : > { %p9_p4 = scmp.ge.s32.totalorder %s12_s9, 6  }
 0x1b2   :  { %11 = sbr.rel (!%p9_p4) target bundleno = 1 (0x1), region = 58 }

// kernel: sisr_forward.36
= control target key start
LH: loop header
LB: loop body
LE: loop exit
PB: predicated region body
PF: predicated region fallthrough
CT: control target
= control target key end

     0   :  { %s618_s12 = smov 0   ;;  %s700_s0 = inlined_call_operand.vmem [shape: bf16[4,8,360], index: 0, kind: input, shape index: {}]   ;;  %s701_s1 = inlined_call_operand.vmem [shape: bf16[8,72], index: 1, kind: input, shape index: {}]   ;;  %s702_s2 = inlined_call_operand.vmem [shape: bf16[4,8,288], index: 2, kind: input, shape index: {}]   ;;  %s703_s3 = inlined_call_operand.vmem [shape: bf16[4,8,288], index: 3, kind: output, shape index: {}]  }
   0x1 LB: > { %s510_s13 = sadd.s32 4294967295, %s587_s12   ;;  %p514_p0 = scmp.ge.s32.totalorder %s587_s12, 1  ;;  %s587_s12 = sphi %s618_s12, %s13_s12  }
   0x2   : > { %p147_p1 = scmp.lt.s32.totalorder %s587_s12, 5 }
   0x4   : > { %p148_p2 = pnand %p514_p0, %p147_p1 }
   0x5   : > { %p176_p3 = scmp.lt.s32.totalorder (!%p148_p2), %s510_s13, 3  ;;  %s589_s18 = smov (!%p148_p2), 92  }
   0x6   : > { %151 = sbr.rel (%p148_p2) target bundleno = 431 (0x1af), region = 32  ;;  %s590_s19 = smov (!%p148_p2), 90  }
   0x7   : > { %s591_s20 = smov (!%p148_p2), 109   ;;  %s592_s21 = smov (!%p148_p2), 91  }
   0x8   : > { %s593_s22 = smov (!%p148_p2), 108   ;;  %s594_s23 = smov (!%p148_p2), 126  }
   0x9   : > { %s595_s24 = smov (!%p148_p2), 110   ;;  %s596_s25 = smov (!%p148_p2), 127  }
   0xa   : > { %s597_s26 = smov (!%p148_p2), 111  }
   0xb   : > { %s705_s13 = smov (!%p176_p3, %s510_s13), 3  ;;  %vm290_vm0 = vcmask 736256   ;;  %vm278_vm1 = vcmask 744448   ;;  %vm266_vm2 = vcmask 752640   ;;  %vm254_vm3 = vcmask 883712  }
   0xc   : > { %s626_s14 = smul.u32 12, %s705_s13  ;;  %vm242_vm4 = vcmask 891904   ;;  %vm230_vm5 = vcmask 900096   ;;  %vm218_vm6 = vcmask 1031168   ;;  %vm206_vm7 = vcmask 1039360  }
   0xd   : > { %vm389_vm8 = vcmask 1043456   ;;  %vm362_vm9 = vcmask 908288   ;;  %vm385_vm10 = vcmask 588800   ;;  %vm441_vm11 = vcmask 257024  }
   0xe   : > { %s180_s17 = scalar_lea.vmem %s700_s0, %s626_s14  ;;  %s185_s4 = scalar_lea.vmem %s702_s2, %s626_s14 }
   0xf   : > { %v632_v0 = vld [vmem:[%s180_s17] sm:$0xff]  ;;  %v634_v1 = vld [vmem:[%s180_s17 + $0x8] sm:$0xf]  ;;  %s190_s7 = scalar_lea.vmem %s703_s3, %s626_s14 }
  0x10   : > { %v194_v2 = vunpack.c.l.bf16 %v632_v0  ;;  %v196_v3 = vunpack.c.l.bf16 %v634_v1  ;;  %v643_v5 = vunpack.c.h.bf16 %v632_v0 }
  0x12   : > { %v546_v4 = vpack.i.bf16 %v194_v2, %v196_v3 }
  0x14   : > { %547 = vrot.lane.b32.xlu1 %v546_v4, %s589_s18  ;;  %542 = vrot.lane.b32.xlu0 %v546_v4, %s590_s19 }
  0x15   : > { %557 = vrot.lane.b32.xlu2 %v546_v4, %s591_s20 }
  0x1c   : > { %552 = vrot.lane.b32.xlu1 %v546_v4, %s592_s21  ;;  %286 = vrot.lane.b32.xlu0 %v643_v5, %s590_s19 }
  0x1d   : > { %562 = vrot.lane.b32.xlu2 %v546_v4, %s593_s22 }
  0x24   : > { %274 = vrot.lane.b32.xlu1 %v643_v5, %s592_s21  ;;  %262 = vrot.lane.b32.xlu0 %v643_v5, %s589_s18 }
  0x25   : > { %567 = vrot.lane.b32.xlu2 %v546_v4, %s594_s23 }
  0x2c   : > { %238 = vrot.lane.b32.xlu1 %v643_v5, %s591_s20  ;;  %572 = vrot.lane.b32.xlu0 %v546_v4, %s595_s24 }
  0x2d   : > { %250 = vrot.lane.b32.xlu2 %v643_v5, %s593_s22 }
  0x34   : > { %214 = vrot.lane.b32.xlu1 %v643_v5, %s594_s23  ;;  %577 = vrot.lane.b32.xlu0 %v546_v4, %s596_s25 }
  0x35   : > { %226 = vrot.lane.b32.xlu2 %v643_v5, %s595_s24 }
  0x3c   : > { %202 = vrot.lane.b32.xlu0 %v643_v5, %s596_s25 }
  0x6f   : > { %v558_v6 = vpop.permute.xlu2 %557 }
  0x70   : > { %v559_v23 = vunpack.i.l.bf16 %v558_v6  ;;  %v560_v38 = vunpack.i.h.bf16 %v558_v6 }
  0x77   : > { %v563_v9 = vpop.permute.xlu2 %562 }
  0x78   : > { %v564_v24 = vunpack.i.l.bf16 %v563_v9  ;;  %v565_v36 = vunpack.i.h.bf16 %v563_v9 }
  0x7a   : > { %v305_v35 = vpack.c.bf16 %v564_v24, %v559_v23 }
  0x7f   : > { %v568_v21 = vpop.permute.xlu2 %567 }
  0x80   : > { %v569_v39 = vunpack.i.l.bf16 %v568_v21  ;;  %v570_v52 = vunpack.i.h.bf16 %v568_v21  ;;  %v296_v21 = vld [vmem:[%s701_s1] sm:$0xf] }
  0x86   : > { %v548_v7 = vpop.permute.xlu1 %547  ;;  %v543_v8 = vpop.permute.xlu0 %542 }
  0x87   : > { %v544_v10 = vunpack.i.l.bf16 %v543_v8  ;;  %v545_v12 = vunpack.i.h.bf16 %v543_v8  ;;  %v549_v15 = vunpack.i.l.bf16 %v548_v7  ;;  %v550_v25 = vunpack.i.h.bf16 %v548_v7  ;;  %v251_v37 = vpop.permute.xlu2 %250 }
  0x88   : > { %v255_v40 = vsel %vm254_vm3, %v565_v36, %v251_v37  ;;  %v256_v43 = vsel %vm254_vm3, %v251_v37, %v564_v24 }
  0x89   : > { %v311_v11 = vpack.c.bf16 %v544_v10, %v544_v10 }
  0x8b   : > { %360 = vrot.lane.b32.xlu1 %v311_v11, %s597_s26 }
  0x8e   : > { %v553_v13 = vpop.permute.xlu1 %552  ;;  %v287_v14 = vpop.permute.xlu0 %286 }
  0x8f   : > { %v554_v16 = vunpack.i.l.bf16 %v553_v13  ;;  %v291_v17 = vsel %vm290_vm0, %v545_v12, %v287_v14  ;;  %v292_v18 = vsel %vm290_vm0, %v287_v14, %v544_v10  ;;  %v555_v26 = vunpack.i.h.bf16 %v553_v13  ;;  %v227_v51 = vpop.permute.xlu2 %226 }
  0x90   : > { %v309_v19 = vpack.c.bf16 %v291_v17, %v291_v17  ;;  %v310_v20 = vpack.c.bf16 %v292_v18, %v292_v18 }
  0x91   : > { %v308_v22 = vpack.c.bf16 %v554_v16, %v549_v15 }
  0x92   : > { %356 = vrot.lane.b32.xlu0 %v309_v19, %s597_s26 }
  0x93   : > { %354 = vrot.lane.b32.xlu2 %v308_v22, %s597_s26  ;;  %358 = vrot.lane.b32.xlu1 %v310_v20, %s597_s26 }
  0x96   : > { %v275_v27 = vpop.permute.xlu1 %274  ;;  %v263_v28 = vpop.permute.xlu0 %262 }
  0x97   : > { %v279_v29 = vsel %vm278_vm1, %v555_v26, %v275_v27  ;;  %v280_v30 = vsel %vm278_vm1, %v275_v27, %v554_v16  ;;  %v267_v31 = vsel %vm266_vm2, %v550_v25, %v263_v28  ;;  %v268_v32 = vsel %vm266_vm2, %v263_v28, %v549_v15 }
  0x98   : > { %v306_v33 = vpack.c.bf16 %v279_v29, %v267_v31  ;;  %v307_v34 = vpack.c.bf16 %v280_v30, %v268_v32 }
  0x9a   : > { %350 = vrot.lane.b32.xlu0 %v306_v33, %s597_s26 }
  0x9b   : > { %348 = vrot.lane.b32.xlu2 %v305_v35, %s597_s26  ;;  %352 = vrot.lane.b32.xlu1 %v307_v34, %s597_s26  ;;  %v313_v34 = vld [vmem:[%s185_s4 + $0x8] sm:$0xf] }
  0x9c   : > { %v316_v35 = vunpack.c.l.bf16 %v313_v34 }
  0x9e   : > { %v239_v41 = vpop.permute.xlu1 %238  ;;  %v573_v42 = vpop.permute.xlu0 %572 }
  0x9f   : > { %v243_v44 = vsel %vm242_vm4, %v560_v38, %v239_v41  ;;  %v244_v45 = vsel %vm242_vm4, %v239_v41, %v559_v23  ;;  %v574_v46 = vunpack.i.l.bf16 %v573_v42  ;;  %v575_v50 = vunpack.i.h.bf16 %v573_v42 }
  0xa0   : > { %v303_v47 = vpack.c.bf16 %v255_v40, %v243_v44  ;;  %v304_v48 = vpack.c.bf16 %v256_v43, %v244_v45  ;;  %v312_v40 = vld [vmem:[%s185_s4] sm:$0xff] }
  0xa1   : > { %v302_v49 = vpack.c.bf16 %v574_v46, %v569_v39  ;;  %v231_v53 = vsel %vm230_vm5, %v575_v50, %v227_v51  ;;  %v232_v56 = vsel %vm230_vm5, %v227_v51, %v574_v46  ;;  %v314_v41 = vunpack.c.l.bf16 %v312_v40 }
  0xa2   : > { %344 = vrot.lane.b32.xlu0 %v303_v47, %s597_s26  ;;  %v315_v42 = vunpack.c.h.bf16 %v312_v40 }
  0xa3   : > { %342 = vrot.lane.b32.xlu2 %v302_v49, %s597_s26  ;;  %346 = vrot.lane.b32.xlu1 %v304_v48, %s597_s26 }
  0xa6   : > { %v215_v54 = vpop.permute.xlu1 %214  ;;  %v578_v55 = vpop.permute.xlu0 %577 }
  0xa7   : > { %v219_v57 = vsel %vm218_vm6, %v570_v52, %v215_v54  ;;  %v220_v58 = vsel %vm218_vm6, %v215_v54, %v569_v39  ;;  %v579_v59 = vunpack.i.l.bf16 %v578_v55  ;;  %v580_v63 = vunpack.i.h.bf16 %v578_v55 }
  0xa8   : > { %v300_v60 = vpack.c.bf16 %v231_v53, %v219_v57  ;;  %v301_v61 = vpack.c.bf16 %v232_v56, %v220_v58 }
  0xa9   : > { %v299_v62 = vpack.c.bf16 %v579_v59, %v196_v3 }
  0xaa   : > { %338 = vrot.lane.b32.xlu0 %v300_v60, %s597_s26 }
  0xab   : > { %336 = vrot.lane.b32.xlu2 %v299_v62, %s597_s26  ;;  %340 = vrot.lane.b32.xlu1 %v301_v61, %s597_s26 }
  0xae   : > { %v203_v4 = vpop.permute.xlu0 %202 }
  0xaf   : > { %v207_v6 = vsel %vm206_vm7, %v580_v63, %v203_v4  ;;  %v208_v7 = vsel %vm206_vm7, %v203_v4, %v579_v59 }
  0xb0   : > { %v297_v8 = vpack.c.bf16 %v207_v6, %v194_v2  ;;  %v298_v9 = vpack.c.bf16 %v208_v7, %v643_v5 }
  0xb2   : > { %334 = vrot.lane.b32.xlu0 %v298_v9, %s597_s26 }
  0xb3   : > { %332 = vrot.lane.b32.xlu2 %v297_v8, %s597_s26 }
  0xed   : > { %v355_v1 = vpop.permute.xlu2 %354 }
  0xf5   : > { %v349_v3 = vpop.permute.xlu2 %348 }
  0xfd   : > { %v361_v10 = vpop.permute.xlu1 %360  ;;  %v343_v13 = vpop.permute.xlu2 %342 }
  0xfe   : > { %v397_v11 = vsel %vm389_vm8, %v361_v10, 0 }
  0xff   : > { %428 = vmatpush.bf16.msra.mxu2 %v397_v11 }
 0x103   : > { %429 = vmatpush.bf16.msra.mxu2 %v355_v1 }
 0x104   : > { %v357_v12 = vpop.permute.xlu0 %356 }
 0x105   : > { %v359_v14 = vpop.permute.xlu1 %358  ;;  %v337_v20 = vpop.permute.xlu2 %336 }
 0x106   : > { %v371_v0 = vsel %vm362_vm9, %v357_v12, %v359_v14  ;;  %v372_v2 = vsel %vm362_vm9, %v359_v14, %v361_v10 }
 0x107   : > { %430 = vmatpush.bf16.msra.mxu2 %v349_v3  ;;  %v391_v5 = vsel %vm389_vm8, %v371_v0, 0  ;;  %v394_v15 = vsel %vm389_vm8, %v372_v2, 0 }
 0x108   : > { %402 = vmatpush.bf16.msra.mxu0 %v391_v5  ;;  %415 = vmatpush.bf16.msra.mxu1 %v394_v15 }
 0x10b   : > { %431 = vmatpush.bf16.msra.mxu2 %v343_v13 }
 0x10c   : > { %v351_v16 = vpop.permute.xlu0 %350 }
 0x10d   : > { %v353_v17 = vpop.permute.xlu1 %352  ;;  %v333_v30 = vpop.permute.xlu2 %332 }
 0x10e   : > { %v369_v18 = vsel %vm362_vm9, %v351_v16, %v353_v17  ;;  %v370_v19 = vsel %vm362_vm9, %v353_v17, %v355_v1 }
 0x10f   : > { %403 = vmatpush.bf16.msra.mxu0 %v369_v18  ;;  %416 = vmatpush.bf16.msra.mxu1 %v370_v19 }
 0x110   : > { %432 = vmatpush.bf16.msra.mxu2 %v337_v20 }
 0x113   : > { %520 = vmatmul.msk.bf16.vlgmr.msra.gmra.mxu2 %vm385_vm10, %v296_v21 }
 0x114   : > { %v345_v22 = vpop.permute.xlu0 %344 }
 0x115   : > { %v347_v23 = vpop.permute.xlu1 %346 }
 0x116   : > { %v367_v24 = vsel %vm362_vm9, %v345_v22, %v347_v23  ;;  %v368_v25 = vsel %vm362_vm9, %v347_v23, %v349_v3 }
 0x117   : > { %404 = vmatpush.bf16.msra.mxu0 %v367_v24  ;;  %417 = vmatpush.bf16.msra.mxu1 %v368_v25 }
 0x11c   : > { %v339_v26 = vpop.permute.xlu0 %338 }
 0x11d   : > { %v341_v27 = vpop.permute.xlu1 %340 }
 0x11e   : > { %v365_v28 = vsel %vm362_vm9, %v339_v26, %v341_v27  ;;  %v366_v29 = vsel %vm362_vm9, %v341_v27, %v343_v13 }
 0x11f   : > { %405 = vmatpush.bf16.msra.mxu0 %v365_v28  ;;  %418 = vmatpush.bf16.msra.mxu1 %v366_v29 }
 0x124   : > { %v335_v31 = vpop.permute.xlu0 %334 }
 0x125   : > { %v363_v32 = vsel %vm362_vm9, %v333_v30, %v335_v31  ;;  %v364_v33 = vsel %vm362_vm9, %v335_v31, %v337_v20 }
 0x126   : > { %406 = vmatpush.bf16.msra.mxu0 %v363_v32  ;;  %419 = vmatpush.bf16.msra.mxu1 %v364_v33 }
 0x129   : > { %518 = vmatmul.msk.bf16.vlgmr.msra.gmra.mxu0 %vm385_vm10, %v296_v21  ;;  %519 = vmatmul.msk.bf16.vlgmr.msra.gmra.mxu1 %vm385_vm10, %v296_v21 }
 0x196   : > { %v434_v36 = vpop.f32.mrf.mxu2 }
 0x197   : > { %v435_v37 = vadd.f32 %v434_v36, %v316_v35 }
 0x199   : > { %v439_v38 = vpack.c.bf16 %v435_v37, %v435_v37 }
 0x19b   : > { %442 = vst.msk [vmem:[%s190_s7 + $0x8] sm:$0xf] %vm441_vm11, %v439_v38 }
 0x19e   : > { %v436_v39 = vpop.f32.mrf.mxu2 }
 0x1a6   : > { %v408_v43 = vpop.f32.mrf.mxu0  ;;  %v421_v44 = vpop.f32.mrf.mxu1 }
 0x1a7   : > { %v409_v45 = vadd.f32 %v408_v43, %v314_v41  ;;  %v422_v46 = vadd.f32 %v421_v44, %v315_v42 }
 0x1a9   : > { %v438_v47 = vpack.c.bf16 %v422_v46, %v409_v45 }
 0x1ab   : > { %440 = vst [vmem:[%s190_s7] sm:$0xff] %v438_v47 }
 0x1ae   : > { %v410_v48 = vpop.f32.mrf.mxu0  ;;  %v423_v49 = vpop.f32.mrf.mxu1 }
 0x1af PF: > { %s13_s12 = sadd.s32 1, %s587_s12  }
 0x1b0   : > { %p10_p4 = scmp.ge.s32.totalorder %s13_s12, 6  }
 0x1b2   :  { %12 = sbr.rel (!%p10_p4) target bundleno = 1 (0x1), region = 65 }

// kernel: sisr_forward.41
= control target key start
LH: loop header
LB: loop body
LE: loop exit
PB: predicated region body
PF: predicated region fallthrough
CT: control target
= control target key end

     0   :  { %s680_s12 = smov 0   ;;  %s811_s0 = inlined_call_operand.vmem [shape: bf16[4,8,360], index: 0, kind: input, shape index: {}]   ;;  %s812_s1 = inlined_call_operand.vmem [shape: bf16[24,72], index: 1, kind: input, shape index: {}]   ;;  %s813_s2 = inlined_call_operand.vmem [shape: f32[24,1], index: 2, kind: input, shape index: {}]   ;;  %s814_s3 = inlined_call_operand.vmem [shape: bf16[4,24,288], index: 3, kind: output, shape index: {}]  }
   0x1 LB: > { %s554_s13 = sadd.s32 4294967295, %s648_s12   ;;  %p558_p0 = scmp.ge.s32.totalorder %s648_s12, 1  ;;  %s648_s12 = sphi %s680_s12, %s13_s12  }
   0x2   : > { %p137_p1 = scmp.lt.s32.totalorder %s648_s12, 5 }
   0x4   : > { %p138_p2 = pnand %p558_p0, %p137_p1 }
   0x5   : > { %p161_p3 = scmp.lt.s32.totalorder (!%p138_p2), %s554_s13, 3  ;;  %s650_s18 = smov (!%p138_p2), 91  }
   0x6   : > { %141 = sbr.rel (%p138_p2) target bundleno = 441 (0x1b9), region = 32  ;;  %s651_s19 = smov (!%p138_p2), 90  }
   0x7   : > { %s652_s20 = smov (!%p138_p2), 108   ;;  %s653_s21 = smov (!%p138_p2), 109  }
   0x8   : > { %s654_s22 = smov (!%p138_p2), 92   ;;  %s655_s23 = smov (!%p138_p2), 110  }
   0x9   : > { %s656_s24 = smov (!%p138_p2), 126   ;;  %s657_s25 = smov (!%p138_p2), 127  }
   0xa   : > { %s658_s26 = smov (!%p138_p2), 111  }
   0xb   : > { %s816_s13 = smov (!%p161_p3, %s554_s13), 3  ;;  %vm270_vm0 = vcmask 736256   ;;  %vm246_vm1 = vcmask 752640   ;;  %vm258_vm2 = vcmask 744448   ;;  %vm222_vm3 = vcmask 891904  }
   0xc   : > { %s579_s14 = smul.u32 12, %s816_s13  ;;  %vm234_vm4 = vcmask 883712   ;;  %vm210_vm5 = vcmask 900096   ;;  %vm198_vm6 = vcmask 1031168   ;;  %vm186_vm7 = vcmask 1039360  }
   0xd   : > { %vm395_vm8 = vcmask 1043456   ;;  %vm365_vm9 = vcmask 908288   ;;  %vm388_vm10 = vcmask 588800   ;;  %s580_s10 = smul.u32 36, %s816_s13  ;;  %vm493_vm12 = vcmask 257024  }
   0xe   : > { %s165_s17 = scalar_lea.vmem %s811_s0, %s579_s14 }
   0xf   : > { %v694_v0 = vld [vmem:[%s165_s17] sm:$0xff]  ;;  %v696_v1 = vld [vmem:[%s165_s17 + $0x8] sm:$0xf]  ;;  %s797_s15 = scalar_lea.vmem %s814_s3, %s580_s10 }
  0x10   : > { %v175_v2 = vunpack.c.h.bf16 %v694_v0  ;;  %v176_v3 = vunpack.c.l.bf16 %v696_v1  ;;  %v705_v5 = vunpack.c.l.bf16 %v694_v0 }
  0x12   : > { %v609_v4 = vpack.i.bf16 %v175_v2, %v176_v3 }
  0x14   : > { %610 = vrot.lane.b32.xlu1 %v609_v4, %s650_s18  ;;  %600 = vrot.lane.b32.xlu0 %v609_v4, %s651_s19 }
  0x15   : > { %620 = vrot.lane.b32.xlu2 %v609_v4, %s652_s20 }
  0x1c   : > { %615 = vrot.lane.b32.xlu1 %v609_v4, %s653_s21  ;;  %605 = vrot.lane.b32.xlu0 %v609_v4, %s654_s22 }
  0x1d   : > { %264 = vrot.lane.b32.xlu2 %v705_v5, %s651_s19 }
  0x24   : > { %630 = vrot.lane.b32.xlu1 %v609_v4, %s655_s23  ;;  %625 = vrot.lane.b32.xlu0 %v609_v4, %s656_s24 }
  0x25   : > { %635 = vrot.lane.b32.xlu2 %v609_v4, %s657_s25 }
  0x2c   : > { %252 = vrot.lane.b32.xlu1 %v705_v5, %s650_s18  ;;  %240 = vrot.lane.b32.xlu0 %v705_v5, %s654_s22 }
  0x2d   : > { %216 = vrot.lane.b32.xlu2 %v705_v5, %s653_s21 }
  0x34   : > { %192 = vrot.lane.b32.xlu1 %v705_v5, %s656_s24  ;;  %228 = vrot.lane.b32.xlu0 %v705_v5, %s652_s20 }
  0x35   : > { %204 = vrot.lane.b32.xlu2 %v705_v5, %s655_s23 }
  0x3c   : > { %180 = vrot.lane.b32.xlu0 %v705_v5, %s657_s25 }
  0x6f   : > { %v715_v6 = vpop.permute.xlu2 %620 }
  0x70   : > { %v622_v14 = vunpack.i.l.bf16 %v715_v6  ;;  %v623_v35 = vunpack.i.h.bf16 %v715_v6 }
  0x72   : > { %v236_v43 = vsel %vm234_vm4, %v623_v35, %v622_v14 }
  0x77   : > { %v265_v17 = vpop.permute.xlu2 %264 }
  0x7f   : > { %v636_v32 = vpop.permute.xlu2 %635 }
  0x80   : > { %v637_v38 = vunpack.i.l.bf16 %v636_v32  ;;  %v638_v49 = vunpack.i.h.bf16 %v636_v32 }
  0x82   : > { %v281_v44 = vpack.c.bf16 %v637_v38, %v176_v3  ;;  %v188_v55 = vsel %vm186_vm7, %v638_v49, %v637_v38 }
  0x83   : > { %v280_v60 = vpack.c.bf16 %v188_v55, %v175_v2 }
  0x86   : > { %v717_v7 = vpop.permute.xlu1 %610  ;;  %v601_v8 = vpop.permute.xlu0 %600 }
  0x87   : > { %v603_v9 = vunpack.i.h.bf16 %v601_v8  ;;  %v602_v10 = vunpack.i.l.bf16 %v601_v8  ;;  %v612_v18 = vunpack.i.l.bf16 %v717_v7  ;;  %v613_v24 = vunpack.i.h.bf16 %v717_v7  ;;  %v217_v51 = vpop.permute.xlu2 %216 }
  0x89   : > { %v293_v11 = vpack.c.bf16 %v602_v10, %v602_v10  ;;  %v272_v12 = vsel %vm270_vm0, %v603_v9, %v602_v10  ;;  %v271_v30 = vsel %vm270_vm0, %v265_v17, %v603_v9  ;;  %v260_v31 = vsel %vm258_vm2, %v613_v24, %v612_v18  ;;  %v294_v17 = vld [vmem:[%s813_s2] sm:$0xff] }
  0x8a   : > { %v292_v13 = vpack.c.bf16 %v272_v12, %v272_v12  ;;  %v291_v37 = vpack.c.bf16 %v271_v30, %v271_v30 }
  0x8b   : > { %363 = vrot.lane.b32.xlu1 %v293_v11, %s658_s26 }
  0x8c   : > { %361 = vrot.lane.b32.xlu0 %v292_v13, %s658_s26 }
  0x8e   : > { %v616_v15 = vpop.permute.xlu1 %615  ;;  %v606_v16 = vpop.permute.xlu0 %605 }
  0x8f   : > { %v617_v19 = vunpack.i.l.bf16 %v616_v15  ;;  %v607_v20 = vunpack.i.l.bf16 %v606_v16  ;;  %v608_v23 = vunpack.i.h.bf16 %v606_v16  ;;  %v618_v36 = vunpack.i.h.bf16 %v616_v15  ;;  %v205_v62 = vpop.permute.xlu2 %204 }
  0x90   : > { %v659_v16 = vmov 0  }
  0x91   : > { %v287_v21 = vpack.c.bf16 %v622_v14, %v617_v19  ;;  %v290_v22 = vpack.c.bf16 %v612_v18, %v607_v20  ;;  %v248_v27 = vsel %vm246_vm1, %v608_v23, %v607_v20  ;;  %v224_v42 = vsel %vm222_vm3, %v618_v36, %v617_v19  ;;  %639 = vset.pattern.permute.xlu1 %v659_v16 }
  0x92   : > { %v289_v34 = vpack.c.bf16 %v260_v31, %v248_v27  ;;  %v286_v48 = vpack.c.bf16 %v236_v43, %v224_v42  ;;  %v223_v56 = vsel %vm222_vm3, %v217_v51, %v618_v36  ;;  %641 = vset.pattern.permute.xlu0 %v659_v16  ;;  %640 = vset.pattern.permute.xlu2 %v659_v16  ;;  %v573_v27 = vld [vmem:[%s812_s1] sm:$0xff] }
  0x93   : > { %351 = vrot.lane.b32.xlu1 %v287_v21, %s658_s26  ;;  %357 = vrot.lane.b32.xlu2 %v290_v22, %s658_s26 }
  0x96   : > { %v631_v25 = vpop.permute.xlu1 %630  ;;  %v626_v26 = vpop.permute.xlu0 %625 }
  0x97   : > { %v632_v28 = vunpack.i.l.bf16 %v631_v25  ;;  %v627_v29 = vunpack.i.l.bf16 %v626_v26  ;;  %v633_v39 = vunpack.i.h.bf16 %v631_v25  ;;  %v628_v40 = vunpack.i.h.bf16 %v626_v26 }
  0x99   : > { %v284_v33 = vpack.c.bf16 %v632_v28, %v627_v29  ;;  %v200_v45 = vsel %vm198_vm6, %v628_v40, %v627_v29  ;;  %v212_v46 = vsel %vm210_vm5, %v633_v39, %v632_v28  ;;  %v211_v4 = vsel %vm210_vm5, %v205_v62, %v633_v39 }
  0x9a   : > { %v283_v50 = vpack.c.bf16 %v212_v46, %v200_v45 }
  0x9b   : > { %345 = vrot.lane.b32.xlu0 %v284_v33, %s658_s26  ;;  %355 = vrot.lane.b32.xlu2 %v289_v34, %s658_s26  ;;  %v278_v33 = vld [vmem:[%s812_s1 + $0x8] sm:$0xf] }
  0x9c   : > { %359 = vrot.lane.b32.xlu1 %v291_v37, %s658_s26 }
  0x9e   : > { %v241_v41 = vpop.permute.xlu0 %240  ;;  %v253_v47 = vpop.permute.xlu1 %252 }
  0x9f   : > { %v259_v52 = vsel %vm258_vm2, %v253_v47, %v613_v24  ;;  %v247_v53 = vsel %vm246_vm1, %v241_v41, %v608_v23  ;;  %v296_v23 = vld [vmem:[%s813_s2 + $0x10] sm:$0xff]  ;;  %v295_v24 = vld [vmem:[%s813_s2 + $0x8] sm:$0xff] }
  0xa0   : > { %v288_v59 = vpack.c.bf16 %v259_v52, %v247_v53 }
  0xa3   : > { %349 = vrot.lane.b32.xlu2 %v286_v48, %s658_s26  ;;  %339 = vrot.lane.b32.xlu0 %v281_v44, %s658_s26 }
  0xa4   : > { %343 = vrot.lane.b32.xlu1 %v283_v50, %s658_s26 }
  0xa6   : > { %v229_v54 = vpop.permute.xlu0 %228  ;;  %v193_v61 = vpop.permute.xlu1 %192 }
  0xa7   : > { %v235_v57 = vsel %vm234_vm4, %v229_v54, %v623_v35  ;;  %v199_v63 = vsel %vm198_vm6, %v193_v61, %v628_v40  ;;  %v317_v35 = vunpack.c.l.b16 %v278_v33 }
  0xa8   : > { %v285_v58 = vpack.c.bf16 %v235_v57, %v223_v56  ;;  %v282_v7 = vpack.c.bf16 %v211_v4, %v199_v63 }
  0xa9   : > { %v319_v39 = vpack.c.b16 %v317_v35, %v317_v35 }
  0xab   : > { %353 = vrot.lane.b32.xlu2 %v288_v59, %s658_s26  ;;  %337 = vrot.lane.b32.xlu0 %v280_v60, %s658_s26 }
  0xac   : > { %347 = vrot.lane.b32.xlu1 %v285_v58, %s658_s26 }
  0xae   : > { %v181_v1 = vpop.permute.xlu0 %180 }
  0xaf   : > { %v187_v3 = vsel %vm186_vm7, %v181_v1, %v638_v49 }
  0xb0   : > { %v279_v6 = vpack.c.bf16 %v187_v3, %v705_v5 }
  0xb3   : > { %341 = vrot.lane.b32.xlu2 %v282_v7, %s658_s26  ;;  %335 = vrot.lane.b32.xlu0 %v279_v6, %s658_s26 }
  0xb4   : > { %299 = vperm.xlu1 %639, %v294_v17  }
  0xbb   : > { %309 = vperm.xlu0 %641, %v296_v23   ;;  %304 = vperm.xlu2 %640, %v295_v24  }
  0xed   : > { %v358_v0 = vpop.permute.xlu2 %357 }
  0xf5   : > { %v356_v2 = vpop.permute.xlu2 %355 }
  0xf6   : > { %v373_v5 = vsel %vm365_vm9, %v356_v2, %v358_v0 }
  0xfd   : > { %v364_v8 = vpop.permute.xlu1 %363  ;;  %v350_v14 = vpop.permute.xlu2 %349 }
  0xfe   : > { %v362_v9 = vpop.permute.xlu0 %361  ;;  %v403_v10 = vsel %vm395_vm8, %v364_v8, 0 }
  0xff   : > { %444 = vmatpush.bf16.msra.mxu2 %v403_v10  ;;  %v375_v11 = vsel %vm365_vm9, %v362_v9, %v364_v8 }
 0x100   : > { %v400_v12 = vsel %vm395_vm8, %v375_v11, 0 }
 0x101   : > { %426 = vmatpush.bf16.msra.mxu1 %v400_v12 }
 0x103   : > { %445 = vmatpush.bf16.msra.mxu2 %v358_v0 }
 0x105   : > { %v352_v13 = vpop.permute.xlu1 %351  ;;  %427 = vmatpush.bf16.msra.mxu1 %v373_v5  ;;  %v354_v22 = vpop.permute.xlu2 %353 }
 0x106   : > { %v371_v15 = vsel %vm365_vm9, %v350_v14, %v352_v13  ;;  %v372_v25 = vsel %vm365_vm9, %v354_v22, %v356_v2 }
 0x107   : > { %446 = vmatpush.bf16.msra.mxu2 %v352_v13 }
 0x109   : > { %428 = vmatpush.bf16.msra.mxu1 %v371_v15 }
 0x10d   : > { %v346_v18 = vpop.permute.xlu0 %345  ;;  %v342_v36 = vpop.permute.xlu2 %341 }
 0x10e   : > { %v360_v19 = vpop.permute.xlu1 %359  ;;  %447 = vmatpush.bf16.msra.mxu2 %v346_v18 }
 0x10f   : > { %v374_v20 = vsel %vm365_vm9, %v360_v19, %v362_v9 }
 0x110   : > { %v397_v21 = vsel %vm395_vm8, %v374_v20, 0 }
 0x111   : > { %408 = vmatpush.bf16.msra.mxu0 %v397_v21  ;;  %574 = vmatpush.bf16.msra.mxu3 %v397_v21 }
 0x115   : > { %409 = vmatpush.bf16.msra.mxu0 %v372_v25  ;;  %575 = vmatpush.bf16.msra.mxu3 %v372_v25  ;;  %v340_v26 = vpop.permute.xlu0 %339  ;;  %v305_v48 = vpop.permute.xlu2 %304 }
 0x116   : > { %v344_v28 = vpop.permute.xlu1 %343  ;;  %448 = vmatpush.bf16.msra.mxu2 %v340_v26 }
 0x117   : > { %v369_v29 = vsel %vm365_vm9, %v344_v28, %v346_v18  ;;  %v368_v37 = vsel %vm365_vm9, %v342_v36, %v344_v28 }
 0x118   : > { %429 = vmatpush.bf16.msra.mxu1 %v369_v29 }
 0x119   : > { %569 = vmatmul.msk.bf16.vlgmr.msra.gmra.mxu2 %vm388_vm10, %v573_v27 }
 0x11d   : > { %v338_v30 = vpop.permute.xlu0 %337 }
 0x11e   : > { %v348_v31 = vpop.permute.xlu1 %347  ;;  %v367_v32 = vsel %vm365_vm9, %v338_v30, %v340_v26 }
 0x11f   : > { %v370_v34 = vsel %vm365_vm9, %v348_v31, %v350_v14  ;;  %430 = vmatpush.bf16.msra.mxu1 %v367_v32 }
 0x120   : > { %410 = vmatpush.bf16.msra.mxu0 %v370_v34  ;;  %576 = vmatpush.bf16.msra.mxu3 %v370_v34 }
 0x122   : > { %567 = vmatmul.msk.bf16.vlgmr.msra.gmra.mxu1 %vm388_vm10, %v573_v27 }
 0x124   : > { %411 = vmatpush.bf16.msra.mxu0 %v368_v37  ;;  %577 = vmatpush.bf16.msra.mxu3 %v368_v37 }
 0x125   : > { %v336_v38 = vpop.permute.xlu0 %335 }
 0x126   : > { %v366_v40 = vsel %vm365_vm9, %v336_v38, %v338_v30  ;;  %v300_v41 = vpop.permute.xlu1 %299 }
 0x128   : > { %412 = vmatpush.bf16.msra.mxu0 %v366_v40  ;;  %578 = vmatpush.bf16.msra.mxu3 %v366_v40 }
 0x129   : > { %570 = vmatmul.msk.bf16.gmra.mxu2 %vm388_vm10, %v319_v39 }
 0x12b   : > { %565 = vmatmul.msk.bf16.vlgmr.msra.gmra.mxu0 %vm388_vm10, %v573_v27  ;;  %566 = vmatmul.msk.bf16.vlgmr.msra.gmra.mxu3 %vm388_vm10, %v319_v39 }
 0x12d   : > { %v310_v59 = vpop.permute.xlu0 %309 }
 0x132   : > { %568 = vmatmul.msk.bf16.gmra.mxu1 %vm388_vm10, %v319_v39 }
 0x19c   : > { %v450_v42 = vpop.f32.mrf.mxu2 }
 0x19d   : > { %v451_v43 = vadd.f32 %v450_v42, %v300_v41 }
 0x19f   : > { %vm461_vm11 = vcmp.ge.f32.partialorder %v451_v43, 0.0  ;;  %v470_v44 = vmul.f32 0.1, %v451_v43  ;;  %v432_v45 = vpop.f32.mrf.mxu1 }
 0x1a0   : > { %v433_v50 = vadd.f32 %v432_v45, %v300_v41 }
 0x1a1   : > { %v479_v46 = vsel %vm461_vm11, %v451_v43, %v470_v44 }
 0x1a2   : > { %v487_v47 = vpack.c.bf16 %v479_v46, %v479_v46  ;;  %v469_v55 = vmul.f32 0.1, %v433_v50  ;;  %vm460_vm14 = vcmp.ge.f32.partialorder %v433_v50, 0.0 }
 0x1a4   : > { %494 = vst.msk [vmem:[%s797_s15 + $0x8] sm:$0xf] %vm493_vm12, %v487_v47  ;;  %v452_v49 = vpop.f32.mrf.mxu2  ;;  %v478_v63 = vsel %vm460_vm14, %v433_v50, %v469_v55 }
 0x1a5   : > { %v453_v51 = vadd.f32 %v452_v49, %v305_v48 }
 0x1a7   : > { %vm464_vm13 = vcmp.ge.f32.partialorder %v453_v51, 0.0  ;;  %v473_v52 = vmul.f32 0.1, %v453_v51  ;;  %v434_v53 = vpop.f32.mrf.mxu1 }
 0x1a8   : > { %v414_v54 = vpop.f32.mrf.mxu0  ;;  %v435_v61 = vadd.f32 %v434_v53, %v305_v48 }
 0x1a9   : > { %v482_v56 = vsel %vm464_vm13, %v453_v51, %v473_v52  ;;  %v415_v57 = vadd.f32 %v414_v54, %v300_v41 }
 0x1aa   : > { %v489_v58 = vpack.c.bf16 %v482_v56, %v482_v56  ;;  %v472_v8 = vmul.f32 0.1, %v435_v61  ;;  %vm463_vm2 = vcmp.ge.f32.partialorder %v435_v61, 0.0 }
 0x1ab   : > { %vm459_vm15 = vcmp.ge.f32.partialorder %v415_v57, 0.0  ;;  %v468_v60 = vmul.f32 0.1, %v415_v57 }
 0x1ac   : > { %496 = vst.msk [vmem:[%s797_s15 + $0x14] sm:$0xf] %vm493_vm12, %v489_v58  ;;  %v455_v62 = vpop.f32.mrf.mxu2  ;;  %v481_v19 = vsel %vm463_vm2, %v435_v61, %v472_v8 }
 0x1ad   : > { %v477_v1 = vsel %vm459_vm15, %v415_v57, %v468_v60  ;;  %v456_v3 = vadd.f32 %v455_v62, %v310_v59 }
 0x1ae   : > { %v486_v4 = vpack.c.bf16 %v478_v63, %v477_v1  ;;  %v419_v6 = vpop.f32.mrf.mxu3 }
 0x1af   : > { %v420_v7 = vadd.f32 %v419_v6, %v310_v59  ;;  %vm467_vm0 = vcmp.ge.f32.partialorder %v456_v3, 0.0  ;;  %v476_v0 = vmul.f32 0.1, %v456_v3  ;;  %v437_v2 = vpop.f32.mrf.mxu1 }
 0x1b0   : > { %492 = vst [vmem:[%s797_s15] sm:$0xff] %v486_v4  ;;  %v416_v9 = vpop.f32.mrf.mxu0  ;;  %v438_v10 = vadd.f32 %v437_v2, %v310_v59 }
 0x1b1   : > { %vm465_vm1 = vcmp.ge.f32.partialorder %v420_v7, 0.0  ;;  %v474_v11 = vmul.f32 0.1, %v420_v7  ;;  %v485_v12 = vsel %vm467_vm0, %v456_v3, %v476_v0  ;;  %v417_v5 = vadd.f32 %v416_v9, %v305_v48 }
 0x1b2   : > { %v491_v13 = vpack.c.bf16 %v485_v12, %v485_v12  ;;  %vm466_vm3 = vcmp.ge.f32.partialorder %v438_v10, 0.0  ;;  %v475_v14 = vmul.f32 0.1, %v438_v10 }
 0x1b3   : > { %vm462_vm4 = vcmp.ge.f32.partialorder %v417_v5, 0.0  ;;  %v471_v15 = vmul.f32 0.1, %v417_v5  ;;  %v483_v16 = vsel %vm465_vm1, %v420_v7, %v474_v11 }
 0x1b4   : > { %498 = vst.msk [vmem:[%s797_s15 + $0x20] sm:$0xf] %vm493_vm12, %v491_v13  ;;  %v484_v17 = vsel %vm466_vm3, %v438_v10, %v475_v14  ;;  %v457_v18 = vpop.f32.mrf.mxu2 }
 0x1b5   : > { %v480_v20 = vsel %vm462_vm4, %v417_v5, %v471_v15  ;;  %v490_v21 = vpack.c.bf16 %v484_v17, %v483_v16 }
 0x1b6   : > { %v488_v22 = vpack.c.bf16 %v481_v19, %v480_v20  ;;  %v421_v23 = vpop.f32.mrf.mxu3 }
 0x1b7   : > { %497 = vst [vmem:[%s797_s15 + $0x18] sm:$0xff] %v490_v21  ;;  %v439_v24 = vpop.f32.mrf.mxu1 }
 0x1b8   : > { %495 = vst [vmem:[%s797_s15 + $0xc] sm:$0xff] %v488_v22 }
 0x1b9 PF: > { %s13_s12 = sadd.s32 1, %s648_s12  }
 0x1ba   : > { %p10_p4 = scmp.ge.s32.totalorder %s13_s12, 6  }
 0x1bc   :  { %12 = sbr.rel (!%p10_p4) target bundleno = 1 (0x1), region = 62 }

// kernel: sisr_forward.42
= control target key start
LH: loop header
LB: loop body
LE: loop exit
PB: predicated region body
PF: predicated region fallthrough
CT: control target
= control target key end

     0   :  { %s1515_s12 = smov 0   ;;  %s2138_s0 = inlined_call_operand.vmem [shape: bf16[4,32,360], index: 0, kind: input, shape index: {}]   ;;  %s2139_s1 = inlined_call_operand.vmem [shape: bf16[24,288], index: 1, kind: input, shape index: {}]   ;;  %s2140_s2 = inlined_call_operand.vmem [shape: f32[24,1], index: 2, kind: input, shape index: {}]   ;;  %s2141_s3 = inlined_call_operand.vmem [shape: bf16[4,24,288], index: 3, kind: output, shape index: {}]  }
   0x1 LB: > { %s1184_s13 = sadd.s32 4294967295, %s1483_s12   ;;  %p1188_p0 = scmp.ge.s32.totalorder %s1483_s12, 1  ;;  %s1483_s12 = sphi %s1515_s12, %s13_s12  }
   0x2   : > { %p137_p1 = scmp.lt.s32.totalorder %s1483_s12, 5 }
   0x4   : > { %p138_p2 = pnand %p1188_p0, %p137_p1 }
   0x6   : > { %141 = sbr.rel (%p138_p2) target bundleno = 651 (0x28b), region = 32 }
   0xb   : > { %p161_p3 = scmp.lt.s32.totalorder %s1184_s13, 3  ;;  %s1485_s18 = smov 127   ;;  %vm228_vm0 = vcmask 1039360   ;;  %vm273_vm1 = vcmask 1031168   ;;  %vm318_vm2 = vcmask 900096   ;;  %vm363_vm3 = vcmask 891904  }
   0xc   : > { %s1486_s19 = smov 126   ;;  %s1487_s20 = smov 110   ;;  %vm408_vm4 = vcmask 883712   ;;  %vm543_vm5 = vcmask 736256   ;;  %vm498_vm6 = vcmask 744448   ;;  %vm453_vm7 = vcmask 752640  }
   0xd   : > { %s2209_s13 = smov (!%p161_p3, %s1184_s13), 3  ;;  %s1488_s21 = smov 109   ;;  %vm829_vm8 = vcmask 908288   ;;  %vm920_vm9 = vcmask 261120   ;;  %vm1123_vm12 = vcmask 257024  }
   0xe   : > { %s1214_s14 = smul.u32 48, %s2209_s13  ;;  %s1489_s22 = smov 108  }
   0xf   : > { %s1490_s23 = smov 90   ;;  %s1491_s24 = smov 91  }
  0x10   : > { %s165_s17 = scalar_lea.vmem %s2138_s0, %s1214_s14  ;;  %s1492_s25 = smov 92  }
  0x11   : > { %v1529_v0 = vld [vmem:[%s165_s17 + $0xc] sm:$0xff]  ;;  %v1531_v1 = vld [vmem:[%s165_s17 + $0x14] sm:$0xf]  ;;  %v172_v2 = vld [vmem:[%s165_s17] sm:$0xff]  ;;  %s1493_s26 = smov 111  }
  0x12   : > { %v2143_v3 = vunpack.c.h.bf16 %v1529_v0  ;;  %v2142_v4 = vunpack.c.l.bf16 %v1531_v1  ;;  %v1535_v5 = vunpack.c.l.bf16 %v172_v2  ;;  %v177_v6 = vld [vmem:[%s165_s17 + $0x20] sm:$0xf]  ;;  %v1537_v7 = vunpack.c.h.bf16 %v172_v2  ;;  %v176_v8 = vld [vmem:[%s165_s17 + $0x18] sm:$0xff]  ;;  %v1539_v9 = vld [vmem:[%s165_s17 + $0x24] sm:$0xff] }
  0x13   : > { %v173_v11 = vld [vmem:[%s165_s17 + $0x8] sm:$0xf]  ;;  %v1547_v12 = vunpack.c.l.bf16 %v177_v6  ;;  %v1550_v13 = vunpack.c.l.bf16 %v1539_v9  ;;  %v1554_v15 = vld [vmem:[%s165_s17 + $0x2c] sm:$0xf]  ;;  %v1557_v16 = vunpack.c.l.bf16 %v176_v8  ;;  %v1559_v17 = vunpack.c.h.bf16 %v176_v8 }
  0x14   : > { %2159 = vst [vmem:[#allocation2_spill] sm:$0xff] %v1535_v5  ;;  %v1545_v10 = vpack.i.bf16 %v2142_v4, %v2143_v3  ;;  %v1234_v14 = vpack.i.bf16 %v1537_v7, %v1535_v5  ;;  %v1564_v19 = vunpack.c.l.bf16 %v1529_v0  ;;  %v1566_v20 = vunpack.c.l.bf16 %v173_v11 }
  0x15   : > { %2160 = vst [vmem:[#allocation3_spill] sm:$0xff] %v1550_v13  ;;  %v1254_v18 = vpack.i.bf16 %v1550_v13, %v1547_v12  ;;  %v2145_v21 = vunpack.c.h.bf16 %v1539_v9  ;;  %v2144_v22 = vunpack.c.l.bf16 %v1554_v15  ;;  %v1249_v23 = vpack.i.bf16 %v1559_v17, %v1557_v16 }
  0x16   : > { %1245 = vrot.lane.b32.xlu1 %v1545_v10, %s1485_s18  ;;  %2161 = vst [vmem:[#allocation4_spill] sm:$0xff] %v1557_v16  ;;  %1235 = vrot.lane.b32.xlu0 %v1234_v14, %s1485_s18  ;;  %v1239_v24 = vpack.i.bf16 %v1564_v19, %v1566_v20  ;;  %v1399_v26 = vpack.i.bf16 %v1547_v12, %v1559_v17 }
  0x17   : > { %2162 = vst [vmem:[#allocation5_spill] sm:$0xff] %v1564_v19  ;;  %1255 = vrot.lane.b32.xlu2 %v1254_v18, %s1485_s18  ;;  %v1578_v25 = vpack.i.bf16 %v2144_v22, %v2145_v21  ;;  %v1597_v27 = vpack.i.bf16 %v1550_v13, %v1557_v16  ;;  %v1414_v29 = vpack.i.bf16 %v1566_v20, %v1537_v7 }
  0x18   : > { %v1424_v30 = vpack.i.bf16 %v1564_v19, %v1535_v5 }
  0x1e   : > { %1250 = vrot.lane.b32.xlu1 %v1249_v23, %s1485_s18  ;;  %1240 = vrot.lane.b32.xlu0 %v1239_v24, %s1485_s18 }
  0x1f   : > { %1260 = vrot.lane.b32.xlu2 %v1578_v25, %s1485_s18 }
  0x26   : > { %1270 = vrot.lane.b32.xlu1 %v1239_v24, %s1486_s19  ;;  %1265 = vrot.lane.b32.xlu0 %v1234_v14, %s1486_s19 }
  0x27   : > { %1275 = vrot.lane.b32.xlu2 %v1545_v10, %s1486_s19 }
  0x2e   : > { %1285 = vrot.lane.b32.xlu1 %v1254_v18, %s1486_s19  ;;  %1280 = vrot.lane.b32.xlu0 %v1249_v23, %s1486_s19 }
  0x2f   : > { %1290 = vrot.lane.b32.xlu2 %v1578_v25, %s1486_s19 }
  0x36   : > { %1300 = vrot.lane.b32.xlu1 %v1239_v24, %s1487_s20  ;;  %1295 = vrot.lane.b32.xlu0 %v1234_v14, %s1487_s20 }
  0x37   : > { %1305 = vrot.lane.b32.xlu2 %v1545_v10, %s1487_s20 }
  0x3e   : > { %1315 = vrot.lane.b32.xlu1 %v1254_v18, %s1487_s20  ;;  %1310 = vrot.lane.b32.xlu0 %v1249_v23, %s1487_s20 }
  0x3f   : > { %1320 = vrot.lane.b32.xlu2 %v1578_v25, %s1487_s20 }
  0x46   : > { %1330 = vrot.lane.b32.xlu1 %v1239_v24, %s1488_s21  ;;  %1325 = vrot.lane.b32.xlu0 %v1234_v14, %s1488_s21 }
  0x47   : > { %1335 = vrot.lane.b32.xlu2 %v1545_v10, %s1488_s21 }
  0x4e   : > { %1345 = vrot.lane.b32.xlu1 %v1254_v18, %s1488_s21  ;;  %1340 = vrot.lane.b32.xlu0 %v1249_v23, %s1488_s21 }
  0x4f   : > { %1350 = vrot.lane.b32.xlu2 %v1578_v25, %s1488_s21 }
  0x56   : > { %1360 = vrot.lane.b32.xlu1 %v1239_v24, %s1489_s22  ;;  %1355 = vrot.lane.b32.xlu0 %v1234_v14, %s1489_s22 }
  0x57   : > { %1365 = vrot.lane.b32.xlu2 %v1545_v10, %s1489_s22 }
  0x5e   : > { %1375 = vrot.lane.b32.xlu1 %v1254_v18, %s1490_s23  ;;  %1370 = vrot.lane.b32.xlu0 %v1249_v23, %s1490_s23 }
  0x5f   : > { %1380 = vrot.lane.b32.xlu2 %v1578_v25, %s1490_s23 }
  0x66   : > { %1390 = vrot.lane.b32.xlu1 %v1239_v24, %s1490_s23  ;;  %1385 = vrot.lane.b32.xlu0 %v1234_v14, %s1490_s23 }
  0x67   : > { %1395 = vrot.lane.b32.xlu2 %v1545_v10, %s1490_s23 }
  0x6e   : > { %1405 = vrot.lane.b32.xlu1 %v1578_v25, %s1491_s24  ;;  %1400 = vrot.lane.b32.xlu0 %v1399_v26, %s1491_s24 }
  0x6f   : > { %1410 = vrot.lane.b32.xlu2 %v1597_v27, %s1491_s24 }
  0x71   : > { %v1256_v28 = vpop.permute.xlu2 %1255 }
  0x72   : > { %v1258_v31 = vunpack.i.h.bf16 %v1256_v28  ;;  %v1257_v32 = vunpack.i.l.bf16 %v1256_v28 }
  0x76   : > { %1420 = vrot.lane.b32.xlu1 %v1545_v10, %s1491_s24  ;;  %1415 = vrot.lane.b32.xlu0 %v1414_v29, %s1491_s24 }
  0x77   : > { %1425 = vrot.lane.b32.xlu2 %v1424_v30, %s1491_s24  ;;  %s1215_s24 = smul.u32 36, %s2209_s13 }
  0x79   : > { %v1261_v33 = vpop.permute.xlu2 %1260  ;;  %s2121_s27 = scalar_lea.vmem %s2141_s3, %s1215_s24 }
  0x7a   : > { %v1263_v34 = vunpack.i.h.bf16 %v1261_v33  ;;  %v1262_v35 = vunpack.i.l.bf16 %v1261_v33 }
  0x7c   : > { %v1606_v36 = vpack.c.bf16 %v1263_v34, %v1257_v32  ;;  %v1609_v37 = vsel %vm228_vm0, %v1258_v31, %v1262_v35  ;;  %v1623_v45 = vsel %vm228_vm0, %v1262_v35, %v1263_v34 }
  0x7e   : > { %1435 = vrot.lane.b32.xlu1 %v1578_v25, %s1492_s25  ;;  %1430 = vrot.lane.b32.xlu0 %v1399_v26, %s1492_s25 }
  0x7f   : > { %1440 = vrot.lane.b32.xlu2 %v1597_v27, %s1492_s25 }
  0x81   : > { %v1276_v38 = vpop.permute.xlu2 %1275 }
  0x82   : > { %v1278_v63 = vunpack.i.h.bf16 %v1276_v38  ;;  %v1277_v2 = vunpack.i.l.bf16 %v1276_v38 }
  0x86   : > { %1450 = vrot.lane.b32.xlu1 %v1545_v10, %s1492_s25  ;;  %1445 = vrot.lane.b32.xlu0 %v1414_v29, %s1492_s25 }
  0x87   : > { %1455 = vrot.lane.b32.xlu2 %v1424_v30, %s1492_s25 }
  0x88   : > { %v1246_v39 = vpop.permute.xlu1 %1245  ;;  %v1236_v40 = vpop.permute.xlu0 %1235 }
  0x89   : > { %v1291_v41 = vpop.permute.xlu2 %1290  ;;  %v1248_v42 = vunpack.i.h.bf16 %v1246_v39  ;;  %v1247_v43 = vunpack.i.l.bf16 %v1246_v39  ;;  %v1238_v46 = vunpack.i.h.bf16 %v1236_v40  ;;  %v1237_v47 = vunpack.i.l.bf16 %v1236_v40 }
  0x8a   : > { %v1293_v33 = vunpack.i.h.bf16 %v1291_v41  ;;  %v1292_v34 = vunpack.i.l.bf16 %v1291_v41 }
  0x8b   : > { %v1629_v54 = vsel %vm228_vm0, %v1247_v43, %v1248_v42  ;;  %v1646_v61 = vsel %vm228_vm0, %v1237_v47, %v1238_v46 }
  0x8c   : > { %2163 = vst [vmem:[#allocation6_spill] sm:$0xff] %v1646_v61 }
  0x8e   : > { %1465 = vrot.lane.b32.xlu1 %v1578_v25, %s1489_s22  ;;  %1460 = vrot.lane.b32.xlu0 %v1399_v26, %s1489_s22  ;;  %v1655_v25 = vsel %vm273_vm1, %v1277_v2, %v1278_v63 }
  0x8f   : > { %1470 = vrot.lane.b32.xlu2 %v1597_v27, %s1489_s22 }
  0x90   : > { %v1251_v44 = vpop.permute.xlu1 %1250  ;;  %v1241_v50 = vpop.permute.xlu0 %1240 }
  0x91   : > { %v1253_v48 = vunpack.i.h.bf16 %v1251_v44  ;;  %v1252_v49 = vunpack.i.l.bf16 %v1251_v44  ;;  %v1243_v51 = vunpack.i.h.bf16 %v1241_v50  ;;  %v1242_v52 = vunpack.i.l.bf16 %v1241_v50  ;;  %v1306_v8 = vpop.permute.xlu2 %1305 }
  0x93   : > { %v1626_v53 = vsel %vm228_vm0, %v1253_v48, %v1257_v32  ;;  %v1632_v55 = vsel %vm228_vm0, %v1252_v49, %v1253_v48  ;;  %v1634_v56 = vpack.c.bf16 %v1248_v42, %v1242_v52  ;;  %v1639_v58 = vsel %vm228_vm0, %v1238_v46, %v1242_v52 }
  0x94   : > { %v1649_v62 = vsel %vm228_vm0, %v1243_v51, %v1247_v43  ;;  %v1675_v46 = vsel %vm273_vm1, %v1292_v34, %v1293_v33  ;;  %v1308_v52 = vunpack.i.h.bf16 %v1306_v8 }
  0x98   : > { %v1271_v10 = vpop.permute.xlu1 %1270  ;;  %v1266_v18 = vpop.permute.xlu0 %1265 }
  0x99   : > { %v1273_v11 = vunpack.i.h.bf16 %v1271_v10  ;;  %v1272_v14 = vunpack.i.l.bf16 %v1271_v10  ;;  %v1268_v23 = vunpack.i.h.bf16 %v1266_v18  ;;  %v1267_v24 = vunpack.i.l.bf16 %v1266_v18  ;;  %v1672_v42 = vpop.permute.xlu2 %1320 }
  0x9b   : > { %v1657_v26 = vpack.c.bf16 %v1278_v63, %v1272_v14  ;;  %v1660_v28 = vsel %vm273_vm1, %v1273_v11, %v1277_v2  ;;  %v1663_v29 = vsel %vm273_vm1, %v1268_v23, %v1272_v14  ;;  %v1666_v31 = vsel %vm273_vm1, %v1267_v24, %v1268_v23 }
  0x9c   : > { %v1307_v63 = vunpack.i.l.bf16 %v1306_v8 }
  0x9e   : > { %v1695_v24 = vsel %vm318_vm2, %v1307_v63, %v1308_v52 }
  0xa0   : > { %v1286_v35 = vpop.permute.xlu1 %1285  ;;  %v1281_v40 = vpop.permute.xlu0 %1280 }
  0xa1   : > { %v1288_v38 = vunpack.i.h.bf16 %v1286_v35  ;;  %v1287_v39 = vunpack.i.l.bf16 %v1286_v35  ;;  %v1283_v43 = vunpack.i.h.bf16 %v1281_v40  ;;  %v1282_v44 = vunpack.i.l.bf16 %v1281_v40 }
  0xa2   : > { %v2146_v40 = vunpack.i.l.bf16 %v1672_v42 }
  0xa3   : > { %v1677_v47 = vpack.c.bf16 %v1293_v33, %v1287_v39  ;;  %v1680_v48 = vsel %vm273_vm1, %v1288_v38, %v1292_v34  ;;  %v1683_v49 = vsel %vm273_vm1, %v1283_v43, %v1287_v39  ;;  %v1686_v41 = vsel %vm273_vm1, %v1282_v44, %v1283_v43  ;;  %v1336_v34 = vpop.permute.xlu2 %1335 }
  0xa4   : > { %v1337_v6 = vunpack.i.l.bf16 %v1336_v34 }
  0xa8   : > { %v1301_v2 = vpop.permute.xlu1 %1300  ;;  %v1296_v14 = vpop.permute.xlu0 %1295 }
  0xa9   : > { %v1303_v10 = vunpack.i.h.bf16 %v1301_v2  ;;  %v1302_v11 = vunpack.i.l.bf16 %v1301_v2  ;;  %v1298_v18 = vunpack.i.h.bf16 %v1296_v14  ;;  %v1297_v23 = vunpack.i.l.bf16 %v1296_v14 }
  0xab   : > { %v1697_v33 = vpack.c.bf16 %v1308_v52, %v1302_v11  ;;  %v1700_v35 = vsel %vm318_vm2, %v1303_v10, %v1307_v63  ;;  %v1703_v8 = vsel %vm318_vm2, %v1298_v18, %v1302_v11  ;;  %v1706_v38 = vsel %vm318_vm2, %v1297_v23, %v1298_v18  ;;  %v1351_v14 = vpop.permute.xlu2 %1350 }
  0xac   : > { %v1338_v23 = vunpack.i.h.bf16 %v1336_v34  ;;  %v1353_v57 = vunpack.i.h.bf16 %v1351_v14  ;;  %v1352_v39 = vunpack.i.l.bf16 %v1351_v14 }
  0xb0   : > { %v1713_v43 = vpop.permute.xlu1 %1315  ;;  %v1716_v52 = vpop.permute.xlu0 %1310 }
  0xb1   : > { %v1318_v44 = vunpack.i.h.bf16 %v1713_v43  ;;  %v2147_v63 = vunpack.i.h.bf16 %v1716_v52  ;;  %v1312_v2 = vunpack.i.l.bf16 %v1716_v52  ;;  %v1317_v61 = vunpack.i.l.bf16 %v1713_v43 }
  0xb3   : > { %v1723_v10 = vsel %vm318_vm2, %v1312_v2, %v2147_v63  ;;  %v1728_v11 = vsel %vm318_vm2, %v1318_v44, %v2146_v40  ;;  %v1733_v2 = vsel %vm363_vm3, %v1337_v6, %v1338_v23  ;;  %v1366_v30 = vpop.permute.xlu2 %1365 }
  0xb4   : > { %2164 = vst [vmem:[#allocation7_spill] sm:$0xff] %v1733_v2  ;;  %v1367_v40 = vunpack.i.l.bf16 %v1366_v30 }
  0xb8   : > { %v1331_v4 = vpop.permute.xlu1 %1330  ;;  %v1326_v22 = vpop.permute.xlu0 %1325 }
  0xb9   : > { %v1333_v3 = vunpack.i.h.bf16 %v1331_v4  ;;  %v1332_v59 = vunpack.i.l.bf16 %v1331_v4  ;;  %v1328_v21 = vunpack.i.h.bf16 %v1326_v22  ;;  %v1327_v32 = vunpack.i.l.bf16 %v1326_v22 }
  0xba   : > { %v1368_v22 = vunpack.i.h.bf16 %v1366_v30 }
  0xbb   : > { %v1735_v60 = vpack.c.bf16 %v1338_v23, %v1332_v59  ;;  %v1738_v44 = vsel %vm363_vm3, %v1333_v3, %v1337_v6  ;;  %v1741_v51 = vsel %vm363_vm3, %v1328_v21, %v1332_v59  ;;  %v1744_v34 = vsel %vm363_vm3, %v1327_v32, %v1328_v21 }
  0xbc   : > { %2166 = vst [vmem:[#allocation9_spill] sm:$0xff] %v1738_v44  ;;  %v1751_v59 = vsel %vm363_vm3, %v1352_v39, %v1353_v57  ;;  %v1769_v19 = vsel %vm408_vm4, %v1367_v40, %v1368_v22 }
  0xbd   : > { %2165 = vst [vmem:[#allocation8_spill] sm:$0xff] %v1735_v60 }
  0xbe   : > { %2167 = vst [vmem:[#allocation10_spill] sm:$0xff] %v1741_v51 }
  0xbf   : > { %2168 = vst [vmem:[#allocation11_spill] sm:$0xff] %v1744_v34 }
  0xc0   : > { %v1346_v23 = vpop.permute.xlu1 %1345  ;;  %v1341_v3 = vpop.permute.xlu0 %1340 }
  0xc1   : > { %v1348_v18 = vunpack.i.h.bf16 %v1346_v23  ;;  %v1347_v50 = vunpack.i.l.bf16 %v1346_v23  ;;  %v1343_v6 = vunpack.i.h.bf16 %v1341_v3  ;;  %v1342_v27 = vunpack.i.l.bf16 %v1341_v3 }
  0xc3   : > { %v1753_v21 = vpack.c.bf16 %v1353_v57, %v1347_v50  ;;  %v1756_v32 = vsel %vm363_vm3, %v1348_v18, %v1352_v39  ;;  %v1759_v4 = vsel %vm363_vm3, %v1343_v6, %v1347_v50  ;;  %v1762_v14 = vsel %vm363_vm3, %v1342_v27, %v1343_v6  ;;  %v1381_v18 = vpop.permute.xlu2 %1380 }
  0xc4   : > { %2169 = vst [vmem:[#allocation12_spill] sm:$0xff] %v1756_v32  ;;  %v1383_v23 = vunpack.i.h.bf16 %v1381_v18  ;;  %v1382_v5 = vunpack.i.l.bf16 %v1381_v18 }
  0xc5   : > { %2170 = vst [vmem:[#allocation13_spill] sm:$0xff] %v1762_v14 }
  0xc8   : > { %v1361_v57 = vpop.permute.xlu1 %1360  ;;  %v1356_v39 = vpop.permute.xlu0 %1355 }
  0xc9   : > { %v1363_v63 = vunpack.i.h.bf16 %v1361_v57  ;;  %v1362_v34 = vunpack.i.l.bf16 %v1361_v57  ;;  %v1358_v44 = vunpack.i.h.bf16 %v1356_v39  ;;  %v1357_v50 = vunpack.i.l.bf16 %v1356_v39 }
  0xcb   : > { %v1771_v27 = vpack.c.bf16 %v1368_v22, %v1362_v34  ;;  %v1774_v6 = vsel %vm408_vm4, %v1363_v63, %v1367_v40  ;;  %v1777_v3 = vsel %vm408_vm4, %v1358_v44, %v1362_v34  ;;  %v1780_v30 = vsel %vm408_vm4, %v1357_v50, %v1358_v44  ;;  %v1396_v50 = vpop.permute.xlu2 %1395 }
  0xcc   : > { %v551_v34 = vsel %vm543_vm5, %v1382_v5, %v1383_v23  ;;  %v1398_v14 = vunpack.i.h.bf16 %v1396_v50  ;;  %v1397_v32 = vunpack.i.l.bf16 %v1396_v50 }
  0xd0   : > { %v1376_v22 = vpop.permute.xlu1 %1375  ;;  %v1371_v40 = vpop.permute.xlu0 %1370 }
  0xd1   : > { %v1378_v60 = vunpack.i.h.bf16 %v1376_v22  ;;  %v1377_v51 = vunpack.i.l.bf16 %v1376_v22  ;;  %v1373_v63 = vunpack.i.h.bf16 %v1371_v40  ;;  %v1372_v2 = vunpack.i.l.bf16 %v1371_v40 }
  0xd2   : > { %v1323_v22 = vunpack.i.h.bf16 %v1672_v42 }
  0xd3   : > { %v1787_v13 = vpack.c.bf16 %v1383_v23, %v1377_v51  ;;  %v550_v44 = vsel %vm543_vm5, %v1378_v60, %v1382_v5  ;;  %v549_v57 = vsel %vm543_vm5, %v1373_v63, %v1377_v51  ;;  %v548_v39 = vsel %vm543_vm5, %v1372_v2, %v1373_v63 }
  0xd4   : > { %v622_v16 = vpack.c.bf16 %v551_v34, %v549_v57  ;;  %v621_v18 = vpack.c.bf16 %v550_v44, %v548_v39  ;;  %v547_v2 = vsel %vm543_vm5, %v1397_v32, %v1398_v14  ;;  %v2172_v63 = vunpack.i.h.bf16 %v1716_v52 }
  0xd5   : > { %2171 = vst [vmem:[#allocation14_spill] sm:$0xff] %v1787_v13 }
  0xd6   : > { %825 = vrot.lane.b32.xlu1 %v622_v16, %s1493_s26  ;;  %823 = vrot.lane.b32.xlu0 %v621_v18, %s1493_s26  ;;  %v324_v43 = vsel %vm318_vm2, %v2172_v63, %v1317_v61  ;;  %v2173_v16 = vunpack.i.l.bf16 %v1672_v42 }
  0xd8   : > { %v1391_v23 = vpop.permute.xlu1 %1390  ;;  %v1386_v40 = vpop.permute.xlu0 %1385  ;;  %v326_v34 = vsel %vm318_vm2, %v2173_v16, %v1323_v22 }
  0xd9   : > { %v1393_v5 = vunpack.i.h.bf16 %v1391_v23  ;;  %v1392_v60 = vunpack.i.l.bf16 %v1391_v23  ;;  %v1388_v51 = vunpack.i.h.bf16 %v1386_v40  ;;  %v1387_v13 = vunpack.i.l.bf16 %v1386_v40 }
  0xda   : > { %v592_v40 = vpack.c.bf16 %v326_v34, %v324_v43 }
  0xdb   : > { %v1797_v57 = vpack.c.bf16 %v1398_v14, %v1392_v60  ;;  %v546_v39 = vsel %vm543_vm5, %v1393_v5, %v1397_v32  ;;  %v544_v44 = vsel %vm543_vm5, %v1387_v13, %v1388_v51  ;;  %v545_v50 = vsel %vm543_vm5, %v1388_v51, %v1392_v60  ;;  %v1411_v60 = vpop.permute.xlu2 %1410 }
  0xdc   : > { %v618_v18 = vpack.c.bf16 %v546_v39, %v544_v44  ;;  %v619_v23 = vpack.c.bf16 %v547_v2, %v545_v50  ;;  %v593_v2 = vpack.c.bf16 %v1323_v22, %v1317_v61  ;;  %v1413_v43 = vunpack.i.h.bf16 %v1411_v60 }
  0xdd   : > { %v1412_v34 = vunpack.i.l.bf16 %v1411_v60  ;;  %v2174_v22 = vpack.c.bf16 %v1695_v24, %v1703_v8  ;;  %v2175_v24 = vpack.c.bf16 %v1675_v46, %v1683_v49 }
  0xde   : > { %817 = vrot.lane.b32.xlu2 %v618_v18, %s1493_s26  ;;  %819 = vrot.lane.b32.xlu0 %v619_v23, %s1493_s26 }
  0xdf   : > { %765 = vrot.lane.b32.xlu1 %v592_v40, %s1493_s26 }
  0xe0   : > { %v1406_v52 = vpop.permute.xlu1 %1405  ;;  %v1401_v42 = vpop.permute.xlu0 %1400 }
  0xe1   : > { %v1408_v32 = vunpack.i.h.bf16 %v1406_v52  ;;  %v1407_v14 = vunpack.i.l.bf16 %v1406_v52  ;;  %v1403_v5 = vunpack.i.h.bf16 %v1401_v42  ;;  %v1402_v63 = vunpack.i.l.bf16 %v1401_v42 }
  0xe3   : > { %v506_v13 = vsel %vm498_vm6, %v1407_v14, %v1408_v32  ;;  %v617_v16 = vpack.c.bf16 %v1408_v32, %v1403_v5  ;;  %v504_v51 = vsel %vm498_vm6, %v1402_v63, %v1403_v5  ;;  %v503_v18 = vsel %vm498_vm6, %v1412_v34, %v1402_v63 }
  0xe4   : > { %v616_v39 = vpack.c.bf16 %v506_v13, %v504_v51  ;;  %v505_v23 = vsel %vm498_vm6, %v1413_v43, %v1407_v14 }
  0xe5   : > { %v615_v61 = vpack.c.bf16 %v505_v23, %v503_v18  ;;  %v2176_v23 = vpack.c.bf16 %v1728_v11, %v1723_v10  ;;  %v2177_v10 = vpack.c.bf16 %v1655_v25, %v1663_v29 }
  0xe6   : > { %767 = vrot.lane.b32.xlu2 %v593_v2, %s1493_s26  ;;  %813 = vrot.lane.b32.xlu0 %v616_v39, %s1493_s26 }
  0xe7   : > { %815 = vrot.lane.b32.xlu1 %v617_v16, %s1493_s26  ;;  %v1426_v16 = vpop.permute.xlu2 %1425 }
  0xe8   : > { %v1421_v44 = vpop.permute.xlu1 %1420  ;;  %v1416_v50 = vpop.permute.xlu0 %1415  ;;  %v1428_v60 = vunpack.i.h.bf16 %v1426_v16  ;;  %v1427_v51 = vunpack.i.l.bf16 %v1426_v16 }
  0xe9   : > { %v1423_v40 = vunpack.i.h.bf16 %v1421_v44  ;;  %v1422_v52 = vunpack.i.l.bf16 %v1421_v44  ;;  %v1418_v32 = vunpack.i.h.bf16 %v1416_v50  ;;  %v1417_v42 = vunpack.i.l.bf16 %v1416_v50 }
  0xeb   : > { %v500_v5 = vsel %vm498_vm6, %v1417_v42, %v1418_v32  ;;  %v502_v63 = vsel %vm498_vm6, %v1422_v52, %v1423_v40  ;;  %v614_v14 = vpack.c.bf16 %v1423_v40, %v1418_v32  ;;  %v499_v2 = vsel %vm498_vm6, %v1427_v51, %v1417_v42 }
  0xec   : > { %v613_v13 = vpack.c.bf16 %v502_v63, %v500_v5  ;;  %v501_v39 = vsel %vm498_vm6, %v1428_v60, %v1422_v52  ;;  %v2178_v51 = vpack.c.bf16 %v1700_v35, %v1706_v38 }
  0xed   : > { %v612_v18 = vpack.c.bf16 %v501_v39, %v499_v2 }
  0xee   : > { %761 = vrot.lane.b32.xlu0 %v1697_v33, %s1493_s26  ;;  %759 = vrot.lane.b32.xlu2 %v2174_v22, %s1493_s26 }
  0xef   : > { %811 = vrot.lane.b32.xlu1 %v615_v61, %s1493_s26  ;;  %v1441_v32 = vpop.permute.xlu2 %1440 }
  0xf0   : > { %v1436_v33 = vpop.permute.xlu1 %1435  ;;  %v1431_v8 = vpop.permute.xlu0 %1430  ;;  %v1443_v42 = vunpack.i.h.bf16 %v1441_v32  ;;  %v1442_v61 = vunpack.i.l.bf16 %v1441_v32 }
  0xf1   : > { %v1438_v43 = vunpack.i.h.bf16 %v1436_v33  ;;  %v1437_v34 = vunpack.i.l.bf16 %v1436_v33  ;;  %v1433_v44 = vunpack.i.h.bf16 %v1431_v8  ;;  %v1432_v50 = vunpack.i.l.bf16 %v1431_v8 }
  0xf3   : > { %v459_v46 = vsel %vm453_vm7, %v1432_v50, %v1433_v44  ;;  %v461_v49 = vsel %vm453_vm7, %v1437_v34, %v1438_v43  ;;  %v611_v40 = vpack.c.bf16 %v1438_v43, %v1433_v44  ;;  %v458_v22 = vsel %vm453_vm7, %v1442_v61, %v1432_v50 }
  0xf4   : > { %v610_v52 = vpack.c.bf16 %v461_v49, %v459_v46  ;;  %v460_v5 = vsel %vm453_vm7, %v1443_v42, %v1437_v34  ;;  %v2180_v49 = vpack.c.bf16 %v1680_v48, %v1686_v41 }
  0xf5   : > { %v609_v60 = vpack.c.bf16 %v460_v5, %v458_v22 }
  0xf6   : > { %809 = vrot.lane.b32.xlu0 %v614_v14, %s1493_s26  ;;  %807 = vrot.lane.b32.xlu2 %v613_v13, %s1493_s26 }
  0xf7   : > { %753 = vrot.lane.b32.xlu1 %v2175_v24, %s1493_s26  ;;  %v1456_v8 = vpop.permute.xlu2 %1455 }
  0xf8   : > { %v1446_v11 = vpop.permute.xlu0 %1445  ;;  %v1458_v2 = vunpack.i.h.bf16 %v1456_v8  ;;  %v1457_v39 = vunpack.i.l.bf16 %v1456_v8 }
  0xf9   : > { %v1448_v13 = vunpack.i.h.bf16 %v1446_v11  ;;  %v1447_v16 = vunpack.i.l.bf16 %v1446_v11  ;;  %v2183_v11 = vunpack.c.h.bf16 %v1539_v9  ;;  %v2186_v9 = vpack.c.bf16 %v1609_v37, %v1632_v55 }
  0xfb   : > { %v455_v25 = vsel %vm453_vm7, %v1447_v16, %v1448_v13  ;;  %v454_v43 = vsel %vm453_vm7, %v1457_v39, %v1447_v16  ;;  %v2202_v39 = vld [vmem:[#allocation2_spill] sm:$0xff] }
  0xfe   : > { %763 = vrot.lane.b32.xlu0 %v2176_v23, %s1493_s26  ;;  %755 = vrot.lane.b32.xlu2 %v1677_v47, %s1493_s26  ;;  %v1451_v47 = vpop.permute.xlu1 %1450 }
  0xff   : > { %805 = vrot.lane.b32.xlu1 %v612_v18, %s1493_s26  ;;  %v1453_v63 = vunpack.i.h.bf16 %v1451_v47  ;;  %v1452_v14 = vunpack.i.l.bf16 %v1451_v47  ;;  %v1471_v32 = vpop.permute.xlu2 %1470  ;;  %v2182_v47 = vpack.c.bf16 %v1660_v28, %v1666_v31 }
 0x100   : > { %v1461_v38 = vpop.permute.xlu0 %1460  ;;  %v1473_v42 = vunpack.i.h.bf16 %v1471_v32  ;;  %v1472_v61 = vunpack.i.l.bf16 %v1471_v32 }
 0x101   : > { %v457_v29 = vsel %vm453_vm7, %v1452_v14, %v1453_v63  ;;  %v608_v24 = vpack.c.bf16 %v1453_v63, %v1448_v13  ;;  %v456_v34 = vsel %vm453_vm7, %v1458_v2, %v1452_v14  ;;  %v1463_v18 = vunpack.i.h.bf16 %v1461_v38  ;;  %v2196_v13 = vld [vmem:[#allocation4_spill] sm:$0xff] }
 0x102   : > { %v607_v33 = vpack.c.bf16 %v457_v29, %v455_v25  ;;  %v1462_v23 = vunpack.i.l.bf16 %v1461_v38  ;;  %v606_v46 = vpack.c.bf16 %v456_v34, %v454_v43  ;;  %v2201_v29 = vld [vmem:[#allocation8_spill] sm:$0xff]  ;;  %v2204_v38 = vld [vmem:[#allocation9_spill] sm:$0xff]  ;;  %v2205_v43 = vld [vmem:[#allocation11_spill] sm:$0xff] }
 0x103   : > { %v2206_v34 = vpack.c.bf16 %v2204_v38, %v2205_v43 }
 0x104   : > { %v413_v48 = vsel %vm408_vm4, %v1472_v61, %v1462_v23 }
 0x106   : > { %803 = vrot.lane.b32.xlu0 %v611_v40, %s1493_s26  ;;  %801 = vrot.lane.b32.xlu2 %v610_v52, %s1493_s26  ;;  %v1466_v35 = vpop.permute.xlu1 %1465 }
 0x107   : > { %747 = vrot.lane.b32.xlu1 %v2177_v10, %s1493_s26  ;;  %v1468_v44 = vunpack.i.h.bf16 %v1466_v35  ;;  %v1467_v50 = vunpack.i.l.bf16 %v1466_v35 }
 0x109   : > { %v605_v40 = vpack.c.bf16 %v1468_v44, %v1463_v18  ;;  %v415_v41 = vsel %vm408_vm4, %v1473_v42, %v1467_v50 }
 0x10a   : > { %v603_v10 = vpack.c.bf16 %v415_v41, %v413_v48 }
 0x10e   : > { %749 = vrot.lane.b32.xlu2 %v1657_v26, %s1493_s26  ;;  %757 = vrot.lane.b32.xlu0 %v2178_v51, %s1493_s26  ;;  %v2179_v26 = vpack.c.bf16 %v1623_v45, %v1626_v53  ;;  %v414_v45 = vsel %vm408_vm4, %v1462_v23, %v1463_v18  ;;  %v416_v53 = vsel %vm408_vm4, %v1467_v50, %v1468_v44  ;;  %v2199_v51 = vld [vmem:[#allocation10_spill] sm:$0xff] }
 0x10f   : > { %799 = vrot.lane.b32.xlu1 %v609_v60, %s1493_s26  ;;  %v604_v52 = vpack.c.bf16 %v416_v53, %v414_v45  ;;  %v2198_v60 = vld [vmem:[#allocation7_spill] sm:$0xff]  ;;  %v2207_v44 = vld [vmem:[#allocation14_spill] sm:$0xff] }
 0x110   : > { %v2200_v25 = vpack.c.bf16 %v2198_v60, %v2199_v51 }
 0x116   : > { %795 = vrot.lane.b32.xlu2 %v607_v33, %s1493_s26  ;;  %797 = vrot.lane.b32.xlu0 %v608_v24, %s1493_s26 }
 0x117   : > { %741 = vrot.lane.b32.xlu1 %v2179_v26, %s1493_s26  ;;  %v2203_v26 = vld [vmem:[#allocation5_spill] sm:$0xff] }
 0x118   : > { %v570_v35 = vpack.c.bf16 %v2203_v26, %v2202_v39 }
 0x11e   : > { %743 = vrot.lane.b32.xlu2 %v1606_v36, %s1493_s26  ;;  %751 = vrot.lane.b32.xlu0 %v2180_v49, %s1493_s26  ;;  %v2181_v36 = vpack.c.bf16 %v1629_v54, %v1639_v58  ;;  %v574_v54 = vpack.c.bf16 %v2183_v11, %v1559_v17  ;;  %v2184_v58 = vpack.c.bf16 %v1769_v19, %v1777_v3  ;;  %v2188_v3 = vunpack.c.h.bf16 %v1529_v0 }
 0x11f   : > { %793 = vrot.lane.b32.xlu1 %v606_v46, %s1493_s26  ;;  %v2187_v17 = vpack.c.bf16 %v1774_v6, %v1780_v30  ;;  %v2190_v0 = vunpack.c.l.bf16 %v1531_v1  ;;  %v2194_v30 = vld [vmem:[#allocation13_spill] sm:$0xff] }
 0x126   : > { %789 = vrot.lane.b32.xlu2 %v604_v52, %s1493_s26  ;;  %791 = vrot.lane.b32.xlu0 %v605_v40, %s1493_s26 }
 0x127   : > { %735 = vrot.lane.b32.xlu1 %v2181_v36, %s1493_s26 }
 0x12e   : > { %745 = vrot.lane.b32.xlu0 %v2182_v47, %s1493_s26  ;;  %737 = vrot.lane.b32.xlu2 %v1634_v56, %s1493_s26  ;;  %v2185_v56 = vunpack.c.l.bf16 %v1554_v15 }
 0x12f   : > { %787 = vrot.lane.b32.xlu1 %v603_v10, %s1493_s26 }
 0x130   : > { %v575_v31 = vpack.c.bf16 %v2185_v56, %v1547_v12  ;;  %v2189_v12 = vpack.c.bf16 %v1751_v59, %v1759_v4  ;;  %v2191_v4 = vld [vmem:[#allocation6_spill] sm:$0xff] }
 0x131   : > { %v2192_v59 = vpack.c.bf16 %v1649_v62, %v2191_v4  ;;  %v2197_v62 = vld [vmem:[#allocation3_spill] sm:$0xff] }
 0x132   : > { %v573_v16 = vpack.c.bf16 %v2197_v62, %v2196_v13 }
 0x136   : > { %785 = vrot.lane.b32.xlu0 %v1771_v27, %s1493_s26  ;;  %783 = vrot.lane.b32.xlu2 %v2184_v58, %s1493_s26  ;;  %v571_v27 = vpack.c.bf16 %v2188_v3, %v1537_v7  ;;  %v572_v7 = vpack.c.bf16 %v2190_v0, %v1566_v20  ;;  %v1213_v3 = vld [vmem:[%s2139_s1 + $0x10] sm:$0xf0] }
 0x137   : > { %729 = vrot.lane.b32.xlu1 %v574_v54, %s1493_s26 }
 0x138   : > { %v818_v28 = vpop.permute.xlu2 %817 }
 0x13e   : > { %739 = vrot.lane.b32.xlu0 %v2186_v9, %s1493_s26  ;;  %731 = vrot.lane.b32.xlu2 %v575_v31, %s1493_s26 }
 0x13f   : > { %781 = vrot.lane.b32.xlu1 %v2187_v17, %s1493_s26  ;;  %v1201_v17 = vld [vmem:[%s2139_s1 + $0x8] sm:$0xf] }
 0x140   : > { %v1915_v19 = vpop.permute.xlu2 %767 }
 0x146   : > { %779 = vrot.lane.b32.xlu0 %v1753_v21, %s1493_s26  ;;  %777 = vrot.lane.b32.xlu2 %v2189_v12, %s1493_s26  ;;  %v2193_v21 = vld [vmem:[#allocation12_spill] sm:$0xff] }
 0x147   : > { %723 = vrot.lane.b32.xlu1 %v571_v27, %s1493_s26  ;;  %v2195_v22 = vpack.c.bf16 %v2193_v21, %v2194_v30  ;;  %v2006_v27 = vor.u32 %v1213_v3, %v1201_v17 }
 0x148   : > { %v1927_v15 = vpop.permute.xlu1 %825  ;;  %v824_v37 = vpop.permute.xlu0 %823 }
 0x149   : > { %v760_v55 = vpop.permute.xlu2 %759  ;;  %v864_v6 = vsel %vm829_vm8, %v824_v37, %v1927_v15 }
 0x14a   : > { %969 = vmatpush.bf16.msra.mxu2 %v864_v6 }
 0x14e   : > { %725 = vrot.lane.b32.xlu2 %v572_v7, %s1493_s26  ;;  %733 = vrot.lane.b32.xlu0 %v2192_v59, %s1493_s26 }
 0x14f   : > { %775 = vrot.lane.b32.xlu1 %v2195_v22, %s1493_s26  ;;  %v569_v22 = vld [vmem:[%s2139_s1 + $0x20] sm:$0xf] }
 0x150   : > { %v1943_v5 = vpop.permute.xlu0 %819 }
 0x151   : > { %v766_v63 = vpop.permute.xlu1 %765  ;;  %v808_v14 = vpop.permute.xlu2 %807  ;;  %v862_v1 = vsel %vm829_vm8, %v818_v28, %v1943_v5 }
 0x152   : > { %970 = vmatpush.bf16.msra.mxu2 %v862_v1  ;;  %v845_v20 = vsel %vm829_vm8, %v766_v63, %v1915_v19 }
 0x153   : > { %981 = vmatpush.bf16.msra.mxu3 %v845_v20 }
 0x155   : > { %1203 = vmatmul.msk.bf16.vlgmr.msra.gmra.mxu2 %vm920_vm9, %v2006_v27 }
 0x156   : > { %771 = vrot.lane.b32.xlu2 %v2200_v25, %s1493_s26  ;;  %773 = vrot.lane.b32.xlu0 %v2201_v29, %s1493_s26 }
 0x157   : > { %727 = vrot.lane.b32.xlu1 %v573_v16, %s1493_s26 }
 0x158   : > { %v814_v24 = vpop.permute.xlu0 %813 }
 0x159   : > { %v1958_v33 = vpop.permute.xlu1 %815  ;;  %v1960_v8 = vpop.permute.xlu2 %755 }
 0x15a   : > { %v861_v2 = vsel %vm829_vm8, %v814_v24, %v1958_v33 }
 0x15b   : > { %999 = vmatpush.bf16.msrb.mxu2 %v861_v2 }
 0x15e   : > { %769 = vrot.lane.b32.xlu2 %v2206_v34, %s1493_s26  ;;  %721 = vrot.lane.b32.xlu0 %v570_v35, %s1493_s26 }
 0x15f   : > { %827 = vrot.lane.b32.xlu1 %v2207_v44, %s1493_s26 }
 0x160   : > { %v1973_v50 = vpop.permute.xlu0 %761 }
 0x161   : > { %v812_v18 = vpop.permute.xlu1 %811  ;;  %v802_v23 = vpop.permute.xlu2 %801  ;;  %v843_v46 = vsel %vm829_vm8, %v760_v55, %v1973_v50 }
 0x162   : > { %v860_v49 = vsel %vm829_vm8, %v812_v18, %v814_v24  ;;  %982 = vmatpush.bf16.msra.mxu3 %v843_v46  ;;  %v1212_v46 = vld [vmem:[%s2139_s1 + $0x8] sm:$0xf0] }
 0x163   : > { %945 = vmatpush.bf16.msra.mxu1 %v860_v49 }
 0x166   : > { %821 = vrot.lane.b32.xlu2 %v1797_v57, %s1493_s26 }
 0x168   : > { %v1980_v45 = vpop.permute.xlu0 %809 }
 0x169   : > { %v1982_v53 = vpop.permute.xlu2 %749  ;;  %v754_v40 = vpop.permute.xlu1 %753  ;;  %v859_v52 = vsel %vm829_vm8, %v808_v14, %v1980_v45 }
 0x16a   : > { %v841_v32 = vsel %vm829_vm8, %v754_v40, %v1960_v8  ;;  %1000 = vmatpush.bf16.msrb.mxu2 %v859_v52 }
 0x16b   : > { %983 = vmatpush.bf16.msra.mxu3 %v841_v32 }
 0x170   : > { %v764_v42 = vpop.permute.xlu0 %763 }
 0x171   : > { %v796_v61 = vpop.permute.xlu2 %795  ;;  %v806_v36 = vpop.permute.xlu1 %805  ;;  %v844_v48 = vsel %vm829_vm8, %v764_v42, %v766_v63  ;;  %v656_v63 = vunpack.c.l.b16 %v569_v22 }
 0x172   : > { %927 = vmatpush.bf16.msra.mxu0 %v844_v48  ;;  %v858_v57 = vsel %vm829_vm8, %v806_v36, %v808_v14  ;;  %v1494_v36 = vmov 0   ;;  %v625_v48 = vld [vmem:[%s2140_s2 + $0x8] sm:$0xff] }
 0x173   : > { %946 = vmatpush.bf16.msra.mxu1 %v858_v57  ;;  %v2023_v14 = vpack.c.b16 %v656_v63, %v656_v63  ;;  %1475 = vset.pattern.permute.xlu1 %v1494_v36  ;;  %v624_v57 = vld [vmem:[%s2140_s2] sm:$0xff] }
 0x174   : > { %1474 = vset.pattern.permute.xlu0 %v1494_v36  ;;  %634 = vperm.xlu1 %1475, %v625_v48  }
 0x175   : > { %1204 = vmatmul.msk.bf16.gmra.mxu2 %vm920_vm9, %v2023_v14  ;;  %629 = vperm.xlu0 %1474, %v624_v57  }
 0x176   : > { %1476 = vset.pattern.permute.xlu2 %v1494_v36 }
 0x178   : > { %v1990_v41 = vpop.permute.xlu0 %803 }
 0x179   : > { %v1992_v10 = vpop.permute.xlu2 %743  ;;  %v748_v47 = vpop.permute.xlu1 %747  ;;  %v857_v11 = vsel %vm829_vm8, %v802_v23, %v1990_v41 }
 0x17a   : > { %v839_v54 = vsel %vm829_vm8, %v748_v47, %v1982_v53  ;;  %1001 = vmatpush.bf16.msrb.mxu2 %v857_v11 }
 0x17b   : > { %984 = vmatpush.bf16.msra.mxu3 %v839_v54 }
 0x180   : > { %v758_v58 = vpop.permute.xlu0 %757 }
 0x181   : > { %v790_v28 = vpop.permute.xlu2 %789  ;;  %v800_v56 = vpop.permute.xlu1 %799  ;;  %v842_v31 = vsel %vm829_vm8, %v758_v58, %v760_v55 }
 0x182   : > { %928 = vmatpush.bf16.msra.mxu0 %v842_v31  ;;  %v856_v9 = vsel %vm829_vm8, %v800_v56, %v802_v23  ;;  %v1193_v23 = vld [vmem:[%s2139_s1] sm:$0xf]  ;;  %v1195_v56 = vld [vmem:[%s2139_s1 + $0xc] sm:$0xf0] }
 0x183   : > { %947 = vmatpush.bf16.msra.mxu1 %v856_v9 }
 0x188   : > { %v2008_v12 = vpop.permute.xlu0 %797 }
 0x189   : > { %v742_v37 = vpop.permute.xlu1 %741  ;;  %v2012_v55 = vpop.permute.xlu2 %737  ;;  %v855_v6 = vsel %vm829_vm8, %v796_v61, %v2008_v12 }
 0x18a   : > { %v837_v0 = vsel %vm829_vm8, %v742_v37, %v1992_v10  ;;  %1002 = vmatpush.bf16.msrb.mxu2 %v855_v6 }
 0x18b   : > { %985 = vmatpush.bf16.msra.mxu3 %v837_v0 }
 0x190   : > { %v752_v7 = vpop.permute.xlu0 %751 }
 0x191   : > { %v794_v4 = vpop.permute.xlu1 %793  ;;  %v784_v59 = vpop.permute.xlu2 %783  ;;  %v840_v21 = vsel %vm829_vm8, %v752_v7, %v754_v40 }
 0x192   : > { %929 = vmatpush.bf16.msra.mxu0 %v840_v21  ;;  %v854_v30 = vsel %vm829_vm8, %v794_v4, %v796_v61  ;;  %v2056_v61 = vor.u32 %v1212_v46, %v1193_v23 }
 0x193   : > { %948 = vmatpush.bf16.msra.mxu1 %v854_v30 }
 0x198   : > { %v2025_v1 = vpop.permute.xlu0 %791 }
 0x199   : > { %v736_v20 = vpop.permute.xlu1 %735  ;;  %v853_v13 = vsel %vm829_vm8, %v790_v28, %v2025_v1  ;;  %v2033_v16 = vpop.permute.xlu2 %731 }
 0x19a   : > { %v835_v62 = vsel %vm829_vm8, %v736_v20, %v2012_v55  ;;  %1003 = vmatpush.bf16.msrb.mxu2 %v853_v13 }
 0x19b   : > { %986 = vmatpush.bf16.msra.mxu3 %v835_v62 }
 0x1a0   : > { %v746_v60 = vpop.permute.xlu0 %745 }
 0x1a1   : > { %v788_v51 = vpop.permute.xlu1 %787  ;;  %v838_v25 = vsel %vm829_vm8, %v746_v60, %v748_v47  ;;  %v778_v24 = vpop.permute.xlu2 %777 }
 0x1a2   : > { %930 = vmatpush.bf16.msra.mxu0 %v838_v25  ;;  %v852_v29 = vsel %vm829_vm8, %v788_v51, %v790_v28  ;;  %v1211_v28 = vld [vmem:[%s2139_s1 + $0x4] sm:$0xf] }
 0x1a3   : > { %949 = vmatpush.bf16.msra.mxu1 %v852_v29  ;;  %v1198_v9 = vor.u32 %v1211_v28, %v1195_v56 }
 0x1a8   : > { %v2037_v2 = vpop.permute.xlu0 %785 }
 0x1a9   : > { %v730_v39 = vpop.permute.xlu1 %729  ;;  %v851_v26 = vsel %vm829_vm8, %v784_v59, %v2037_v2  ;;  %v2043_v38 = vpop.permute.xlu2 %725 }
 0x1aa   : > { %v833_v35 = vsel %vm829_vm8, %v730_v39, %v2033_v16  ;;  %1004 = vmatpush.bf16.msrb.mxu2 %v851_v26 }
 0x1ab   : > { %987 = vmatpush.bf16.msra.mxu3 %v833_v35 }
 0x1b0   : > { %v740_v43 = vpop.permute.xlu0 %739 }
 0x1b1   : > { %v782_v34 = vpop.permute.xlu1 %781  ;;  %v836_v44 = vsel %vm829_vm8, %v740_v43, %v742_v37  ;;  %v772_v40 = vpop.permute.xlu2 %771 }
 0x1b2   : > { %931 = vmatpush.bf16.msra.mxu0 %v836_v44  ;;  %v850_v18 = vsel %vm829_vm8, %v782_v34, %v784_v59 }
 0x1b3   : > { %950 = vmatpush.bf16.msra.mxu1 %v850_v18 }
 0x1b8   : > { %v780_v49 = vpop.permute.xlu0 %779 }
 0x1b9   : > { %v724_v52 = vpop.permute.xlu1 %723  ;;  %v849_v32 = vsel %vm829_vm8, %v778_v24, %v780_v49  ;;  %v770_v58 = vpop.permute.xlu2 %769 }
 0x1ba   : > { %v831_v42 = vsel %vm829_vm8, %v724_v52, %v2043_v38  ;;  %1005 = vmatpush.bf16.msrb.mxu2 %v849_v32  ;;  %v846_v31 = vsel %vm829_vm8, %v770_v58, %v772_v40 }
 0x1bb   : > { %988 = vmatpush.bf16.msra.mxu3 %v831_v42 }
 0x1be   : > { %989 = vmatmul.bf16.vlgmr.msra.gmra.mxu3 %v2056_v61 }
 0x1bf   : > { %1053 = vmatpush.bf16.msrb.mxu3 %v1958_v33 }
 0x1c0   : > { %v734_v47 = vpop.permute.xlu0 %733 }
 0x1c1   : > { %v776_v11 = vpop.permute.xlu1 %775  ;;  %v834_v33 = vsel %vm829_vm8, %v734_v47, %v736_v20  ;;  %v822_v21 = vpop.permute.xlu2 %821 }
 0x1c2   : > { %932 = vmatpush.bf16.msra.mxu0 %v834_v33  ;;  %v848_v54 = vsel %vm829_vm8, %v776_v11, %v778_v24 }
 0x1c3   : > { %1054 = vmatpush.bf16.msrb.mxu3 %v1980_v45  ;;  %951 = vmatpush.bf16.msra.mxu1 %v848_v54  ;;  %v568_v45 = vld [vmem:[%s2139_s1 + $0x18] sm:$0xff] }
 0x1c4   : > { %v654_v17 = vunpack.c.l.b16 %v568_v45  ;;  %v655_v59 = vunpack.c.h.b16 %v568_v45 }
 0x1c6   : > { %v660_v7 = vpack.c.b16 %v654_v17, %v654_v17 }
 0x1c7   : > { %1055 = vmatpush.bf16.msrb.mxu3 %v1990_v41  ;;  %952 = vmatpush.bf16.msra.mxu1 %v846_v31 }
 0x1c8   : > { %v774_v3 = vpop.permute.xlu0 %773 }
 0x1c9   : > { %v728_v37 = vpop.permute.xlu1 %727  ;;  %v847_v6 = vsel %vm829_vm8, %v772_v40, %v774_v3 }
 0x1ca   : > { %v832_v0 = vsel %vm829_vm8, %v728_v37, %v730_v39  ;;  %1006 = vmatpush.bf16.msrb.mxu2 %v847_v6  ;;  %953 = vmatmul.bf16.vlgmr.msra.gmra.mxu1 %v1198_v9 }
 0x1cb   : > { %1035 = vmatpush.bf16.msrb.mxu1 %v1915_v19  ;;  %1056 = vmatpush.bf16.msrb.mxu3 %v2008_v12 }
 0x1cc   : > { %933 = vmatpush.bf16.msra.mxu0 %v832_v0 }
 0x1cd   : > { %1007 = vmatmul.bf16.vlgmr.msrb.gmra.mxu2 %v1198_v9 }
 0x1ce   : > { %994 = vmatmul.bf16.gmra.mxu3 %v660_v7 }
 0x1cf   : > { %1036 = vmatpush.bf16.msrb.mxu1 %v1973_v50  ;;  %1057 = vmatpush.bf16.msrb.mxu3 %v2025_v1  ;;  %v661_v50 = vpack.c.b16 %v655_v59, %v655_v59 }
 0x1d0   : > { %v722_v19 = vpop.permute.xlu0 %721 }
 0x1d1   : > { %v828_v41 = vpop.permute.xlu1 %827  ;;  %v830_v12 = vsel %vm829_vm8, %v722_v19, %v724_v52 }
 0x1d2   : > { %1077 = vmatpush.bf16.msra.mxu2 %v828_v41  ;;  %934 = vmatpush.bf16.msra.mxu0 %v830_v12  ;;  %v865_v4 = vsel %vm829_vm8, %v1927_v15, %v828_v41  ;;  %v626_v15 = vld [vmem:[%s2140_s2 + $0x10] sm:$0xff] }
 0x1d3   : > { %1037 = vmatpush.bf16.msrb.mxu1 %v1960_v8  ;;  %1058 = vmatpush.bf16.msrb.mxu3 %v2037_v2  ;;  %v863_v8 = vsel %vm829_vm8, %v1943_v5, %v822_v21 }
 0x1d4   : > { %639 = vperm.xlu2 %1476, %v626_v15  }
 0x1d5   : > { %935 = vmatmul.bf16.vlgmr.msra.gmra.mxu0 %v2056_v61 }
 0x1d6   : > { %1023 = vmatpush.bf16.msrb.mxu0 %v865_v4  ;;  %1078 = vmatpush.bf16.msra.mxu2 %v822_v21 }
 0x1d7   : > { %1038 = vmatpush.bf16.msrb.mxu1 %v1982_v53  ;;  %1059 = vmatpush.bf16.msrb.mxu3 %v780_v49 }
 0x1d8   : > { %v972_v5 = vpop.f32.mrf.mxu2 }
 0x1da   : > { %1024 = vmatpush.bf16.msrb.mxu0 %v863_v8  ;;  %958 = vmatmul.bf16.gmra.mxu1 %v661_v50 }
 0x1db   : > { %1039 = vmatpush.bf16.msrb.mxu1 %v1992_v10  ;;  %1060 = vmatpush.bf16.msrb.mxu3 %v774_v3 }
 0x1dd   : > { %1012 = vmatmul.bf16.gmra.mxu2 %v661_v50 }
 0x1de   : > { %1061 = vmatmul.bf16.vlgmr.msrb.gmra.mxu3 %v1198_v9 }
 0x1df   : > { %1040 = vmatpush.bf16.msrb.mxu1 %v2012_v55 }
 0x1e0   : > { %v974_v53 = vpop.f32.mrf.mxu2 }
 0x1e3   : > { %1041 = vmatpush.bf16.msrb.mxu1 %v2033_v16 }
 0x1e5   : > { %940 = vmatmul.bf16.gmra.mxu0 %v660_v7 }
 0x1e6   : > { %v635_v18 = vpop.permute.xlu1 %634 }
 0x1e7   : > { %1042 = vmatpush.bf16.msrb.mxu1 %v2043_v38  ;;  %v630_v2 = vpop.permute.xlu0 %629 }
 0x1ea   : > { %1043 = vmatmul.bf16.vlgmr.msrb.gmra.mxu1 %v2056_v61 }
 0x1ed   : > { %1207 = vmatmul.msk.bf16.vlgmr.msra.gmra.mxu2 %vm920_vm9, %v2006_v27 }
 0x1ee   : > { %1066 = vmatmul.bf16.gmra.mxu3 %v661_v50 }
 0x1f5   : > { %1205 = vmatmul.msk.bf16.vlgmr.msrb.gmra.mxu0 %vm920_vm9, %v2006_v27 }
 0x1f8   : > { %v2111_v10 = vpop.f32.mrf.mxu2 }
 0x1fa   : > { %1048 = vmatmul.bf16.gmra.mxu1 %v660_v7 }
 0x1fd   : > { %1208 = vmatmul.msk.bf16.gmra.mxu2 %vm920_vm9, %v2023_v14 }
 0x200   : > { %v979_v55 = vpop.f32.mrf.mxu2 }
 0x205   : > { %1206 = vmatmul.msk.bf16.gmra.mxu0 %vm920_vm9, %v2023_v14 }
 0x22e   : > { %v640_v31 = vpop.permute.xlu2 %639 }
 0x241   : > { %v990_v30 = vpop.f32.mrf.mxu3 }
 0x242   : > { %v991_v23 = vadd.f32 %v990_v30, %v630_v2 }
 0x247   : > { %v954_v22 = vpop.f32.mrf.mxu1 }
 0x249   : > { %v992_v63 = vpop.f32.mrf.mxu3 }
 0x24a   : > { %v993_v56 = vadd.f32 %v992_v63, %v635_v18 }
 0x24f   : > { %v956_v1 = vpop.f32.mrf.mxu1 }
 0x250   : > { %v1008_v20 = vpop.f32.mrf.mxu2 }
 0x251   : > { %v2113_v13 = vpop.f32.mrf.mxu3  ;;  %v1009_v61 = vadd.f32 %v1008_v20, %v991_v23 }
 0x252   : > { %v936_v27 = vpop.f32.mrf.mxu0 }
 0x253   : > { %v937_v39 = vadd.f32 %v936_v27, %v630_v2 }
 0x255   : > { %v955_v34 = vadd.f32 %v954_v22, %v937_v39 }
 0x257   : > { %v959_v62 = vpop.f32.mrf.mxu1  ;;  %v973_v49 = vadd.f32 %v972_v5, %v955_v34 }
 0x258   : > { %v1010_v16 = vpop.f32.mrf.mxu2 }
 0x259   : > { %v997_v60 = vpop.f32.mrf.mxu3  ;;  %v1098_v48 = vmul.f32 0.1, %v973_v49  ;;  %vm1089_vm11 = vcmp.ge.f32.partialorder %v973_v49, 0.0  ;;  %v1011_v41 = vadd.f32 %v1010_v16, %v993_v56 }
 0x25a   : > { %v938_v51 = vpop.f32.mrf.mxu0 }
 0x25b   : > { %v939_v40 = vadd.f32 %v938_v51, %v635_v18  ;;  %v1107_v3 = vsel %vm1089_vm11, %v973_v49, %v1098_v48 }
 0x25d   : > { %v957_v57 = vadd.f32 %v956_v1, %v939_v40 }
 0x25f   : > { %v961_v25 = vpop.f32.mrf.mxu1  ;;  %v975_v45 = vadd.f32 %v974_v53, %v957_v57  ;;  %v996_v53 = vadd.f32 %v2113_v13, %v640_v31 }
 0x260   : > { %v2115_v29 = vpop.f32.mrf.mxu2 }
 0x261   : > { %v1062_v14 = vpop.f32.mrf.mxu3  ;;  %v1101_v21 = vmul.f32 0.1, %v975_v45  ;;  %vm1092_vm15 = vcmp.ge.f32.partialorder %v975_v45, 0.0  ;;  %v1014_v25 = vadd.f32 %v2115_v29, %v996_v53 }
 0x262   : > { %v941_v24 = vpop.f32.mrf.mxu0 }
 0x263   : > { %v942_v17 = vadd.f32 %v941_v24, %v640_v31  ;;  %v1110_v20 = vsel %vm1092_vm15, %v975_v45, %v1101_v21 }
 0x265   : > { %v960_v50 = vadd.f32 %v959_v62, %v942_v17 }
 0x267   : > { %v1044_v26 = vpop.f32.mrf.mxu1  ;;  %v978_v1 = vadd.f32 %v2111_v10, %v960_v50 }
 0x268   : > { %v1015_v35 = vpop.f32.mrf.mxu2  ;;  %v1045_v38 = vadd.f32 %v1044_v26, %v630_v2 }
 0x269   : > { %v1064_v43 = vpop.f32.mrf.mxu3  ;;  %vm1095_vm2 = vcmp.ge.f32.partialorder %v978_v1, 0.0 }
 0x26a   : > { %v943_v44 = vpop.f32.mrf.mxu0  ;;  %v1063_v46 = vadd.f32 %v1062_v14, %v1045_v38  ;;  %v1104_v14 = vmul.f32 0.1, %v978_v1 }
 0x26c   : > { %v1113_v35 = vsel %vm1095_vm2, %v978_v1, %v1104_v14 }
 0x26f   : > { %v1046_v52 = vpop.f32.mrf.mxu1 }
 0x270   : > { %v1080_v32 = vpop.f32.mrf.mxu2  ;;  %v1047_v11 = vadd.f32 %v1046_v52, %v635_v18 }
 0x271   : > { %v1081_v42 = vadd.f32 %v1080_v32, %v1063_v46  ;;  %v1067_v36 = vpop.f32.mrf.mxu3 }
 0x272   : > { %v1026_v47 = vpop.f32.mrf.mxu0  ;;  %v1065_v6 = vadd.f32 %v1064_v43, %v1047_v11 }
 0x273   : > { %vm1091_vm10 = vcmp.ge.f32.partialorder %v1081_v42, 0.0  ;;  %v1100_v33 = vmul.f32 0.1, %v1081_v42  ;;  %v1027_v54 = vadd.f32 %v1026_v47, %v1009_v61 }
 0x275   : > { %v1109_v58 = vsel %vm1091_vm10, %v1081_v42, %v1100_v33  ;;  %vm1090_vm13 = vcmp.ge.f32.partialorder %v1027_v54, 0.0  ;;  %v1099_v28 = vmul.f32 0.1, %v1027_v54 }
 0x276   : > { %v1117_v9 = vpack.c.bf16 %v1109_v58, %v1109_v58 }
 0x277   : > { %v1108_v37 = vsel %vm1090_vm13, %v1027_v54, %v1099_v28  ;;  %v1049_v0 = vpop.f32.mrf.mxu1 }
 0x278   : > { %1124 = vst.msk [vmem:[%s2121_s27 + $0x8] sm:$0xf] %vm1123_vm12, %v1117_v9  ;;  %v1116_v7 = vpack.c.bf16 %v1108_v37, %v1107_v3  ;;  %v1082_v19 = vpop.f32.mrf.mxu2  ;;  %v1050_v12 = vadd.f32 %v1049_v0, %v640_v31 }
 0x279   : > { %v1083_v4 = vadd.f32 %v1082_v19, %v1065_v6  ;;  %v1069_v59 = vpop.f32.mrf.mxu3 }
 0x27a   : > { %1122 = vst [vmem:[%s2121_s27] sm:$0xff] %v1116_v7  ;;  %v1028_v8 = vpop.f32.mrf.mxu0  ;;  %v1068_v22 = vadd.f32 %v1067_v36, %v1050_v12 }
 0x27b   : > { %vm1094_vm14 = vcmp.ge.f32.partialorder %v1083_v4, 0.0  ;;  %v1103_v15 = vmul.f32 0.1, %v1083_v4  ;;  %v1029_v5 = vadd.f32 %v1028_v8, %v1011_v41 }
 0x27d   : > { %v1112_v55 = vsel %vm1094_vm14, %v1083_v4, %v1103_v15  ;;  %vm1093_vm0 = vcmp.ge.f32.partialorder %v1029_v5, 0.0  ;;  %v1102_v30 = vmul.f32 0.1, %v1029_v5 }
 0x27e   : > { %v1119_v63 = vpack.c.bf16 %v1112_v55, %v1112_v55 }
 0x27f   : > { %v1111_v27 = vsel %vm1093_vm0, %v1029_v5, %v1102_v30  ;;  %v1051_v16 = vpop.f32.mrf.mxu1 }
 0x280   : > { %1126 = vst.msk [vmem:[%s2121_s27 + $0x14] sm:$0xf] %vm1123_vm12, %v1119_v63  ;;  %v1118_v62 = vpack.c.bf16 %v1111_v27, %v1110_v20  ;;  %v1085_v60 = vpop.f32.mrf.mxu2 }
 0x281   : > { %v1086_v51 = vadd.f32 %v1085_v60, %v1068_v22 }
 0x282   : > { %1125 = vst [vmem:[%s2121_s27 + $0xc] sm:$0xff] %v1118_v62  ;;  %v1031_v13 = vpop.f32.mrf.mxu0 }
 0x283   : > { %vm1097_vm1 = vcmp.ge.f32.partialorder %v1086_v51, 0.0  ;;  %v1106_v24 = vmul.f32 0.1, %v1086_v51  ;;  %v1032_v2 = vadd.f32 %v1031_v13, %v1014_v25 }
 0x285   : > { %v1115_v10 = vsel %vm1097_vm1, %v1086_v51, %v1106_v24  ;;  %vm1096_vm3 = vcmp.ge.f32.partialorder %v1032_v2, 0.0  ;;  %v1105_v39 = vmul.f32 0.1, %v1032_v2 }
 0x286   : > { %v1121_v26 = vpack.c.bf16 %v1115_v10, %v1115_v10 }
 0x287   : > { %v1114_v38 = vsel %vm1096_vm3, %v1032_v2, %v1105_v39 }
 0x288   : > { %1128 = vst.msk [vmem:[%s2121_s27 + $0x20] sm:$0xf] %vm1123_vm12, %v1121_v26  ;;  %v1120_v43 = vpack.c.bf16 %v1114_v38, %v1113_v35  ;;  %v1087_v34 = vpop.f32.mrf.mxu2 }
 0x28a   : > { %1127 = vst [vmem:[%s2121_s27 + $0x18] sm:$0xff] %v1120_v43  ;;  %v1033_v29 = vpop.f32.mrf.mxu0 }
 0x28b PF: > { %s13_s12 = sadd.s32 1, %s1483_s12  }
 0x28c   : > { %p10_p4 = scmp.ge.s32.totalorder %s13_s12, 6  }
 0x28e   :  { %12 = sbr.rel (!%p10_p4) target bundleno = 1 (0x1), region = 62 }

// kernel: sisr_forward.43
= control target key start
LH: loop header
LB: loop body
LE: loop exit
PB: predicated region body
PF: predicated region fallthrough
CT: control target
= control target key end

     0   :  { %s2273_s12 = smov 0   ;;  %s3879_s0 = inlined_call_operand.vmem [shape: bf16[4,56,360], index: 0, kind: input, shape index: {}]   ;;  %s3880_s1 = inlined_call_operand.vmem [shape: bf16[24,504], index: 1, kind: input, shape index: {}]   ;;  %s3881_s2 = inlined_call_operand.vmem [shape: f32[24,1], index: 2, kind: input, shape index: {}]   ;;  %s3882_s3 = inlined_call_operand.vmem [shape: bf16[4,24,288], index: 3, kind: output, shape index: {}]  }
   0x1 LB: > { %s1777_s13 = sadd.s32 4294967295, %s2241_s12   ;;  %p1781_p0 = scmp.ge.s32.totalorder %s2241_s12, 1  ;;  %s2241_s12 = sphi %s2273_s12, %s13_s12  }
   0x2   : > { %p137_p1 = scmp.lt.s32.totalorder %s2241_s12, 5 }
   0x4   : > { %p138_p2 = pnand %p1781_p0, %p137_p1 }
   0x6   : > { %141 = sbr.rel (%p138_p2) target bundleno = 899 (0x383), region = 32 }
   0xb   : > { %p161_p3 = scmp.lt.s32.totalorder %s1777_s13, 3  ;;  %s2243_s18 = smov 127   ;;  %vm269_vm0 = vcmask 1039360   ;;  %vm347_vm1 = vcmask 1031168   ;;  %vm425_vm2 = vcmask 900096   ;;  %vm503_vm3 = vcmask 891904  }
   0xc   : > { %s2244_s19 = smov 126   ;;  %s2245_s20 = smov 110   ;;  %vm581_vm4 = vcmask 883712   ;;  %vm659_vm5 = vcmask 752640   ;;  %vm815_vm6 = vcmask 736256   ;;  %vm737_vm7 = vcmask 744448  }
   0xd   : > { %s4221_s13 = smov (!%p161_p3, %s1777_s13), 3  ;;  %s2246_s21 = smov 109   ;;  %vm1291_vm8 = vcmask 908288   ;;  %vm1456_vm9 = vcmask 1043456   ;;  %vm1449_vm10 = vcmask 982016  }
   0xe   : > { %s1812_s14 = smul.u32 84, %s4221_s13  ;;  %s2247_s22 = smov 108  }
   0xf   : > { %s2248_s23 = smov 92   ;;  %s2249_s24 = smov 91  }
  0x10   : > { %s2287_s17 = scalar_lea.vmem %s3879_s0, %s1812_s14  ;;  %s2250_s25 = smov 90  }
  0x11   : > { %v2290_v0 = vld [vmem:[%s2287_s17 + $0x20] sm:$0xf]  ;;  %v2293_v1 = vld [vmem:[%s2287_s17 + $0x24] sm:$0xff]  ;;  %v2296_v2 = vld [vmem:[%s2287_s17 + $0xc] sm:$0xff]  ;;  %s2252_s5 = smov 111   ;;  %s1813_s28 = smul.u32 36, %s4221_s13 }
  0x12   : > { %3991 = vst [vmem:[#allocation2_spill] sm:$0xff] %v2290_v0  ;;  %v3886_v3 = vunpack.c.l.bf16 %v2290_v0  ;;  %v3894_v4 = vunpack.c.l.bf16 %v2293_v1  ;;  %v2301_v5 = vld [vmem:[%s2287_s17 + $0x14] sm:$0xf]  ;;  %v3892_v6 = vunpack.c.h.bf16 %v2296_v2  ;;  %v2305_v7 = vld [vmem:[%s2287_s17] sm:$0xff]  ;;  %v2311_v11 = vld [vmem:[%s2287_s17 + $0x2c] sm:$0xf]  ;;  %v3888_v17 = vunpack.c.h.bf16 %v2293_v1 }
  0x13   : > { %3992 = vst [vmem:[#allocation3_spill] sm:$0xff] %v2293_v1  ;;  %v3883_v8 = vunpack.c.l.bf16 %v2301_v5  ;;  %v3891_v9 = vunpack.c.l.bf16 %v2305_v7  ;;  %v3893_v10 = vunpack.c.h.bf16 %v2305_v7  ;;  %v2320_v13 = vld [vmem:[%s2287_s17 + $0x18] sm:$0xff]  ;;  %v2323_v14 = vld [vmem:[%s2287_s17 + $0x8] sm:$0xf]  ;;  %v3885_v18 = vunpack.c.l.bf16 %v2311_v11  ;;  %v182_v27 = vld [vmem:[%s2287_s17 + $0x44] sm:$0xf]  ;;  %s3861_s4 = scalar_lea.vmem %s3882_s3, %s1813_s28 }
  0x14   : > { %3993 = vst [vmem:[#allocation4_spill] sm:$0xff] %v2296_v2  ;;  %v2317_v12 = vpack.i.bf16 %v3894_v4, %v3886_v3  ;;  %v3890_v19 = vunpack.c.l.bf16 %v2296_v2  ;;  %v3895_v20 = vunpack.c.l.bf16 %v2320_v13  ;;  %v3889_v21 = vunpack.c.h.bf16 %v2320_v13  ;;  %v181_v26 = vld [vmem:[%s2287_s17 + $0x3c] sm:$0xff]  ;;  %v180_v28 = vld [vmem:[%s2287_s17 + $0x38] sm:$0xf]  ;;  %v179_v29 = vld [vmem:[%s2287_s17 + $0x30] sm:$0xff] }
  0x15   : > { %3994 = vst [vmem:[#allocation5_spill] sm:$0xff] %v2301_v5  ;;  %v2329_v15 = vpack.i.bf16 %v3883_v8, %v3892_v6  ;;  %v2335_v16 = vpack.i.bf16 %v3893_v10, %v3891_v9  ;;  %v3884_v22 = vunpack.c.l.bf16 %v2323_v14  ;;  %v2353_v23 = vpack.i.bf16 %v3885_v18, %v3888_v17  ;;  %v2402_v39 = vld [vmem:[%s2287_s17 + $0x48] sm:$0xff]  ;;  %v184_v42 = vld [vmem:[%s2287_s17 + $0x50] sm:$0xf] }
  0x16   : > { %3995 = vst [vmem:[#allocation6_spill] sm:$0xff] %v2305_v7  ;;  %1853 = vrot.lane.b32.xlu2 %v2317_v12, %s2243_s18  ;;  %v2359_v24 = vpack.i.bf16 %v3889_v21, %v3895_v20  ;;  %v2373_v30 = vunpack.c.h.bf16 %v181_v26  ;;  %v2375_v31 = vunpack.c.l.bf16 %v182_v27  ;;  %v2381_v32 = vunpack.c.l.bf16 %v180_v28 }
  0x17   : > { %3996 = vst [vmem:[#allocation7_spill] sm:$0xff] %v2311_v11  ;;  %1843 = vrot.lane.b32.xlu1 %v2329_v15, %s2243_s18  ;;  %1833 = vrot.lane.b32.xlu0 %v2335_v16, %s2243_s18  ;;  %v2365_v25 = vpack.i.bf16 %v3890_v19, %v3884_v22  ;;  %v2383_v33 = vunpack.c.l.bf16 %v181_v26  ;;  %v2385_v34 = vunpack.c.l.bf16 %v179_v29  ;;  %v2387_v35 = vunpack.c.h.bf16 %v179_v29 }
  0x18   : > { %3997 = vst [vmem:[#allocation8_spill] sm:$0xff] %v2320_v13  ;;  %v2391_v36 = vpack.i.bf16 %v2375_v31, %v2373_v30  ;;  %v3897_v40 = vunpack.c.l.bf16 %v2402_v39  ;;  %v3899_v41 = vunpack.c.h.bf16 %v2402_v39  ;;  %v2413_v43 = vunpack.c.l.bf16 %v184_v42 }
  0x19   : > { %3998 = vst [vmem:[#allocation9_spill] sm:$0xff] %v2323_v14  ;;  %v2395_v37 = vpack.i.bf16 %v2383_v33, %v2381_v32  ;;  %v2399_v38 = vpack.i.bf16 %v2387_v35, %v2385_v34 }
  0x1a   : > { %3999 = vst [vmem:[#allocation10_spill] sm:$0xff] %v2373_v30  ;;  %v2419_v44 = vpack.i.bf16 %v3899_v41, %v3897_v40 }
  0x1b   : > { %4000 = vst [vmem:[#allocation11_spill] sm:$0xff] %v2375_v31 }
  0x1c   : > { %4001 = vst [vmem:[#allocation12_spill] sm:$0xff] %v2381_v32 }
  0x1d   : > { %4002 = vst [vmem:[#allocation13_spill] sm:$0xff] %v2383_v33 }
  0x1e   : > { %1858 = vrot.lane.b32.xlu2 %v2353_v23, %s2243_s18  ;;  %4003 = vst [vmem:[#allocation14_spill] sm:$0xff] %v2385_v34 }
  0x1f   : > { %1848 = vrot.lane.b32.xlu1 %v2359_v24, %s2243_s18  ;;  %1838 = vrot.lane.b32.xlu0 %v2365_v25, %s2243_s18  ;;  %4004 = vst [vmem:[#allocation15_spill] sm:$0xff] %v2387_v35 }
  0x20   : > { %4005 = vst [vmem:[#allocation16_spill] sm:$0xff] %v2413_v43 }
  0x26   : > { %1873 = vrot.lane.b32.xlu2 %v2391_v36, %s2243_s18 }
  0x27   : > { %1868 = vrot.lane.b32.xlu1 %v2395_v37, %s2243_s18  ;;  %1863 = vrot.lane.b32.xlu0 %v2399_v38, %s2243_s18 }
  0x2e   : > { %1883 = vrot.lane.b32.xlu2 %v2335_v16, %s2244_s19 }
  0x2f   : > { %267 = vrot.lane.b32.xlu1 %v2413_v43, %s2243_s18  ;;  %1878 = vrot.lane.b32.xlu0 %v2419_v44, %s2243_s18 }
  0x36   : > { %1898 = vrot.lane.b32.xlu2 %v2359_v24, %s2244_s19 }
  0x37   : > { %1893 = vrot.lane.b32.xlu1 %v2329_v15, %s2244_s19  ;;  %1888 = vrot.lane.b32.xlu0 %v2365_v25, %s2244_s19 }
  0x3e   : > { %1913 = vrot.lane.b32.xlu2 %v2399_v38, %s2244_s19 }
  0x3f   : > { %1908 = vrot.lane.b32.xlu1 %v2353_v23, %s2244_s19  ;;  %1903 = vrot.lane.b32.xlu0 %v2317_v12, %s2244_s19 }
  0x46   : > { %1928 = vrot.lane.b32.xlu2 %v2419_v44, %s2244_s19 }
  0x47   : > { %1923 = vrot.lane.b32.xlu1 %v2391_v36, %s2244_s19  ;;  %1918 = vrot.lane.b32.xlu0 %v2395_v37, %s2244_s19 }
  0x4e   : > { %1938 = vrot.lane.b32.xlu2 %v2365_v25, %s2245_s20 }
  0x4f   : > { %1933 = vrot.lane.b32.xlu1 %v2335_v16, %s2245_s20  ;;  %345 = vrot.lane.b32.xlu0 %v2413_v43, %s2244_s19 }
  0x56   : > { %1953 = vrot.lane.b32.xlu2 %v2317_v12, %s2245_s20 }
  0x57   : > { %1948 = vrot.lane.b32.xlu1 %v2359_v24, %s2245_s20  ;;  %1943 = vrot.lane.b32.xlu0 %v2329_v15, %s2245_s20 }
  0x5e   : > { %1968 = vrot.lane.b32.xlu2 %v2395_v37, %s2245_s20 }
  0x5f   : > { %1963 = vrot.lane.b32.xlu1 %v2399_v38, %s2245_s20  ;;  %1958 = vrot.lane.b32.xlu0 %v2353_v23, %s2245_s20 }
  0x66   : > { %423 = vrot.lane.b32.xlu2 %v2413_v43, %s2245_s20 }
  0x67   : > { %1978 = vrot.lane.b32.xlu1 %v2419_v44, %s2245_s20  ;;  %1973 = vrot.lane.b32.xlu0 %v2391_v36, %s2245_s20 }
  0x6e   : > { %1993 = vrot.lane.b32.xlu2 %v2329_v15, %s2246_s21 }
  0x6f   : > { %1988 = vrot.lane.b32.xlu1 %v2365_v25, %s2246_s21  ;;  %1983 = vrot.lane.b32.xlu0 %v2335_v16, %s2246_s21 }
  0x70   : > { %v2450_v45 = vpop.permute.xlu2 %1853 }
  0x71   : > { %v3898_v54 = vunpack.i.l.bf16 %v2450_v45 }
  0x76   : > { %2008 = vrot.lane.b32.xlu2 %v2353_v23, %s2246_s21 }
  0x77   : > { %2003 = vrot.lane.b32.xlu1 %v2317_v12, %s2246_s21  ;;  %1998 = vrot.lane.b32.xlu0 %v2359_v24, %s2246_s21 }
  0x78   : > { %v2455_v46 = vpop.permute.xlu2 %1858 }
  0x79   : > { %v3900_v63 = vunpack.i.h.bf16 %v2455_v46 }
  0x7e   : > { %2023 = vrot.lane.b32.xlu2 %v2391_v36, %s2246_s21 }
  0x7f   : > { %2018 = vrot.lane.b32.xlu1 %v2395_v37, %s2246_s21  ;;  %2013 = vrot.lane.b32.xlu0 %v2399_v38, %s2246_s21 }
  0x80   : > { %v2460_v47 = vpop.permute.xlu2 %1873 }
  0x81   : > { %4006 = vst [vmem:[#allocation17_spill] sm:$0xff] %v2460_v47  ;;  %v3887_v48 = vunpack.i.h.bf16 %v2460_v47  ;;  %v3902_v49 = vunpack.i.l.bf16 %v2460_v47 }
  0x83   : > { %v2469_v50 = vsel %vm269_vm0, %v3902_v49, %v3887_v48 }
  0x86   : > { %2033 = vrot.lane.b32.xlu2 %v2335_v16, %s2247_s22 }
  0x87   : > { %501 = vrot.lane.b32.xlu1 %v2413_v43, %s2246_s21  ;;  %2028 = vrot.lane.b32.xlu0 %v2419_v44, %s2246_s21 }
  0x88   : > { %v2475_v51 = vpop.permute.xlu2 %1883 }
  0x89   : > { %v2477_v52 = vpop.permute.xlu1 %1843  ;;  %v2479_v53 = vpop.permute.xlu0 %1833  ;;  %v3904_v48 = vunpack.i.h.bf16 %v2475_v51 }
  0x8a   : > { %v3896_v55 = vunpack.i.h.bf16 %v2477_v52 }
  0x8c   : > { %v2487_v56 = vpack.c.bf16 %v3898_v54, %v3896_v55 }
  0x8e   : > { %4007 = vst [vmem:[#allocation18_spill] sm:$0xff] %v2487_v56  ;;  %2048 = vrot.lane.b32.xlu2 %v2359_v24, %s2247_s22 }
  0x8f   : > { %2043 = vrot.lane.b32.xlu1 %v2329_v15, %s2247_s22  ;;  %2038 = vrot.lane.b32.xlu0 %v2365_v25, %s2247_s22 }
  0x90   : > { %v2495_v57 = vpop.permute.xlu2 %1898 }
  0x91   : > { %4008 = vst [vmem:[#allocation19_spill] sm:$0xff] %v2495_v57  ;;  %v2497_v58 = vpop.permute.xlu1 %1848  ;;  %v2499_v59 = vpop.permute.xlu0 %1838 }
  0x96   : > { %2063 = vrot.lane.b32.xlu2 %v2399_v38, %s2247_s22 }
  0x97   : > { %2058 = vrot.lane.b32.xlu1 %v2353_v23, %s2247_s22  ;;  %2053 = vrot.lane.b32.xlu0 %v2317_v12, %s2247_s22 }
  0x98   : > { %v2507_v60 = vpop.permute.xlu2 %1913 }
  0x99   : > { %4009 = vst [vmem:[#allocation20_spill] sm:$0xff] %v2507_v60  ;;  %v2509_v61 = vpop.permute.xlu1 %1868  ;;  %v2511_v62 = vpop.permute.xlu0 %1863 }
  0x9a   : > { %v3901_v26 = vunpack.i.l.bf16 %v2509_v61 }
  0x9c   : > { %v2519_v27 = vpack.c.bf16 %v3901_v26, %v3900_v63 }
  0x9e   : > { %4010 = vst [vmem:[#allocation21_spill] sm:$0xff] %v2519_v27  ;;  %2078 = vrot.lane.b32.xlu2 %v2419_v44, %s2247_s22 }
  0x9f   : > { %2073 = vrot.lane.b32.xlu1 %v2391_v36, %s2247_s22  ;;  %2068 = vrot.lane.b32.xlu0 %v2395_v37, %s2247_s22 }
  0xa0   : > { %v1929_v28 = vpop.permute.xlu2 %1928 }
  0xa1   : > { %v2527_v29 = vpop.permute.xlu1 %267  ;;  %v2529_v42 = vpop.permute.xlu0 %1878  ;;  %v1931_v49 = vunpack.i.h.bf16 %v1929_v28 }
  0xa2   : > { %4011 = vst [vmem:[#allocation22_spill] sm:$0xff] %v2527_v29  ;;  %v3903_v8 = vunpack.i.h.bf16 %v2529_v42 }
  0xa4   : > { %v2536_v22 = vsel %vm269_vm0, %v3903_v8, %v2527_v29  ;;  %v1930_v8 = vunpack.i.l.bf16 %v1929_v28 }
  0xa6   : > { %2088 = vrot.lane.b32.xlu2 %v2365_v25, %s2248_s23  ;;  %v2623_v28 = vsel %vm347_vm1, %v1930_v8, %v1931_v49 }
  0xa7   : > { %2083 = vrot.lane.b32.xlu1 %v2335_v16, %s2248_s23  ;;  %579 = vrot.lane.b32.xlu0 %v2413_v43, %s2247_s22  ;;  %4022 = vst [vmem:[#allocation33_spill] sm:$0xff] %v2623_v28 }
  0xa8   : > { %v2546_v3 = vpop.permute.xlu2 %1938 }
  0xa9   : > { %v2549_v17 = vpop.permute.xlu1 %1893  ;;  %v2551_v21 = vpop.permute.xlu0 %1888 }
  0xaa   : > { %v1896_v19 = vunpack.i.h.bf16 %v2549_v17  ;;  %v3905_v9 = vunpack.i.l.bf16 %v2549_v17  ;;  %v1890_v6 = vunpack.i.l.bf16 %v2551_v21 }
  0xac   : > { %v2556_v10 = vpack.c.bf16 %v1896_v19, %v1890_v6  ;;  %v2561_v4 = vsel %vm347_vm1, %v3904_v48, %v1890_v6  ;;  %v2566_v20 = vsel %vm347_vm1, %v3905_v9, %v1896_v19 }
  0xae   : > { %4012 = vst [vmem:[#allocation23_spill] sm:$0xff] %v2556_v10  ;;  %2103 = vrot.lane.b32.xlu2 %v2317_v12, %s2248_s23 }
  0xaf   : > { %2098 = vrot.lane.b32.xlu1 %v2359_v24, %s2248_s23  ;;  %2093 = vrot.lane.b32.xlu0 %v2329_v15, %s2248_s23 }
  0xb0   : > { %v2576_v40 = vpop.permute.xlu2 %1953 }
  0xb1   : > { %4013 = vst [vmem:[#allocation24_spill] sm:$0xff] %v2576_v40  ;;  %v2578_v6 = vpop.permute.xlu1 %1908  ;;  %v2580_v54 = vpop.permute.xlu0 %1903 }
  0xb2   : > { %4014 = vst [vmem:[#allocation25_spill] sm:$0xff] %v2578_v6 }
  0xb3   : > { %4015 = vst [vmem:[#allocation26_spill] sm:$0xff] %v2580_v54 }
  0xb6   : > { %2118 = vrot.lane.b32.xlu2 %v2395_v37, %s2248_s23 }
  0xb7   : > { %2113 = vrot.lane.b32.xlu1 %v2399_v38, %s2248_s23  ;;  %2108 = vrot.lane.b32.xlu0 %v2353_v23, %s2248_s23 }
  0xb8   : > { %v2588_v19 = vpop.permute.xlu2 %1968 }
  0xb9   : > { %v2590_v41 = vpop.permute.xlu1 %1923  ;;  %v2592_v63 = vpop.permute.xlu0 %1918  ;;  %v3920_v56 = vunpack.i.l.bf16 %v2588_v19 }
  0xba   : > { %4016 = vst [vmem:[#allocation27_spill] sm:$0xff] %v2590_v41  ;;  %v3907_v26 = vunpack.i.h.bf16 %v2590_v41  ;;  %v3908_v18 = vunpack.i.l.bf16 %v2592_v63 }
  0xbb   : > { %4017 = vst [vmem:[#allocation28_spill] sm:$0xff] %v2592_v63  ;;  %v2251_v63 = vmov 0  }
  0xbc   : > { %v2600_v55 = vpack.c.bf16 %v3907_v26, %v3908_v18  ;;  %v3913_v26 = vunpack.i.l.bf16 %v2546_v3  ;;  %2234 = vset.pattern.permute.xlu0 %v2251_v63  ;;  %2233 = vset.pattern.permute.xlu2 %v2251_v63 }
  0xbd   : > { %2232 = vset.pattern.permute.xlu1 %v2251_v63 }
  0xbe   : > { %4018 = vst [vmem:[#allocation29_spill] sm:$0xff] %v2600_v55  ;;  %657 = vrot.lane.b32.xlu2 %v2413_v43, %s2248_s23 }
  0xbf   : > { %2128 = vrot.lane.b32.xlu1 %v2419_v44, %s2248_s23  ;;  %2123 = vrot.lane.b32.xlu0 %v2391_v36, %s2248_s23 }
  0xc0   : > { %v2608_v48 = vpop.permute.xlu2 %423 }
  0xc1   : > { %v1934_v9 = vpop.permute.xlu1 %1933  ;;  %v2610_v5 = vpop.permute.xlu0 %345 }
  0xc2   : > { %4019 = vst [vmem:[#allocation30_spill] sm:$0xff] %v2610_v5  ;;  %v1936_v18 = vunpack.i.h.bf16 %v1934_v9  ;;  %v1935_v14 = vunpack.i.l.bf16 %v1934_v9  ;;  %v2615_v55 = vsel %vm347_vm1, %v1931_v49, %v2610_v5  ;;  %v3915_v49 = vunpack.i.l.bf16 %v2576_v40 }
  0xc3   : > { %4020 = vst [vmem:[#allocation31_spill] sm:$0xff] %v2615_v55 }
  0xc4   : > { %v2620_v11 = vsel %vm425_vm2, %v1936_v18, %v3913_v26  ;;  %v2626_v0 = vsel %vm425_vm2, %v1935_v14, %v1936_v18 }
  0xc5   : > { %4021 = vst [vmem:[#allocation32_spill] sm:$0xff] %v2620_v11 }
  0xc6   : > { %4023 = vst [vmem:[#allocation34_spill] sm:$0xff] %v2626_v0  ;;  %2143 = vrot.lane.b32.xlu2 %v2329_v15, %s2249_s24  ;;  %v2222_v0 = vpack.i.bf16 %v2381_v32, %v2387_v35 }
  0xc7   : > { %2138 = vrot.lane.b32.xlu1 %v2365_v25, %s2249_s24  ;;  %2133 = vrot.lane.b32.xlu0 %v2335_v16, %s2249_s24 }
  0xc8   : > { %v2638_v8 = vpop.permute.xlu2 %1993 }
  0xc9   : > { %v2640_v14 = vpop.permute.xlu1 %1948  ;;  %v2642_v18 = vpop.permute.xlu0 %1943 }
  0xca   : > { %v3916_v26 = vunpack.i.h.bf16 %v2642_v18 }
  0xcc   : > { %v2650_v9 = vpack.c.bf16 %v3915_v49, %v3916_v26 }
  0xce   : > { %4024 = vst [vmem:[#allocation35_spill] sm:$0xff] %v2650_v9  ;;  %2158 = vrot.lane.b32.xlu2 %v2353_v23, %s2249_s24 }
  0xcf   : > { %2153 = vrot.lane.b32.xlu1 %v2317_v12, %s2249_s24  ;;  %2148 = vrot.lane.b32.xlu0 %v2359_v24, %s2249_s24 }
  0xd0   : > { %v2658_v29 = vpop.permute.xlu2 %2008 }
  0xd1   : > { %v2660_v5 = vpop.permute.xlu1 %1963  ;;  %v2662_v10 = vpop.permute.xlu0 %1958 }
  0xd2   : > { %v3921_v49 = vunpack.i.h.bf16 %v2662_v10 }
  0xd4   : > { %v2670_v26 = vpack.c.bf16 %v3920_v56, %v3921_v49 }
  0xd6   : > { %4025 = vst [vmem:[#allocation36_spill] sm:$0xff] %v2670_v26  ;;  %2173 = vrot.lane.b32.xlu2 %v2391_v36, %s2249_s24  ;;  %v3930_v26 = vunpack.i.h.bf16 %v2638_v8 }
  0xd7   : > { %2168 = vrot.lane.b32.xlu1 %v2395_v37, %s2249_s24  ;;  %2163 = vrot.lane.b32.xlu0 %v2399_v38, %s2249_s24 }
  0xd8   : > { %v2024_v9 = vpop.permute.xlu2 %2023 }
  0xd9   : > { %v2678_v27 = vpop.permute.xlu1 %1978  ;;  %v2026_v57 = vunpack.i.h.bf16 %v2024_v9  ;;  %v2025_v54 = vunpack.i.l.bf16 %v2024_v9  ;;  %v2680_v6 = vpop.permute.xlu0 %1973 }
  0xdb   : > { %v2683_v56 = vsel %vm503_vm3, %v2025_v54, %v2026_v57 }
  0xdc   : > { %4026 = vst [vmem:[#allocation37_spill] sm:$0xff] %v2683_v56 }
  0xde   : > { %2183 = vrot.lane.b32.xlu2 %v2335_v16, %s2250_s25 }
  0xdf   : > { %735 = vrot.lane.b32.xlu1 %v2413_v43, %s2249_s24  ;;  %2178 = vrot.lane.b32.xlu0 %v2419_v44, %s2249_s24 }
  0xe0   : > { %v2691_v36 = vpop.permute.xlu2 %2033 }
  0xe1   : > { %v2693_v37 = vpop.permute.xlu1 %1988  ;;  %v3928_v38 = vunpack.i.h.bf16 %v2691_v36  ;;  %v2035_v9 = vunpack.i.l.bf16 %v2691_v36  ;;  %v2697_v49 = vpop.permute.xlu0 %1983 }
  0xe2   : > { %v3931_v16 = vunpack.i.l.bf16 %v2693_v37 }
  0xe3   : > { %v2704_v2 = vsel %vm581_vm4, %v2035_v9, %v3928_v38  ;;  %v3936_v38 = vunpack.i.h.bf16 %v2658_v29 }
  0xe4   : > { %4027 = vst [vmem:[#allocation38_spill] sm:$0xff] %v2704_v2  ;;  %v2710_v7 = vpack.c.bf16 %v3930_v26, %v3931_v16 }
  0xe6   : > { %4028 = vst [vmem:[#allocation39_spill] sm:$0xff] %v2710_v7  ;;  %2198 = vrot.lane.b32.xlu2 %v2359_v24, %s2250_s25 }
  0xe7   : > { %2193 = vrot.lane.b32.xlu1 %v2329_v15, %s2250_s25  ;;  %2188 = vrot.lane.b32.xlu0 %v2365_v25, %s2250_s25  ;;  %v3938_v15 = vunpack.i.l.bf16 %v2658_v29 }
  0xe8   : > { %v2718_v9 = vpop.permute.xlu2 %2048 }
  0xe9   : > { %v2721_v60 = vpop.permute.xlu1 %2003  ;;  %v2723_v26 = vpop.permute.xlu0 %1998 }
  0xea   : > { %v2006_v16 = vunpack.i.h.bf16 %v2721_v60  ;;  %v3939_v7 = vunpack.i.l.bf16 %v2721_v60  ;;  %v3937_v24 = vunpack.i.h.bf16 %v2723_v26  ;;  %v2000_v63 = vunpack.i.l.bf16 %v2723_v26 }
  0xec   : > { %v2734_v25 = vpack.c.bf16 %v3936_v38, %v3939_v7  ;;  %v2739_v41 = vsel %vm503_vm3, %v2000_v63, %v3937_v24  ;;  %v2744_v28 = vsel %vm503_vm3, %v2006_v16, %v3938_v15  ;;  %v2227_v16 = vpack.i.bf16 %v2373_v30, %v2383_v33 }
  0xee   : > { %4029 = vst [vmem:[#allocation40_spill] sm:$0xff] %v2734_v25  ;;  %2213 = vrot.lane.b32.xlu2 %v2419_v44, %s2250_s25 }
  0xef   : > { %2208 = vrot.lane.b32.xlu1 %v2353_v23, %s2250_s25  ;;  %2203 = vrot.lane.b32.xlu0 %v2317_v12, %s2250_s25  ;;  %v2217_v23 = vpack.i.bf16 %v2385_v34, %v2413_v43  ;;  %v4041_v34 = vunpack.i.l.bf16 %v2549_v17 }
  0xf0   : > { %v2754_v38 = vpop.permute.xlu2 %2063 }
  0xf1   : > { %v2019_v63 = vpop.permute.xlu1 %2018  ;;  %v2014_v24 = vpop.permute.xlu0 %2013 }
  0xf2   : > { %v2021_v15 = vunpack.i.h.bf16 %v2019_v63  ;;  %v2020_v7 = vunpack.i.l.bf16 %v2019_v63  ;;  %v2016_v25 = vunpack.i.h.bf16 %v2014_v24  ;;  %v2015_v44 = vunpack.i.l.bf16 %v2014_v24 }
  0xf4   : > { %v2763_v1 = vsel %vm503_vm3, %v2021_v15, %v2025_v54  ;;  %v2765_v12 = vpack.c.bf16 %v2026_v57, %v2020_v7  ;;  %v2768_v13 = vsel %vm503_vm3, %v2016_v25, %v2020_v7  ;;  %v2771_v33 = vsel %vm503_vm3, %v2015_v44, %v2016_v25 }
  0xf5   : > { %4030 = vst [vmem:[#allocation41_spill] sm:$0xff] %v2763_v1 }
  0xf6   : > { %4031 = vst [vmem:[#allocation42_spill] sm:$0xff] %v2765_v12  ;;  %2228 = vrot.lane.b32.xlu2 %v2227_v16, %s2250_s25  ;;  %v2050_v16 = vunpack.i.l.bf16 %v2718_v9 }
  0xf7   : > { %4032 = vst [vmem:[#allocation43_spill] sm:$0xff] %v2768_v13  ;;  %2223 = vrot.lane.b32.xlu1 %v2222_v0, %s2250_s25  ;;  %2218 = vrot.lane.b32.xlu0 %v2217_v23, %s2250_s25  ;;  %v2051_v0 = vunpack.i.h.bf16 %v2718_v9  ;;  %v4039_v9 = vunpack.i.h.bf16 %v2691_v36 }
  0xf8   : > { %4033 = vst [vmem:[#allocation44_spill] sm:$0xff] %v2771_v33  ;;  %v2780_v54 = vpop.permute.xlu2 %2078 }
  0xf9   : > { %v502_v57 = vpop.permute.xlu1 %501  ;;  %v2029_v7 = vpop.permute.xlu0 %2028  ;;  %v2805_v24 = vsel %vm581_vm4, %v2050_v16, %v2051_v0  ;;  %v2065_v16 = vunpack.i.l.bf16 %v2754_v38 }
  0xfa   : > { %v2031_v15 = vunpack.i.h.bf16 %v2029_v7  ;;  %v2030_v12 = vunpack.i.l.bf16 %v2029_v7  ;;  %4038 = vst [vmem:[#allocation49_spill] sm:$0xff] %v2805_v24 }
  0xfc   : > { %v2783_v25 = vsel %vm503_vm3, %v2031_v15, %v502_v57  ;;  %v2786_v44 = vsel %vm503_vm3, %v2030_v12, %v2031_v15  ;;  %v955_v12 = vld [vmem:[%s3881_s2 + $0x10] sm:$0xff] }
  0xfd   : > { %4034 = vst [vmem:[#allocation45_spill] sm:$0xff] %v2783_v25 }
  0xfe   : > { %4035 = vst [vmem:[#allocation46_spill] sm:$0xff] %v2786_v44  ;;  %v1885_v44 = vunpack.i.l.bf16 %v2475_v51 }
  0xff   : > { %807 = vrot.lane.b32.xlu0 %v2375_v31, %s2250_s25 }
 0x100   : > { %v2794_v23 = vpop.permute.xlu2 %2088 }
 0x101   : > { %v2044_v63 = vpop.permute.xlu1 %2043  ;;  %v2039_v7 = vpop.permute.xlu0 %2038 }
 0x102   : > { %v2045_v43 = vunpack.i.l.bf16 %v2044_v63  ;;  %v2041_v32 = vunpack.i.h.bf16 %v2039_v7  ;;  %v2040_v13 = vunpack.i.l.bf16 %v2039_v7  ;;  %v2046_v2 = vunpack.i.h.bf16 %v2044_v63  ;;  %v953_v63 = vld [vmem:[%s3881_s2] sm:$0xff] }
 0x103   : > { %958 = vperm.xlu1 %2232, %v953_v63   ;;  %v4046_v63 = vunpack.i.l.bf16 %v2721_v60 }
 0x104   : > { %v2796_v56 = vpack.c.bf16 %v2040_v13, %v502_v57  ;;  %v2802_v15 = vsel %vm581_vm4, %v2041_v32, %v2045_v43  ;;  %v2810_v31 = vsel %vm581_vm4, %v4039_v9, %v2040_v13  ;;  %v2066_v32 = vunpack.i.h.bf16 %v2754_v38 }
 0x105   : > { %4037 = vst [vmem:[#allocation48_spill] sm:$0xff] %v2802_v15 }
 0x106   : > { %4036 = vst [vmem:[#allocation47_spill] sm:$0xff] %v2796_v56  ;;  %v1891_v56 = vunpack.i.h.bf16 %v2551_v21  ;;  %v4042_v21 = vunpack.i.h.bf16 %v2475_v51 }
 0x107   : > { %4040 = vst [vmem:[#allocation50_spill] sm:$0xff] %v2810_v31  ;;  %968 = vperm.xlu0 %2234, %v955_v12   ;;  %v2829_v31 = vsel %vm581_vm4, %v2065_v16, %v2066_v32  ;;  %v954_v12 = vld [vmem:[%s3881_s2 + $0x8] sm:$0xff] }
 0x108   : > { %v2820_v36 = vpop.permute.xlu2 %2103  ;;  %v350_v57 = vsel %vm347_vm1, %v1891_v56, %v4041_v34  ;;  %v348_v25 = vsel %vm347_vm1, %v1885_v44, %v4042_v21  ;;  %v2843_v34 = vsel %vm581_vm4, %v2045_v43, %v2046_v2  ;;  %963 = vperm.xlu2 %2233, %v954_v12   ;;  %v4047_v12 = vunpack.i.h.bf16 %v2723_v26 }
 0x109   : > { %v2059_v13 = vpop.permute.xlu1 %2058  ;;  %v2054_v9 = vpop.permute.xlu0 %2053  ;;  %4044 = vst [vmem:[#allocation52_spill] sm:$0xff] %v2843_v34  ;;  %v878_v56 = vpack.c.bf16 %v350_v57, %v348_v25  ;;  %v4048_v44 = vunpack.i.h.bf16 %v2658_v29 }
 0x10a   : > { %v2060_v33 = vunpack.i.l.bf16 %v2059_v13  ;;  %v2056_v1 = vunpack.i.h.bf16 %v2054_v9  ;;  %v2055_v7 = vunpack.i.l.bf16 %v2054_v9  ;;  %v2081_v9 = vunpack.i.h.bf16 %v2780_v54 }
 0x10b   : > { %v2061_v21 = vunpack.i.h.bf16 %v2059_v13  ;;  %v509_v16 = vsel %vm503_vm3, %v4047_v12, %v4046_v63  ;;  %v1880_v63 = vunpack.i.l.bf16 %v2529_v42 }
 0x10c   : > { %v2831_v38 = vpack.c.bf16 %v2055_v7, %v2046_v2  ;;  %v2840_v17 = vsel %vm581_vm4, %v2056_v1, %v2060_v33  ;;  %v2846_v51 = vsel %vm581_vm4, %v2051_v0, %v2055_v7  ;;  %v2080_v1 = vunpack.i.l.bf16 %v2780_v54 }
 0x10d   : > { %4045 = vst [vmem:[#allocation53_spill] sm:$0xff] %v2846_v51  ;;  %v4049_v54 = vunpack.i.l.bf16 %v2658_v29 }
 0x10e   : > { %4043 = vst [vmem:[#allocation51_spill] sm:$0xff] %v2831_v38  ;;  %v2871_v38 = vsel %vm581_vm4, %v2060_v33, %v2061_v21  ;;  %v1871_v33 = vunpack.i.h.bf16 %v2509_v61 }
 0x10f   : > { %1141 = vrot.lane.b32.xlu0 %v878_v56, %s2252_s5  ;;  %v511_v13 = vsel %vm503_vm3, %v4049_v54, %v4048_v44  ;;  %v2868_v56 = vsel %vm581_vm4, %v2080_v1, %v2081_v9  ;;  %4051 = vst [vmem:[#allocation55_spill] sm:$0xff] %v2871_v38  ;;  %v4057_v44 = vunpack.i.l.bf16 %v2460_v47 }
 0x110   : > { %v2855_v2 = vpop.permute.xlu2 %2118  ;;  %4050 = vst [vmem:[#allocation54_spill] sm:$0xff] %v2868_v56  ;;  %v903_v29 = vpack.c.bf16 %v511_v13, %v509_v16  ;;  %v4055_v16 = vunpack.i.h.bf16 %v2529_v42 }
 0x111   : > { %v2074_v43 = vpop.permute.xlu1 %2073  ;;  %v2069_v25 = vpop.permute.xlu0 %2068  ;;  %v2120_v47 = vunpack.i.l.bf16 %v2855_v2  ;;  %v2121_v24 = vunpack.i.h.bf16 %v2855_v2 }
 0x112   : > { %v2075_v0 = vunpack.i.l.bf16 %v2074_v43  ;;  %v2071_v7 = vunpack.i.h.bf16 %v2069_v25  ;;  %v2070_v57 = vunpack.i.l.bf16 %v2069_v25  ;;  %v2076_v55 = vunpack.i.h.bf16 %v2074_v43 }
 0x113   : > { %v282_v12 = vsel %vm269_vm0, %v1880_v63, %v4055_v16 }
 0x114   : > { %v2873_v25 = vpack.c.bf16 %v2070_v57, %v2061_v21  ;;  %v2876_v60 = vsel %vm581_vm4, %v2071_v7, %v2075_v0  ;;  %v2879_v26 = vsel %vm581_vm4, %v2066_v32, %v2070_v57  ;;  %v2891_v43 = vsel %vm581_vm4, %v2075_v0, %v2076_v55 }
 0x115   : > { %4053 = vst [vmem:[#allocation57_spill] sm:$0xff] %v2876_v60  ;;  %v2090_v32 = vunpack.i.l.bf16 %v2794_v23 }
 0x116   : > { %4052 = vst [vmem:[#allocation56_spill] sm:$0xff] %v2873_v25  ;;  %v280_v25 = vsel %vm269_vm0, %v1871_v33, %v4057_v44  ;;  %v2091_v44 = vunpack.i.h.bf16 %v2794_v23  ;;  %v2105_v33 = vunpack.i.l.bf16 %v2820_v36 }
 0x117   : > { %4054 = vst [vmem:[#allocation58_spill] sm:$0xff] %v2879_v26  ;;  %1191 = vrot.lane.b32.xlu0 %v903_v29, %s2252_s5  ;;  %v875_v63 = vpack.c.bf16 %v282_v12, %v280_v25 }
 0x118   : > { %v2888_v21 = vpop.permute.xlu2 %657 }
 0x119   : > { %v2084_v7 = vpop.permute.xlu1 %2083  ;;  %v580_v57 = vpop.permute.xlu0 %579 }
 0x11a   : > { %v2086_v54 = vunpack.i.h.bf16 %v2084_v7  ;;  %v2085_v13 = vunpack.i.l.bf16 %v2084_v7  ;;  %v2898_v29 = vsel %vm581_vm4, %v2081_v9, %v580_v57  ;;  %v2900_v1 = vpack.c.bf16 %v580_v57, %v2076_v55 }
 0x11c   : > { %4056 = vst [vmem:[#allocation59_spill] sm:$0xff] %v2900_v1  ;;  %v2908_v11 = vsel %vm659_vm5, %v2086_v54, %v2090_v32  ;;  %v2911_v42 = vsel %vm659_vm5, %v2085_v13, %v2086_v54 }
 0x11f   : > { %1135 = vrot.lane.b32.xlu0 %v875_v63, %s2252_s5 }
 0x120   : > { %v2914_v9 = vpop.permute.xlu2 %2143 }
 0x121   : > { %v2916_v55 = vpop.permute.xlu1 %2098  ;;  %v2094_v7 = vpop.permute.xlu0 %2093  ;;  %v2145_v2 = vunpack.i.l.bf16 %v2914_v9 }
 0x122   : > { %v3959_v57 = vunpack.i.h.bf16 %v2916_v55  ;;  %v2096_v16 = vunpack.i.h.bf16 %v2094_v7  ;;  %v2095_v0 = vunpack.i.l.bf16 %v2094_v7 }
 0x124   : > { %v2921_v1 = vpack.c.bf16 %v2096_v16, %v2090_v32  ;;  %v2924_v54 = vsel %vm659_vm5, %v2095_v0, %v2096_v16  ;;  %v2929_v12 = vsel %vm659_vm5, %v2091_v44, %v2095_v0  ;;  %v2934_v13 = vsel %vm659_vm5, %v3959_v57, %v2105_v33 }
 0x126   : > { %4058 = vst [vmem:[#allocation60_spill] sm:$0xff] %v2921_v1 }
 0x128   : > { %v2938_v63 = vpop.permute.xlu2 %2158 }
 0x129   : > { %v2114_v32 = vpop.permute.xlu1 %2113  ;;  %v2940_v7 = vpop.permute.xlu0 %2108 }
 0x12a   : > { %v2111_v16 = vunpack.i.h.bf16 %v2940_v7  ;;  %v3967_v25 = vunpack.i.l.bf16 %v2940_v7  ;;  %v2116_v23 = vunpack.i.h.bf16 %v2114_v32  ;;  %v2115_v30 = vunpack.i.l.bf16 %v2114_v32 }
 0x12c   : > { %v2944_v1 = vpack.c.bf16 %v2111_v16, %v2105_v33  ;;  %v2949_v0 = vsel %vm659_vm5, %v3967_v25, %v2111_v16  ;;  %v669_v16 = vsel %vm659_vm5, %v2116_v23, %v2120_v47 }
 0x12e   : > { %4059 = vst [vmem:[#allocation61_spill] sm:$0xff] %v2944_v1 }
 0x130   : > { %v2953_v57 = vpop.permute.xlu2 %2173 }
 0x131   : > { %v2129_v35 = vpop.permute.xlu1 %2128  ;;  %v2124_v38 = vpop.permute.xlu0 %2123 }
 0x132   : > { %v2131_v26 = vunpack.i.h.bf16 %v2129_v35  ;;  %v2130_v15 = vunpack.i.l.bf16 %v2129_v35  ;;  %v2126_v33 = vunpack.i.h.bf16 %v2124_v38  ;;  %v2125_v1 = vunpack.i.l.bf16 %v2124_v38 }
 0x133   : > { %v668_v35 = vsel %vm659_vm5, %v2115_v30, %v2116_v23 }
 0x134   : > { %v2959_v25 = vsel %vm659_vm5, %v2130_v15, %v2131_v26  ;;  %v2963_v44 = vsel %vm659_vm5, %v2131_v26, %v2888_v21  ;;  %v2965_v34 = vpack.c.bf16 %v2126_v33, %v2120_v47  ;;  %v671_v32 = vsel %vm659_vm5, %v2125_v1, %v2126_v33 }
 0x135   : > { %4060 = vst [vmem:[#allocation62_spill] sm:$0xff] %v2959_v25  ;;  %v927_v51 = vpack.c.bf16 %v671_v32, %v669_v16  ;;  %v670_v38 = vsel %vm659_vm5, %v2121_v24, %v2125_v1 }
 0x136   : > { %4061 = vst [vmem:[#allocation63_spill] sm:$0xff] %v2963_v44  ;;  %v926_v40 = vpack.c.bf16 %v670_v38, %v668_v35 }
 0x137   : > { %4062 = vst [vmem:[#allocation64_spill] sm:$0xff] %v2965_v34  ;;  %1239 = vrot.lane.b32.xlu2 %v927_v51, %s2252_s5 }
 0x138   : > { %1237 = vrot.lane.b32.xlu1 %v926_v40, %s2252_s5  ;;  %v2972_v15 = vpop.permute.xlu2 %2183 }
 0x139   : > { %v2139_v26 = vpop.permute.xlu1 %2138  ;;  %v3972_v47 = vunpack.i.h.bf16 %v2972_v15  ;;  %v2185_v33 = vunpack.i.l.bf16 %v2972_v15  ;;  %v2134_v16 = vpop.permute.xlu0 %2133 }
 0x13a   : > { %v2141_v32 = vunpack.i.h.bf16 %v2139_v26  ;;  %v2140_v30 = vunpack.i.l.bf16 %v2139_v26  ;;  %v2136_v23 = vunpack.i.h.bf16 %v2134_v16  ;;  %v2135_v24 = vunpack.i.l.bf16 %v2134_v16 }
 0x13b   : > { %v2980_v40 = vsel %vm815_vm6, %v2185_v33, %v3972_v47  ;;  %v2146_v33 = vunpack.i.h.bf16 %v2914_v9 }
 0x13c   : > { %v2983_v51 = vpack.c.bf16 %v2140_v30, %v2888_v21  ;;  %v2986_v1 = vsel %vm737_vm7, %v2136_v23, %v2140_v30  ;;  %v2989_v35 = vsel %vm737_vm7, %v2135_v24, %v2136_v23  ;;  %v2992_v38 = vsel %vm737_vm7, %v2141_v32, %v2145_v2 }
 0x13d   : > { %4064 = vst [vmem:[#allocation66_spill] sm:$0xff] %v2986_v1  ;;  %v2160_v21 = vunpack.i.l.bf16 %v2938_v63  ;;  %v3003_v32 = vsel %vm737_vm7, %v2145_v2, %v2146_v33  ;;  %v2161_v2 = vunpack.i.h.bf16 %v2938_v63 }
 0x13e   : > { %4063 = vst [vmem:[#allocation65_spill] sm:$0xff] %v2983_v51 }
 0x13f   : > { %4065 = vst [vmem:[#allocation67_spill] sm:$0xff] %v2989_v35 }
 0x140   : > { %4066 = vst [vmem:[#allocation68_spill] sm:$0xff] %v2992_v38  ;;  %v2999_v47 = vpop.permute.xlu2 %2198 }
 0x141   : > { %v2154_v30 = vpop.permute.xlu1 %2153  ;;  %v2149_v51 = vpop.permute.xlu0 %2148  ;;  %4067 = vst [vmem:[#allocation69_spill] sm:$0xff] %v3003_v32 }
 0x142   : > { %v2156_v34 = vunpack.i.h.bf16 %v2154_v30  ;;  %v2155_v23 = vunpack.i.l.bf16 %v2154_v30  ;;  %v2151_v24 = vunpack.i.h.bf16 %v2149_v51  ;;  %v2150_v60 = vunpack.i.l.bf16 %v2149_v51 }
 0x144   : > { %v3005_v56 = vpack.c.bf16 %v2155_v23, %v2146_v33  ;;  %v3008_v26 = vsel %vm737_vm7, %v2156_v34, %v2160_v21  ;;  %v3011_v9 = vsel %vm737_vm7, %v2151_v24, %v2155_v23  ;;  %v3014_v16 = vsel %vm737_vm7, %v2150_v60, %v2151_v24 }
 0x145   : > { %4069 = vst [vmem:[#allocation71_spill] sm:$0xff] %v3011_v9  ;;  %v2175_v33 = vunpack.i.l.bf16 %v2953_v57 }
 0x146   : > { %4068 = vst [vmem:[#allocation70_spill] sm:$0xff] %v3005_v56 }
 0x147   : > { %4070 = vst [vmem:[#allocation72_spill] sm:$0xff] %v3014_v16 }
 0x148   : > { %v3020_v30 = vpop.permute.xlu2 %2213 }
 0x149   : > { %v2169_v34 = vpop.permute.xlu1 %2168  ;;  %v3982_v56 = vunpack.i.h.bf16 %v3020_v30  ;;  %v2215_v23 = vunpack.i.l.bf16 %v3020_v30  ;;  %v2164_v35 = vpop.permute.xlu0 %2163 }
 0x14a   : > { %v2171_v60 = vunpack.i.h.bf16 %v2169_v34  ;;  %v2170_v24 = vunpack.i.l.bf16 %v2169_v34  ;;  %v2166_v44 = vunpack.i.h.bf16 %v2164_v35  ;;  %v2165_v1 = vunpack.i.l.bf16 %v2164_v35 }
 0x14b   : > { %v828_v51 = vsel %vm815_vm6, %v2215_v23, %v3982_v56  ;;  %v3040_v34 = vsel %vm737_vm7, %v2160_v21, %v2161_v2 }
 0x14c   : > { %v3029_v25 = vpack.c.bf16 %v2170_v24, %v2161_v2  ;;  %v950_v38 = vpack.c.bf16 %v828_v51, %v828_v51  ;;  %v3032_v63 = vsel %vm737_vm7, %v2165_v1, %v2166_v44  ;;  %v3035_v16 = vsel %vm737_vm7, %v2171_v60, %v2175_v33  ;;  %4073 = vst [vmem:[#allocation75_spill] sm:$0xff] %v3040_v34 }
 0x14d   : > { %4072 = vst [vmem:[#allocation74_spill] sm:$0xff] %v3035_v16  ;;  %v3043_v35 = vsel %vm737_vm7, %v2166_v44, %v2170_v24  ;;  %v2176_v1 = vunpack.i.h.bf16 %v2953_v57  ;;  %v2106_v24 = vunpack.i.h.bf16 %v2820_v36 }
 0x14e   : > { %4071 = vst [vmem:[#allocation73_spill] sm:$0xff] %v3029_v25  ;;  %1285 = vrot.lane.b32.xlu1 %v950_v38, %s2252_s5  ;;  %v2100_v38 = vunpack.i.l.bf16 %v2916_v55 }
 0x14f   : > { %4074 = vst [vmem:[#allocation76_spill] sm:$0xff] %v3043_v35  ;;  %v3052_v32 = vsel %vm737_vm7, %v2175_v33, %v2176_v1  ;;  %v4077_v33 = vunpack.i.l.bf16 %v2940_v7 }
 0x151   : > { %v736_v23 = vpop.permute.xlu1 %735  ;;  %v2179_v56 = vpop.permute.xlu0 %2178 }
 0x152   : > { %v3049_v60 = vpack.c.bf16 %v736_v23, %v2176_v1  ;;  %v2181_v25 = vunpack.i.h.bf16 %v2179_v56  ;;  %v2180_v9 = vunpack.i.l.bf16 %v2179_v56  ;;  %v4076_v56 = vpack.c.bf16 %v2566_v20, %v2561_v4 }
 0x153   : > { %v4080_v4 = vunpack.i.h.bf16 %v2972_v15 }
 0x154   : > { %4075 = vst [vmem:[#allocation77_spill] sm:$0xff] %v3049_v60  ;;  %v3055_v21 = vsel %vm737_vm7, %v2181_v25, %v736_v23  ;;  %v3058_v44 = vsel %vm737_vm7, %v2180_v9, %v2181_v25  ;;  %v666_v25 = vsel %vm659_vm5, %v2106_v24, %v4077_v33  ;;  %v4078_v23 = vunpack.i.h.bf16 %v2916_v55 }
 0x155   : > { %v1985_v33 = vunpack.i.l.bf16 %v2697_v49 }
 0x156   : > { %1143 = vrot.lane.b32.xlu1 %v4076_v56, %s2252_s5  ;;  %v664_v51 = vsel %vm659_vm5, %v2100_v38, %v4078_v23  ;;  %v3989_v56 = vunpack.i.h.bf16 %v2697_v49 }
 0x157   : > { %v923_v36 = vpack.c.bf16 %v666_v25, %v664_v51  ;;  %v4082_v25 = vpack.c.bf16 %v2536_v22, %v2469_v50 }
 0x158   : > { %v504_v23 = vsel %vm503_vm3, %v1985_v33, %v3989_v56 }
 0x159   : > { %v2194_v9 = vpop.permute.xlu1 %2193  ;;  %v2189_v1 = vpop.permute.xlu0 %2188 }
 0x15a   : > { %v2196_v57 = vunpack.i.h.bf16 %v2194_v9  ;;  %v2195_v60 = vunpack.i.l.bf16 %v2194_v9  ;;  %v2191_v2 = vunpack.i.h.bf16 %v2189_v1  ;;  %v2190_v34 = vunpack.i.l.bf16 %v2189_v1 }
 0x15b   : > { %v3988_v9 = vunpack.i.l.bf16 %v2638_v8 }
 0x15c   : > { %v3076_v35 = vpack.c.bf16 %v2196_v57, %v2190_v34  ;;  %v3081_v20 = vsel %vm815_vm6, %v4080_v4, %v2190_v34  ;;  %v3084_v7 = vsel %vm815_vm6, %v2195_v60, %v2196_v57  ;;  %v3087_v24 = vsel %vm815_vm6, %v2191_v2, %v2195_v60 }
 0x15d   : > { %v1991_v2 = vunpack.i.h.bf16 %v2693_v37 }
 0x15e   : > { %4079 = vst [vmem:[#allocation78_spill] sm:$0xff] %v3076_v35  ;;  %1231 = vrot.lane.b32.xlu1 %v923_v36, %s2252_s5 }
 0x15f   : > { %v506_v36 = vsel %vm503_vm3, %v1991_v2, %v3988_v9 }
 0x160   : > { %v899_v50 = vpack.c.bf16 %v506_v36, %v504_v23  ;;  %v2200_v23 = vunpack.i.l.bf16 %v2999_v47 }
 0x161   : > { %v3094_v51 = vpop.permute.xlu1 %2208  ;;  %v3096_v15 = vpop.permute.xlu0 %2203 }
 0x162   : > { %v3986_v34 = vunpack.i.h.bf16 %v3094_v51  ;;  %v3987_v57 = vunpack.i.l.bf16 %v3096_v15 }
 0x164   : > { %v3104_v60 = vpack.c.bf16 %v3986_v34, %v3987_v57  ;;  %v4083_v57 = vunpack.i.h.bf16 %v3020_v30  ;;  %v2210_v30 = vunpack.i.l.bf16 %v3094_v51 }
 0x166   : > { %4081 = vst [vmem:[#allocation79_spill] sm:$0xff] %v3104_v60  ;;  %1137 = vrot.lane.b32.xlu1 %v4082_v25, %s2252_s5  ;;  %v2229_v25 = vpop.permute.xlu2 %2228 }
 0x167   : > { %v2231_v33 = vunpack.i.h.bf16 %v2229_v25 }
 0x169   : > { %v2219_v1 = vpop.permute.xlu0 %2218  ;;  %v2224_v38 = vpop.permute.xlu1 %2223 }
 0x16a   : > { %v3120_v4 = vunpack.i.l.bf16 %v2219_v1  ;;  %v2226_v34 = vunpack.i.h.bf16 %v2224_v38  ;;  %v2225_v35 = vunpack.i.l.bf16 %v2224_v38  ;;  %v4084_v38 = vpack.c.bf16 %v2924_v54, %v2908_v11 }
 0x16b   : > { %v1976_v11 = vunpack.i.h.bf16 %v2680_v6  ;;  %v1975_v54 = vunpack.i.l.bf16 %v2680_v6 }
 0x16c   : > { %v829_v22 = vsel %vm815_vm6, %v4083_v57, %v3120_v4  ;;  %v825_v2 = vsel %vm815_vm6, %v2225_v35, %v2226_v34  ;;  %v2206_v57 = vunpack.i.h.bf16 %v3096_v15 }
 0x16d   : > { %v951_v55 = vpack.c.bf16 %v829_v22, %v829_v22  ;;  %v1981_v22 = vunpack.i.h.bf16 %v2678_v27 }
 0x16e   : > { %1183 = vrot.lane.b32.xlu1 %v899_v50, %s2252_s5  ;;  %v4087_v50 = vpack.c.bf16 %v2949_v0, %v2934_v13 }
 0x16f   : > { %1287 = vrot.lane.b32.xlu2 %v951_v55, %s2252_s5  ;;  %v2201_v55 = vunpack.i.h.bf16 %v2999_v47  ;;  %v4086_v47 = vpack.c.bf16 %v2929_v12, %v2911_v42  ;;  %v437_v42 = vsel %vm425_vm2, %v1975_v54, %v1976_v11  ;;  %v439_v12 = vsel %vm425_vm2, %v1981_v22, %v2608_v48 }
 0x171   : > { %v808_v9 = vpop.permute.xlu0 %807 }
 0x172   : > { %v827_v56 = vsel %vm815_vm6, %v2231_v33, %v808_v9  ;;  %v3130_v60 = vpack.c.bf16 %v808_v9, %v2226_v34  ;;  %v4085_v34 = vpack.c.bf16 %v2744_v28, %v2739_v41  ;;  %v820_v9 = vsel %vm815_vm6, %v2200_v23, %v2201_v55 }
 0x173   : > { %v948_v16 = vpack.c.bf16 %v827_v56, %v825_v2  ;;  %v822_v56 = vsel %vm815_vm6, %v2206_v57, %v2210_v30  ;;  %v2230_v41 = vunpack.i.l.bf16 %v2229_v25  ;;  %v2221_v28 = vunpack.i.h.bf16 %v2219_v1 }
 0x174   : > { %v944_v36 = vpack.c.bf16 %v822_v56, %v820_v9  ;;  %v1860_v2 = vunpack.i.l.bf16 %v2455_v46  ;;  %v4088_v57 = vunpack.i.l.bf16 %v2509_v61  ;;  %v4089_v1 = vunpack.i.h.bf16 %v2455_v46 }
 0x175   : > { %1281 = vrot.lane.b32.xlu0 %v948_v16, %s2252_s5  ;;  %v1866_v16 = vunpack.i.h.bf16 %v2511_v62  ;;  %v824_v13 = vsel %vm815_vm6, %v2221_v28, %v2225_v35  ;;  %v826_v0 = vsel %vm815_vm6, %v2230_v41, %v2231_v33  ;;  %v1980_v61 = vunpack.i.l.bf16 %v2678_v27 }
 0x176   : > { %1227 = vrot.lane.b32.xlu1 %v4084_v38, %s2252_s5  ;;  %v277_v25 = vsel %vm269_vm0, %v1860_v2, %v4089_v1  ;;  %v1851_v56 = vunpack.i.h.bf16 %v2497_v58  ;;  %v1850_v9 = vunpack.i.l.bf16 %v2497_v58  ;;  %v1971_v46 = vunpack.i.h.bf16 %v2588_v19 }
 0x177   : > { %1189 = vrot.lane.b32.xlu2 %v4085_v34, %s2252_s5  ;;  %v279_v38 = vsel %vm269_vm0, %v1866_v16, %v4088_v57  ;;  %v897_v34 = vpack.c.bf16 %v439_v12, %v437_v42  ;;  %v1845_v35 = vunpack.i.l.bf16 %v2477_v52  ;;  %v438_v33 = vsel %vm425_vm2, %v1980_v61, %v1981_v22 }
 0x178   : > { %v873_v23 = vpack.c.bf16 %v279_v38, %v277_v25  ;;  %v436_v27 = vsel %vm425_vm2, %v1971_v46, %v1975_v54  ;;  %v274_v58 = vsel %vm269_vm0, %v1850_v9, %v1851_v56  ;;  %v4090_v28 = vunpack.i.l.bf16 %v2693_v37 }
 0x179   : > { %v896_v38 = vpack.c.bf16 %v438_v33, %v436_v27  ;;  %v4092_v42 = vunpack.i.h.bf16 %v2638_v8  ;;  %v4093_v12 = vunpack.i.l.bf16 %v2638_v8  ;;  %v1865_v25 = vunpack.i.l.bf16 %v2511_v62 }
 0x17a   : > { %v4094_v8 = vpack.c.bf16 %v2898_v29, %v2891_v43  ;;  %v4095_v62 = vpack.c.bf16 %v3084_v7, %v3081_v20  ;;  %v1960_v43 = vunpack.i.l.bf16 %v2662_v10  ;;  %v1840_v29 = vunpack.i.l.bf16 %v2499_v59 }
 0x17b   : > { %v507_v1 = vsel %vm503_vm3, %v4093_v12, %v4092_v42  ;;  %v278_v37 = vsel %vm269_vm0, %v1865_v25, %v1866_v16  ;;  %v4097_v16 = vunpack.i.h.bf16 %v3094_v51  ;;  %v4098_v20 = vpack.c.bf16 %v3087_v24, %v2980_v40 }
 0x17c   : > { %v1836_v51 = vunpack.i.h.bf16 %v2479_v53  ;;  %v4100_v9 = vunpack.i.h.bf16 %v2662_v10  ;;  %v4101_v40 = vunpack.i.l.bf16 %v2588_v19  ;;  %v4102_v46 = vunpack.c.h.bf16 %v2402_v39 }
 0x17d   : > { %1225 = vrot.lane.b32.xlu0 %v4086_v47, %s2252_s5  ;;  %v947_v47 = vpack.c.bf16 %v826_v0, %v824_v13  ;;  %v1951_v33 = vunpack.i.h.bf16 %v2640_v14  ;;  %v1950_v10 = vunpack.i.l.bf16 %v2640_v14  ;;  %v1941_v19 = vunpack.i.h.bf16 %v2546_v3 }
 0x17e   : > { %1273 = vrot.lane.b32.xlu1 %v944_v36, %s2252_s5  ;;  %v1841_v36 = vunpack.i.h.bf16 %v2499_v59  ;;  %v4106_v12 = vunpack.i.l.bf16 %v2450_v45 }
 0x17f   : > { %1233 = vrot.lane.b32.xlu2 %v4087_v50, %s2252_s5  ;;  %v4091_v50 = vunpack.i.h.bf16 %v2697_v49  ;;  %v1856_v49 = vunpack.i.h.bf16 %v2450_v45  ;;  %v430_v14 = vsel %vm425_vm2, %v1950_v10, %v1951_v33  ;;  %v4109_v45 = vld [vmem:[#allocation24_spill] sm:$0xff] }
 0x180   : > { %v272_v41 = vsel %vm269_vm0, %v1841_v36, %v1845_v35  ;;  %v433_v36 = vsel %vm425_vm2, %v1960_v43, %v4100_v9  ;;  %v4122_v9 = vld [vmem:[#allocation10_spill] sm:$0xff] }
 0x181   : > { %v505_v57 = vsel %vm503_vm3, %v4091_v50, %v4090_v28  ;;  %v869_v54 = vpack.c.bf16 %v274_v58, %v272_v41  ;;  %v276_v13 = vsel %vm269_vm0, %v1856_v49, %v1860_v2  ;;  %v823_v2 = vsel %vm815_vm6, %v2210_v30, %v4097_v16  ;;  %v3232_v30 = vpop.permute.xlu2 %963  ;;  %v4103_v58 = vld [vmem:[#allocation54_spill] sm:$0xff]  ;;  %v4104_v28 = vld [vmem:[#allocation57_spill] sm:$0xff]  ;;  %v3289_v16 = vpop.permute.xlu0 %968 }
 0x182   : > { %v900_v22 = vpack.c.bf16 %v507_v1, %v505_v57  ;;  %v872_v0 = vpack.c.bf16 %v278_v37, %v276_v13  ;;  %v1945_v41 = vunpack.i.l.bf16 %v2642_v18  ;;  %v4105_v50 = vpack.c.bf16 %v4103_v58, %v4104_v28 }
 0x183   : > { %v275_v1 = vsel %vm269_vm0, %v1851_v56, %v4106_v12  ;;  %v4108_v49 = vunpack.i.h.bf16 %v2477_v52  ;;  %v1956_v56 = vunpack.i.h.bf16 %v4109_v45  ;;  %v4110_v52 = vpack.c.bf16 %v3055_v21, %v3052_v32  ;;  %v4118_v21 = vld [vmem:[#allocation58_spill] sm:$0xff] }
 0x184   : > { %v428_v57 = vsel %vm425_vm2, %v1941_v19, %v1945_v41  ;;  %v4117_v32 = vpack.c.bf16 %v3032_v63, %v3008_v26  ;;  %v4126_v26 = vld [vmem:[#allocation74_spill] sm:$0xff]  ;;  %v4128_v19 = vunpack.i.h.bf16 %v2642_v18  ;;  %v4129_v28 = vunpack.i.l.bf16 %v4109_v45  ;;  %v4140_v45 = vld [vmem:[#allocation45_spill] sm:$0xff] }
 0x185   : > { %1131 = vrot.lane.b32.xlu0 %v873_v23, %s2252_s5  ;;  %v4096_v23 = vunpack.i.l.bf16 %v3096_v15  ;;  %v4099_v15 = vpack.c.bf16 %v2829_v31, %v2840_v17  ;;  %v271_v31 = vsel %vm269_vm0, %v1836_v51, %v1840_v29  ;;  %v273_v37 = vsel %vm269_vm0, %v1845_v35, %v4108_v49 }
 0x186   : > { %1179 = vrot.lane.b32.xlu1 %v897_v34, %s2252_s5  ;;  %v1966_v34 = vunpack.i.h.bf16 %v2660_v5  ;;  %v867_v27 = vpack.c.bf16 %v271_v31, %v4102_v46  ;;  %v890_v13 = vpack.c.bf16 %v430_v14, %v428_v57  ;;  %v4124_v31 = vld [vmem:[#allocation31_spill] sm:$0xff]  ;;  %v4127_v63 = vpack.c.bf16 %v3058_v44, %v4126_v26  ;;  %v4156_v26 = vld [vmem:[#allocation28_spill] sm:$0xff] }
 0x187   : > { %1279 = vrot.lane.b32.xlu2 %v947_v47, %s2252_s5  ;;  %v821_v61 = vsel %vm815_vm6, %v2201_v55, %v4096_v23  ;;  %v3234_v55 = vpop.permute.xlu1 %958  ;;  %v1835_v47 = vunpack.i.l.bf16 %v2479_v53  ;;  %v4111_v23 = vld [vmem:[#allocation53_spill] sm:$0xff]  ;;  %v429_v58 = vsel %vm425_vm2, %v1945_v41, %v4128_v19  ;;  %v431_v44 = vsel %vm425_vm2, %v1951_v33, %v4129_v28  ;;  %v4132_v57 = vld [vmem:[#allocation3_spill] sm:$0xff]  ;;  %v4159_v28 = vld [vmem:[#allocation6_spill] sm:$0xff] }
 0x188   : > { %v945_v7 = vpack.c.bf16 %v823_v2, %v821_v61  ;;  %v435_v24 = vsel %vm425_vm2, %v1966_v34, %v4101_v40  ;;  %v4112_v61 = vld [vmem:[#allocation52_spill] sm:$0xff]  ;;  %v4114_v2 = vld [vmem:[#allocation49_spill] sm:$0xff]  ;;  %v4133_v14 = vunpack.c.l.bf16 %v4132_v57  ;;  %v891_v18 = vpack.c.bf16 %v431_v44, %v429_v58 }
 0x189   : > { %v894_v17 = vpack.c.bf16 %v435_v24, %v433_v36  ;;  %v270_v53 = vsel %vm269_vm0, %v1835_v47, %v1836_v51  ;;  %v4121_v51 = vld [vmem:[#allocation15_spill] sm:$0xff]  ;;  %v1142_v40 = vpop.permute.xlu0 %1141  ;;  %v4123_v24 = vld [vmem:[#allocation32_spill] sm:$0xff]  ;;  %v4160_v44 = vunpack.c.h.bf16 %v4159_v28 }
 0x18a   : > { %v864_v36 = vpack.c.bf16 %v4122_v9, %v4121_v51  ;;  %v4150_v51 = vld [vmem:[#allocation41_spill] sm:$0xff]  ;;  %v4151_v9 = vld [vmem:[#allocation44_spill] sm:$0xff] }
 0x18d   : > { %1177 = vrot.lane.b32.xlu0 %v896_v38, %s2252_s5 }
 0x18e   : > { %1123 = vrot.lane.b32.xlu1 %v869_v54, %s2252_s5 }
 0x18f   : > { %1185 = vrot.lane.b32.xlu2 %v900_v22, %s2252_s5  ;;  %v4107_v22 = vunpack.c.l.bf16 %v2402_v39  ;;  %v432_v39 = vsel %vm425_vm2, %v1956_v56, %v1960_v43  ;;  %v4115_v43 = vld [vmem:[#allocation48_spill] sm:$0xff] }
 0x191   : > { %v3261_v38 = vpop.permute.xlu2 %1239  ;;  %v866_v25 = vpack.c.bf16 %v270_v53, %v4107_v22 }
 0x195   : > { %1221 = vrot.lane.b32.xlu0 %v4094_v8, %s2252_s5  ;;  %v870_v8 = vpack.c.bf16 %v275_v1, %v273_v37  ;;  %v4134_v1 = vld [vmem:[#allocation34_spill] sm:$0xff] }
 0x196   : > { %1269 = vrot.lane.b32.xlu1 %v4095_v62, %s2252_s5  ;;  %v4137_v37 = vld [vmem:[#allocation14_spill] sm:$0xff] }
 0x197   : > { %1129 = vrot.lane.b32.xlu2 %v872_v0, %s2252_s5  ;;  %v1965_v0 = vunpack.i.l.bf16 %v2660_v5  ;;  %v4113_v5 = vpack.c.bf16 %v4111_v23, %v4112_v61 }
 0x199   : > { %v434_v62 = vsel %vm425_vm2, %v1965_v0, %v1966_v34  ;;  %v4119_v34 = vld [vmem:[#allocation55_spill] sm:$0xff]  ;;  %v4139_v0 = vld [vmem:[#allocation50_spill] sm:$0xff]  ;;  %vm1716_vm2 = vcmask 257024  }
 0x19a   : > { %v893_v35 = vpack.c.bf16 %v434_v62, %v432_v39  ;;  %v4141_v56 = vpack.c.bf16 %v4139_v0, %v4140_v45  ;;  %v4142_v39 = vld [vmem:[#allocation71_spill] sm:$0xff]  ;;  %v4143_v62 = vld [vmem:[#allocation69_spill] sm:$0xff] }
 0x19d   : > { %1267 = vrot.lane.b32.xlu0 %v4098_v20, %s2252_s5  ;;  %v4116_v20 = vpack.c.bf16 %v4114_v2, %v4115_v43  ;;  %v4145_v43 = vld [vmem:[#allocation27_spill] sm:$0xff] }
 0x19e   : > { %1213 = vrot.lane.b32.xlu1 %v4099_v15, %s2252_s5 }
 0x19f   : > { %1275 = vrot.lane.b32.xlu2 %v945_v7, %s2252_s5  ;;  %v4120_v7 = vpack.c.bf16 %v4118_v21, %v4119_v34  ;;  %v4147_v21 = vld [vmem:[#allocation68_spill] sm:$0xff] }
 0x1a5   : > { %1173 = vrot.lane.b32.xlu0 %v894_v17, %s2252_s5  ;;  %v4125_v17 = vpack.c.bf16 %v4123_v24, %v4124_v31  ;;  %v4154_v24 = vld [vmem:[#allocation75_spill] sm:$0xff] }
 0x1a6   : > { %1119 = vrot.lane.b32.xlu1 %v867_v27, %s2252_s5 }
 0x1a7   : > { %1219 = vrot.lane.b32.xlu2 %v4105_v50, %s2252_s5  ;;  %v4130_v50 = vld [vmem:[#allocation8_spill] sm:$0xff] }
 0x1a8   : > { %v4131_v53 = vunpack.c.l.bf16 %v4130_v50 }
 0x1aa   : > { %v1238_v42 = vpop.permute.xlu1 %1237 }
 0x1ab   : > { %v1338_v54 = vsel %vm1291_vm8, %v1238_v42, %v3261_v38  ;;  %v860_v42 = vpack.c.bf16 %v4133_v14, %v4131_v53  ;;  %v4161_v53 = vld [vmem:[#allocation4_spill] sm:$0xff] }
 0x1ac   : > { %1502 = vmatpush.bf16.msra.mxu2 %v1338_v54  ;;  %v4135_v54 = vld [vmem:[#allocation33_spill] sm:$0xff]  ;;  %v4162_v14 = vunpack.c.h.bf16 %v4161_v53 }
 0x1ad   : > { %1117 = vrot.lane.b32.xlu0 %v866_v25, %s2252_s5  ;;  %v4136_v22 = vpack.c.bf16 %v4134_v1, %v4135_v54  ;;  %v3337_v25 = vpop.permute.xlu0 %1191  ;;  %v4163_v1 = vld [vmem:[#allocation25_spill] sm:$0xff] }
 0x1ae   : > { %1165 = vrot.lane.b32.xlu1 %v890_v13, %s2252_s5  ;;  %v4138_v13 = vld [vmem:[#allocation13_spill] sm:$0xff]  ;;  %v1910_v54 = vunpack.i.l.bf16 %v4163_v1 }
 0x1af   : > { %1125 = vrot.lane.b32.xlu2 %v870_v8, %s2252_s5  ;;  %v863_v8 = vpack.c.bf16 %v4138_v13, %v4137_v37  ;;  %v4166_v13 = vld [vmem:[#allocation38_spill] sm:$0xff] }
 0x1b5   : > { %1263 = vrot.lane.b32.xlu0 %v4110_v52, %s2252_s5  ;;  %v4144_v52 = vpack.c.bf16 %v4142_v39, %v4143_v62 }
 0x1b6   : > { %1209 = vrot.lane.b32.xlu1 %v4113_v5, %s2252_s5 }
 0x1b7   : > { %1171 = vrot.lane.b32.xlu2 %v893_v35, %s2252_s5  ;;  %v1136_v35 = vpop.permute.xlu0 %1135 }
 0x1bd   : > { %1207 = vrot.lane.b32.xlu0 %v4116_v20, %s2252_s5  ;;  %v1925_v20 = vunpack.i.l.bf16 %v4145_v43 }
 0x1be   : > { %1255 = vrot.lane.b32.xlu1 %v4117_v32, %s2252_s5  ;;  %v4146_v32 = vld [vmem:[#allocation72_spill] sm:$0xff] }
 0x1bf   : > { %1215 = vrot.lane.b32.xlu2 %v4120_v7, %s2252_s5  ;;  %v4148_v34 = vpack.c.bf16 %v4146_v32, %v4147_v21  ;;  %v4149_v7 = vld [vmem:[#allocation20_spill] sm:$0xff]  ;;  %v4171_v32 = vunpack.c.h.bf16 %v4130_v50  ;;  %v4172_v21 = vunpack.c.h.bf16 %v4132_v57 }
 0x1c0   : > { %v1286_v15 = vpop.permute.xlu1 %1285 }
 0x1c5   : > { %1113 = vrot.lane.b32.xlu0 %v864_v36, %s2252_s5  ;;  %v4152_v36 = vpack.c.bf16 %v4150_v51, %v4151_v9  ;;  %v1921_v9 = vunpack.i.h.bf16 %v4156_v26 }
 0x1c6   : > { %1161 = vrot.lane.b32.xlu1 %v4125_v17, %s2252_s5 }
 0x1c7   : > { %1261 = vrot.lane.b32.xlu2 %v4127_v63, %s2252_s5  ;;  %v4157_v63 = vunpack.i.l.bf16 %v4156_v26  ;;  %v358_v57 = vsel %vm347_vm1, %v1921_v9, %v1925_v20 }
 0x1c8   : > { %v3314_v47 = vpop.permute.xlu1 %1143 }
 0x1c9   : > { %v3316_v46 = vpop.permute.xlu2 %1287  ;;  %v1306_v27 = vsel %vm1291_vm8, %v1142_v40, %v3314_v47  ;;  %v4153_v40 = vld [vmem:[#allocation76_spill] sm:$0xff] }
 0x1ca   : > { %1466 = vmatpush.bf16.msra.mxu0 %v1306_v27  ;;  %v1354_v10 = vsel %vm1291_vm8, %v1286_v15, %v3316_v46  ;;  %v1916_v15 = vunpack.i.h.bf16 %v4149_v7  ;;  %v4155_v31 = vpack.c.bf16 %v4153_v40, %v4154_v24  ;;  %v1915_v40 = vunpack.i.l.bf16 %v4149_v7 }
 0x1cb   : > { %v1458_v12 = vsel %vm1456_vm9, %v1354_v10, 0  ;;  %v4158_v10 = vunpack.i.h.bf16 %v4145_v43 }
 0x1cc   : > { %1520 = vmatpush.bf16.msra.mxu3 %v1458_v12  ;;  %v357_v27 = vsel %vm347_vm1, %v1916_v15, %v4157_v63  ;;  %v356_v26 = vsel %vm347_vm1, %v1915_v40, %v1916_v15  ;;  %v4173_v63 = vld [vmem:[#allocation66_spill] sm:$0xff] }
 0x1cd   : > { %1159 = vrot.lane.b32.xlu0 %v4136_v22, %s2252_s5  ;;  %v359_v19 = vsel %vm347_vm1, %v1925_v20, %v4158_v10  ;;  %v4164_v22 = vld [vmem:[#allocation26_spill] sm:$0xff] }
 0x1ce   : > { %1105 = vrot.lane.b32.xlu1 %v860_v42, %s2252_s5  ;;  %v858_v42 = vpack.c.bf16 %v4162_v14, %v4160_v44  ;;  %v885_v12 = vpack.c.bf16 %v359_v19, %v357_v27  ;;  %v4174_v27 = vld [vmem:[#allocation63_spill] sm:$0xff]  ;;  %v884_v19 = vpack.c.bf16 %v358_v57, %v356_v26  ;;  %v4177_v44 = vld [vmem:[#allocation61_spill] sm:$0xff] }
 0x1cf   : > { %1167 = vrot.lane.b32.xlu2 %v891_v18, %s2252_s5  ;;  %v1906_v18 = vunpack.i.h.bf16 %v4164_v22  ;;  %v4175_v10 = vpack.c.bf16 %v4173_v63, %v4174_v27  ;;  %v4178_v14 = vld [vmem:[#allocation37_spill] sm:$0xff]  ;;  %v4189_v57 = vld [vmem:[#allocation23_spill] sm:$0xff] }
 0x1d0   : > { %v1232_v33 = vpop.permute.xlu1 %1231 }
 0x1d1   : > { %v1190_v41 = vpop.permute.xlu2 %1189  ;;  %v354_v39 = vsel %vm347_vm1, %v1906_v18, %v1910_v54 }
 0x1d2   : > { %v1322_v49 = vsel %vm1291_vm8, %v1190_v41, %v3337_v25 }
 0x1d3   : > { %1484 = vmatpush.bf16.msra.mxu1 %v1322_v49 }
 0x1d5   : > { %1203 = vrot.lane.b32.xlu0 %v4141_v56, %s2252_s5 }
 0x1d6   : > { %1251 = vrot.lane.b32.xlu1 %v4144_v52, %s2252_s5  ;;  %v4169_v52 = vunpack.c.l.bf16 %v4159_v28  ;;  %v4176_v28 = vld [vmem:[#allocation64_spill] sm:$0xff] }
 0x1d7   : > { %1111 = vrot.lane.b32.xlu2 %v863_v8, %s2252_s5  ;;  %v4167_v8 = vld [vmem:[#allocation46_spill] sm:$0xff] }
 0x1d8   : > { %v3354_v23 = vpop.permute.xlu1 %1137  ;;  %v4168_v0 = vpack.c.bf16 %v4166_v13, %v4167_v8  ;;  %v4181_v13 = vld [vmem:[#allocation40_spill] sm:$0xff]  ;;  %v1911_v8 = vunpack.i.h.bf16 %v4163_v1 }
 0x1d9   : > { %v3356_v61 = vpop.permute.xlu2 %1233  ;;  %v1304_v5 = vsel %vm1291_vm8, %v1136_v35, %v3354_v23  ;;  %v4170_v35 = vunpack.c.l.bf16 %v4161_v53 }
 0x1da   : > { %1467 = vmatpush.bf16.msra.mxu0 %v1304_v5  ;;  %v1336_v2 = vsel %vm1291_vm8, %v1232_v33, %v3356_v61  ;;  %v4165_v33 = vld [vmem:[#allocation19_spill] sm:$0xff] }
 0x1db   : > { %1503 = vmatpush.bf16.msra.mxu2 %v1336_v2  ;;  %v1901_v41 = vunpack.i.h.bf16 %v4165_v33  ;;  %v1900_v49 = vunpack.i.l.bf16 %v4165_v33  ;;  %v857_v5 = vpack.c.bf16 %v4170_v35, %v4169_v52  ;;  %v4183_v52 = vld [vmem:[#allocation67_spill] sm:$0xff]  ;;  %v4184_v35 = vld [vmem:[#allocation62_spill] sm:$0xff] }
 0x1dd   : > { %1249 = vrot.lane.b32.xlu0 %v4148_v34, %s2252_s5  ;;  %v352_v43 = vsel %vm347_vm1, %v1900_v49, %v1901_v41  ;;  %v861_v34 = vpack.c.bf16 %v4172_v21, %v4171_v32  ;;  %v355_v21 = vsel %vm347_vm1, %v1910_v54, %v1911_v8 }
 0x1de   : > { %1195 = vrot.lane.b32.xlu1 %v4152_v36, %s2252_s5  ;;  %v881_v51 = vpack.c.bf16 %v354_v39, %v352_v43 }
 0x1df   : > { %1257 = vrot.lane.b32.xlu2 %v4155_v31, %s2252_s5 }
 0x1e0   : > { %v1184_v17 = vpop.permute.xlu1 %1183 }
 0x1e1   : > { %v1280_v58 = vpop.permute.xlu2 %1279 }
 0x1e5   : > { %1155 = vrot.lane.b32.xlu0 %v885_v12, %s2252_s5 }
 0x1e6   : > { %1101 = vrot.lane.b32.xlu1 %v858_v42, %s2252_s5  ;;  %v4179_v42 = vld [vmem:[#allocation43_spill] sm:$0xff] }
 0x1e7   : > { %v3392_v37 = vpop.permute.xlu0 %1281  ;;  %1201 = vrot.lane.b32.xlu2 %v4168_v0, %s2252_s5  ;;  %v4180_v12 = vpack.c.bf16 %v4178_v14, %v4179_v42  ;;  %v1905_v0 = vunpack.i.l.bf16 %v4164_v22  ;;  %v4212_v22 = vld [vmem:[#allocation30_spill] sm:$0xff] }
 0x1e8   : > { %v3398_v45 = vpop.permute.xlu1 %1227  ;;  %v1352_v56 = vsel %vm1291_vm8, %v1280_v58, %v3392_v37 }
 0x1e9   : > { %v3403_v62 = vpop.permute.xlu2 %1185  ;;  %1521 = vmatpush.bf16.msra.mxu3 %v1352_v56  ;;  %v4182_v56 = vld [vmem:[#allocation39_spill] sm:$0xff]  ;;  %v883_v59 = vpack.c.bf16 %v1911_v8, %v1905_v0  ;;  %v4213_v8 = vunpack.i.l.bf16 %v2546_v3 }
 0x1ea   : > { %v1320_v2 = vsel %vm1291_vm8, %v1184_v17, %v3403_v62  ;;  %v952_v17 = vpack.c.bf16 %v3120_v4, %v3120_v4  ;;  %v1794_v3 = vld [vmem:[%s3880_s1 + $0x8] sm:$0xf] }
 0x1eb   : > { %1485 = vmatpush.bf16.msra.mxu1 %v1320_v2 }
 0x1ed   : > { %1099 = vrot.lane.b32.xlu0 %v857_v5, %s2252_s5  ;;  %v4185_v5 = vpack.c.bf16 %v4183_v52, %v4184_v35 }
 0x1ee   : > { %1147 = vrot.lane.b32.xlu1 %v881_v51, %s2252_s5 }
 0x1ef   : > { %v1226_v36 = vpop.permute.xlu0 %1225  ;;  %1107 = vrot.lane.b32.xlu2 %v861_v34, %s2252_s5  ;;  %v353_v34 = vsel %vm347_vm1, %v1901_v41, %v1905_v0  ;;  %v4187_v41 = vld [vmem:[#allocation21_spill] sm:$0xff]  ;;  %v889_v0 = vpack.c.bf16 %v4213_v8, %v4212_v22  ;;  %v1808_v22 = vld [vmem:[%s3880_s1 + $0x4] sm:$0xf]  ;;  %v1788_v8 = vld [vmem:[%s3880_s1 + $0x10] sm:$0xf0] }
 0x1f0   : > { %v1274_v24 = vpop.permute.xlu1 %1273  ;;  %v1334_v31 = vsel %vm1291_vm8, %v1226_v36, %v3398_v45  ;;  %v882_v9 = vpack.c.bf16 %v355_v21, %v353_v34  ;;  %v4186_v36 = vld [vmem:[#allocation79_spill] sm:$0xff]  ;;  %v4198_v21 = vld [vmem:[#allocation77_spill] sm:$0xff] }
 0x1f1   : > { %1504 = vmatpush.bf16.msra.mxu2 %v1334_v31  ;;  %v1130_v50 = vpop.permute.xlu2 %1129  ;;  %v4199_v34 = vld [vmem:[#allocation73_spill] sm:$0xff] }
 0x1f5   : > { %1245 = vrot.lane.b32.xlu0 %v4175_v10, %s2252_s5  ;;  %v4190_v10 = vld [vmem:[#allocation17_spill] sm:$0xff] }
 0x1f6   : > { %1289 = vrot.lane.b32.xlu1 %v952_v17, %s2252_s5 }
 0x1f7   : > { %v3432_v7 = vpop.permute.xlu0 %1131  ;;  %1153 = vrot.lane.b32.xlu2 %v884_v19, %s2252_s5  ;;  %v4191_v19 = vunpack.i.h.bf16 %v4190_v10 }
 0x1f8   : > { %v3435_v58 = vpop.permute.xlu1 %1179  ;;  %v1302_v20 = vsel %vm1291_vm8, %v1130_v50, %v3432_v7  ;;  %v4188_v50 = vld [vmem:[#allocation18_spill] sm:$0xff] }
 0x1f9   : > { %1468 = vmatpush.bf16.msra.mxu0 %v1302_v20  ;;  %v3439_v4 = vpop.permute.xlu2 %1275  ;;  %v4192_v20 = vld [vmem:[#allocation22_spill] sm:$0xff] }
 0x1fa   : > { %v1350_v15 = vsel %vm1291_vm8, %v1274_v24, %v3439_v4 }
 0x1fb   : > { %1522 = vmatpush.bf16.msra.mxu3 %v1350_v15  ;;  %v877_v15 = vpack.c.bf16 %v4192_v20, %v4191_v19 }
 0x1fd   : > { %1241 = vrot.lane.b32.xlu0 %v4176_v28, %s2252_s5  ;;  %v4193_v28 = vld [vmem:[#allocation59_spill] sm:$0xff] }
 0x1fe   : > { %1235 = vrot.lane.b32.xlu1 %v4177_v44, %s2252_s5  ;;  %v4194_v44 = vld [vmem:[#allocation56_spill] sm:$0xff] }
 0x1ff   : > { %v1178_v53 = vpop.permute.xlu0 %1177  ;;  %1197 = vrot.lane.b32.xlu2 %v4180_v12, %s2252_s5 }
 0x200   : > { %v1318_v18 = vsel %vm1291_vm8, %v1178_v53, %v3435_v58  ;;  %v1124_v33 = vpop.permute.xlu1 %1123 }
 0x201   : > { %1486 = vmatpush.bf16.msra.mxu1 %v1318_v18  ;;  %v1220_v49 = vpop.permute.xlu2 %1219  ;;  %v4195_v18 = vld [vmem:[#allocation36_spill] sm:$0xff] }
 0x205   : > { %1193 = vrot.lane.b32.xlu0 %v4181_v13, %s2252_s5 }
 0x206   : > { %1187 = vrot.lane.b32.xlu1 %v4182_v56, %s2252_s5 }
 0x207   : > { %v3459_v39 = vpop.permute.xlu0 %1221  ;;  %1243 = vrot.lane.b32.xlu2 %v4185_v5, %s2252_s5 }
 0x208   : > { %v1332_v2 = vsel %vm1291_vm8, %v1220_v49, %v3459_v39  ;;  %v3467_v43 = vpop.permute.xlu1 %1269  ;;  %v4197_v49 = vld [vmem:[#allocation60_spill] sm:$0xff] }
 0x209   : > { %1505 = vmatpush.bf16.msra.mxu2 %v1332_v2  ;;  %v3469_v32 = vpop.permute.xlu2 %1125  ;;  %v898_v2 = vpack.c.bf16 %v2608_v48, %v1976_v11  ;;  %v4204_v11 = vld [vmem:[#allocation7_spill] sm:$0xff] }
 0x20a   : > { %v1300_v51 = vsel %vm1291_vm8, %v1124_v33, %v3469_v32  ;;  %v4196_v33 = vld [vmem:[#allocation35_spill] sm:$0xff] }
 0x20b   : > { %1469 = vmatpush.bf16.msra.mxu0 %v1300_v51 }
 0x20d   : > { %1283 = vrot.lane.b32.xlu0 %v3130_v60, %s2252_s5 }
 0x20e   : > { %1277 = vrot.lane.b32.xlu1 %v4186_v36, %s2252_s5 }
 0x20f   : > { %v1268_v40 = vpop.permute.xlu0 %1267  ;;  %1149 = vrot.lane.b32.xlu2 %v882_v9, %s2252_s5 }
 0x210   : > { %v1348_v54 = vsel %vm1291_vm8, %v1268_v40, %v3467_v43  ;;  %v1214_v24 = vpop.permute.xlu1 %1213 }
 0x211   : > { %v1172_v31 = vpop.permute.xlu2 %1171  ;;  %1523 = vmatpush.bf16.msra.mxu3 %v1348_v54  ;;  %v4200_v54 = vld [vmem:[#allocation12_spill] sm:$0xff] }
 0x215   : > { %1133 = vrot.lane.b32.xlu0 %v4187_v41, %s2252_s5  ;;  %v4205_v41 = vunpack.c.l.bf16 %v4204_v11 }
 0x216   : > { %1127 = vrot.lane.b32.xlu1 %v4188_v50, %s2252_s5 }
 0x217   : > { %v3490_v60 = vpop.permute.xlu0 %1173  ;;  %1145 = vrot.lane.b32.xlu2 %v4189_v57, %s2252_s5  ;;  %v4206_v57 = vld [vmem:[#allocation78_spill] sm:$0xff] }
 0x218   : > { %v1316_v17 = vsel %vm1291_vm8, %v1172_v31, %v3490_v60  ;;  %v3496_v26 = vpop.permute.xlu1 %1119  ;;  %v4202_v31 = vld [vmem:[#allocation2_spill] sm:$0xff] }
 0x219   : > { %1487 = vmatpush.bf16.msra.mxu1 %v1316_v17  ;;  %v3498_v63 = vpop.permute.xlu2 %1215  ;;  %v4203_v48 = vunpack.c.l.bf16 %v4202_v31 }
 0x21a   : > { %v1330_v27 = vsel %vm1291_vm8, %v1214_v24, %v3498_v63  ;;  %v4201_v24 = vld [vmem:[#allocation11_spill] sm:$0xff] }
 0x21b   : > { %1506 = vmatpush.bf16.msra.mxu2 %v1330_v27  ;;  %v865_v6 = vpack.c.bf16 %v4201_v24, %v4200_v54  ;;  %v862_v50 = vpack.c.bf16 %v4205_v41, %v4203_v48  ;;  %v1811_v24 = vld [vmem:[%s3880_s1 + $0x14] sm:$0xf0] }
 0x21c   : > { %v3613_v41 = vor.u32 %v1811_v24, %v1794_v3  ;;  %v3666_v24 = vor.u32 %v1808_v22, %v1788_v8 }
 0x21d   : > { %1223 = vrot.lane.b32.xlu0 %v4193_v28, %s2252_s5 }
 0x21e   : > { %1217 = vrot.lane.b32.xlu1 %v4194_v44, %s2252_s5  ;;  %v4208_v44 = vld [vmem:[#allocation47_spill] sm:$0xff] }
 0x21f   : > { %1139 = vrot.lane.b32.xlu2 %v877_v15, %s2252_s5  ;;  %v1118_v53 = vpop.permute.xlu0 %1117  ;;  %v4207_v15 = vld [vmem:[#allocation16_spill] sm:$0xff] }
 0x220   : > { %v1166_v14 = vpop.permute.xlu1 %1165  ;;  %v1298_v42 = vsel %vm1291_vm8, %v1118_v53, %v3496_v26  ;;  %v868_v28 = vpack.c.bf16 %v1840_v29, %v4207_v15  ;;  %v4209_v53 = vld [vmem:[#allocation42_spill] sm:$0xff]  ;;  %v4210_v29 = vld [vmem:[#allocation29_spill] sm:$0xff] }
 0x221   : > { %v1262_v12 = vpop.permute.xlu2 %1261  ;;  %1470 = vmatpush.bf16.msra.mxu0 %v1298_v42 }
 0x225   : > { %1175 = vrot.lane.b32.xlu0 %v4195_v18, %s2252_s5 }
 0x226   : > { %1169 = vrot.lane.b32.xlu1 %v4196_v33, %s2252_s5  ;;  %v4211_v33 = vld [vmem:[#allocation51_spill] sm:$0xff] }
 0x227   : > { %1229 = vrot.lane.b32.xlu2 %v4197_v49, %s2252_s5  ;;  %v3518_v13 = vpop.permute.xlu0 %1263 }
 0x228   : > { %v3520_v56 = vpop.permute.xlu1 %1209  ;;  %v1346_v52 = vsel %vm1291_vm8, %v1262_v12, %v3518_v13 }
 0x229   : > { %v3524_v35 = vpop.permute.xlu2 %1167  ;;  %1524 = vmatpush.bf16.msra.mxu3 %v1346_v52 }
 0x22a   : > { %v1314_v5 = vsel %vm1291_vm8, %v1166_v14, %v3524_v35 }
 0x22b   : > { %1488 = vmatpush.bf16.msra.mxu1 %v1314_v5 }
 0x22d   : > { %1265 = vrot.lane.b32.xlu0 %v4198_v21, %s2252_s5  ;;  %v4214_v21 = vld [vmem:[#allocation65_spill] sm:$0xff] }
 0x22e   : > { %1259 = vrot.lane.b32.xlu1 %v4199_v34, %s2252_s5 }
 0x22f   : > { %1181 = vrot.lane.b32.xlu2 %v898_v2, %s2252_s5  ;;  %v1208_v51 = vpop.permute.xlu0 %1207 }
 0x230   : > { %v1256_v9 = vpop.permute.xlu1 %1255  ;;  %v1328_v36 = vsel %vm1291_vm8, %v1208_v51, %v3520_v56 }
 0x231   : > { %v1112_v40 = vpop.permute.xlu2 %1111  ;;  %1507 = vmatpush.bf16.msra.mxu2 %v1328_v36 }
 0x235   : > { %1115 = vrot.lane.b32.xlu0 %v865_v6, %s2252_s5 }
 0x236   : > { %1109 = vrot.lane.b32.xlu1 %v862_v50, %s2252_s5  ;;  %v4216_v50 = vld [vmem:[#allocation9_spill] sm:$0xff] }
 0x237   : > { %1271 = vrot.lane.b32.xlu2 %v4206_v57, %s2252_s5  ;;  %v3548_v17 = vpop.permute.xlu0 %1113  ;;  %v4217_v57 = vunpack.c.l.bf16 %v4216_v50 }
 0x238   : > { %v3550_v27 = vpop.permute.xlu1 %1161  ;;  %v1296_v10 = vsel %vm1291_vm8, %v1112_v40, %v3548_v17  ;;  %v4215_v40 = vld [vmem:[#allocation70_spill] sm:$0xff] }
 0x239   : > { %v3554_v19 = vpop.permute.xlu2 %1257  ;;  %1471 = vmatpush.bf16.msra.mxu0 %v1296_v10  ;;  %v4218_v10 = vld [vmem:[#allocation5_spill] sm:$0xff] }
 0x23a   : > { %v1344_v20 = vsel %vm1291_vm8, %v1256_v9, %v3554_v19 }
 0x23b   : > { %1525 = vmatpush.bf16.msra.mxu3 %v1344_v20  ;;  %v4219_v20 = vunpack.c.l.bf16 %v4218_v10 }
 0x23d   : > { %1205 = vrot.lane.b32.xlu0 %v4208_v44, %s2252_s5  ;;  %v859_v15 = vpack.c.bf16 %v4219_v20, %v4217_v57  ;;  %v1810_v44 = vld [vmem:[%s3880_s1 + $0xc] sm:$0xf0] }
 0x23e   : > { %1199 = vrot.lane.b32.xlu1 %v4209_v53, %s2252_s5 }
 0x23f   : > { %1121 = vrot.lane.b32.xlu2 %v868_v28, %s2252_s5  ;;  %v1160_v14 = vpop.permute.xlu0 %1159  ;;  %v1786_v28 = vld [vmem:[%s3880_s1] sm:$0xf] }
 0x240   : > { %v1106_v42 = vpop.permute.xlu1 %1105  ;;  %v1312_v12 = vsel %vm1291_vm8, %v1160_v14, %v3550_v27 }
 0x241   : > { %v1202_v18 = vpop.permute.xlu2 %1201  ;;  %1489 = vmatpush.bf16.msra.mxu1 %v1312_v12  ;;  %v3629_v12 = vor.u32 %v1810_v44, %v1786_v28 }
 0x245   : > { %1157 = vrot.lane.b32.xlu0 %v4210_v29, %s2252_s5  ;;  %v1809_v29 = vld [vmem:[%s3880_s1 + $0xc] sm:$0xf] }
 0x246   : > { %1151 = vrot.lane.b32.xlu1 %v883_v59, %s2252_s5  ;;  %v856_v59 = vld [vmem:[%s3880_s1 + $0x28] sm:$0xff] }
 0x247   : > { %1211 = vrot.lane.b32.xlu2 %v4211_v33, %s2252_s5  ;;  %v3577_v49 = vpop.permute.xlu0 %1203  ;;  %v1796_v33 = vld [vmem:[%s3880_s1 + $0x18] sm:$0xf0]  ;;  %v988_v44 = vunpack.c.h.b16 %v856_v59 }
 0x248   : > { %v3579_v52 = vpop.permute.xlu1 %1251  ;;  %v1326_v5 = vsel %vm1291_vm8, %v1202_v18, %v3577_v49 }
 0x249   : > { %v3583_v2 = vpop.permute.xlu2 %1107  ;;  %1508 = vmatpush.bf16.msra.mxu2 %v1326_v5  ;;  %v987_v5 = vunpack.c.l.b16 %v856_v59 }
 0x24a   : > { %v1294_v1 = vsel %vm1291_vm8, %v1106_v42, %v3583_v2 }
 0x24b   : > { %1472 = vmatpush.bf16.msra.mxu0 %v1294_v1 }
 0x24d   : > { %1247 = vrot.lane.b32.xlu0 %v4214_v21, %s2252_s5 }
 0x24f   : > { %1163 = vrot.lane.b32.xlu2 %v889_v0, %s2252_s5  ;;  %v1250_v34 = vpop.permute.xlu0 %1249 }
 0x250   : > { %v1196_v51 = vpop.permute.xlu1 %1195  ;;  %v1342_v9 = vsel %vm1291_vm8, %v1250_v34, %v3579_v52  ;;  %v3653_v34 = vor.u32 %v1809_v29, %v1796_v33 }
 0x251   : > { %v1154_v36 = vpop.permute.xlu2 %1153  ;;  %1526 = vmatpush.bf16.msra.mxu3 %v1342_v9 }
 0x257   : > { %1253 = vrot.lane.b32.xlu2 %v4215_v40, %s2252_s5  ;;  %v3597_v54 = vpop.permute.xlu0 %1155 }
 0x258   : > { %v3605_v6 = vpop.permute.xlu1 %1101  ;;  %v1310_v31 = vsel %vm1291_vm8, %v1154_v36, %v3597_v54  ;;  %v855_v36 = vld [vmem:[%s3880_s1 + $0x20] sm:$0xff] }
 0x259   : > { %v3609_v48 = vpop.permute.xlu2 %1197  ;;  %1490 = vmatpush.bf16.msra.mxu1 %v1310_v31  ;;  %v3668_v31 = vpack.c.b16 %v987_v5, %v987_v5 }
 0x25a   : > { %v1324_v11 = vsel %vm1291_vm8, %v1196_v51, %v3609_v48 }
 0x25b   : > { %1509 = vmatpush.bf16.msra.mxu2 %v1324_v11  ;;  %v985_v11 = vunpack.c.l.b16 %v855_v36 }
 0x25d   : > { %v3681_v10 = vpack.c.b16 %v985_v11, %v985_v11 }
 0x25e   : > { %1510 = vmatmul.bf16.vlgmr.msra.gmra.mxu2 %v3613_v41 }
 0x25f   : > { %1103 = vrot.lane.b32.xlu2 %v859_v15, %s2252_s5  ;;  %v1100_v53 = vpop.permute.xlu0 %1099 }
 0x260   : > { %v1148_v14 = vpop.permute.xlu1 %1147  ;;  %v1292_v42 = vsel %vm1291_vm8, %v1100_v53, %v3605_v6  ;;  %v986_v53 = vunpack.c.h.b16 %v855_v36 }
 0x261   : > { %v1244_v18 = vpop.permute.xlu2 %1243  ;;  %1473 = vmatpush.bf16.msra.mxu0 %v1292_v42 }
 0x262   : > { %v3706_v59 = vpack.c.b16 %v986_v53, %v986_v53 }
 0x264   : > { %1474 = vmatmul.bf16.vlgmr.msra.gmra.mxu0 %v3629_v12 }
 0x267   : > { %v3641_v1 = vpop.permute.xlu0 %1245 }
 0x268   : > { %v3649_v0 = vpop.permute.xlu1 %1289  ;;  %v1340_v21 = vsel %vm1291_vm8, %v1244_v18, %v3641_v1  ;;  %v3699_v18 = vpack.c.b16 %v988_v44, %v988_v44 }
 0x269   : > { %v3655_v51 = vpop.permute.xlu2 %1149  ;;  %1527 = vmatpush.bf16.msra.mxu3 %v1340_v21  ;;  %v1355_v9 = vsel %vm1291_vm8, %v3316_v46, %v3649_v0 }
 0x26a   : > { %v1308_v40 = vsel %vm1291_vm8, %v1148_v14, %v3655_v51  ;;  %v1461_v3 = vsel %vm1456_vm9, %v1355_v9, 0 }
 0x26b   : > { %1491 = vmatpush.bf16.msra.mxu1 %v1308_v40 }
 0x26c   : > { %1800 = vmatmul.msk.bf16.vlgmr.msra.gmra.mxu3 %vm1449_vm10, %v3653_v34 }
 0x26d   : > { %1592 = vmatpush.bf16.msrb.mxu3 %v1461_v3 }
 0x26e   : > { %1492 = vmatmul.bf16.vlgmr.msra.gmra.mxu1 %v3666_v24  ;;  %1515 = vmatmul.bf16.gmra.mxu2 %v3668_v31 }
 0x26f   : > { %v3674_v46 = vpop.permute.xlu0 %1241 }
 0x270   : > { %v3676_v50 = vpop.permute.xlu1 %1235  ;;  %v1339_v57 = vsel %vm1291_vm8, %v3261_v38, %v3674_v46 }
 0x271   : > { %v3683_v20 = vpop.permute.xlu2 %1145  ;;  %1574 = vmatpush.bf16.msrb.mxu2 %v1339_v57  ;;  %v1337_v28 = vsel %vm1291_vm8, %v3356_v61, %v3676_v50 }
 0x272   : > { %v1307_v15 = vsel %vm1291_vm8, %v3314_v47, %v3683_v20 }
 0x273   : > { %1538 = vmatpush.bf16.msrb.mxu0 %v1307_v15 }
 0x274   : > { %1479 = vmatmul.bf16.gmra.mxu0 %v3681_v10 }
 0x275   : > { %1575 = vmatpush.bf16.msrb.mxu2 %v1337_v28 }
 0x277   : > { %v3692_v38 = vpop.permute.xlu0 %1193 }
 0x278   : > { %v3694_v14 = vpop.permute.xlu1 %1187  ;;  %v1323_v42 = vsel %vm1291_vm8, %v3337_v25, %v3692_v38 }
 0x279   : > { %v3701_v47 = vpop.permute.xlu2 %1139  ;;  %1556 = vmatpush.bf16.msrb.mxu1 %v1323_v42  ;;  %v1321_v29 = vsel %vm1291_vm8, %v3403_v62, %v3694_v14 }
 0x27a   : > { %v1305_v61 = vsel %vm1291_vm8, %v3354_v23, %v3701_v47 }
 0x27b   : > { %1539 = vmatpush.bf16.msrb.mxu0 %v1305_v61 }
 0x27c   : > { %1801 = vmatmul.msk.bf16.gmra.mxu3 %vm1449_vm10, %v3699_v18 }
 0x27d   : > { %1557 = vmatpush.bf16.msrb.mxu1 %v1321_v29 }
 0x27e   : > { %1497 = vmatmul.bf16.gmra.mxu1 %v3706_v59 }
 0x27f   : > { %v3714_v25 = vpop.permute.xlu0 %1283 }
 0x280   : > { %v3716_v33 = vpop.permute.xlu1 %1277  ;;  %v1353_v23 = vsel %vm1291_vm8, %v3392_v37, %v3714_v25 }
 0x281   : > { %v3721_v5 = vpop.permute.xlu2 %1229  ;;  %1593 = vmatpush.bf16.msrb.mxu3 %v1353_v23  ;;  %v1351_v62 = vsel %vm1291_vm8, %v3439_v4, %v3716_v33 }
 0x282   : > { %v1335_v22 = vsel %vm1291_vm8, %v3398_v45, %v3721_v5 }
 0x283   : > { %1576 = vmatpush.bf16.msrb.mxu2 %v1335_v22 }
 0x285   : > { %1594 = vmatpush.bf16.msrb.mxu3 %v1351_v62 }
 0x287   : > { %v3729_v8 = vpop.permute.xlu0 %1133 }
 0x288   : > { %v3731_v21 = vpop.permute.xlu1 %1127  ;;  %v1303_v37 = vsel %vm1291_vm8, %v3432_v7, %v3729_v8 }
 0x289   : > { %v3736_v9 = vpop.permute.xlu2 %1181  ;;  %1540 = vmatpush.bf16.msrb.mxu0 %v1303_v37  ;;  %v1301_v4 = vsel %vm1291_vm8, %v3469_v32, %v3731_v21 }
 0x28a   : > { %v1319_v45 = vsel %vm1291_vm8, %v3435_v58, %v3736_v9 }
 0x28b   : > { %1558 = vmatpush.bf16.msrb.mxu1 %v1319_v45 }
 0x28d   : > { %1541 = vmatpush.bf16.msrb.mxu0 %v1301_v4 }
 0x28f   : > { %v3744_v36 = vpop.permute.xlu0 %1223 }
 0x290   : > { %v3746_v40 = vpop.permute.xlu1 %1217  ;;  %v1333_v7 = vsel %vm1291_vm8, %v3459_v39, %v3744_v36 }
 0x291   : > { %v3751_v3 = vpop.permute.xlu2 %1271  ;;  %1577 = vmatpush.bf16.msrb.mxu2 %v1333_v7  ;;  %v1331_v32 = vsel %vm1291_vm8, %v3498_v63, %v3746_v40 }
 0x292   : > { %v1349_v58 = vsel %vm1291_vm8, %v3467_v43, %v3751_v3 }
 0x293   : > { %1595 = vmatpush.bf16.msrb.mxu3 %v1349_v58 }
 0x295   : > { %1578 = vmatpush.bf16.msrb.mxu2 %v1331_v32 }
 0x297   : > { %v3759_v11 = vpop.permute.xlu0 %1175 }
 0x298   : > { %v3761_v57 = vpop.permute.xlu1 %1169  ;;  %v1317_v39 = vsel %vm1291_vm8, %v3490_v60, %v3759_v11 }
 0x299   : > { %v3766_v15 = vpop.permute.xlu2 %1121  ;;  %1559 = vmatpush.bf16.msrb.mxu1 %v1317_v39  ;;  %v1315_v63 = vsel %vm1291_vm8, %v3524_v35, %v3761_v57 }
 0x29a   : > { %v1299_v43 = vsel %vm1291_vm8, %v3496_v26, %v3766_v15 }
 0x29b   : > { %1542 = vmatpush.bf16.msrb.mxu0 %v1299_v43 }
 0x29d   : > { %1560 = vmatpush.bf16.msrb.mxu1 %v1315_v63 }
 0x29f   : > { %v3774_v28 = vpop.permute.xlu0 %1265 }
 0x2a0   : > { %v3776_v44 = vpop.permute.xlu1 %1259  ;;  %v1347_v60 = vsel %vm1291_vm8, %v3518_v13, %v3774_v28 }
 0x2a1   : > { %v1212_v53 = vpop.permute.xlu2 %1211  ;;  %1596 = vmatpush.bf16.msrb.mxu3 %v1347_v60  ;;  %v1345_v26 = vsel %vm1291_vm8, %v3554_v19, %v3776_v44 }
 0x2a2   : > { %v1329_v42 = vsel %vm1291_vm8, %v3520_v56, %v1212_v53 }
 0x2a3   : > { %1579 = vmatpush.bf16.msrb.mxu2 %v1329_v42 }
 0x2a5   : > { %1597 = vmatpush.bf16.msrb.mxu3 %v1345_v26 }
 0x2a7   : > { %v1116_v35 = vpop.permute.xlu0 %1115 }
 0x2a8   : > { %v3786_v61 = vpop.permute.xlu1 %1109  ;;  %v1297_v29 = vsel %vm1291_vm8, %v3548_v17, %v1116_v35 }
 0x2a9   : > { %v1164_v23 = vpop.permute.xlu2 %1163  ;;  %1543 = vmatpush.bf16.msrb.mxu0 %v1297_v29  ;;  %v1295_v56 = vsel %vm1291_vm8, %v3583_v2, %v3786_v61 }
 0x2aa   : > { %v1313_v13 = vsel %vm1291_vm8, %v3550_v27, %v1164_v23 }
 0x2ab   : > { %1561 = vmatpush.bf16.msrb.mxu1 %v1313_v13 }
 0x2ad   : > { %1544 = vmatpush.bf16.msrb.mxu0 %v1295_v56 }
 0x2af   : > { %v1206_v22 = vpop.permute.xlu0 %1205 }
 0x2b0   : > { %v1200_v19 = vpop.permute.xlu1 %1199  ;;  %v1327_v62 = vsel %vm1291_vm8, %v3577_v49, %v1206_v22 }
 0x2b1   : > { %v1254_v37 = vpop.permute.xlu2 %1253  ;;  %1580 = vmatpush.bf16.msrb.mxu2 %v1327_v62  ;;  %v1325_v27 = vsel %vm1291_vm8, %v3609_v48, %v1200_v19 }
 0x2b2   : > { %v1343_v17 = vsel %vm1291_vm8, %v3579_v52, %v1254_v37 }
 0x2b3   : > { %1598 = vmatpush.bf16.msrb.mxu3 %v1343_v17 }
 0x2b5   : > { %1581 = vmatpush.bf16.msrb.mxu2 %v1325_v27 }
 0x2b7   : > { %v1158_v45 = vpop.permute.xlu0 %1157 }
 0x2b8   : > { %v1311_v2 = vsel %vm1291_vm8, %v3597_v54, %v1158_v45  ;;  %1582 = vmatmul.bf16.vlgmr.msrb.gmra.mxu2 %v3613_v41  ;;  %v1152_v49 = vpop.permute.xlu1 %1151 }
 0x2b9   : > { %1646 = vmatpush.bf16.msra.mxu2 %v3674_v46  ;;  %v1104_v4 = vpop.permute.xlu2 %1103  ;;  %1562 = vmatpush.bf16.msrb.mxu1 %v1311_v2  ;;  %v1309_v48 = vsel %vm1291_vm8, %v3655_v51, %v1152_v49  ;;  %v1464_v46 = vsel %vm1456_vm9, %v3649_v0, 0 }
 0x2ba   : > { %v1293_v52 = vsel %vm1291_vm8, %v3605_v6, %v1104_v4 }
 0x2bb   : > { %1545 = vmatpush.bf16.msrb.mxu0 %v1293_v52 }
 0x2bd   : > { %1647 = vmatpush.bf16.msra.mxu2 %v3676_v50  ;;  %1563 = vmatpush.bf16.msrb.mxu1 %v1309_v48 }
 0x2be   : > { %1546 = vmatmul.bf16.vlgmr.msrb.gmra.mxu0 %v3629_v12 }
 0x2bf   : > { %1610 = vmatpush.bf16.msra.mxu0 %v3683_v20  ;;  %v1248_v54 = vpop.permute.xlu0 %1247 }
 0x2c0   : > { %1564 = vmatmul.bf16.vlgmr.msrb.gmra.mxu1 %v3666_v24  ;;  %v1341_v6 = vsel %vm1291_vm8, %v3641_v1, %v1248_v54 }
 0x2c1   : > { %1628 = vmatpush.bf16.msra.mxu1 %v3692_v38  ;;  %1648 = vmatpush.bf16.msra.mxu2 %v3721_v5 }
 0x2c2   : > { %1599 = vmatpush.bf16.msrb.mxu3 %v1341_v6 }
 0x2c3   : > { %1611 = vmatpush.bf16.msra.mxu0 %v3701_v47 }
 0x2c5   : > { %1629 = vmatpush.bf16.msra.mxu1 %v3694_v14  ;;  %1649 = vmatpush.bf16.msra.mxu2 %v3744_v36 }
 0x2c6   : > { %1664 = vmatpush.bf16.msra.mxu3 %v1464_v46 }
 0x2c7   : > { %1802 = vmatmul.msk.bf16.vlgmr.msrb.gmra.mxu3 %vm1449_vm10, %v3653_v34  ;;  %1612 = vmatpush.bf16.msra.mxu0 %v3729_v8 }
 0x2c8   : > { %1587 = vmatmul.bf16.gmra.mxu2 %v3668_v31 }
 0x2c9   : > { %1630 = vmatpush.bf16.msra.mxu1 %v3736_v9  ;;  %1650 = vmatpush.bf16.msra.mxu2 %v3746_v40 }
 0x2ca   : > { %1665 = vmatpush.bf16.msra.mxu3 %v3714_v25 }
 0x2cb   : > { %1613 = vmatpush.bf16.msra.mxu0 %v3731_v21 }
 0x2cd   : > { %1631 = vmatpush.bf16.msra.mxu1 %v3759_v11  ;;  %1651 = vmatpush.bf16.msra.mxu2 %v1212_v53 }
 0x2ce   : > { %1666 = vmatpush.bf16.msra.mxu3 %v3716_v33  ;;  %1551 = vmatmul.bf16.gmra.mxu0 %v3681_v10 }
 0x2cf   : > { %1614 = vmatpush.bf16.msra.mxu0 %v3766_v15 }
 0x2d0   : > { %1569 = vmatmul.bf16.gmra.mxu1 %v3706_v59 }
 0x2d1   : > { %1632 = vmatpush.bf16.msra.mxu1 %v3761_v57  ;;  %1652 = vmatpush.bf16.msra.mxu2 %v1206_v22 }
 0x2d2   : > { %1667 = vmatpush.bf16.msra.mxu3 %v3751_v3 }
 0x2d3   : > { %1615 = vmatpush.bf16.msra.mxu0 %v1116_v35 }
 0x2d5   : > { %1633 = vmatpush.bf16.msra.mxu1 %v1164_v23  ;;  %1653 = vmatpush.bf16.msra.mxu2 %v1200_v19 }
 0x2d6   : > { %1668 = vmatpush.bf16.msra.mxu3 %v3774_v28 }
 0x2d7   : > { %1803 = vmatmul.msk.bf16.gmra.mxu3 %vm1449_vm10, %v3699_v18  ;;  %1616 = vmatpush.bf16.msra.mxu0 %v3786_v61 }
 0x2d8   : > { %1654 = vmatmul.bf16.vlgmr.msra.gmra.mxu2 %v3613_v41 }
 0x2d9   : > { %1634 = vmatpush.bf16.msra.mxu1 %v1158_v45 }
 0x2da   : > { %1669 = vmatpush.bf16.msra.mxu3 %v3776_v44 }
 0x2db   : > { %1617 = vmatpush.bf16.msra.mxu0 %v1104_v4 }
 0x2dd   : > { %1635 = vmatpush.bf16.msra.mxu1 %v1152_v49 }
 0x2de   : > { %1670 = vmatpush.bf16.msra.mxu3 %v1254_v37  ;;  %1618 = vmatmul.bf16.vlgmr.msra.gmra.mxu0 %v3629_v12 }
 0x2e0   : > { %1636 = vmatmul.bf16.vlgmr.msra.gmra.mxu1 %v3666_v24 }
 0x2e1   : > { %v1475_v1 = vpop.f32.mrf.mxu0  ;;  %v1511_v0 = vpop.f32.mrf.mxu2 }
 0x2e2   : > { %1671 = vmatpush.bf16.msra.mxu3 %v1248_v54  ;;  %v1476_v20 = vadd.f32 %v1475_v1, %v3234_v55 }
 0x2e7   : > { %1804 = vmatmul.msk.bf16.vlgmr.msra.gmra.mxu3 %vm1449_vm10, %v3653_v34 }
 0x2e8   : > { %1659 = vmatmul.bf16.gmra.mxu2 %v3668_v31 }
 0x2e9   : > { %v1477_v51 = vpop.f32.mrf.mxu0  ;;  %v1513_v50 = vpop.f32.mrf.mxu2 }
 0x2ea   : > { %v1478_v33 = vadd.f32 %v1477_v51, %v3232_v30 }
 0x2eb   : > { %v1493_v38 = vpop.f32.mrf.mxu1 }
 0x2ec   : > { %v1494_v41 = vadd.f32 %v1493_v38, %v1476_v20 }
 0x2ee   : > { %v1512_v14 = vadd.f32 %v1511_v0, %v1494_v41  ;;  %1623 = vmatmul.bf16.gmra.mxu0 %v3681_v10 }
 0x2ef   : > { %v1529_v12 = vpop.f32.mrf.mxu3 }
 0x2f0   : > { %v1530_v47 = vadd.f32 %v1529_v12, %v1512_v14  ;;  %1641 = vmatmul.bf16.gmra.mxu1 %v3706_v59 }
 0x2f1   : > { %v1480_v24 = vpop.f32.mrf.mxu0  ;;  %v1516_v25 = vpop.f32.mrf.mxu2 }
 0x2f2   : > { %v1481_v10 = vadd.f32 %v1480_v24, %v3289_v16  ;;  %v1691_v26 = vmul.f32 0.1, %v1530_v47  ;;  %vm1682_vm11 = vcmp.ge.f32.partialorder %v1530_v47, 0.0 }
 0x2f3   : > { %v1495_v34 = vpop.f32.mrf.mxu1 }
 0x2f4   : > { %v1496_v5 = vadd.f32 %v1495_v34, %v1478_v33  ;;  %v1700_v56 = vsel %vm1682_vm11, %v1530_v47, %v1691_v26 }
 0x2f6   : > { %v1514_v31 = vadd.f32 %v1513_v50, %v1496_v5 }
 0x2f7   : > { %1805 = vmatmul.msk.bf16.gmra.mxu3 %vm1449_vm10, %v3699_v18  ;;  %v1531_v8 = vpop.f32.mrf.mxu3 }
 0x2f8   : > { %v1532_v21 = vadd.f32 %v1531_v8, %v1514_v31 }
 0x2f9   : > { %v1482_v9 = vpop.f32.mrf.mxu0  ;;  %v1518_v36 = vpop.f32.mrf.mxu2 }
 0x2fa   : > { %v1694_v45 = vmul.f32 0.1, %v1532_v21  ;;  %vm1685_vm13 = vcmp.ge.f32.partialorder %v1532_v21, 0.0 }
 0x2fb   : > { %v1498_v40 = vpop.f32.mrf.mxu1 }
 0x2fc   : > { %v1499_v7 = vadd.f32 %v1498_v40, %v1481_v10  ;;  %v1703_v54 = vsel %vm1685_vm13, %v1532_v21, %v1694_v45 }
 0x2fe   : > { %v1517_v3 = vadd.f32 %v1516_v25, %v1499_v7 }
 0x2ff   : > { %v1534_v59 = vpop.f32.mrf.mxu3 }
 0x300   : > { %v1535_v58 = vadd.f32 %v1534_v59, %v1517_v3 }
 0x302   : > { %v1697_v50 = vmul.f32 0.1, %v1535_v58  ;;  %vm1688_vm15 = vcmp.ge.f32.partialorder %v1535_v58, 0.0 }
 0x303   : > { %v1500_v32 = vpop.f32.mrf.mxu1 }
 0x304   : > { %v1706_v12 = vsel %vm1688_vm15, %v1535_v58, %v1697_v50 }
 0x307   : > { %v1536_v11 = vpop.f32.mrf.mxu3 }
 0x33b   : > { %v1547_v57 = vpop.f32.mrf.mxu0  ;;  %v1583_v39 = vpop.f32.mrf.mxu2 }
 0x33c   : > { %v1548_v18 = vadd.f32 %v1547_v57, %v3234_v55 }
 0x33d   : > { %v1565_v15 = vpop.f32.mrf.mxu1 }
 0x33e   : > { %v1566_v43 = vadd.f32 %v1565_v15, %v1548_v18 }
 0x340   : > { %v1584_v60 = vadd.f32 %v1583_v39, %v1566_v43 }
 0x343   : > { %v1549_v63 = vpop.f32.mrf.mxu0  ;;  %v1585_v28 = vpop.f32.mrf.mxu2 }
 0x344   : > { %v1550_v53 = vadd.f32 %v1549_v63, %v3232_v30 }
 0x345   : > { %v1567_v44 = vpop.f32.mrf.mxu1 }
 0x346   : > { %v1568_v61 = vadd.f32 %v1567_v44, %v1550_v53 }
 0x348   : > { %v1586_v37 = vadd.f32 %v1585_v28, %v1568_v61 }
 0x34a   : > { %v1601_v42 = vpop.f32.mrf.mxu3 }
 0x34b   : > { %v1602_v35 = vadd.f32 %v1601_v42, %v1584_v60  ;;  %v1552_v23 = vpop.f32.mrf.mxu0  ;;  %v1588_v13 = vpop.f32.mrf.mxu2 }
 0x34c   : > { %v1553_v17 = vadd.f32 %v1552_v23, %v3289_v16 }
 0x34d   : > { %vm1683_vm12 = vcmp.ge.f32.partialorder %v1602_v35, 0.0  ;;  %v1692_v29 = vmul.f32 0.1, %v1602_v35  ;;  %v1570_v62 = vpop.f32.mrf.mxu1 }
 0x34e   : > { %v1571_v4 = vadd.f32 %v1570_v62, %v1553_v17 }
 0x34f   : > { %v1701_v22 = vsel %vm1683_vm12, %v1602_v35, %v1692_v29 }
 0x350   : > { %v1709_v19 = vpack.c.bf16 %v1701_v22, %v1700_v56  ;;  %v1589_v0 = vadd.f32 %v1588_v13, %v1571_v4 }
 0x352   : > { %1715 = vst [vmem:[%s3861_s4] sm:$0xff] %v1709_v19  ;;  %v1603_v27 = vpop.f32.mrf.mxu3 }
 0x353   : > { %v1604_v2 = vadd.f32 %v1603_v27, %v1586_v37  ;;  %v1554_v52 = vpop.f32.mrf.mxu0  ;;  %v1590_v48 = vpop.f32.mrf.mxu2 }
 0x355   : > { %vm1686_vm14 = vcmp.ge.f32.partialorder %v1604_v2, 0.0  ;;  %v1695_v49 = vmul.f32 0.1, %v1604_v2  ;;  %v1572_v1 = vpop.f32.mrf.mxu1 }
 0x357   : > { %v1704_v6 = vsel %vm1686_vm14, %v1604_v2, %v1695_v49 }
 0x358   : > { %v1711_v46 = vpack.c.bf16 %v1704_v6, %v1703_v54 }
 0x35a   : > { %1718 = vst [vmem:[%s3861_s4 + $0xc] sm:$0xff] %v1711_v46  ;;  %v1606_v51 = vpop.f32.mrf.mxu3 }
 0x35b   : > { %v1607_v20 = vadd.f32 %v1606_v51, %v1589_v0  ;;  %v1619_v41 = vpop.f32.mrf.mxu0  ;;  %v1655_v14 = vpop.f32.mrf.mxu2 }
 0x35c   : > { %v1620_v33 = vadd.f32 %v1619_v41, %v3234_v55 }
 0x35d   : > { %vm1689_vm0 = vcmp.ge.f32.partialorder %v1607_v20, 0.0  ;;  %v1698_v38 = vmul.f32 0.1, %v1607_v20  ;;  %v1637_v25 = vpop.f32.mrf.mxu1 }
 0x35e   : > { %v1638_v5 = vadd.f32 %v1637_v25, %v1620_v33 }
 0x35f   : > { %v1707_v47 = vsel %vm1689_vm0, %v1607_v20, %v1698_v38 }
 0x360   : > { %v1713_v24 = vpack.c.bf16 %v1707_v47, %v1706_v12  ;;  %v1656_v9 = vadd.f32 %v1655_v14, %v1638_v5 }
 0x362   : > { %1720 = vst [vmem:[%s3861_s4 + $0x18] sm:$0xff] %v1713_v24  ;;  %v1608_v34 = vpop.f32.mrf.mxu3 }
 0x363   : > { %v1621_v31 = vpop.f32.mrf.mxu0  ;;  %v1657_v8 = vpop.f32.mrf.mxu2 }
 0x364   : > { %v1622_v36 = vadd.f32 %v1621_v31, %v3232_v30 }
 0x365   : > { %v1639_v21 = vpop.f32.mrf.mxu1 }
 0x366   : > { %v1640_v7 = vadd.f32 %v1639_v21, %v1622_v36 }
 0x368   : > { %v1658_v57 = vadd.f32 %v1657_v8, %v1640_v7 }
 0x36a   : > { %v1673_v10 = vpop.f32.mrf.mxu3 }
 0x36b   : > { %v1674_v40 = vadd.f32 %v1673_v10, %v1656_v9  ;;  %v1624_v59 = vpop.f32.mrf.mxu0  ;;  %v1660_v58 = vpop.f32.mrf.mxu2 }
 0x36c   : > { %v1625_v39 = vadd.f32 %v1624_v59, %v3289_v16 }
 0x36d   : > { %vm1684_vm1 = vcmp.ge.f32.partialorder %v1674_v40, 0.0  ;;  %v1693_v3 = vmul.f32 0.1, %v1674_v40  ;;  %v1642_v11 = vpop.f32.mrf.mxu1 }
 0x36e   : > { %v1643_v30 = vadd.f32 %v1642_v11, %v1625_v39 }
 0x36f   : > { %v1702_v32 = vsel %vm1684_vm1, %v1674_v40, %v1693_v3 }
 0x370   : > { %v1710_v55 = vpack.c.bf16 %v1702_v32, %v1702_v32  ;;  %v1661_v42 = vadd.f32 %v1660_v58, %v1643_v30 }
 0x372   : > { %1717 = vst.msk [vmem:[%s3861_s4 + $0x8] sm:$0xf] %vm1716_vm2, %v1710_v55  ;;  %v1675_v15 = vpop.f32.mrf.mxu3 }
 0x373   : > { %v1676_v18 = vadd.f32 %v1675_v15, %v1658_v57  ;;  %v1626_v63 = vpop.f32.mrf.mxu0  ;;  %v1662_v28 = vpop.f32.mrf.mxu2 }
 0x375   : > { %vm1687_vm3 = vcmp.ge.f32.partialorder %v1676_v18, 0.0  ;;  %v1696_v43 = vmul.f32 0.1, %v1676_v18  ;;  %v1644_v53 = vpop.f32.mrf.mxu1 }
 0x377   : > { %v1705_v44 = vsel %vm1687_vm3, %v1676_v18, %v1696_v43 }
 0x378   : > { %v1712_v60 = vpack.c.bf16 %v1705_v44, %v1705_v44 }
 0x37a   : > { %1719 = vst.msk [vmem:[%s3861_s4 + $0x14] sm:$0xf] %vm1716_vm2, %v1712_v60  ;;  %v1678_v26 = vpop.f32.mrf.mxu3 }
 0x37b   : > { %v1679_v35 = vadd.f32 %v1678_v26, %v1661_v42 }
 0x37d   : > { %vm1690_vm4 = vcmp.ge.f32.partialorder %v1679_v35, 0.0  ;;  %v1699_v16 = vmul.f32 0.1, %v1679_v35 }
 0x37f   : > { %v1708_v61 = vsel %vm1690_vm4, %v1679_v35, %v1699_v16 }
 0x380   : > { %v1714_v29 = vpack.c.bf16 %v1708_v61, %v1708_v61 }
 0x382   : > { %1721 = vst.msk [vmem:[%s3861_s4 + $0x20] sm:$0xf] %vm1716_vm2, %v1714_v29  ;;  %v1680_v23 = vpop.f32.mrf.mxu3 }
 0x383 PF: > { %s13_s12 = sadd.s32 1, %s2241_s12  }
 0x384   : > { %p10_p4 = scmp.ge.s32.totalorder %s13_s12, 6  }
 0x386   :  { %12 = sbr.rel (!%p10_p4) target bundleno = 1 (0x1), region = 62 }

// kernel: sisr_forward.44
= control target key start
LH: loop header
LB: loop body
LE: loop exit
PB: predicated region body
PF: predicated region fallthrough
CT: control target
= control target key end

     0   :  { %s3127_s12 = smov 0   ;;  %s5477_s0 = inlined_call_operand.vmem [shape: bf16[4,80,360], index: 0, kind: input, shape index: {}]   ;;  %s5478_s1 = inlined_call_operand.vmem [shape: bf16[24,720], index: 1, kind: input, shape index: {}]   ;;  %s5479_s2 = inlined_call_operand.vmem [shape: f32[24,1], index: 2, kind: input, shape index: {}]   ;;  %s5480_s3 = inlined_call_operand.vmem [shape: bf16[4,24,288], index: 3, kind: output, shape index: {}]  }
   0x1 LB: > { %s2408_s13 = sadd.s32 4294967295, %s3095_s12   ;;  %p2412_p0 = scmp.ge.s32.totalorder %s3095_s12, 1  ;;  %s3095_s12 = sphi %s3127_s12, %s13_s12  }
   0x2   : > { %p137_p1 = scmp.lt.s32.totalorder %s3095_s12, 5 }
   0x4   : > { %p138_p2 = pnand %p2412_p0, %p137_p1 }
   0x6   : > { %141 = sbr.rel (%p138_p2) target bundleno = 1032 (0x408), region = 32 }
   0xb   : > { %p161_p3 = scmp.lt.s32.totalorder %s2408_s13, 3  ;;  %s3097_s18 = smov 127   ;;  %vm312_vm0 = vcmask 1039360   ;;  %vm534_vm1 = vcmask 900096   ;;  %vm645_vm2 = vcmask 891904   ;;  %vm423_vm3 = vcmask 1031168  }
   0xc   : > { %s3098_s19 = smov 126   ;;  %s3099_s20 = smov 110   ;;  %vm867_vm4 = vcmask 752640   ;;  %vm1089_vm5 = vcmask 736256   ;;  %vm756_vm6 = vcmask 883712   ;;  %vm1756_vm7 = vcmask 908288  }
   0xd   : > { %s6091_s13 = smov (!%p161_p3, %s2408_s13), 3  ;;  %s3100_s21 = smov 109   ;;  %vm978_vm8 = vcmask 744448   ;;  %vm1982_vm9 = vcmask 654336  }
   0xe   : > { %s2466_s14 = smul.u32 120, %s6091_s13  ;;  %s3101_s22 = smov 108  }
   0xf   : > { %s3102_s23 = smov 92   ;;  %s3103_s24 = smov 91  }
  0x10   : > { %s3141_s17 = scalar_lea.vmem %s5477_s0, %s2466_s14  ;;  %s3104_s25 = smov 90  }
  0x11   : > { %v3144_v0 = vld [vmem:[%s3141_s17 + $0x20] sm:$0xf]  ;;  %v3147_v1 = vld [vmem:[%s3141_s17 + $0x24] sm:$0xff]  ;;  %v3150_v2 = vld [vmem:[%s3141_s17 + $0xc] sm:$0xff]  ;;  %s3106_s5 = smov 111   ;;  %s2467_s11 = smul.u32 36, %s6091_s13 }
  0x12   : > { %v5504_v3 = vunpack.c.l.bf16 %v3144_v0  ;;  %v5499_v4 = vunpack.c.l.bf16 %v3147_v1  ;;  %v3155_v5 = vld [vmem:[%s3141_s17 + $0x14] sm:$0xf]  ;;  %v5515_v6 = vunpack.c.h.bf16 %v3150_v2  ;;  %v3159_v7 = vld [vmem:[%s3141_s17] sm:$0xff]  ;;  %v3165_v11 = vld [vmem:[%s3141_s17 + $0x2c] sm:$0xf]  ;;  %v5505_v17 = vunpack.c.h.bf16 %v3147_v1 }
  0x13   : > { %v5511_v8 = vunpack.c.l.bf16 %v3155_v5  ;;  %v5510_v9 = vunpack.c.l.bf16 %v3159_v7  ;;  %v5516_v10 = vunpack.c.h.bf16 %v3159_v7  ;;  %v3174_v13 = vld [vmem:[%s3141_s17 + $0x18] sm:$0xff]  ;;  %v3177_v14 = vld [vmem:[%s3141_s17 + $0x8] sm:$0xf]  ;;  %v5503_v18 = vunpack.c.l.bf16 %v3165_v11  ;;  %v3225_v27 = vld [vmem:[%s3141_s17 + $0x44] sm:$0xf]  ;;  %s5457_s16 = scalar_lea.vmem %s5480_s3, %s2467_s11 }
  0x14   : > { %v3171_v12 = vpack.i.bf16 %v5499_v4, %v5504_v3  ;;  %v5509_v19 = vunpack.c.l.bf16 %v3150_v2  ;;  %v5500_v20 = vunpack.c.l.bf16 %v3174_v13  ;;  %v5506_v21 = vunpack.c.h.bf16 %v3174_v13  ;;  %v3222_v26 = vld [vmem:[%s3141_s17 + $0x3c] sm:$0xff]  ;;  %v3228_v28 = vld [vmem:[%s3141_s17 + $0x38] sm:$0xf]  ;;  %v3231_v29 = vld [vmem:[%s3141_s17 + $0x30] sm:$0xff] }
  0x15   : > { %v3183_v15 = vpack.i.bf16 %v5511_v8, %v5515_v6  ;;  %v3189_v16 = vpack.i.bf16 %v5516_v10, %v5510_v9  ;;  %v5512_v22 = vunpack.c.l.bf16 %v3177_v14  ;;  %v3207_v23 = vpack.i.bf16 %v5503_v18, %v5505_v17  ;;  %v3264_v39 = vld [vmem:[%s3141_s17 + $0x54] sm:$0xff]  ;;  %v3267_v40 = vld [vmem:[%s3141_s17 + $0x5c] sm:$0xf]  ;;  %v3270_v41 = vld [vmem:[%s3141_s17 + $0x50] sm:$0xf] }
  0x16   : > { %2507 = vrot.lane.b32.xlu2 %v3171_v12, %s3097_s18  ;;  %v3213_v24 = vpack.i.bf16 %v5506_v21, %v5500_v20  ;;  %v5497_v30 = vunpack.c.h.bf16 %v3222_v26  ;;  %v5495_v31 = vunpack.c.l.bf16 %v3225_v27  ;;  %v5496_v32 = vunpack.c.l.bf16 %v3228_v28  ;;  %v3273_v42 = vld [vmem:[%s3141_s17 + $0x48] sm:$0xff]  ;;  %v3309_v53 = vld [vmem:[%s3141_s17 + $0x74] sm:$0xf]  ;;  %v3315_v55 = vld [vmem:[%s3141_s17 + $0x60] sm:$0xff] }
  0x17   : > { %2497 = vrot.lane.b32.xlu1 %v3183_v15, %s3097_s18  ;;  %2487 = vrot.lane.b32.xlu0 %v3189_v16, %s3097_s18  ;;  %v3219_v25 = vpack.i.bf16 %v5509_v19, %v5512_v22  ;;  %v5493_v33 = vunpack.c.l.bf16 %v3222_v26  ;;  %v5494_v34 = vunpack.c.l.bf16 %v3231_v29  ;;  %v5498_v35 = vunpack.c.h.bf16 %v3231_v29  ;;  %v3306_v52 = vld [vmem:[%s3141_s17 + $0x6c] sm:$0xff]  ;;  %v3312_v54 = vld [vmem:[%s3141_s17 + $0x68] sm:$0xf] }
  0x18   : > { %v3249_v36 = vpack.i.bf16 %v5495_v31, %v5497_v30  ;;  %v5491_v43 = vunpack.c.h.bf16 %v3264_v39  ;;  %v5489_v44 = vunpack.c.l.bf16 %v3267_v40  ;;  %v5490_v45 = vunpack.c.l.bf16 %v3270_v41 }
  0x19   : > { %v3255_v37 = vpack.i.bf16 %v5493_v33, %v5496_v32  ;;  %v3261_v38 = vpack.i.bf16 %v5498_v35, %v5494_v34  ;;  %v5481_v46 = vunpack.c.l.bf16 %v3264_v39  ;;  %v5488_v47 = vunpack.c.l.bf16 %v3273_v42 }
  0x1a   : > { %v5492_v48 = vunpack.c.h.bf16 %v3273_v42  ;;  %v3291_v49 = vpack.i.bf16 %v5489_v44, %v5491_v43  ;;  %v5486_v56 = vunpack.c.h.bf16 %v3306_v52  ;;  %v5484_v57 = vunpack.c.l.bf16 %v3309_v53 }
  0x1b   : > { %v3297_v50 = vpack.i.bf16 %v5481_v46, %v5490_v45  ;;  %v5485_v58 = vunpack.c.l.bf16 %v3312_v54  ;;  %v5482_v59 = vunpack.c.l.bf16 %v3306_v52  ;;  %v5483_v60 = vunpack.c.l.bf16 %v3315_v55 }
  0x1c   : > { %v3303_v51 = vpack.i.bf16 %v5492_v48, %v5488_v47  ;;  %v5487_v61 = vunpack.c.h.bf16 %v3315_v55  ;;  %v3333_v62 = vpack.i.bf16 %v5484_v57, %v5486_v56 }
  0x1d   : > { %v3339_v63 = vpack.i.bf16 %v5482_v59, %v5485_v58 }
  0x1e   : > { %2512 = vrot.lane.b32.xlu2 %v3207_v23, %s3097_s18  ;;  %v3345_v46 = vpack.i.bf16 %v5487_v61, %v5483_v60 }
  0x1f   : > { %2502 = vrot.lane.b32.xlu1 %v3213_v24, %s3097_s18  ;;  %2492 = vrot.lane.b32.xlu0 %v3219_v25, %s3097_s18 }
  0x26   : > { %2527 = vrot.lane.b32.xlu2 %v3249_v36, %s3097_s18 }
  0x27   : > { %2522 = vrot.lane.b32.xlu1 %v3255_v37, %s3097_s18  ;;  %2517 = vrot.lane.b32.xlu0 %v3261_v38, %s3097_s18 }
  0x2e   : > { %2542 = vrot.lane.b32.xlu2 %v3291_v49, %s3097_s18 }
  0x2f   : > { %2537 = vrot.lane.b32.xlu1 %v3297_v50, %s3097_s18  ;;  %2532 = vrot.lane.b32.xlu0 %v3303_v51, %s3097_s18 }
  0x36   : > { %2557 = vrot.lane.b32.xlu2 %v3333_v62, %s3097_s18 }
  0x37   : > { %2552 = vrot.lane.b32.xlu1 %v3339_v63, %s3097_s18  ;;  %2547 = vrot.lane.b32.xlu0 %v3345_v46, %s3097_s18 }
  0x3e   : > { %2572 = vrot.lane.b32.xlu2 %v3183_v15, %s3098_s19 }
  0x3f   : > { %2567 = vrot.lane.b32.xlu1 %v3219_v25, %s3098_s19  ;;  %2562 = vrot.lane.b32.xlu0 %v3189_v16, %s3098_s19 }
  0x46   : > { %2587 = vrot.lane.b32.xlu2 %v3207_v23, %s3098_s19 }
  0x47   : > { %2582 = vrot.lane.b32.xlu1 %v3171_v12, %s3098_s19  ;;  %2577 = vrot.lane.b32.xlu0 %v3213_v24, %s3098_s19 }
  0x4e   : > { %2602 = vrot.lane.b32.xlu2 %v3249_v36, %s3098_s19 }
  0x4f   : > { %2597 = vrot.lane.b32.xlu1 %v3255_v37, %s3098_s19  ;;  %2592 = vrot.lane.b32.xlu0 %v3261_v38, %s3098_s19 }
  0x56   : > { %2617 = vrot.lane.b32.xlu2 %v3291_v49, %s3098_s19 }
  0x57   : > { %2612 = vrot.lane.b32.xlu1 %v3297_v50, %s3098_s19  ;;  %2607 = vrot.lane.b32.xlu0 %v3303_v51, %s3098_s19 }
  0x5e   : > { %2632 = vrot.lane.b32.xlu2 %v3333_v62, %s3098_s19 }
  0x5f   : > { %2627 = vrot.lane.b32.xlu1 %v3339_v63, %s3098_s19  ;;  %2622 = vrot.lane.b32.xlu0 %v3345_v46, %s3098_s19 }
  0x66   : > { %2647 = vrot.lane.b32.xlu2 %v3183_v15, %s3099_s20 }
  0x67   : > { %2642 = vrot.lane.b32.xlu1 %v3219_v25, %s3099_s20  ;;  %2637 = vrot.lane.b32.xlu0 %v3189_v16, %s3099_s20 }
  0x6e   : > { %2662 = vrot.lane.b32.xlu2 %v3207_v23, %s3099_s20 }
  0x6f   : > { %2657 = vrot.lane.b32.xlu1 %v3171_v12, %s3099_s20  ;;  %2652 = vrot.lane.b32.xlu0 %v3213_v24, %s3099_s20 }
  0x70   : > { %v3374_v59 = vpop.permute.xlu2 %2507 }
  0x76   : > { %2677 = vrot.lane.b32.xlu2 %v3249_v36, %s3099_s20 }
  0x77   : > { %2672 = vrot.lane.b32.xlu1 %v3255_v37, %s3099_s20  ;;  %2667 = vrot.lane.b32.xlu0 %v3261_v38, %s3099_s20 }
  0x78   : > { %v3379_v60 = vpop.permute.xlu2 %2512 }
  0x7e   : > { %2692 = vrot.lane.b32.xlu2 %v3291_v49, %s3099_s20 }
  0x7f   : > { %2687 = vrot.lane.b32.xlu1 %v3297_v50, %s3099_s20  ;;  %2682 = vrot.lane.b32.xlu0 %v3303_v51, %s3099_s20 }
  0x80   : > { %v3384_v57 = vpop.permute.xlu2 %2527 }
  0x81   : > { %v5501_v43 = vunpack.i.h.bf16 %v3384_v57 }
  0x86   : > { %2707 = vrot.lane.b32.xlu2 %v3333_v62, %s3099_s20 }
  0x87   : > { %2702 = vrot.lane.b32.xlu1 %v3339_v63, %s3099_s20  ;;  %2697 = vrot.lane.b32.xlu0 %v3345_v46, %s3099_s20 }
  0x88   : > { %v3389_v58 = vpop.permute.xlu2 %2542 }
  0x89   : > { %5715 = vst [vmem:[#allocation2_spill] sm:$0xff] %v3389_v58  ;;  %v3391_v56 = vpop.permute.xlu1 %2497  ;;  %v3393_v61 = vpop.permute.xlu0 %2487  ;;  %v5508_v30 = vunpack.i.h.bf16 %v3389_v58 }
  0x8e   : > { %2722 = vrot.lane.b32.xlu2 %v3183_v15, %s3100_s21 }
  0x8f   : > { %2717 = vrot.lane.b32.xlu1 %v3219_v25, %s3100_s21  ;;  %2712 = vrot.lane.b32.xlu0 %v3189_v16, %s3100_s21 }
  0x90   : > { %v3401_v47 = vpop.permute.xlu2 %2557 }
  0x91   : > { %5716 = vst [vmem:[#allocation3_spill] sm:$0xff] %v3401_v47  ;;  %v3403_v44 = vpop.permute.xlu1 %2502  ;;  %v3405_v45 = vpop.permute.xlu0 %2492  ;;  %v5514_v18 = vunpack.i.h.bf16 %v3401_v47 }
  0x96   : > { %2737 = vrot.lane.b32.xlu2 %v3207_v23, %s3100_s21 }
  0x97   : > { %2732 = vrot.lane.b32.xlu1 %v3171_v12, %s3100_s21  ;;  %2727 = vrot.lane.b32.xlu0 %v3213_v24, %s3100_s21 }
  0x98   : > { %v3414_v48 = vpop.permute.xlu2 %2572 }
  0x99   : > { %5717 = vst [vmem:[#allocation4_spill] sm:$0xff] %v3414_v48  ;;  %v3416_v33 = vpop.permute.xlu1 %2522  ;;  %v3418_v34 = vpop.permute.xlu0 %2517  ;;  %v5518_v19 = vunpack.i.h.bf16 %v3414_v48 }
  0x9a   : > { %v5502_v31 = vunpack.i.l.bf16 %v3416_v33 }
  0x9c   : > { %v3425_v32 = vpack.c.bf16 %v5501_v43, %v5502_v31 }
  0x9e   : > { %5718 = vst [vmem:[#allocation5_spill] sm:$0xff] %v3425_v32  ;;  %2752 = vrot.lane.b32.xlu2 %v3249_v36, %s3100_s21 }
  0x9f   : > { %2747 = vrot.lane.b32.xlu1 %v3255_v37, %s3100_s21  ;;  %2742 = vrot.lane.b32.xlu0 %v3261_v38, %s3100_s21 }
  0xa0   : > { %v3434_v35 = vpop.permute.xlu2 %2587 }
  0xa1   : > { %5719 = vst [vmem:[#allocation6_spill] sm:$0xff] %v3434_v35  ;;  %v3436_v4 = vpop.permute.xlu1 %2537  ;;  %v3438_v20 = vpop.permute.xlu0 %2532  ;;  %v5523_v6 = vunpack.i.h.bf16 %v3434_v35 }
  0xa2   : > { %5720 = vst [vmem:[#allocation7_spill] sm:$0xff] %v3436_v4  ;;  %v5507_v43 = vunpack.i.l.bf16 %v3436_v4 }
  0xa3   : > { %5721 = vst [vmem:[#allocation8_spill] sm:$0xff] %v3438_v20 }
  0xa4   : > { %v3445_v31 = vpack.c.bf16 %v5508_v30, %v5507_v43 }
  0xa6   : > { %5722 = vst [vmem:[#allocation9_spill] sm:$0xff] %v3445_v31  ;;  %2767 = vrot.lane.b32.xlu2 %v3291_v49, %s3100_s21 }
  0xa7   : > { %2762 = vrot.lane.b32.xlu1 %v3297_v50, %s3100_s21  ;;  %2757 = vrot.lane.b32.xlu0 %v3303_v51, %s3100_s21 }
  0xa8   : > { %v3454_v3 = vpop.permute.xlu2 %2602 }
  0xa9   : > { %5723 = vst [vmem:[#allocation10_spill] sm:$0xff] %v3454_v3  ;;  %v3456_v17 = vpop.permute.xlu1 %2552  ;;  %v3458_v21 = vpop.permute.xlu0 %2547 }
  0xaa   : > { %5724 = vst [vmem:[#allocation11_spill] sm:$0xff] %v3456_v17  ;;  %v5513_v43 = vunpack.i.l.bf16 %v3456_v17 }
  0xab   : > { %5725 = vst [vmem:[#allocation12_spill] sm:$0xff] %v3458_v21 }
  0xac   : > { %v3465_v30 = vpack.c.bf16 %v5514_v18, %v5513_v43 }
  0xae   : > { %5726 = vst [vmem:[#allocation13_spill] sm:$0xff] %v3465_v30  ;;  %2782 = vrot.lane.b32.xlu2 %v3333_v62, %s3100_s21 }
  0xaf   : > { %2777 = vrot.lane.b32.xlu1 %v3339_v63, %s3100_s21  ;;  %2772 = vrot.lane.b32.xlu0 %v3345_v46, %s3100_s21 }
  0xb0   : > { %v3474_v9 = vpop.permute.xlu2 %2617 }
  0xb1   : > { %5727 = vst [vmem:[#allocation14_spill] sm:$0xff] %v3474_v9  ;;  %v3476_v8 = vpop.permute.xlu1 %2567  ;;  %v3478_v22 = vpop.permute.xlu0 %2562 }
  0xb2   : > { %5728 = vst [vmem:[#allocation15_spill] sm:$0xff] %v3476_v8  ;;  %v5517_v43 = vunpack.i.l.bf16 %v3476_v8 }
  0xb3   : > { %5729 = vst [vmem:[#allocation16_spill] sm:$0xff] %v3478_v22 }
  0xb4   : > { %v3485_v18 = vpack.c.bf16 %v5518_v19, %v5517_v43 }
  0xb6   : > { %5730 = vst [vmem:[#allocation17_spill] sm:$0xff] %v3485_v18  ;;  %2797 = vrot.lane.b32.xlu2 %v3183_v15, %s3101_s22  ;;  %v5530_v18 = vunpack.i.h.bf16 %v3454_v3 }
  0xb7   : > { %2792 = vrot.lane.b32.xlu1 %v3219_v25, %s3101_s22  ;;  %2787 = vrot.lane.b32.xlu0 %v3189_v16, %s3101_s22 }
  0xb8   : > { %v3494_v10 = vpop.permute.xlu2 %2632 }
  0xb9   : > { %v3496_v31 = vpop.permute.xlu1 %2582  ;;  %v3498_v30 = vpop.permute.xlu0 %2577 }
  0xba   : > { %5731 = vst [vmem:[#allocation18_spill] sm:$0xff] %v3496_v31  ;;  %v5522_v43 = vunpack.i.l.bf16 %v3496_v31 }
  0xbb   : > { %5732 = vst [vmem:[#allocation19_spill] sm:$0xff] %v3498_v30 }
  0xbc   : > { %v3505_v19 = vpack.c.bf16 %v5523_v6, %v5522_v43 }
  0xbe   : > { %5733 = vst [vmem:[#allocation20_spill] sm:$0xff] %v3505_v19  ;;  %2812 = vrot.lane.b32.xlu2 %v3207_v23, %s3101_s22  ;;  %v5537_v19 = vunpack.i.h.bf16 %v3474_v9 }
  0xbf   : > { %2807 = vrot.lane.b32.xlu1 %v3171_v12, %s3101_s22  ;;  %2802 = vrot.lane.b32.xlu0 %v3213_v24, %s3101_s22 }
  0xc0   : > { %v3514_v32 = vpop.permute.xlu2 %2647 }
  0xc1   : > { %v3516_v20 = vpop.permute.xlu1 %2597  ;;  %v3518_v4 = vpop.permute.xlu0 %2592 }
  0xc2   : > { %5734 = vst [vmem:[#allocation21_spill] sm:$0xff] %v3516_v20  ;;  %v5529_v43 = vunpack.i.l.bf16 %v3516_v20 }
  0xc3   : > { %5735 = vst [vmem:[#allocation22_spill] sm:$0xff] %v3518_v4 }
  0xc4   : > { %v3525_v6 = vpack.c.bf16 %v5530_v18, %v5529_v43 }
  0xc6   : > { %5736 = vst [vmem:[#allocation23_spill] sm:$0xff] %v3525_v6  ;;  %2827 = vrot.lane.b32.xlu2 %v3249_v36, %s3101_s22  ;;  %v5544_v6 = vunpack.i.h.bf16 %v3494_v10 }
  0xc7   : > { %2822 = vrot.lane.b32.xlu1 %v3255_v37, %s3101_s22  ;;  %2817 = vrot.lane.b32.xlu0 %v3261_v38, %s3101_s22 }
  0xc8   : > { %v3534_v58 = vpop.permute.xlu2 %2662 }
  0xc9   : > { %5737 = vst [vmem:[#allocation24_spill] sm:$0xff] %v3534_v58  ;;  %v3536_v21 = vpop.permute.xlu1 %2612  ;;  %v3538_v17 = vpop.permute.xlu0 %2607 }
  0xca   : > { %5738 = vst [vmem:[#allocation25_spill] sm:$0xff] %v3536_v21  ;;  %v5536_v43 = vunpack.i.l.bf16 %v3536_v21 }
  0xcb   : > { %5739 = vst [vmem:[#allocation26_spill] sm:$0xff] %v3538_v17 }
  0xcc   : > { %v3545_v18 = vpack.c.bf16 %v5537_v19, %v5536_v43 }
  0xce   : > { %5740 = vst [vmem:[#allocation27_spill] sm:$0xff] %v3545_v18  ;;  %2842 = vrot.lane.b32.xlu2 %v3291_v49, %s3101_s22  ;;  %v5551_v18 = vunpack.i.h.bf16 %v3514_v32 }
  0xcf   : > { %2837 = vrot.lane.b32.xlu1 %v3297_v50, %s3101_s22  ;;  %2832 = vrot.lane.b32.xlu0 %v3303_v51, %s3101_s22 }
  0xd0   : > { %v3554_v47 = vpop.permute.xlu2 %2677 }
  0xd1   : > { %5741 = vst [vmem:[#allocation28_spill] sm:$0xff] %v3554_v47  ;;  %v3556_v22 = vpop.permute.xlu1 %2627  ;;  %v3558_v8 = vpop.permute.xlu0 %2622 }
  0xd2   : > { %v5543_v43 = vunpack.i.l.bf16 %v3556_v22 }
  0xd4   : > { %v3565_v19 = vpack.c.bf16 %v5544_v6, %v5543_v43 }
  0xd6   : > { %5742 = vst [vmem:[#allocation29_spill] sm:$0xff] %v3565_v19  ;;  %2857 = vrot.lane.b32.xlu2 %v3333_v62, %s3101_s22  ;;  %v5558_v19 = vunpack.i.h.bf16 %v3534_v58 }
  0xd7   : > { %2852 = vrot.lane.b32.xlu1 %v3339_v63, %s3101_s22  ;;  %2847 = vrot.lane.b32.xlu0 %v3345_v46, %s3101_s22 }
  0xd8   : > { %v3574_v48 = vpop.permute.xlu2 %2692 }
  0xd9   : > { %5743 = vst [vmem:[#allocation30_spill] sm:$0xff] %v3574_v48  ;;  %v3576_v30 = vpop.permute.xlu1 %2642  ;;  %v3578_v31 = vpop.permute.xlu0 %2637 }
  0xda   : > { %v5550_v43 = vunpack.i.l.bf16 %v3576_v30 }
  0xdc   : > { %v3585_v6 = vpack.c.bf16 %v5551_v18, %v5550_v43 }
  0xde   : > { %5744 = vst [vmem:[#allocation31_spill] sm:$0xff] %v3585_v6  ;;  %2872 = vrot.lane.b32.xlu2 %v3183_v15, %s3102_s23  ;;  %v5565_v6 = vunpack.i.h.bf16 %v3554_v47 }
  0xdf   : > { %2867 = vrot.lane.b32.xlu1 %v3219_v25, %s3102_s23  ;;  %2862 = vrot.lane.b32.xlu0 %v3189_v16, %s3102_s23 }
  0xe0   : > { %v3594_v35 = vpop.permute.xlu2 %2707 }
  0xe1   : > { %5745 = vst [vmem:[#allocation32_spill] sm:$0xff] %v3594_v35  ;;  %v3596_v4 = vpop.permute.xlu1 %2657  ;;  %v3598_v20 = vpop.permute.xlu0 %2652 }
  0xe2   : > { %5746 = vst [vmem:[#allocation33_spill] sm:$0xff] %v3596_v4  ;;  %v5557_v43 = vunpack.i.l.bf16 %v3596_v4 }
  0xe3   : > { %5747 = vst [vmem:[#allocation34_spill] sm:$0xff] %v3598_v20 }
  0xe4   : > { %v3605_v18 = vpack.c.bf16 %v5558_v19, %v5557_v43 }
  0xe6   : > { %5748 = vst [vmem:[#allocation35_spill] sm:$0xff] %v3605_v18  ;;  %2887 = vrot.lane.b32.xlu2 %v3207_v23, %s3102_s23  ;;  %v5572_v18 = vunpack.i.h.bf16 %v3574_v48 }
  0xe7   : > { %2882 = vrot.lane.b32.xlu1 %v3171_v12, %s3102_s23  ;;  %2877 = vrot.lane.b32.xlu0 %v3213_v24, %s3102_s23 }
  0xe8   : > { %v3614_v20 = vpop.permute.xlu2 %2722 }
  0xe9   : > { %5749 = vst [vmem:[#allocation36_spill] sm:$0xff] %v3614_v20  ;;  %v3616_v3 = vpop.permute.xlu1 %2672  ;;  %v3618_v4 = vpop.permute.xlu0 %2667 }
  0xea   : > { %5750 = vst [vmem:[#allocation37_spill] sm:$0xff] %v3616_v3  ;;  %v5564_v43 = vunpack.i.l.bf16 %v3616_v3 }
  0xeb   : > { %5751 = vst [vmem:[#allocation38_spill] sm:$0xff] %v3618_v4 }
  0xec   : > { %v3625_v19 = vpack.c.bf16 %v5565_v6, %v5564_v43 }
  0xee   : > { %5752 = vst [vmem:[#allocation39_spill] sm:$0xff] %v3625_v19  ;;  %2902 = vrot.lane.b32.xlu2 %v3249_v36, %s3102_s23  ;;  %v5579_v19 = vunpack.i.h.bf16 %v3594_v35 }
  0xef   : > { %2897 = vrot.lane.b32.xlu1 %v3255_v37, %s3102_s23  ;;  %2892 = vrot.lane.b32.xlu0 %v3261_v38, %s3102_s23 }
  0xf0   : > { %v3634_v58 = vpop.permute.xlu2 %2737 }
  0xf1   : > { %5753 = vst [vmem:[#allocation40_spill] sm:$0xff] %v3634_v58  ;;  %v3636_v4 = vpop.permute.xlu1 %2687  ;;  %v3638_v3 = vpop.permute.xlu0 %2682 }
  0xf2   : > { %5754 = vst [vmem:[#allocation41_spill] sm:$0xff] %v3636_v4  ;;  %v5571_v43 = vunpack.i.l.bf16 %v3636_v4 }
  0xf3   : > { %5755 = vst [vmem:[#allocation42_spill] sm:$0xff] %v3638_v3 }
  0xf4   : > { %v3645_v6 = vpack.c.bf16 %v5572_v18, %v5571_v43 }
  0xf6   : > { %5756 = vst [vmem:[#allocation43_spill] sm:$0xff] %v3645_v6  ;;  %2917 = vrot.lane.b32.xlu2 %v3291_v49, %s3102_s23  ;;  %v5586_v6 = vunpack.i.h.bf16 %v3614_v20 }
  0xf7   : > { %2912 = vrot.lane.b32.xlu1 %v3297_v50, %s3102_s23  ;;  %2907 = vrot.lane.b32.xlu0 %v3303_v51, %s3102_s23 }
  0xf8   : > { %v3654_v47 = vpop.permute.xlu2 %2752 }
  0xf9   : > { %5757 = vst [vmem:[#allocation44_spill] sm:$0xff] %v3654_v47  ;;  %v3656_v3 = vpop.permute.xlu1 %2702  ;;  %v3658_v4 = vpop.permute.xlu0 %2697 }
  0xfa   : > { %5758 = vst [vmem:[#allocation45_spill] sm:$0xff] %v3656_v3  ;;  %v5578_v43 = vunpack.i.l.bf16 %v3656_v3 }
  0xfb   : > { %5759 = vst [vmem:[#allocation46_spill] sm:$0xff] %v3658_v4 }
  0xfc   : > { %v3665_v18 = vpack.c.bf16 %v5579_v19, %v5578_v43 }
  0xfe   : > { %5760 = vst [vmem:[#allocation47_spill] sm:$0xff] %v3665_v18  ;;  %2932 = vrot.lane.b32.xlu2 %v3333_v62, %s3102_s23  ;;  %v5593_v18 = vunpack.i.h.bf16 %v3634_v58 }
  0xff   : > { %2927 = vrot.lane.b32.xlu1 %v3339_v63, %s3102_s23  ;;  %2922 = vrot.lane.b32.xlu0 %v3345_v46, %s3102_s23 }
 0x100   : > { %v3674_v48 = vpop.permute.xlu2 %2767 }
 0x101   : > { %v3676_v4 = vpop.permute.xlu1 %2717  ;;  %v3678_v3 = vpop.permute.xlu0 %2712 }
 0x102   : > { %5761 = vst [vmem:[#allocation48_spill] sm:$0xff] %v3676_v4  ;;  %v5585_v43 = vunpack.i.l.bf16 %v3676_v4 }
 0x103   : > { %5762 = vst [vmem:[#allocation49_spill] sm:$0xff] %v3678_v3 }
 0x104   : > { %v3685_v19 = vpack.c.bf16 %v5586_v6, %v5585_v43 }
 0x106   : > { %5763 = vst [vmem:[#allocation50_spill] sm:$0xff] %v3685_v19  ;;  %2947 = vrot.lane.b32.xlu2 %v3183_v15, %s3103_s24  ;;  %v5600_v19 = vunpack.i.h.bf16 %v3654_v47 }
 0x107   : > { %2942 = vrot.lane.b32.xlu1 %v3219_v25, %s3103_s24  ;;  %2937 = vrot.lane.b32.xlu0 %v3189_v16, %s3103_s24 }
 0x108   : > { %v3694_v35 = vpop.permute.xlu2 %2782 }
 0x109   : > { %5764 = vst [vmem:[#allocation51_spill] sm:$0xff] %v3694_v35  ;;  %v3696_v3 = vpop.permute.xlu1 %2732  ;;  %v3698_v4 = vpop.permute.xlu0 %2727 }
 0x10a   : > { %5765 = vst [vmem:[#allocation52_spill] sm:$0xff] %v3696_v3  ;;  %v5592_v43 = vunpack.i.l.bf16 %v3696_v3 }
 0x10b   : > { %5766 = vst [vmem:[#allocation53_spill] sm:$0xff] %v3698_v4 }
 0x10c   : > { %v3705_v6 = vpack.c.bf16 %v5593_v18, %v5592_v43 }
 0x10e   : > { %5767 = vst [vmem:[#allocation54_spill] sm:$0xff] %v3705_v6  ;;  %2962 = vrot.lane.b32.xlu2 %v3207_v23, %s3103_s24  ;;  %v5607_v6 = vunpack.i.h.bf16 %v3674_v48 }
 0x10f   : > { %2957 = vrot.lane.b32.xlu1 %v3171_v12, %s3103_s24  ;;  %2952 = vrot.lane.b32.xlu0 %v3213_v24, %s3103_s24 }
 0x110   : > { %v3714_v20 = vpop.permute.xlu2 %2797 }
 0x111   : > { %5768 = vst [vmem:[#allocation55_spill] sm:$0xff] %v3714_v20  ;;  %v3716_v4 = vpop.permute.xlu1 %2747  ;;  %v3718_v3 = vpop.permute.xlu0 %2742 }
 0x112   : > { %5769 = vst [vmem:[#allocation56_spill] sm:$0xff] %v3716_v4  ;;  %v5599_v43 = vunpack.i.l.bf16 %v3716_v4 }
 0x113   : > { %5770 = vst [vmem:[#allocation57_spill] sm:$0xff] %v3718_v3 }
 0x114   : > { %v3725_v18 = vpack.c.bf16 %v5600_v19, %v5599_v43 }
 0x116   : > { %5771 = vst [vmem:[#allocation58_spill] sm:$0xff] %v3725_v18  ;;  %2977 = vrot.lane.b32.xlu2 %v3249_v36, %s3103_s24  ;;  %v5614_v18 = vunpack.i.h.bf16 %v3694_v35 }
 0x117   : > { %2972 = vrot.lane.b32.xlu1 %v3255_v37, %s3103_s24  ;;  %2967 = vrot.lane.b32.xlu0 %v3261_v38, %s3103_s24 }
 0x118   : > { %v3734_v58 = vpop.permute.xlu2 %2812 }
 0x119   : > { %5772 = vst [vmem:[#allocation59_spill] sm:$0xff] %v3734_v58  ;;  %v3736_v17 = vpop.permute.xlu1 %2762  ;;  %v3738_v21 = vpop.permute.xlu0 %2757 }
 0x11a   : > { %v5606_v43 = vunpack.i.l.bf16 %v3736_v17 }
 0x11c   : > { %v3745_v19 = vpack.c.bf16 %v5607_v6, %v5606_v43 }
 0x11e   : > { %5773 = vst [vmem:[#allocation60_spill] sm:$0xff] %v3745_v19  ;;  %2992 = vrot.lane.b32.xlu2 %v3291_v49, %s3103_s24  ;;  %v5621_v19 = vunpack.i.h.bf16 %v3714_v20 }
 0x11f   : > { %2987 = vrot.lane.b32.xlu1 %v3297_v50, %s3103_s24  ;;  %2982 = vrot.lane.b32.xlu0 %v3303_v51, %s3103_s24 }
 0x120   : > { %v3754_v9 = vpop.permute.xlu2 %2827 }
 0x121   : > { %5774 = vst [vmem:[#allocation61_spill] sm:$0xff] %v3754_v9  ;;  %v3756_v3 = vpop.permute.xlu1 %2777  ;;  %v3758_v4 = vpop.permute.xlu0 %2772 }
 0x122   : > { %5775 = vst [vmem:[#allocation62_spill] sm:$0xff] %v3756_v3  ;;  %v5613_v43 = vunpack.i.l.bf16 %v3756_v3 }
 0x123   : > { %5776 = vst [vmem:[#allocation63_spill] sm:$0xff] %v3758_v4 }
 0x124   : > { %v3765_v6 = vpack.c.bf16 %v5614_v18, %v5613_v43 }
 0x126   : > { %5777 = vst [vmem:[#allocation64_spill] sm:$0xff] %v3765_v6  ;;  %3007 = vrot.lane.b32.xlu2 %v3333_v62, %s3103_s24  ;;  %v5623_v6 = vunpack.i.h.bf16 %v3734_v58 }
 0x127   : > { %3002 = vrot.lane.b32.xlu1 %v3339_v63, %s3103_s24  ;;  %2997 = vrot.lane.b32.xlu0 %v3345_v46, %s3103_s24 }
 0x128   : > { %v3774_v4 = vpop.permute.xlu2 %2842 }
 0x129   : > { %v3776_v47 = vpop.permute.xlu1 %2792  ;;  %v3778_v3 = vpop.permute.xlu0 %2787 }
 0x12a   : > { %5778 = vst [vmem:[#allocation65_spill] sm:$0xff] %v3776_v47  ;;  %v5620_v43 = vunpack.i.l.bf16 %v3776_v47 }
 0x12b   : > { %5779 = vst [vmem:[#allocation66_spill] sm:$0xff] %v3778_v3 }
 0x12c   : > { %v3785_v18 = vpack.c.bf16 %v5621_v19, %v5620_v43 }
 0x12e   : > { %5780 = vst [vmem:[#allocation67_spill] sm:$0xff] %v3785_v18  ;;  %3022 = vrot.lane.b32.xlu2 %v3183_v15, %s3104_s25 }
 0x12f   : > { %3017 = vrot.lane.b32.xlu1 %v3219_v25, %s3104_s25  ;;  %3012 = vrot.lane.b32.xlu0 %v3189_v16, %s3104_s25  ;;  %v3105_v16 = vmov 0   ;;  %v5625_v25 = vunpack.i.h.bf16 %v3754_v9 }
 0x130   : > { %v3794_v35 = vpop.permute.xlu2 %2857  ;;  %3087 = vset.pattern.permute.xlu1 %v3105_v16  ;;  %3088 = vset.pattern.permute.xlu2 %v3105_v16 }
 0x131   : > { %v3796_v3 = vpop.permute.xlu1 %2807  ;;  %v3798_v47 = vpop.permute.xlu0 %2802  ;;  %3086 = vset.pattern.permute.xlu0 %v3105_v16 }
 0x132   : > { %5781 = vst [vmem:[#allocation68_spill] sm:$0xff] %v3796_v3  ;;  %v5622_v43 = vunpack.i.l.bf16 %v3796_v3 }
 0x133   : > { %5782 = vst [vmem:[#allocation69_spill] sm:$0xff] %v3798_v47 }
 0x134   : > { %v3805_v15 = vpack.c.bf16 %v5623_v6, %v5622_v43 }
 0x136   : > { %5783 = vst [vmem:[#allocation70_spill] sm:$0xff] %v3805_v15  ;;  %3037 = vrot.lane.b32.xlu2 %v3207_v23, %s3104_s25 }
 0x137   : > { %3032 = vrot.lane.b32.xlu1 %v3171_v12, %s3104_s25  ;;  %3027 = vrot.lane.b32.xlu0 %v3213_v24, %s3104_s25  ;;  %v5627_v24 = vunpack.i.h.bf16 %v3774_v4 }
 0x138   : > { %v3814_v19 = vpop.permute.xlu2 %2872 }
 0x139   : > { %v3816_v18 = vpop.permute.xlu1 %2822  ;;  %v3818_v43 = vpop.permute.xlu0 %2817 }
 0x13a   : > { %5784 = vst [vmem:[#allocation71_spill] sm:$0xff] %v3816_v18  ;;  %v5624_v23 = vunpack.i.l.bf16 %v3816_v18  ;;  %v5795_v18 = vunpack.c.l.bf16 %v3177_v14 }
 0x13b   : > { %5785 = vst [vmem:[#allocation72_spill] sm:$0xff] %v3818_v43 }
 0x13c   : > { %v3825_v12 = vpack.c.bf16 %v5625_v25, %v5624_v23 }
 0x13e   : > { %5786 = vst [vmem:[#allocation73_spill] sm:$0xff] %v3825_v12  ;;  %3052 = vrot.lane.b32.xlu2 %v3249_v36, %s3104_s25 }
 0x13f   : > { %3047 = vrot.lane.b32.xlu1 %v3255_v37, %s3104_s25  ;;  %3042 = vrot.lane.b32.xlu0 %v3261_v38, %s3104_s25  ;;  %v5629_v37 = vunpack.i.h.bf16 %v3794_v35 }
 0x140   : > { %v3834_v16 = vpop.permute.xlu2 %2887 }
 0x141   : > { %v3836_v6 = vpop.permute.xlu1 %2837  ;;  %v3838_v15 = vpop.permute.xlu0 %2832  ;;  %v5799_v9 = vunpack.i.h.bf16 %v3834_v16 }
 0x142   : > { %5787 = vst [vmem:[#allocation74_spill] sm:$0xff] %v3836_v6  ;;  %v5626_v23 = vunpack.i.l.bf16 %v3836_v6 }
 0x144   : > { %v3845_v36 = vpack.c.bf16 %v5627_v24, %v5626_v23 }
 0x146   : > { %5788 = vst [vmem:[#allocation75_spill] sm:$0xff] %v3845_v36  ;;  %3067 = vrot.lane.b32.xlu2 %v3291_v49, %s3104_s25 }
 0x147   : > { %3062 = vrot.lane.b32.xlu1 %v3297_v50, %s3104_s25  ;;  %3057 = vrot.lane.b32.xlu0 %v3303_v51, %s3104_s25  ;;  %v5636_v50 = vunpack.i.h.bf16 %v3814_v19 }
 0x148   : > { %v3854_v38 = vpop.permute.xlu2 %2902 }
 0x149   : > { %5789 = vst [vmem:[#allocation76_spill] sm:$0xff] %v3854_v38  ;;  %v3856_v25 = vpop.permute.xlu1 %2852  ;;  %v3858_v12 = vpop.permute.xlu0 %2847 }
 0x14a   : > { %v5628_v23 = vunpack.i.l.bf16 %v3856_v25 }
 0x14c   : > { %v3865_v49 = vpack.c.bf16 %v5629_v37, %v5628_v23  ;;  %v1284_v37 = vld [vmem:[%s5479_s2] sm:$0xff] }
 0x14e   : > { %5790 = vst [vmem:[#allocation77_spill] sm:$0xff] %v3865_v49  ;;  %3082 = vrot.lane.b32.xlu2 %v3333_v62, %s3104_s25  ;;  %v1286_v62 = vld [vmem:[%s5479_s2 + $0x10] sm:$0xff]  ;;  %v5798_v49 = vunpack.c.l.bf16 %v3150_v2 }
 0x14f   : > { %3077 = vrot.lane.b32.xlu1 %v3339_v63, %s3104_s25  ;;  %3072 = vrot.lane.b32.xlu0 %v3345_v46, %s3104_s25  ;;  %v1285_v46 = vld [vmem:[%s5479_s2 + $0x8] sm:$0xff] }
 0x150   : > { %v3874_v51 = vpop.permute.xlu2 %2917 }
 0x151   : > { %5791 = vst [vmem:[#allocation78_spill] sm:$0xff] %v3874_v51  ;;  %v3876_v24 = vpop.permute.xlu1 %2867  ;;  %v3878_v36 = vpop.permute.xlu0 %2862 }
 0x152   : > { %v5635_v23 = vunpack.i.l.bf16 %v3876_v24 }
 0x154   : > { %v3888_v63 = vpack.c.bf16 %v5636_v50, %v5635_v23  ;;  %v5793_v50 = vunpack.c.h.bf16 %v3159_v7 }
 0x156   : > { %5792 = vst [vmem:[#allocation79_spill] sm:$0xff] %v3888_v63  ;;  %1299 = vperm.xlu2 %3088, %v1286_v62   ;;  %v5794_v63 = vunpack.c.h.bf16 %v3150_v2  ;;  %v5796_v62 = vunpack.c.l.bf16 %v3155_v5  ;;  %v5648_v5 = vunpack.i.h.bf16 %v3854_v38 }
 0x157   : > { %1294 = vperm.xlu1 %3087, %v1285_v46   ;;  %1289 = vperm.xlu0 %3086, %v1284_v37   ;;  %v5797_v46 = vunpack.c.l.bf16 %v3159_v7 }
 0x158   : > { %v3897_v20 = vpop.permute.xlu2 %2932  ;;  %v1150_v58 = vpack.c.bf16 %v5794_v63, %v5793_v50  ;;  %v1151_v37 = vpack.c.bf16 %v5796_v62, %v5795_v18  ;;  %v5806_v63 = vunpack.c.l.bf16 %v3165_v11  ;;  %v5807_v62 = vunpack.c.l.bf16 %v3174_v13 }
 0x159   : > { %v3899_v3 = vpop.permute.xlu1 %2882  ;;  %v3901_v47 = vpop.permute.xlu0 %2877  ;;  %v1149_v43 = vpack.c.bf16 %v5798_v49, %v5797_v46  ;;  %v5804_v49 = vunpack.c.h.bf16 %v3147_v1 }
 0x15a   : > { %v5646_v23 = vunpack.i.l.bf16 %v3899_v3 }
 0x15c   : > { %v3920_v6 = vpack.c.bf16 %v5799_v9, %v5646_v23  ;;  %v5803_v9 = vunpack.c.h.bf16 %v3174_v13 }
 0x15e   : > { %5800 = vst [vmem:[#allocation80_spill] sm:$0xff] %v3920_v6  ;;  %1488 = vrot.lane.b32.xlu2 %v1150_v58, %s3106_s5  ;;  %v1153_v50 = vpack.c.bf16 %v5804_v49, %v5803_v9  ;;  %v5805_v58 = vunpack.c.l.bf16 %v3144_v0  ;;  %v5650_v0 = vunpack.i.h.bf16 %v3874_v51  ;;  %v5812_v49 = vunpack.c.h.bf16 %v3231_v29 }
 0x15f   : > { %1490 = vrot.lane.b32.xlu0 %v1151_v37, %s3106_s5  ;;  %1486 = vrot.lane.b32.xlu1 %v1149_v43, %s3106_s5  ;;  %v5808_v37 = vunpack.c.l.bf16 %v3147_v1  ;;  %v2769_v6 = vunpack.i.l.bf16 %v3674_v48 }
 0x160   : > { %v3926_v14 = vpop.permute.xlu2 %2947  ;;  %v1154_v43 = vpack.c.bf16 %v5806_v63, %v5805_v58  ;;  %v5813_v58 = vunpack.c.h.bf16 %v3222_v26 }
 0x161   : > { %v3928_v7 = vpop.permute.xlu1 %2897  ;;  %v3930_v2 = vpop.permute.xlu0 %2892  ;;  %v1152_v46 = vpack.c.bf16 %v5808_v37, %v5807_v62  ;;  %v5816_v37 = vunpack.c.l.bf16 %v3231_v29 }
 0x162   : > { %5801 = vst [vmem:[#allocation81_spill] sm:$0xff] %v3928_v7  ;;  %v5647_v18 = vunpack.i.l.bf16 %v3928_v7  ;;  %v1156_v63 = vpack.c.bf16 %v5813_v58, %v5812_v49  ;;  %v5819_v58 = vunpack.c.h.bf16 %v3273_v42 }
 0x163   : > { %5802 = vst [vmem:[#allocation82_spill] sm:$0xff] %v3930_v2 }
 0x164   : > { %v3949_v23 = vpack.c.bf16 %v5648_v5, %v5647_v18 }
 0x166   : > { %5809 = vst [vmem:[#allocation83_spill] sm:$0xff] %v3949_v23  ;;  %1494 = vrot.lane.b32.xlu2 %v1153_v50, %s3106_s5  ;;  %v5814_v50 = vunpack.c.l.bf16 %v3228_v28  ;;  %v2494_v23 = vunpack.i.l.bf16 %v3405_v45 }
 0x167   : > { %1496 = vrot.lane.b32.xlu0 %v1154_v43, %s3106_s5  ;;  %1492 = vrot.lane.b32.xlu1 %v1152_v46, %s3106_s5  ;;  %v5815_v43 = vunpack.c.l.bf16 %v3225_v27  ;;  %v5817_v46 = vunpack.c.l.bf16 %v3222_v26  ;;  %v5652_v27 = vunpack.i.h.bf16 %v3897_v20 }
 0x168   : > { %v3955_v11 = vpop.permute.xlu2 %2962 }
 0x169   : > { %v3957_v13 = vpop.permute.xlu1 %2912  ;;  %v3959_v1 = vpop.permute.xlu0 %2907  ;;  %v1157_v62 = vpack.c.bf16 %v5815_v43, %v5814_v50  ;;  %v1155_v18 = vpack.c.bf16 %v5817_v46, %v5816_v37  ;;  %v5820_v50 = vunpack.c.h.bf16 %v3264_v39  ;;  %v5823_v37 = vunpack.c.l.bf16 %v3273_v42 }
 0x16a   : > { %5810 = vst [vmem:[#allocation84_spill] sm:$0xff] %v3957_v13  ;;  %v5649_v9 = vunpack.i.l.bf16 %v3957_v13  ;;  %v5824_v46 = vunpack.c.l.bf16 %v3264_v39 }
 0x16b   : > { %5811 = vst [vmem:[#allocation85_spill] sm:$0xff] %v3959_v1  ;;  %v1159_v43 = vpack.c.bf16 %v5820_v50, %v5819_v58  ;;  %v5826_v50 = vunpack.c.h.bf16 %v3315_v55  ;;  %v5948_v1 = vld [vmem:[#allocation38_spill] sm:$0xff] }
 0x16c   : > { %v3978_v5 = vpack.c.bf16 %v5650_v0, %v5649_v9  ;;  %v1158_v9 = vpack.c.bf16 %v5824_v46, %v5823_v37  ;;  %v5830_v37 = vunpack.c.l.bf16 %v3315_v55  ;;  %v5831_v46 = vunpack.c.l.bf16 %v3306_v52 }
 0x16d   : > { %v2490_v55 = vunpack.i.h.bf16 %v3393_v61 }
 0x16e   : > { %5818 = vst [vmem:[#allocation86_spill] sm:$0xff] %v3978_v5  ;;  %1500 = vrot.lane.b32.xlu2 %v1156_v63, %s3106_s5  ;;  %v5821_v63 = vunpack.c.l.bf16 %v3270_v41 }
 0x16f   : > { %1502 = vrot.lane.b32.xlu0 %v1157_v62, %s3106_s5  ;;  %1498 = vrot.lane.b32.xlu1 %v1155_v18, %s3106_s5  ;;  %v5822_v62 = vunpack.c.l.bf16 %v3267_v40  ;;  %v5654_v40 = vunpack.i.h.bf16 %v3926_v14 }
 0x170   : > { %v3984_v28 = vpop.permute.xlu2 %2977 }
 0x171   : > { %v3986_v29 = vpop.permute.xlu1 %2927  ;;  %v3988_v26 = vpop.permute.xlu0 %2922  ;;  %v1160_v18 = vpack.c.bf16 %v5822_v62, %v5821_v63  ;;  %v5827_v63 = vunpack.c.h.bf16 %v3306_v52  ;;  %v2489_v52 = vunpack.i.l.bf16 %v3393_v61 }
 0x172   : > { %v5651_v49 = vunpack.i.l.bf16 %v3986_v29 }
 0x173   : > { %v1162_v62 = vpack.c.bf16 %v5827_v63, %v5826_v50  ;;  %v2495_v50 = vunpack.i.h.bf16 %v3405_v45  ;;  %v5656_v63 = vunpack.i.h.bf16 %v3955_v11 }
 0x174   : > { %v4007_v0 = vpack.c.bf16 %v5652_v27, %v5651_v49  ;;  %v1161_v49 = vpack.c.bf16 %v5831_v46, %v5830_v37  ;;  %v2504_v46 = vunpack.i.l.bf16 %v3403_v44 }
 0x176   : > { %5825 = vst [vmem:[#allocation87_spill] sm:$0xff] %v4007_v0  ;;  %1506 = vrot.lane.b32.xlu2 %v1159_v43, %s3106_s5  ;;  %v5828_v43 = vunpack.c.l.bf16 %v3312_v54  ;;  %v2499_v54 = vunpack.i.l.bf16 %v3391_v56 }
 0x177   : > { %1508 = vrot.lane.b32.xlu0 %v1160_v18, %s3106_s5  ;;  %1504 = vrot.lane.b32.xlu1 %v1158_v9, %s3106_s5  ;;  %v5829_v18 = vunpack.c.l.bf16 %v3309_v53  ;;  %v2500_v53 = vunpack.i.h.bf16 %v3391_v56 }
 0x178   : > { %v4013_v41 = vpop.permute.xlu2 %2992  ;;  %v315_v37 = vsel %vm312_vm0, %v2495_v50, %v2499_v54  ;;  %v2509_v50 = vunpack.i.l.bf16 %v3374_v59 }
 0x179   : > { %v4015_v42 = vpop.permute.xlu1 %2942  ;;  %v4017_v39 = vpop.permute.xlu0 %2937  ;;  %v1163_v9 = vpack.c.bf16 %v5829_v18, %v5828_v43  ;;  %v314_v18 = vsel %vm312_vm0, %v2490_v55, %v2494_v23  ;;  %v316_v61 = vsel %vm312_vm0, %v2499_v54, %v2500_v53  ;;  %v1166_v5 = vpack.c.bf16 %v2500_v53, %v2494_v23 }
 0x17a   : > { %v5653_v58 = vunpack.i.l.bf16 %v4015_v42  ;;  %v2515_v54 = vunpack.i.h.bf16 %v3379_v60 }
 0x17c   : > { %v4036_v27 = vpack.c.bf16 %v5654_v40, %v5653_v58  ;;  %v1165_v40 = vpack.c.bf16 %v316_v61, %v314_v18 }
 0x17e   : > { %5832 = vst [vmem:[#allocation88_spill] sm:$0xff] %v4036_v27  ;;  %1512 = vrot.lane.b32.xlu2 %v1162_v62, %s3106_s5  ;;  %v2510_v27 = vunpack.i.h.bf16 %v3374_v59 }
 0x17f   : > { %1514 = vrot.lane.b32.xlu0 %v1163_v9, %s3106_s5  ;;  %1510 = vrot.lane.b32.xlu1 %v1161_v49, %s3106_s5  ;;  %v313_v9 = vsel %vm312_vm0, %v2489_v52, %v2490_v55  ;;  %v2505_v49 = vunpack.i.h.bf16 %v3403_v44  ;;  %v2514_v55 = vunpack.i.l.bf16 %v3379_v60  ;;  %v2519_v44 = vunpack.i.l.bf16 %v3418_v34 }
 0x180   : > { %v4048_v43 = vpop.permute.xlu2 %3007  ;;  %v1164_v0 = vpack.c.bf16 %v315_v37, %v313_v9 }
 0x181   : > { %v4050_v45 = vpop.permute.xlu1 %2957  ;;  %v4052_v62 = vpop.permute.xlu0 %2952  ;;  %v318_v23 = vsel %vm312_vm0, %v2505_v49, %v2509_v50  ;;  %v320_v53 = vsel %vm312_vm0, %v2514_v55, %v2515_v54  ;;  %v317_v59 = vsel %vm312_vm0, %v2504_v46, %v2505_v49  ;;  %v5835_v49 = vunpack.i.h.bf16 %v3984_v28 }
 0x182   : > { %v5655_v56 = vunpack.i.l.bf16 %v4050_v45  ;;  %v1168_v61 = vpack.c.bf16 %v320_v53, %v318_v23  ;;  %v5838_v23 = vunpack.i.l.bf16 %v3416_v33 }
 0x184   : > { %v4065_v58 = vpack.c.bf16 %v5656_v63, %v5655_v56  ;;  %v2525_v56 = vunpack.i.h.bf16 %v3416_v33  ;;  %v2520_v63 = vunpack.i.h.bf16 %v3418_v34  ;;  %v5659_v34 = vunpack.i.h.bf16 %v4013_v41 }
 0x186   : > { %5833 = vst [vmem:[#allocation89_spill] sm:$0xff] %v4065_v58  ;;  %1518 = vrot.lane.b32.xlu2 %v1165_v40, %s3106_s5  ;;  %v1169_v40 = vpack.c.bf16 %v2515_v54, %v2509_v50  ;;  %v2649_v58 = vunpack.i.l.bf16 %v3514_v32  ;;  %v2640_v50 = vunpack.i.h.bf16 %v3578_v31  ;;  %v2639_v54 = vunpack.i.l.bf16 %v3578_v31 }
 0x187   : > { %1520 = vrot.lane.b32.xlu0 %v1166_v5, %s3106_s5  ;;  %1516 = vrot.lane.b32.xlu1 %v1164_v0, %s3106_s5  ;;  %v319_v5 = vsel %vm312_vm0, %v2510_v27, %v2514_v55  ;;  %v2529_v0 = vunpack.i.l.bf16 %v3384_v57  ;;  %v2645_v27 = vunpack.i.h.bf16 %v3576_v30  ;;  %v322_v53 = vsel %vm312_vm0, %v2520_v63, %v5838_v23 }
 0x188   : > { %v4075_v52 = vpop.permute.xlu2 %3022  ;;  %v1167_v9 = vpack.c.bf16 %v319_v5, %v317_v59  ;;  %v5839_v59 = vunpack.i.h.bf16 %v3384_v57 }
 0x189   : > { %5834 = vst [vmem:[#allocation90_spill] sm:$0xff] %v4075_v52  ;;  %v4080_v18 = vpop.permute.xlu1 %2972  ;;  %v4082_v37 = vpop.permute.xlu0 %2967 }
 0x18a   : > { %v5657_v60 = vunpack.i.l.bf16 %v4080_v18  ;;  %v324_v5 = vsel %vm312_vm0, %v2529_v0, %v5839_v59 }
 0x18b   : > { %v1171_v59 = vpack.c.bf16 %v324_v5, %v322_v53 }
 0x18c   : > { %v4094_v46 = vpack.c.bf16 %v5835_v49, %v5657_v60  ;;  %v323_v60 = vsel %vm312_vm0, %v2525_v56, %v2529_v0  ;;  %v5661_v56 = vunpack.i.h.bf16 %v4048_v43 }
 0x18e   : > { %5836 = vst [vmem:[#allocation91_spill] sm:$0xff] %v4094_v46  ;;  %1524 = vrot.lane.b32.xlu2 %v1168_v61, %s3106_s5  ;;  %v537_v61 = vsel %vm534_vm1, %v2645_v27, %v2649_v58  ;;  %v2760_v27 = vunpack.i.h.bf16 %v3738_v21 }
 0x18f   : > { %1526 = vrot.lane.b32.xlu0 %v1169_v40, %s3106_s5  ;;  %1522 = vrot.lane.b32.xlu1 %v1167_v9, %s3106_s5  ;;  %v535_v40 = vsel %vm534_vm1, %v2639_v54, %v2640_v50  ;;  %v321_v9 = vsel %vm312_vm0, %v2519_v44, %v2520_v63  ;;  %v2765_v54 = vunpack.i.h.bf16 %v3736_v17  ;;  %v2759_v63 = vunpack.i.l.bf16 %v3738_v21 }
 0x190   : > { %v4104_v55 = vpop.permute.xlu2 %3037  ;;  %v1194_v23 = vpack.c.bf16 %v537_v61, %v535_v40  ;;  %v1170_v46 = vpack.c.bf16 %v323_v60, %v321_v9  ;;  %v5841_v60 = vunpack.i.h.bf16 %v3514_v32  ;;  %v5842_v61 = vunpack.i.l.bf16 %v3576_v30 }
 0x191   : > { %5837 = vst [vmem:[#allocation92_spill] sm:$0xff] %v4104_v55  ;;  %v4112_v31 = vpop.permute.xlu1 %2987  ;;  %v4114_v49 = vpop.permute.xlu0 %2982  ;;  %v660_v53 = vsel %vm645_vm2, %v2765_v54, %v2769_v6  ;;  %v658_v5 = vsel %vm645_vm2, %v2759_v63, %v2760_v27  ;;  %v5843_v9 = vunpack.i.h.bf16 %v3674_v48  ;;  %v5844_v32 = vunpack.i.l.bf16 %v3736_v17 }
 0x192   : > { %v5658_v33 = vunpack.i.l.bf16 %v4112_v31  ;;  %v538_v0 = vsel %vm534_vm1, %v2649_v58, %v5841_v60  ;;  %v2634_v54 = vunpack.i.l.bf16 %v3494_v10  ;;  %v2630_v63 = vunpack.i.h.bf16 %v3556_v22 }
 0x193   : > { %v659_v58 = vsel %vm645_vm2, %v2760_v27, %v5844_v32  ;;  %v2889_v48 = vunpack.i.l.bf16 %v3834_v16  ;;  %v2625_v27 = vunpack.i.h.bf16 %v3558_v8  ;;  %v2879_v32 = vunpack.i.l.bf16 %v3901_v47 }
 0x194   : > { %v4125_v57 = vpack.c.bf16 %v5659_v34, %v5658_v33  ;;  %v5850_v34 = vld [vmem:[#allocation44_spill] sm:$0xff] }
 0x196   : > { %5840 = vst [vmem:[#allocation93_spill] sm:$0xff] %v4125_v57  ;;  %1530 = vrot.lane.b32.xlu2 %v1171_v59, %s3106_s5 }
 0x197   : > { %1576 = vrot.lane.b32.xlu0 %v1194_v23, %s3106_s5  ;;  %1528 = vrot.lane.b32.xlu1 %v1170_v46, %s3106_s5  ;;  %v536_v46 = vsel %vm534_vm1, %v2640_v50, %v5842_v61  ;;  %v661_v23 = vsel %vm645_vm2, %v2769_v6, %v5843_v9  ;;  %v1218_v50 = vpack.c.bf16 %v660_v53, %v658_v5  ;;  %v2880_v6 = vunpack.i.h.bf16 %v3901_v47 }
 0x198   : > { %v4135_v44 = vpop.permute.xlu2 %3052  ;;  %v1219_v17 = vpack.c.bf16 %v661_v23, %v659_v58  ;;  %v1195_v60 = vpack.c.bf16 %v538_v0, %v536_v46  ;;  %v2624_v61 = vunpack.i.l.bf16 %v3558_v8  ;;  %v2885_v9 = vunpack.i.h.bf16 %v3899_v3 }
 0x199   : > { %v4142_v21 = vpop.permute.xlu1 %3002  ;;  %v4144_v40 = vpop.permute.xlu0 %2997  ;;  %v5664_v53 = vunpack.i.h.bf16 %v4075_v52  ;;  %v442_v0 = vsel %vm423_vm3, %v2630_v63, %v2634_v54  ;;  %v5846_v8 = vunpack.i.h.bf16 %v3834_v16  ;;  %v5847_v47 = vunpack.i.l.bf16 %v3899_v3  ;;  %v5866_v52 = vld [vmem:[#allocation40_spill] sm:$0xff] }
 0x19a   : > { %v5660_v59 = vunpack.i.l.bf16 %v4142_v21  ;;  %v872_v33 = vsel %vm867_vm4, %v2879_v32, %v2880_v6  ;;  %v2754_v16 = vunpack.i.l.bf16 %v5850_v34 }
 0x19b   : > { %v875_v46 = vsel %vm867_vm4, %v2889_v48, %v5846_v8  ;;  %v873_v23 = vsel %vm867_vm4, %v2880_v6, %v5847_v47 }
 0x19c   : > { %v4162_v30 = vpack.c.bf16 %v5661_v56, %v5660_v59  ;;  %v5851_v59 = vld [vmem:[#allocation56_spill] sm:$0xff]  ;;  %v5852_v56 = vld [vmem:[#allocation57_spill] sm:$0xff] }
 0x19d   : > { %v2750_v8 = vunpack.i.h.bf16 %v5851_v59  ;;  %v2745_v3 = vunpack.i.h.bf16 %v5852_v56  ;;  %v2744_v47 = vunpack.i.l.bf16 %v5852_v56 }
 0x19e   : > { %5845 = vst [vmem:[#allocation94_spill] sm:$0xff] %v4162_v30  ;;  %1624 = vrot.lane.b32.xlu2 %v1218_v50, %s3106_s5 }
 0x19f   : > { %1626 = vrot.lane.b32.xlu0 %v1219_v17, %s3106_s5  ;;  %1578 = vrot.lane.b32.xlu1 %v1195_v60, %s3106_s5  ;;  %v440_v17 = vsel %vm423_vm3, %v2624_v61, %v2625_v27  ;;  %v874_v60 = vsel %vm867_vm4, %v2885_v9, %v2889_v48  ;;  %v1243_v61 = vpack.c.bf16 %v875_v46, %v873_v23  ;;  %v5855_v46 = vunpack.i.h.bf16 %v3494_v10 }
 0x1a0   : > { %v4174_v5 = vpop.permute.xlu2 %3067  ;;  %v1191_v48 = vpack.c.bf16 %v442_v0, %v440_v17  ;;  %v1242_v9 = vpack.c.bf16 %v874_v60, %v872_v33  ;;  %v656_v6 = vsel %vm645_vm2, %v2750_v8, %v2754_v16  ;;  %v654_v32 = vsel %vm645_vm2, %v2744_v47, %v2745_v3  ;;  %v5856_v0 = vld [vmem:[#allocation25_spill] sm:$0xff] }
 0x1a1   : > { %v4183_v58 = vpop.permute.xlu1 %3017  ;;  %v4185_v50 = vpop.permute.xlu0 %3012  ;;  %v443_v33 = vsel %vm423_vm3, %v2634_v54, %v5855_v46  ;;  %v2615_v23 = vunpack.i.h.bf16 %v5856_v0  ;;  %v5859_v8 = vunpack.i.l.bf16 %v3556_v22  ;;  %v5862_v46 = vld [vmem:[#allocation26_spill] sm:$0xff]  ;;  %v2870_v22 = vunpack.i.h.bf16 %v3876_v24 }
 0x1a2   : > { %5848 = vst [vmem:[#allocation95_spill] sm:$0xff] %v4183_v58  ;;  %v5663_v63 = vunpack.i.l.bf16 %v4183_v58  ;;  %v2609_v56 = vunpack.i.l.bf16 %v5862_v46  ;;  %v1215_v58 = vpack.c.bf16 %v656_v6, %v654_v32 }
 0x1a3   : > { %5849 = vst [vmem:[#allocation96_spill] sm:$0xff] %v4185_v50  ;;  %v5854_v50 = vld [vmem:[#allocation14_spill] sm:$0xff]  ;;  %v441_v47 = vsel %vm423_vm3, %v2625_v27, %v5859_v8  ;;  %v2865_v27 = vunpack.i.h.bf16 %v3878_v36  ;;  %v3054_v8 = vunpack.i.l.bf16 %v4135_v44 }
 0x1a4   : > { %v4199_v57 = vpack.c.bf16 %v5664_v53, %v5663_v63  ;;  %v2619_v63 = vunpack.i.l.bf16 %v5854_v50  ;;  %v2610_v53 = vunpack.i.h.bf16 %v5862_v46  ;;  %v5865_v6 = vunpack.i.h.bf16 %v5854_v50 }
 0x1a5   : > { %v5868_v50 = vunpack.i.l.bf16 %v3876_v24 }
 0x1a6   : > { %5853 = vst [vmem:[#allocation44_spill] sm:$0xff] %v4199_v57  ;;  %1674 = vrot.lane.b32.xlu2 %v1243_v61, %s3106_s5  ;;  %v5860_v61 = vunpack.i.h.bf16 %v5850_v34  ;;  %v2874_v57 = vunpack.i.l.bf16 %v3814_v19  ;;  %v2864_v34 = vunpack.i.l.bf16 %v3878_v36  ;;  %v4245_v32 = vsel %vm423_vm3, %v2619_v63, %v5865_v6 }
 0x1a7   : > { %1570 = vrot.lane.b32.xlu0 %v1191_v48, %s3106_s5  ;;  %1672 = vrot.lane.b32.xlu1 %v1242_v9, %s3106_s5  ;;  %v5861_v9 = vunpack.i.l.bf16 %v5851_v59  ;;  %v5863_v59 = vunpack.i.h.bf16 %v4104_v55  ;;  %v438_v36 = vsel %vm423_vm3, %v2615_v23, %v2619_v63  ;;  %v436_v46 = vsel %vm423_vm3, %v2609_v56, %v2610_v53  ;;  %v5947_v55 = vld [vmem:[#allocation37_spill] sm:$0xff] }
 0x1a8   : > { %v4207_v30 = vpop.permute.xlu2 %3082  ;;  %v657_v48 = vsel %vm645_vm2, %v2754_v16, %v5860_v61  ;;  %v868_v63 = vsel %vm867_vm4, %v2864_v34, %v2865_v27  ;;  %v1188_v6 = vpack.c.bf16 %v438_v36, %v436_v46 }
 0x1a9   : > { %v4214_v17 = vpop.permute.xlu1 %3032  ;;  %v4216_v60 = vpop.permute.xlu0 %3027  ;;  %v655_v10 = vsel %vm645_vm2, %v2745_v3, %v5861_v9  ;;  %v3055_v3 = vunpack.i.h.bf16 %v4135_v44  ;;  %v1192_v9 = vpack.c.bf16 %v443_v33, %v441_v47  ;;  %v870_v44 = vsel %vm867_vm4, %v2870_v22, %v2874_v57  ;;  %v5870_v33 = vld [vmem:[#allocation52_spill] sm:$0xff] }
 0x1aa   : > { %5857 = vst [vmem:[#allocation56_spill] sm:$0xff] %v4214_v17  ;;  %v5669_v54 = vunpack.i.l.bf16 %v4214_v17  ;;  %v1216_v61 = vpack.c.bf16 %v657_v48, %v655_v10  ;;  %v2735_v23 = vunpack.i.h.bf16 %v5870_v33  ;;  %v5879_v46 = vunpack.i.l.bf16 %v5870_v33 }
 0x1ab   : > { %5858 = vst [vmem:[#allocation57_spill] sm:$0xff] %v4216_v60  ;;  %v4267_v10 = vsel %vm1089_vm5, %v3054_v8, %v3055_v3 }
 0x1ac   : > { %v4238_v16 = vpack.c.bf16 %v5863_v59, %v5669_v54  ;;  %v2739_v59 = vunpack.i.l.bf16 %v5866_v52  ;;  %v5867_v54 = vunpack.i.h.bf16 %v3814_v19  ;;  %v5871_v19 = vld [vmem:[#allocation53_spill] sm:$0xff]  ;;  %5872 = vst [vmem:[#allocation26_spill] sm:$0xff] %v4267_v10  ;;  %v5931_v10 = vld [vmem:[#allocation42_spill] sm:$0xff] }
 0x1ad   : > { %v2730_v47 = vunpack.i.h.bf16 %v5871_v19  ;;  %v2729_v48 = vunpack.i.l.bf16 %v5871_v19 }
 0x1ae   : > { %5864 = vst [vmem:[#allocation14_spill] sm:$0xff] %v4238_v16  ;;  %1618 = vrot.lane.b32.xlu2 %v1215_v58, %s3106_s5  ;;  %v871_v16 = vsel %vm867_vm4, %v2874_v57, %v5867_v54  ;;  %v869_v58 = vsel %vm867_vm4, %v2865_v27, %v5868_v50  ;;  %v5873_v27 = vunpack.i.l.bf16 %v5856_v0  ;;  %v3069_v0 = vunpack.i.l.bf16 %v4174_v5 }
 0x1af   : > { %1620 = vrot.lane.b32.xlu0 %v1216_v61, %s3106_s5  ;;  %1572 = vrot.lane.b32.xlu1 %v1192_v9, %s3106_s5  ;;  %v1240_v50 = vpack.c.bf16 %v871_v16, %v869_v58  ;;  %v652_v36 = vsel %vm645_vm2, %v2735_v23, %v2739_v59  ;;  %v650_v58 = vsel %vm645_vm2, %v2729_v48, %v2730_v47  ;;  %v2855_v16 = vunpack.i.h.bf16 %v3856_v25 }
 0x1b0   : > { %v4261_v56 = vpop.permute.xlu2 %1299  ;;  %v437_v34 = vsel %vm423_vm3, %v2610_v53, %v5873_v27  ;;  %v2850_v53 = vunpack.i.h.bf16 %v3858_v12 }
 0x1b1   : > { %5869 = vst [vmem:[#allocation25_spill] sm:$0xff] %v4261_v56  ;;  %v3048_v54 = vpop.permute.xlu1 %3047  ;;  %v3043_v57 = vpop.permute.xlu0 %3042  ;;  %v1239_v56 = vpack.c.bf16 %v870_v44, %v868_v63  ;;  %v651_v44 = vsel %vm645_vm2, %v2730_v47, %v5879_v46  ;;  %v1189_v27 = vpack.c.bf16 %v4245_v32, %v437_v34  ;;  %v2859_v46 = vunpack.i.l.bf16 %v3794_v35 }
 0x1b2   : > { %v3050_v22 = vunpack.i.h.bf16 %v3048_v54  ;;  %v3049_v24 = vunpack.i.l.bf16 %v3048_v54  ;;  %v3045_v61 = vunpack.i.h.bf16 %v3043_v57  ;;  %v3044_v9 = vunpack.i.l.bf16 %v3043_v57  ;;  %v5881_v57 = vld [vmem:[#allocation21_spill] sm:$0xff] }
 0x1b3   : > { %v3070_v54 = vunpack.i.h.bf16 %v4174_v5  ;;  %v5880_v5 = vld [vmem:[#allocation10_spill] sm:$0xff]  ;;  %v3085_v34 = vunpack.i.h.bf16 %v4207_v30 }
 0x1b4   : > { %v4273_v2 = vsel %vm1089_vm5, %v3050_v22, %v3054_v8  ;;  %v4275_v19 = vpack.c.bf16 %v3055_v3, %v3049_v24  ;;  %v4278_v7 = vsel %vm1089_vm5, %v3045_v61, %v3049_v24  ;;  %v4281_v38 = vsel %vm1089_vm5, %v3044_v9, %v3045_v61  ;;  %v5882_v22 = vld [vmem:[#allocation22_spill] sm:$0xff] }
 0x1b5   : > { %5874 = vst [vmem:[#allocation40_spill] sm:$0xff] %v4273_v2  ;;  %v5878_v8 = vunpack.i.h.bf16 %v5866_v52  ;;  %v2600_v52 = vunpack.i.h.bf16 %v5881_v57  ;;  %v4307_v33 = vsel %vm1089_vm5, %v3069_v0, %v3070_v54  ;;  %v1212_v9 = vpack.c.bf16 %v652_v36, %v650_v58 }
 0x1b6   : > { %5875 = vst [vmem:[#allocation52_spill] sm:$0xff] %v4275_v19  ;;  %1668 = vrot.lane.b32.xlu2 %v1240_v50, %s3106_s5  ;;  %v2849_v24 = vunpack.i.l.bf16 %v3858_v12  ;;  %v3084_v36 = vunpack.i.l.bf16 %v4207_v30  ;;  %v5889_v58 = vunpack.i.h.bf16 %v5882_v22  ;;  %v5890_v30 = vunpack.i.h.bf16 %v3794_v35  ;;  %v5894_v12 = vld [vmem:[#allocation48_spill] sm:$0xff] }
 0x1b7   : > { %5876 = vst [vmem:[#allocation53_spill] sm:$0xff] %v4278_v7  ;;  %v653_v3 = vsel %vm645_vm2, %v2739_v59, %v5878_v8  ;;  %1564 = vrot.lane.b32.xlu0 %v1188_v6, %s3106_s5  ;;  %1666 = vrot.lane.b32.xlu1 %v1239_v56, %s3106_s5  ;;  %v2594_v59 = vunpack.i.l.bf16 %v5882_v22  ;;  %v5930_v7 = vld [vmem:[#allocation41_spill] sm:$0xff] }
 0x1b8   : > { %5877 = vst [vmem:[#allocation97_spill] sm:$0xff] %v4281_v38  ;;  %v4304_v23 = vpop.permute.xlu2 %1488  ;;  %v1213_v61 = vpack.c.bf16 %v653_v3, %v651_v44  ;;  %v5893_v44 = vld [vmem:[#allocation36_spill] sm:$0xff] }
 0x1b9   : > { %5883 = vst [vmem:[#allocation10_spill] sm:$0xff] %v4304_v23  ;;  %v3063_v47 = vpop.permute.xlu1 %3062  ;;  %v3058_v48 = vpop.permute.xlu0 %3057 }
 0x1ba   : > { %5884 = vst [vmem:[#allocation21_spill] sm:$0xff] %v4307_v33  ;;  %v3065_v56 = vunpack.i.h.bf16 %v3063_v47  ;;  %v3064_v6 = vunpack.i.l.bf16 %v3063_v47  ;;  %v3060_v50 = vunpack.i.h.bf16 %v3058_v48  ;;  %v3059_v8 = vunpack.i.l.bf16 %v3058_v48 }
 0x1bb   : > { %v432_v47 = vsel %vm423_vm3, %v2594_v59, %v5889_v58  ;;  %v776_v48 = vsel %vm756_vm6, %v2859_v46, %v5890_v30  ;;  %v773_v59 = vsel %vm756_vm6, %v2849_v24, %v2850_v53 }
 0x1bc   : > { %v4315_v63 = vsel %vm1089_vm5, %v3065_v56, %v3069_v0  ;;  %v4317_v19 = vpack.c.bf16 %v3070_v54, %v3064_v6  ;;  %v4320_v3 = vsel %vm1089_vm5, %v3060_v50, %v3064_v6  ;;  %v4323_v32 = vsel %vm1089_vm5, %v3059_v8, %v3060_v50 }
 0x1bd   : > { %5886 = vst [vmem:[#allocation98_spill] sm:$0xff] %v4320_v3  ;;  %v5888_v0 = vunpack.i.l.bf16 %v5880_v5  ;;  %v5891_v56 = vunpack.i.l.bf16 %v3856_v25  ;;  %v775_v50 = vsel %vm756_vm6, %v2855_v16, %v2859_v46  ;;  %v2724_v25 = vunpack.i.l.bf16 %v5893_v44 }
 0x1be   : > { %5885 = vst [vmem:[#allocation22_spill] sm:$0xff] %v4317_v19  ;;  %1612 = vrot.lane.b32.xlu2 %v1212_v9, %s3106_s5  ;;  %v4351_v9 = vsel %vm1089_vm5, %v3084_v36, %v3085_v34  ;;  %v5895_v19 = vld [vmem:[#allocation49_spill] sm:$0xff] }
 0x1bf   : > { %5887 = vst [vmem:[#allocation99_spill] sm:$0xff] %v4323_v32  ;;  %v434_v54 = vsel %vm423_vm3, %v2600_v52, %v5888_v0  ;;  %1614 = vrot.lane.b32.xlu0 %v1213_v61, %s3106_s5  ;;  %1566 = vrot.lane.b32.xlu1 %v1189_v27, %s3106_s5  ;;  %v774_v6 = vsel %vm756_vm6, %v2850_v53, %v5891_v56  ;;  %v2720_v56 = vunpack.i.h.bf16 %v5894_v12  ;;  %v2715_v38 = vunpack.i.h.bf16 %v5895_v19 }
 0x1c0   : > { %v4346_v52 = vpop.permute.xlu2 %1494  ;;  %v1185_v27 = vpack.c.bf16 %v434_v54, %v432_v47  ;;  %v1237_v2 = vpack.c.bf16 %v776_v48, %v774_v6  ;;  %v2714_v54 = vunpack.i.l.bf16 %v5895_v19  ;;  %v1236_v48 = vpack.c.bf16 %v775_v50, %v773_v59 }
 0x1c1   : > { %5892 = vst [vmem:[#allocation100_spill] sm:$0xff] %v4346_v52  ;;  %v3078_v61 = vpop.permute.xlu1 %3077  ;;  %v3073_v8 = vpop.permute.xlu0 %3072  ;;  %v5900_v50 = vunpack.i.l.bf16 %v5880_v5  ;;  %v5901_v59 = vunpack.i.l.bf16 %v5881_v57 }
 0x1c2   : > { %v3080_v0 = vunpack.i.h.bf16 %v3078_v61  ;;  %v3079_v35 = vunpack.i.l.bf16 %v3078_v61  ;;  %v3075_v58 = vunpack.i.h.bf16 %v3073_v8  ;;  %v3074_v30 = vunpack.i.l.bf16 %v3073_v8  ;;  %v5906_v61 = vld [vmem:[#allocation18_spill] sm:$0xff] }
 0x1c3   : > { %v646_v6 = vsel %vm645_vm2, %v2714_v54, %v2715_v38 }
 0x1c4   : > { %v4357_v16 = vsel %vm1089_vm5, %v3080_v0, %v3084_v36  ;;  %v4359_v53 = vpack.c.bf16 %v3085_v34, %v3079_v35  ;;  %v4362_v24 = vsel %vm1089_vm5, %v3075_v58, %v3079_v35  ;;  %v4365_v46 = vsel %vm1089_vm5, %v3074_v30, %v3075_v58 }
 0x1c5   : > { %v648_v36 = vsel %vm645_vm2, %v2720_v56, %v2724_v25  ;;  %v5899_v0 = vunpack.i.h.bf16 %v5880_v5  ;;  %v5903_v58 = vunpack.i.h.bf16 %v5893_v44  ;;  %v5904_v56 = vunpack.i.l.bf16 %v5894_v12 }
 0x1c6   : > { %5896 = vst [vmem:[#allocation36_spill] sm:$0xff] %v4359_v53  ;;  %1662 = vrot.lane.b32.xlu2 %v1237_v2, %s3106_s5  ;;  %v2585_v5 = vunpack.i.h.bf16 %v5906_v61  ;;  %v2834_v12 = vunpack.i.l.bf16 %v3838_v15 }
 0x1c7   : > { %1558 = vrot.lane.b32.xlu0 %v1185_v27, %s3106_s5  ;;  %1660 = vrot.lane.b32.xlu1 %v1236_v48, %s3106_s5  ;;  %v435_v2 = vsel %vm423_vm3, %v5900_v50, %v5899_v0  ;;  %v5902_v27 = vunpack.i.h.bf16 %v5882_v22  ;;  %v649_v30 = vsel %vm645_vm2, %v2724_v25, %v5903_v58  ;;  %v647_v54 = vsel %vm645_vm2, %v2715_v38, %v5904_v56  ;;  %v5905_v48 = vld [vmem:[#allocation6_spill] sm:$0xff] }
 0x1c8   : > { %v4375_v34 = vpop.permute.xlu2 %1500  ;;  %v2589_v47 = vunpack.i.l.bf16 %v5905_v48  ;;  %v1209_v50 = vpack.c.bf16 %v648_v36, %v646_v6  ;;  %v2844_v22 = vunpack.i.l.bf16 %v3774_v4  ;;  %v1210_v44 = vpack.c.bf16 %v649_v30, %v647_v54  ;;  %v5908_v25 = vld [vmem:[#allocation74_spill] sm:$0xff] }
 0x1c9   : > { %v4379_v19 = vpop.permute.xlu1 %1294  ;;  %v4381_v8 = vpop.permute.xlu0 %1289  ;;  %v433_v35 = vsel %vm423_vm3, %v5902_v27, %v5901_v59  ;;  %v2835_v59 = vunpack.i.h.bf16 %v3838_v15  ;;  %v2840_v58 = vunpack.i.h.bf16 %v5908_v25 }
 0x1ca   : > { %5897 = vst [vmem:[#allocation48_spill] sm:$0xff] %v4379_v19  ;;  %v5907_v19 = vld [vmem:[#allocation19_spill] sm:$0xff]  ;;  %v1186_v27 = vpack.c.bf16 %v435_v2, %v433_v35  ;;  %v430_v36 = vsel %vm423_vm3, %v2585_v5, %v2589_v47  ;;  %v5910_v35 = vunpack.i.l.bf16 %v5908_v25  ;;  %v5914_v25 = vld [vmem:[#allocation46_spill] sm:$0xff] }
 0x1cb   : > { %5898 = vst [vmem:[#allocation49_spill] sm:$0xff] %v4381_v8  ;;  %v2580_v0 = vunpack.i.h.bf16 %v5907_v19  ;;  %v2579_v57 = vunpack.i.l.bf16 %v5907_v19  ;;  %v5909_v19 = vunpack.i.h.bf16 %v3774_v4  ;;  %v771_v54 = vsel %vm756_vm6, %v2840_v58, %v2844_v22 }
 0x1cc   : > { %v770_v15 = vsel %vm756_vm6, %v2835_v59, %v5910_v35  ;;  %v2700_v53 = vunpack.i.h.bf16 %v5914_v25  ;;  %v2699_v35 = vunpack.i.l.bf16 %v5914_v25 }
 0x1cd   : > { %v428_v6 = vsel %vm423_vm3, %v2579_v57, %v2580_v0  ;;  %v772_v2 = vsel %vm756_vm6, %v2844_v22, %v5909_v19  ;;  %v5912_v57 = vld [vmem:[#allocation32_spill] sm:$0xff]  ;;  %v5913_v19 = vld [vmem:[#allocation45_spill] sm:$0xff] }
 0x1ce   : > { %1606 = vrot.lane.b32.xlu2 %v1209_v50, %s3106_s5  ;;  %v769_v50 = vsel %vm756_vm6, %v2834_v12, %v2835_v59  ;;  %v1182_v4 = vpack.c.bf16 %v430_v36, %v428_v6  ;;  %v2705_v8 = vunpack.i.h.bf16 %v5913_v19  ;;  %v5915_v59 = vunpack.i.h.bf16 %v5905_v48 }
 0x1cf   : > { %1608 = vrot.lane.b32.xlu0 %v1210_v44, %s3106_s5  ;;  %1560 = vrot.lane.b32.xlu1 %v1186_v27, %s3106_s5  ;;  %v2709_v44 = vunpack.i.l.bf16 %v5912_v57  ;;  %v1234_v27 = vpack.c.bf16 %v772_v2, %v770_v15  ;;  %v551_v36 = vsel %vm534_vm1, %v2699_v35, %v2700_v53  ;;  %v5917_v15 = vunpack.i.l.bf16 %v5906_v61  ;;  %v5922_v35 = vld [vmem:[#allocation16_spill] sm:$0xff] }
 0x1d0   : > { %v4410_v38 = vpop.permute.xlu2 %1506  ;;  %v431_v58 = vsel %vm423_vm3, %v2589_v47, %v5915_v59  ;;  %v2565_v61 = vunpack.i.h.bf16 %v5922_v35 }
 0x1d1   : > { %v4420_v30 = vpop.permute.xlu0 %1490  ;;  %v1487_v56 = vpop.permute.xlu1 %1486  ;;  %v553_v12 = vsel %vm534_vm1, %v2705_v8, %v2709_v44  ;;  %v5920_v8 = vld [vmem:[#allocation4_spill] sm:$0xff] }
 0x1d2   : > { %5911 = vst [vmem:[#allocation6_spill] sm:$0xff] %v4420_v30  ;;  %v4426_v5 = vsel %vm1756_vm7, %v1487_v56, %v4304_v23  ;;  %v1233_v30 = vpack.c.bf16 %v771_v54, %v769_v50  ;;  %v429_v56 = vsel %vm423_vm3, %v2580_v0, %v5917_v15  ;;  %v5918_v54 = vunpack.i.h.bf16 %v5912_v57  ;;  %v5923_v57 = vld [vmem:[#allocation61_spill] sm:$0xff] }
 0x1d3   : > { %v5919_v50 = vunpack.i.l.bf16 %v5913_v19  ;;  %v2564_v0 = vunpack.i.l.bf16 %v5922_v35  ;;  %v1206_v59 = vpack.c.bf16 %v553_v12, %v551_v36  ;;  %v2829_v15 = vunpack.i.l.bf16 %v5923_v57 }
 0x1d4   : > { %v1183_v23 = vpack.c.bf16 %v431_v58, %v429_v56  ;;  %v5926_v35 = vunpack.i.h.bf16 %v5923_v57  ;;  %v2690_v57 = vunpack.i.h.bf16 %v5930_v7 }
 0x1d5   : > { %v552_v48 = vsel %vm534_vm1, %v2700_v53, %v5919_v50  ;;  %v5925_v53 = vld [vmem:[#allocation71_spill] sm:$0xff]  ;;  %v424_v36 = vsel %vm423_vm3, %v2564_v0, %v2565_v61 }
 0x1d6   : > { %1656 = vrot.lane.b32.xlu2 %v1234_v27, %s3106_s5  ;;  %v5921_v27 = vld [vmem:[#allocation15_spill] sm:$0xff]  ;;  %v2825_v50 = vunpack.i.h.bf16 %v5925_v53  ;;  %v768_v58 = vsel %vm756_vm6, %v2829_v15, %v5926_v35  ;;  %v5927_v56 = vunpack.i.l.bf16 %v5925_v53  ;;  %v2685_v35 = vunpack.i.h.bf16 %v5931_v10 }
 0x1d7   : > { %1552 = vrot.lane.b32.xlu0 %v1182_v4, %s3106_s5  ;;  %1654 = vrot.lane.b32.xlu1 %v1233_v30, %s3106_s5  ;;  %v554_v30 = vsel %vm534_vm1, %v2709_v44, %v5918_v54  ;;  %v2574_v4 = vunpack.i.l.bf16 %v5920_v8  ;;  %v2570_v25 = vunpack.i.h.bf16 %v5921_v27  ;;  %v5924_v44 = vld [vmem:[#allocation72_spill] sm:$0xff]  ;;  %v2684_v53 = vunpack.i.l.bf16 %v5931_v10 }
 0x1d8   : > { %v4435_v22 = vpop.permute.xlu2 %1512  ;;  %v2820_v54 = vunpack.i.h.bf16 %v5924_v44  ;;  %v1207_v19 = vpack.c.bf16 %v554_v30, %v552_v48 }
 0x1d9   : > { %v4442_v6 = vpop.permute.xlu0 %1496  ;;  %v1493_v2 = vpop.permute.xlu1 %1492  ;;  %v426_v12 = vsel %vm423_vm3, %v2570_v25, %v2574_v4 }
 0x1da   : > { %5916 = vst [vmem:[#allocation18_spill] sm:$0xff] %v4442_v6  ;;  %v4455_v47 = vsel %vm1756_vm7, %v1493_v2, %v4346_v52  ;;  %v2819_v2 = vunpack.i.l.bf16 %v5924_v44  ;;  %v766_v30 = vsel %vm756_vm6, %v2820_v54, %v5927_v56  ;;  %v1179_v6 = vpack.c.bf16 %v426_v12, %v424_v36 }
 0x1db   : > { %v1231_v0 = vpack.c.bf16 %v768_v58, %v766_v30  ;;  %v5933_v36 = vunpack.i.h.bf16 %v5920_v8  ;;  %v5934_v58 = vunpack.i.l.bf16 %v5921_v27  ;;  %v5936_v30 = vunpack.i.l.bf16 %v5930_v7  ;;  %v5940_v27 = vld [vmem:[#allocation59_spill] sm:$0xff] }
 0x1dc   : > { %v765_v44 = vsel %vm756_vm6, %v2819_v2, %v2820_v54 }
 0x1dd   : > { %v427_v10 = vsel %vm423_vm3, %v2574_v4, %v5933_v36 }
 0x1de   : > { %1600 = vrot.lane.b32.xlu2 %v1206_v59, %s3106_s5 }
 0x1df   : > { %1602 = vrot.lane.b32.xlu0 %v1207_v19, %s3106_s5  ;;  %1554 = vrot.lane.b32.xlu1 %v1183_v23, %s3106_s5  ;;  %v767_v23 = vsel %vm756_vm6, %v2825_v50, %v2829_v15  ;;  %v5929_v19 = vld [vmem:[#allocation30_spill] sm:$0xff]  ;;  %v547_v50 = vsel %vm534_vm1, %v2684_v53, %v2685_v35 }
 0x1e0   : > { %v4468_v52 = vpop.permute.xlu2 %1518  ;;  %v2694_v25 = vunpack.i.l.bf16 %v5929_v19  ;;  %v1230_v60 = vpack.c.bf16 %v767_v23, %v765_v44  ;;  %v548_v23 = vsel %vm534_vm1, %v2685_v35, %v5936_v30  ;;  %v5937_v44 = vld [vmem:[#allocation3_spill] sm:$0xff] }
 0x1e1   : > { %v4478_v48 = vpop.permute.xlu0 %1502  ;;  %v4480_v59 = vpop.permute.xlu1 %1498 }
 0x1e2   : > { %5928 = vst [vmem:[#allocation19_spill] sm:$0xff] %v4478_v48  ;;  %v549_v54 = vsel %vm534_vm1, %v2690_v57, %v2694_v25  ;;  %v5938_v57 = vld [vmem:[#allocation11_spill] sm:$0xff]  ;;  %v5939_v48 = vld [vmem:[#allocation12_spill] sm:$0xff] }
 0x1e3   : > { %v2555_v53 = vunpack.i.h.bf16 %v5938_v57  ;;  %v2550_v8 = vunpack.i.h.bf16 %v5939_v48  ;;  %v2549_v4 = vunpack.i.l.bf16 %v5939_v48  ;;  %v1203_v36 = vpack.c.bf16 %v549_v54, %v547_v50 }
 0x1e4   : > { %v5943_v50 = vunpack.i.h.bf16 %v5940_v27 }
 0x1e5   : > { %v329_v54 = vsel %vm312_vm0, %v2549_v4, %v2550_v8 }
 0x1e6   : > { %1650 = vrot.lane.b32.xlu2 %v1231_v0, %s3106_s5  ;;  %v2559_v0 = vunpack.i.l.bf16 %v5937_v44 }
 0x1e7   : > { %1546 = vrot.lane.b32.xlu0 %v1179_v6, %s3106_s5  ;;  %1648 = vrot.lane.b32.xlu1 %v1230_v60, %s3106_s5  ;;  %v425_v6 = vsel %vm423_vm3, %v2565_v61, %v5934_v58  ;;  %v5935_v60 = vunpack.i.h.bf16 %v5929_v19  ;;  %v5941_v61 = vld [vmem:[#allocation69_spill] sm:$0xff] }
 0x1e8   : > { %v4491_v15 = vpop.permute.xlu2 %1524  ;;  %v2805_v58 = vunpack.i.h.bf16 %v5941_v61  ;;  %v1180_v17 = vpack.c.bf16 %v427_v10, %v425_v6  ;;  %v2804_v7 = vunpack.i.l.bf16 %v5941_v61  ;;  %v331_v48 = vsel %vm312_vm0, %v2555_v53, %v2559_v0  ;;  %v5946_v61 = vld [vmem:[#allocation28_spill] sm:$0xff] }
 0x1e9   : > { %v4495_v2 = vpop.permute.xlu0 %1508  ;;  %v4497_v12 = vpop.permute.xlu1 %1504  ;;  %v550_v56 = vsel %vm534_vm1, %v2694_v25, %v5935_v60  ;;  %v5942_v25 = vld [vmem:[#allocation68_spill] sm:$0xff]  ;;  %v2679_v53 = vunpack.i.l.bf16 %v5946_v61 }
 0x1ea   : > { %5932 = vst [vmem:[#allocation74_spill] sm:$0xff] %v4495_v2  ;;  %v2814_v2 = vunpack.i.l.bf16 %v5940_v27  ;;  %v1204_v19 = vpack.c.bf16 %v550_v56, %v548_v23  ;;  %v2810_v60 = vunpack.i.h.bf16 %v5942_v25  ;;  %v5944_v6 = vunpack.i.l.bf16 %v5942_v25 }
 0x1eb   : > { %v2675_v27 = vunpack.i.h.bf16 %v5947_v55  ;;  %v2669_v25 = vunpack.i.l.bf16 %v5948_v1 }
 0x1ec   : > { %v764_v10 = vsel %vm756_vm6, %v2814_v2, %v5943_v50  ;;  %v762_v56 = vsel %vm756_vm6, %v2805_v58, %v5944_v6  ;;  %v2670_v50 = vunpack.i.h.bf16 %v5948_v1 }
 0x1ed   : > { %v1228_v4 = vpack.c.bf16 %v764_v10, %v762_v56  ;;  %v5951_v10 = vunpack.i.l.bf16 %v5938_v57  ;;  %v5957_v57 = vld [vmem:[#allocation55_spill] sm:$0xff] }
 0x1ee   : > { %1594 = vrot.lane.b32.xlu2 %v1203_v36, %s3106_s5  ;;  %v761_v36 = vsel %vm756_vm6, %v2804_v7, %v2805_v58  ;;  %v545_v58 = vsel %vm534_vm1, %v2675_v27, %v2679_v53  ;;  %v5955_v27 = vld [vmem:[#allocation7_spill] sm:$0xff] }
 0x1ef   : > { %1596 = vrot.lane.b32.xlu0 %v1204_v19, %s3106_s5  ;;  %1548 = vrot.lane.b32.xlu1 %v1180_v17, %s3106_s5  ;;  %v763_v17 = vsel %vm756_vm6, %v2810_v60, %v2814_v2  ;;  %v1176_v19 = vpack.c.bf16 %v331_v48, %v329_v54  ;;  %v543_v60 = vsel %vm534_vm1, %v2669_v25, %v2670_v50  ;;  %v5950_v54 = vunpack.i.h.bf16 %v5937_v44 }
 0x1f0   : > { %v4522_v35 = vpop.permute.xlu2 %1530  ;;  %v1227_v13 = vpack.c.bf16 %v763_v17, %v761_v36  ;;  %v330_v6 = vsel %vm312_vm0, %v2550_v8, %v5951_v10  ;;  %v5953_v17 = vunpack.i.l.bf16 %v5947_v55  ;;  %v2540_v25 = vunpack.i.h.bf16 %v5955_v27  ;;  %v5958_v8 = vld [vmem:[#allocation66_spill] sm:$0xff] }
 0x1f1   : > { %v4532_v30 = vpop.permute.xlu0 %1514  ;;  %v4534_v23 = vpop.permute.xlu1 %1510  ;;  %v332_v1 = vsel %vm312_vm0, %v2559_v0, %v5950_v54  ;;  %v1200_v54 = vpack.c.bf16 %v545_v58, %v543_v60  ;;  %v2790_v10 = vunpack.i.h.bf16 %v5958_v8  ;;  %v2789_v55 = vunpack.i.l.bf16 %v5958_v8  ;;  %v5962_v8 = vld [vmem:[#allocation24_spill] sm:$0xff] }
 0x1f2   : > { %5945 = vst [vmem:[#allocation32_spill] sm:$0xff] %v4532_v30  ;;  %v544_v36 = vsel %vm534_vm1, %v2670_v50, %v5953_v17  ;;  %v5956_v30 = vld [vmem:[#allocation8_spill] sm:$0xff]  ;;  %v1177_v51 = vpack.c.bf16 %v332_v1, %v330_v6  ;;  %v5960_v60 = vunpack.i.h.bf16 %v5957_v57 }
 0x1f3   : > { %v2535_v44 = vunpack.i.h.bf16 %v5956_v30  ;;  %v2534_v0 = vunpack.i.l.bf16 %v5956_v30 }
 0x1f5   : > { %v325_v58 = vsel %vm312_vm0, %v2534_v0, %v2535_v44  ;;  %v5963_v0 = vld [vmem:[#allocation33_spill] sm:$0xff] }
 0x1f6   : > { %1644 = vrot.lane.b32.xlu2 %v1228_v4, %s3106_s5  ;;  %v2660_v33 = vunpack.i.h.bf16 %v5963_v0 }
 0x1f7   : > { %1540 = vrot.lane.b32.xlu0 %v1176_v19, %s3106_s5  ;;  %1642 = vrot.lane.b32.xlu1 %v1227_v13, %s3106_s5  ;;  %v5952_v13 = vunpack.i.h.bf16 %v5946_v61  ;;  %v5954_v19 = vld [vmem:[#allocation2_spill] sm:$0xff] }
 0x1f8   : > { %v4545_v2 = vpop.permute.xlu2 %1624  ;;  %v2544_v4 = vunpack.i.l.bf16 %v5954_v19 }
 0x1f9   : > { %v4549_v7 = vpop.permute.xlu0 %1520  ;;  %v4551_v48 = vpop.permute.xlu1 %1516  ;;  %v546_v56 = vsel %vm534_vm1, %v2679_v53, %v5952_v13  ;;  %v5959_v53 = vld [vmem:[#allocation65_spill] sm:$0xff] }
 0x1fa   : > { %5949 = vst [vmem:[#allocation45_spill] sm:$0xff] %v4549_v7  ;;  %v2799_v7 = vunpack.i.l.bf16 %v5957_v57  ;;  %v1201_v61 = vpack.c.bf16 %v546_v56, %v544_v36  ;;  %v2795_v13 = vunpack.i.h.bf16 %v5959_v53  ;;  %v327_v30 = vsel %vm312_vm0, %v2540_v25, %v2544_v4  ;;  %v5964_v57 = vld [vmem:[#allocation34_spill] sm:$0xff] }
 0x1fb   : > { %v5961_v6 = vunpack.i.l.bf16 %v5959_v53  ;;  %v1173_v25 = vpack.c.bf16 %v327_v30, %v325_v58  ;;  %v2655_v32 = vunpack.i.h.bf16 %v5964_v57 }
 0x1fc   : > { %v760_v1 = vsel %vm756_vm6, %v2799_v7, %v5960_v60  ;;  %v2654_v60 = vunpack.i.l.bf16 %v5964_v57  ;;  %v5970_v57 = vld [vmem:[#allocation62_spill] sm:$0xff] }
 0x1fd   : > { %v758_v56 = vsel %vm756_vm6, %v2790_v10, %v5961_v6 }
 0x1fe   : > { %1588 = vrot.lane.b32.xlu2 %v1200_v54, %s3106_s5  ;;  %v759_v54 = vsel %vm756_vm6, %v2795_v13, %v2799_v7  ;;  %v1225_v3 = vpack.c.bf16 %v760_v1, %v758_v56  ;;  %v539_v1 = vsel %vm534_vm1, %v2654_v60, %v2655_v32  ;;  %v5967_v56 = vunpack.i.h.bf16 %v5962_v8 }
 0x1ff   : > { %1590 = vrot.lane.b32.xlu0 %v1201_v61, %s3106_s5  ;;  %1542 = vrot.lane.b32.xlu1 %v1177_v51, %s3106_s5  ;;  %v757_v51 = vsel %vm756_vm6, %v2789_v55, %v2790_v10  ;;  %v2664_v61 = vunpack.i.l.bf16 %v5962_v8  ;;  %v5965_v10 = vunpack.i.h.bf16 %v5954_v19  ;;  %v5966_v55 = vunpack.i.l.bf16 %v5955_v27  ;;  %v5969_v27 = vld [vmem:[#allocation51_spill] sm:$0xff] }
 0x200   : > { %v4576_v50 = vpop.permute.xlu2 %1674  ;;  %v1224_v53 = vpack.c.bf16 %v759_v54, %v757_v51  ;;  %v5968_v51 = vunpack.i.l.bf16 %v5963_v0  ;;  %v2780_v60 = vunpack.i.h.bf16 %v5970_v57  ;;  %v3005_v0 = vunpack.i.h.bf16 %v4142_v21 }
 0x201   : > { %v4586_v17 = vpop.permute.xlu0 %1526  ;;  %v1523_v36 = vpop.permute.xlu1 %1522  ;;  %v328_v13 = vsel %vm312_vm0, %v2544_v4, %v5965_v10  ;;  %v326_v30 = vsel %vm312_vm0, %v2535_v44, %v5966_v55  ;;  %v541_v58 = vsel %vm534_vm1, %v2660_v33, %v2664_v61  ;;  %v542_v54 = vsel %vm534_vm1, %v2664_v61, %v5967_v56 }
 0x202   : > { %v540_v19 = vsel %vm534_vm1, %v2655_v32, %v5968_v51  ;;  %v2784_v44 = vunpack.i.l.bf16 %v5969_v27  ;;  %v1174_v33 = vpack.c.bf16 %v328_v13, %v326_v30  ;;  %v3009_v61 = vunpack.i.l.bf16 %v4048_v43 }
 0x203   : > { %v1198_v55 = vpack.c.bf16 %v542_v54, %v540_v19  ;;  %v3000_v32 = vunpack.i.h.bf16 %v4144_v40  ;;  %v1769_v13 = vsel %vm1756_vm7, %v1523_v36, %v4491_v15  ;;  %v5972_v30 = vunpack.i.h.bf16 %v5969_v27 }
 0x204   : > { %v664_v56 = vsel %vm645_vm2, %v2780_v60, %v2784_v44  ;;  %v997_v36 = vsel %vm978_vm8, %v3005_v0, %v3009_v61  ;;  %v5975_v0 = vunpack.i.l.bf16 %v4142_v21  ;;  %v2984_v21 = vunpack.i.l.bf16 %v4114_v49 }
 0x205   : > { %vm2347_vm1 = vcmask 257024  }
 0x206   : > { %1638 = vrot.lane.b32.xlu2 %v1225_v3, %s3106_s5 }
 0x207   : > { %1534 = vrot.lane.b32.xlu0 %v1173_v25, %s3106_s5  ;;  %1636 = vrot.lane.b32.xlu1 %v1224_v53, %s3106_s5  ;;  %v1197_v25 = vpack.c.bf16 %v541_v58, %v539_v1  ;;  %v5971_v53 = vld [vmem:[#allocation63_spill] sm:$0xff]  ;;  %v665_v58 = vsel %vm645_vm2, %v2784_v44, %v5972_v30  ;;  %v2994_v30 = vunpack.i.l.bf16 %v4013_v41 }
 0x208   : > { %v4597_v7 = vpop.permute.xlu2 %1618  ;;  %v2775_v10 = vunpack.i.h.bf16 %v5971_v53  ;;  %v2774_v8 = vunpack.i.l.bf16 %v5971_v53 }
 0x209   : > { %v1577_v6 = vpop.permute.xlu0 %1576  ;;  %v1529_v3 = vpop.permute.xlu1 %1528 }
 0x20a   : > { %v1771_v4 = vsel %vm1756_vm7, %v1529_v3, %v4522_v35  ;;  %v2999_v3 = vunpack.i.l.bf16 %v4144_v40  ;;  %v5973_v40 = vunpack.i.l.bf16 %v5970_v57  ;;  %v662_v51 = vsel %vm645_vm2, %v2774_v8, %v2775_v10 }
 0x20b   : > { %1989 = vmatpush.bf16.msra.mxu0 %v1771_v4  ;;  %v1221_v53 = vpack.c.bf16 %v664_v56, %v662_v51  ;;  %v5974_v8 = vunpack.i.h.bf16 %v4048_v43  ;;  %v5977_v56 = vld [vmem:[#allocation31_spill] sm:$0xff] }
 0x20c   : > { %v663_v54 = vsel %vm645_vm2, %v2775_v10, %v5973_v40  ;;  %v995_v27 = vsel %vm978_vm8, %v2999_v3, %v3000_v32  ;;  %v996_v3 = vsel %vm978_vm8, %v3000_v32, %v5975_v0  ;;  %v5976_v32 = vld [vmem:[#allocation5_spill] sm:$0xff]  ;;  %v5982_v0 = vunpack.i.h.bf16 %v3984_v28 }
 0x20d   : > { %v1222_v57 = vpack.c.bf16 %v665_v58, %v663_v54  ;;  %v1266_v60 = vpack.c.bf16 %v997_v36, %v995_v27  ;;  %v2985_v58 = vunpack.i.h.bf16 %v4114_v49  ;;  %v5978_v54 = vunpack.i.h.bf16 %v4013_v41 }
 0x20e   : > { %1582 = vrot.lane.b32.xlu2 %v1197_v25, %s3106_s5  ;;  %v5979_v49 = vunpack.i.l.bf16 %v4112_v31 }
 0x20f   : > { %1584 = vrot.lane.b32.xlu0 %v1198_v55, %s3106_s5  ;;  %1536 = vrot.lane.b32.xlu1 %v1174_v33, %s3106_s5  ;;  %v1767_v33 = vsel %vm1756_vm7, %v4551_v48, %v4468_v52  ;;  %v998_v55 = vsel %vm978_vm8, %v3009_v61, %v5974_v8  ;;  %v2990_v61 = vunpack.i.h.bf16 %v4112_v31  ;;  %v994_v51 = vsel %vm978_vm8, %v2994_v30, %v5978_v54 }
 0x210   : > { %1990 = vmatpush.bf16.msra.mxu0 %v1769_v13  ;;  %v4631_v1 = vpop.permute.xlu2 %1668  ;;  %v1267_v43 = vpack.c.bf16 %v998_v55, %v996_v3  ;;  %v992_v36 = vsel %vm978_vm8, %v2985_v58, %v5979_v49  ;;  %v5985_v49 = vunpack.i.h.bf16 %v3955_v11 }
 0x211   : > { %v4638_v19 = vpop.permute.xlu0 %1626  ;;  %v4640_v4 = vpop.permute.xlu1 %1578  ;;  %v1264_v31 = vpack.c.bf16 %v994_v51, %v992_v36  ;;  %v4744_v51 = vld [vmem:[%s5478_s1 + $0x30] sm:$0xff] }
 0x212   : > { %v1787_v25 = vsel %vm1756_vm7, %v1577_v6, %v4640_v4  ;;  %v1803_v44 = vsel %vm1756_vm7, %v4545_v2, %v4638_v19  ;;  %v1765_v2 = vsel %vm1756_vm7, %v4534_v23, %v4435_v22  ;;  %v1763_v23 = vsel %vm1756_vm7, %v4497_v12, %v4410_v38 }
 0x213   : > { %2007 = vmatpush.bf16.msra.mxu1 %v1787_v25  ;;  %2025 = vmatpush.bf16.msra.mxu2 %v1803_v44  ;;  %v1761_v12 = vsel %vm1756_vm7, %v4480_v59, %v4375_v34  ;;  %v993_v44 = vsel %vm978_vm8, %v2990_v61, %v2994_v30 }
 0x214   : > { %1991 = vmatpush.bf16.msra.mxu0 %v1767_v33  ;;  %v991_v33 = vsel %vm978_vm8, %v2984_v21, %v2985_v58  ;;  %v2955_v21 = vunpack.i.h.bf16 %v4052_v62 }
 0x216   : > { %1632 = vrot.lane.b32.xlu2 %v1222_v57, %s3106_s5  ;;  %v2417_v57 = vld [vmem:[%s5478_s1] sm:$0xf] }
 0x217   : > { %1720 = vrot.lane.b32.xlu0 %v1266_v60, %s3106_s5  ;;  %1630 = vrot.lane.b32.xlu1 %v1221_v53, %s3106_s5  ;;  %v2450_v60 = vld [vmem:[%s5478_s1 + $0x14] sm:$0xf0]  ;;  %v2979_v53 = vunpack.i.l.bf16 %v3984_v28  ;;  %v2964_v28 = vunpack.i.l.bf16 %v3955_v11 }
 0x218   : > { %1992 = vmatpush.bf16.msra.mxu0 %v1765_v2  ;;  %v4658_v6 = vpop.permute.xlu2 %1612  ;;  %v2970_v2 = vunpack.i.h.bf16 %v4082_v37  ;;  %v4717_v8 = vor.u32 %v2450_v60, %v2417_v57 }
 0x219   : > { %v1571_v48 = vpop.permute.xlu0 %1570  ;;  %v1673_v10 = vpop.permute.xlu1 %1672  ;;  %v990_v3 = vsel %vm978_vm8, %v2979_v53, %v5982_v0  ;;  %v986_v36 = vsel %vm978_vm8, %v2964_v28, %v5985_v49 }
 0x21a   : > { %v1819_v13 = vsel %vm1756_vm7, %v1673_v10, %v4576_v50  ;;  %v2969_v10 = vunpack.i.l.bf16 %v4082_v37  ;;  %5981 = vst [vmem:[#allocation46_spill] sm:$0xff] %v4717_v8 }
 0x21b   : > { %2043 = vmatpush.bf16.msra.mxu3 %v1819_v13  ;;  %v5983_v13 = vunpack.i.l.bf16 %v4080_v18 }
 0x21c   : > { %1993 = vmatpush.bf16.msra.mxu0 %v1763_v23 }
 0x21d   : > { %v988_v37 = vsel %vm978_vm8, %v2970_v2, %v5983_v13 }
 0x21e   : > { %1532 = vrot.lane.b32.xlu2 %v5976_v32, %s3106_s5  ;;  %v2960_v32 = vunpack.i.h.bf16 %v4050_v45 }
 0x21f   : > { %1580 = vrot.lane.b32.xlu0 %v5977_v56, %s3106_s5  ;;  %1722 = vrot.lane.b32.xlu1 %v1267_v43, %s3106_s5  ;;  %v987_v43 = vsel %vm978_vm8, %v2969_v10, %v2970_v2  ;;  %v2954_v56 = vunpack.i.l.bf16 %v4052_v62  ;;  %v5986_v62 = vunpack.i.l.bf16 %v4050_v45  ;;  %v1323_v45 = vunpack.c.l.b16 %v4744_v51 }
 0x220   : > { %1994 = vmatpush.bf16.msra.mxu0 %v1761_v12  ;;  %v4683_v40 = vpop.permute.xlu2 %1662  ;;  %v5984_v12 = vld [vmem:[#allocation27_spill] sm:$0xff]  ;;  %v2949_v2 = vunpack.i.l.bf16 %v3926_v14  ;;  %v2939_v10 = vunpack.i.l.bf16 %v4017_v39 }
 0x221   : > { %v4691_v27 = vpop.permute.xlu0 %1620  ;;  %v4693_v25 = vpop.permute.xlu1 %1572 }
 0x222   : > { %v1785_v59 = vsel %vm1756_vm7, %v1571_v48, %v4693_v25  ;;  %v1801_v41 = vsel %vm1756_vm7, %v4597_v7, %v4691_v27  ;;  %v1263_v48 = vpack.c.bf16 %v993_v44, %v991_v33  ;;  %v2975_v7 = vunpack.i.h.bf16 %v4080_v18 }
 0x223   : > { %2008 = vmatpush.bf16.msra.mxu1 %v1785_v59  ;;  %2026 = vmatpush.bf16.msra.mxu2 %v1801_v41  ;;  %v984_v44 = vsel %vm978_vm8, %v2955_v21, %v5986_v62  ;;  %v985_v41 = vsel %vm978_vm8, %v2960_v32, %v2964_v28  ;;  %v5995_v62 = vld [vmem:[#allocation21_spill] sm:$0xff] }
 0x224   : > { %1995 = vmatpush.bf16.msra.mxu0 %v4455_v47  ;;  %v5980_v47 = vld [vmem:[#allocation29_spill] sm:$0xff]  ;;  %v989_v58 = vsel %vm978_vm8, %v2975_v7, %v2979_v53  ;;  %v1258_v60 = vpack.c.bf16 %v986_v36, %v984_v44  ;;  %v2940_v7 = vunpack.i.h.bf16 %v4017_v39  ;;  %v5996_v44 = vld [vmem:[#allocation98_spill] sm:$0xff] }
 0x225   : > { %v1260_v18 = vpack.c.bf16 %v989_v58, %v987_v43 }
 0x226   : > { %1716 = vrot.lane.b32.xlu2 %v1264_v31, %s3106_s5  ;;  %v983_v31 = vsel %vm978_vm8, %v2954_v56, %v2955_v21  ;;  %v5992_v21 = vunpack.i.l.bf16 %v4015_v42  ;;  %v2930_v56 = vunpack.i.h.bf16 %v3986_v29 }
 0x227   : > { %1574 = vrot.lane.b32.xlu0 %v5980_v47, %s3106_s5  ;;  %1714 = vrot.lane.b32.xlu1 %v1263_v48, %s3106_s5  ;;  %v1257_v53 = vpack.c.bf16 %v985_v41, %v983_v31  ;;  %v2945_v48 = vunpack.i.h.bf16 %v4015_v42  ;;  %v4774_v47 = vpack.c.b16 %v1323_v45, %v1323_v45  ;;  %v5993_v42 = vld [vmem:[#allocation99_spill] sm:$0xff]  ;;  %v5998_v45 = vunpack.i.h.bf16 %v3897_v20 }
 0x228   : > { %1996 = vmatpush.bf16.msra.mxu0 %v4426_v5  ;;  %v1607_v55 = vpop.permute.xlu2 %1606  ;;  %v1261_v5 = vpack.c.bf16 %v990_v3, %v988_v37  ;;  %v5994_v36 = vpack.c.bf16 %v4315_v63, %v5993_v42  ;;  %v5999_v63 = vunpack.i.l.bf16 %v3986_v29  ;;  %v6011_v42 = vld [vmem:[#allocation40_spill] sm:$0xff] }
 0x229   : > { %v1565_v23 = vpop.permute.xlu0 %1564  ;;  %v1667_v30 = vpop.permute.xlu1 %1666  ;;  %5988 = vst [vmem:[#allocation4_spill] sm:$0xff] %v4774_v47  ;;  %v981_v37 = vsel %vm978_vm8, %v2945_v48, %v2949_v2 }
 0x22a   : > { %v1817_v61 = vsel %vm1756_vm7, %v1667_v30, %v4631_v1 }
 0x22b   : > { %1997 = vmatmul.bf16.vlgmr.msra.gmra.mxu0 %v4717_v8  ;;  %2044 = vmatpush.bf16.msra.mxu3 %v1817_v61 }
 0x22e   : > { %1710 = vrot.lane.b32.xlu2 %v1261_v5, %s3106_s5  ;;  %v5991_v5 = vunpack.i.h.bf16 %v3926_v14  ;;  %v2925_v14 = vunpack.i.h.bf16 %v3988_v26 }
 0x22f   : > { %1568 = vrot.lane.b32.xlu0 %v5984_v12, %s3106_s5  ;;  %1708 = vrot.lane.b32.xlu1 %v1260_v18, %s3106_s5  ;;  %v980_v18 = vsel %vm978_vm8, %v2940_v7, %v5992_v21  ;;  %v2924_v12 = vunpack.i.l.bf16 %v3988_v26 }
 0x230   : > { %v4739_v54 = vpop.permute.xlu2 %1656  ;;  %v982_v28 = vsel %vm978_vm8, %v2949_v2, %v5991_v5 }
 0x231   : > { %v4752_v33 = vpop.permute.xlu0 %1614  ;;  %v4754_v59 = vpop.permute.xlu1 %1566  ;;  %v1255_v49 = vpack.c.bf16 %v982_v28, %v980_v18  ;;  %v6004_v28 = vld [vmem:[#allocation92_spill] sm:$0xff] }
 0x232   : > { %v1783_v57 = vsel %vm1756_vm7, %v1565_v23, %v4754_v59  ;;  %v1799_v11 = vsel %vm1756_vm7, %v4658_v6, %v4752_v33  ;;  %v5987_v6 = vpack.c.bf16 %v4357_v16, %v4365_v46  ;;  %v979_v23 = vsel %vm978_vm8, %v2939_v10, %v2940_v7  ;;  %v5989_v16 = vld [vmem:[#allocation23_spill] sm:$0xff]  ;;  %v6000_v10 = vld [vmem:[#allocation20_spill] sm:$0xff] }
 0x233   : > { %2009 = vmatpush.bf16.msra.mxu1 %v1783_v57  ;;  %2027 = vmatpush.bf16.msra.mxu2 %v1799_v11  ;;  %v1254_v30 = vpack.c.bf16 %v981_v37, %v979_v23  ;;  %v5990_v46 = vpack.c.bf16 %v4351_v9, %v4362_v24  ;;  %v2934_v24 = vunpack.i.l.bf16 %v3897_v20  ;;  %v884_v57 = vsel %vm867_vm4, %v2924_v12, %v2925_v14  ;;  %v6001_v37 = vld [vmem:[#allocation78_spill] sm:$0xff]  ;;  %v6005_v18 = vld [vmem:[#allocation56_spill] sm:$0xff] }
 0x234   : > { %v2919_v23 = vunpack.i.l.bf16 %v6001_v37  ;;  %v3039_v21 = vunpack.i.l.bf16 %v6004_v28 }
 0x235   : > { %v886_v31 = vsel %vm867_vm4, %v2930_v56, %v2934_v24 }
 0x236   : > { %1704 = vrot.lane.b32.xlu2 %v1258_v60, %s3106_s5  ;;  %v887_v60 = vsel %vm867_vm4, %v2934_v24, %v5998_v45  ;;  %v1251_v48 = vpack.c.bf16 %v886_v31, %v884_v57 }
 0x237   : > { %1750 = vrot.lane.b32.xlu0 %v5987_v6, %s3106_s5  ;;  %1702 = vrot.lane.b32.xlu1 %v1257_v53, %s3106_s5  ;;  %v885_v53 = vsel %vm867_vm4, %v2925_v14, %v5999_v63  ;;  %v6008_v14 = vld [vmem:[#allocation53_spill] sm:$0xff] }
 0x238   : > { %v1601_v0 = vpop.permute.xlu2 %1600  ;;  %v1252_v7 = vpack.c.bf16 %v887_v60, %v885_v53 }
 0x239   : > { %v1559_v3 = vpop.permute.xlu0 %1558  ;;  %v1661_v13 = vpop.permute.xlu1 %1660 }
 0x23a   : > { %v1815_v39 = vsel %vm1756_vm7, %v1661_v13, %v4683_v40 }
 0x23b   : > { %2002 = vmatmul.bf16.gmra.mxu0 %v4774_v47  ;;  %2045 = vmatpush.bf16.msra.mxu3 %v1815_v39  ;;  %v6002_v39 = vld [vmem:[#allocation84_spill] sm:$0xff] }
 0x23e   : > { %1562 = vrot.lane.b32.xlu2 %v5989_v16, %s3106_s5  ;;  %v6003_v16 = vld [vmem:[#allocation85_spill] sm:$0xff] }
 0x23f   : > { %1696 = vrot.lane.b32.xlu0 %v1254_v30, %s3106_s5  ;;  %1752 = vrot.lane.b32.xlu1 %v5990_v46, %s3106_s5  ;;  %v2915_v30 = vunpack.i.h.bf16 %v6002_v39  ;;  %v2910_v46 = vunpack.i.h.bf16 %v6003_v16  ;;  %v2909_v5 = vunpack.i.l.bf16 %v6003_v16 }
 0x240   : > { %v4788_v58 = vpop.permute.xlu2 %1650 }
 0x241   : > { %v4790_v43 = vpop.permute.xlu0 %1608  ;;  %v4792_v61 = vpop.permute.xlu1 %1560  ;;  %v882_v57 = vsel %vm867_vm4, %v2915_v30, %v2919_v23  ;;  %v880_v63 = vsel %vm867_vm4, %v2909_v5, %v2910_v46 }
 0x242   : > { %v1781_v32 = vsel %vm1756_vm7, %v1559_v3, %v4792_v61  ;;  %v1797_v9 = vsel %vm1756_vm7, %v1607_v55, %v4790_v43  ;;  %v5997_v55 = vpack.c.bf16 %v5995_v62, %v5996_v44 }
 0x243   : > { %2010 = vmatpush.bf16.msra.mxu1 %v1781_v32  ;;  %2028 = vmatpush.bf16.msra.mxu2 %v1797_v9  ;;  %v3035_v32 = vunpack.i.h.bf16 %v6005_v18  ;;  %v6006_v9 = vld [vmem:[#allocation57_spill] sm:$0xff] }
 0x244   : > { %v3030_v24 = vunpack.i.h.bf16 %v6006_v9  ;;  %v3029_v56 = vunpack.i.l.bf16 %v6006_v9  ;;  %v1248_v9 = vpack.c.bf16 %v882_v57, %v880_v63 }
 0x245   : > { %v1096_v53 = vsel %vm1089_vm5, %v3035_v32, %v3039_v21 }
 0x246   : > { %1744 = vrot.lane.b32.xlu2 %v5994_v36, %s3106_s5  ;;  %v6012_v36 = vld [vmem:[#allocation97_spill] sm:$0xff] }
 0x247   : > { %1746 = vrot.lane.b32.xlu0 %v5997_v55, %s3106_s5  ;;  %1698 = vrot.lane.b32.xlu1 %v1255_v49, %s3106_s5  ;;  %v6010_v49 = vld [vmem:[#allocation17_spill] sm:$0xff]  ;;  %v6013_v62 = vpack.c.bf16 %v6011_v42, %v6012_v36  ;;  %v6014_v55 = vunpack.i.h.bf16 %v6001_v37 }
 0x248   : > { %v1595_v41 = vpop.permute.xlu2 %1594 }
 0x249   : > { %v1553_v11 = vpop.permute.xlu0 %1552  ;;  %v1655_v26 = vpop.permute.xlu1 %1654  ;;  %v883_v31 = vsel %vm867_vm4, %v2919_v23, %v6014_v55  ;;  %v6018_v23 = vld [vmem:[#allocation82_spill] sm:$0xff] }
 0x24a   : > { %v1813_v2 = vsel %vm1756_vm7, %v1655_v26, %v4739_v54  ;;  %v2894_v30 = vunpack.i.l.bf16 %v6018_v23  ;;  %v6021_v55 = vld [vmem:[#allocation90_spill] sm:$0xff] }
 0x24b   : > { %2046 = vmatpush.bf16.msra.mxu3 %v1813_v2  ;;  %v1094_v2 = vsel %vm1089_vm5, %v3029_v56, %v3030_v24 }
 0x24c   : > { %v1272_v16 = vpack.c.bf16 %v1096_v53, %v1094_v2 }
 0x24e   : > { %1690 = vrot.lane.b32.xlu2 %v1251_v48, %s3106_s5 }
 0x24f   : > { %1692 = vrot.lane.b32.xlu0 %v1252_v7, %s3106_s5  ;;  %1556 = vrot.lane.b32.xlu1 %v6000_v10, %s3106_s5  ;;  %v6016_v7 = vld [vmem:[#allocation76_spill] sm:$0xff] }
 0x250   : > { %v4831_v20 = vpop.permute.xlu2 %1644  ;;  %v2904_v10 = vunpack.i.l.bf16 %v6016_v7 }
 0x251   : > { %v4833_v6 = vpop.permute.xlu0 %1602  ;;  %v4835_v29 = vpop.permute.xlu1 %1554 }
 0x252   : > { %v1779_v3 = vsel %vm1756_vm7, %v1553_v11, %v4835_v29  ;;  %v1795_v13 = vsel %vm1756_vm7, %v1601_v0, %v4833_v6  ;;  %v6007_v0 = vld [vmem:[#allocation26_spill] sm:$0xff]  ;;  %v6015_v11 = vunpack.i.l.bf16 %v6002_v39  ;;  %v2895_v39 = vunpack.i.h.bf16 %v6018_v23 }
 0x253   : > { %2011 = vmatpush.bf16.msra.mxu1 %v1779_v3  ;;  %2029 = vmatpush.bf16.msra.mxu2 %v1795_v13  ;;  %v6009_v12 = vpack.c.bf16 %v6007_v0, %v6008_v14  ;;  %v6017_v3 = vld [vmem:[#allocation81_spill] sm:$0xff]  ;;  %v6019_v14 = vunpack.i.h.bf16 %v6004_v28  ;;  %v6023_v28 = vld [vmem:[#allocation96_spill] sm:$0xff] }
 0x254   : > { %v881_v26 = vsel %vm867_vm4, %v2910_v46, %v6015_v11  ;;  %v2900_v13 = vunpack.i.h.bf16 %v6017_v3  ;;  %v876_v32 = vsel %vm867_vm4, %v2894_v30, %v2895_v39  ;;  %v6022_v11 = vld [vmem:[#allocation95_spill] sm:$0xff]  ;;  %v6027_v30 = vunpack.i.h.bf16 %v6021_v55 }
 0x255   : > { %v1249_v37 = vpack.c.bf16 %v883_v31, %v881_v26  ;;  %v3024_v31 = vunpack.i.l.bf16 %v6021_v55  ;;  %v3020_v26 = vunpack.i.h.bf16 %v6022_v11  ;;  %v6031_v55 = vld [vmem:[#allocation9_spill] sm:$0xff] }
 0x256   : > { %1740 = vrot.lane.b32.xlu2 %v6009_v12, %s3106_s5  ;;  %v878_v5 = vsel %vm867_vm4, %v2900_v13, %v2904_v10  ;;  %v1097_v12 = vsel %vm1089_vm5, %v3039_v21, %v6019_v14  ;;  %v3014_v21 = vunpack.i.l.bf16 %v6023_v28 }
 0x257   : > { %1550 = vrot.lane.b32.xlu0 %v6010_v49, %s3106_s5  ;;  %1738 = vrot.lane.b32.xlu1 %v6013_v62, %s3106_s5  ;;  %v6020_v49 = vunpack.i.l.bf16 %v6005_v18  ;;  %v1245_v57 = vpack.c.bf16 %v878_v5, %v876_v32  ;;  %v1092_v53 = vsel %vm1089_vm5, %v3020_v26, %v3024_v31 }
 0x258   : > { %v4859_v44 = vpop.permute.xlu2 %1588 }
 0x259   : > { %v1547_v45 = vpop.permute.xlu0 %1546  ;;  %v1649_v60 = vpop.permute.xlu1 %1648  ;;  %v1095_v42 = vsel %vm1089_vm5, %v3030_v24, %v6020_v49  ;;  %v6024_v24 = vld [vmem:[#allocation13_spill] sm:$0xff] }
 0x25a   : > { %v1811_v48 = vsel %vm1756_vm7, %v1649_v60, %v4788_v58  ;;  %v3015_v60 = vunpack.i.h.bf16 %v6023_v28  ;;  %v1273_v18 = vpack.c.bf16 %v1097_v12, %v1095_v42  ;;  %v2447_v28 = vld [vmem:[%s5478_s1 + $0x4] sm:$0xf] }
 0x25b   : > { %2047 = vmatpush.bf16.msra.mxu3 %v1811_v48 }
 0x25c   : > { %v1090_v2 = vsel %vm1089_vm5, %v3014_v21, %v3015_v60  ;;  %v6033_v21 = vld [vmem:[#allocation79_spill] sm:$0xff] }
 0x25d   : > { %v1269_v5 = vpack.c.bf16 %v1092_v53, %v1090_v2 }
 0x25e   : > { %1686 = vrot.lane.b32.xlu2 %v1249_v37, %s3106_s5  ;;  %v6026_v37 = vunpack.i.l.bf16 %v6017_v3 }
 0x25f   : > { %1732 = vrot.lane.b32.xlu0 %v1272_v16, %s3106_s5  ;;  %1684 = vrot.lane.b32.xlu1 %v1248_v9, %s3106_s5  ;;  %v1093_v16 = vsel %vm1089_vm5, %v3024_v31, %v6027_v30  ;;  %v6028_v9 = vunpack.i.l.bf16 %v6022_v11 }
 0x260   : > { %v4880_v46 = vpop.permute.xlu2 %1638  ;;  %v877_v23 = vsel %vm867_vm4, %v2895_v39, %v6026_v37 }
 0x261   : > { %v4884_v56 = vpop.permute.xlu0 %1596  ;;  %v4886_v0 = vpop.permute.xlu1 %1548 }
 0x262   : > { %v1777_v36 = vsel %vm1756_vm7, %v1547_v45, %v4886_v0  ;;  %v1793_v62 = vsel %vm1756_vm7, %v1595_v41, %v4884_v56  ;;  %v6025_v45 = vunpack.i.h.bf16 %v6016_v7  ;;  %v1091_v7 = vsel %vm1089_vm5, %v3015_v60, %v6028_v9  ;;  %v2419_v60 = vld [vmem:[%s5478_s1 + $0x18] sm:$0xf0] }
 0x263   : > { %2012 = vmatpush.bf16.msra.mxu1 %v1777_v36  ;;  %2030 = vmatpush.bf16.msra.mxu2 %v1793_v62  ;;  %v1270_v32 = vpack.c.bf16 %v1093_v16, %v1091_v7  ;;  %v6029_v36 = vld [vmem:[#allocation60_spill] sm:$0xff]  ;;  %v4974_v37 = vor.u32 %v2447_v28, %v2419_v60  ;;  %v6036_v16 = vld [vmem:[#allocation77_spill] sm:$0xff]  ;;  %v1770_v9 = vsel %vm1756_vm7, %v4491_v15, %v4586_v17  ;;  %v2448_v7 = vld [vmem:[%s5478_s1 + $0xc] sm:$0xf] }
 0x264   : > { %v879_v63 = vsel %vm867_vm4, %v2904_v10, %v6025_v45  ;;  %v6030_v62 = vld [vmem:[#allocation80_spill] sm:$0xff]  ;;  %v2451_v45 = vld [vmem:[%s5478_s1 + $0x1c] sm:$0xf0]  ;;  %v6043_v28 = vld [vmem:[#allocation91_spill] sm:$0xff] }
 0x265   : > { %v1246_v14 = vpack.c.bf16 %v879_v63, %v877_v23  ;;  %6035 = vst [vmem:[#allocation15_spill] sm:$0xff] %v4974_v37 }
 0x266   : > { %1544 = vrot.lane.b32.xlu2 %v6024_v24, %s3106_s5  ;;  %v2425_v24 = vld [vmem:[%s5478_s1 + $0x8] sm:$0xf] }
 0x267   : > { %1678 = vrot.lane.b32.xlu0 %v1245_v57, %s3106_s5  ;;  %1734 = vrot.lane.b32.xlu1 %v1273_v18, %s3106_s5  ;;  %v6034_v18 = vld [vmem:[#allocation94_spill] sm:$0xff]  ;;  %v4976_v23 = vor.u32 %v2451_v45, %v2425_v24 }
 0x268   : > { %v1583_v41 = vpop.permute.xlu2 %1582 }
 0x269   : > { %v1541_v48 = vpop.permute.xlu0 %1540  ;;  %v1643_v13 = vpop.permute.xlu1 %1642 }
 0x26a   : > { %v1809_v10 = vsel %vm1756_vm7, %v1643_v13, %v4831_v20 }
 0x26b   : > { %2048 = vmatpush.bf16.msra.mxu3 %v1809_v10  ;;  %v6038_v10 = vld [vmem:[#allocation93_spill] sm:$0xff] }
 0x26e   : > { %1726 = vrot.lane.b32.xlu2 %v1269_v5, %s3106_s5 }
 0x26f   : > { %1728 = vrot.lane.b32.xlu0 %v1270_v32, %s3106_s5  ;;  %1680 = vrot.lane.b32.xlu1 %v1246_v14, %s3106_s5 }
 0x270   : > { %v4925_v3 = vpop.permute.xlu2 %1632 }
 0x271   : > { %v4927_v39 = vpop.permute.xlu0 %1590  ;;  %v4929_v12 = vpop.permute.xlu1 %1542 }
 0x272   : > { %v1775_v49 = vsel %vm1756_vm7, %v1541_v48, %v4929_v12  ;;  %v1791_v42 = vsel %vm1756_vm7, %v4859_v44, %v4927_v39  ;;  %v6032_v44 = vld [vmem:[#allocation58_spill] sm:$0xff] }
 0x273   : > { %2013 = vmatpush.bf16.msra.mxu1 %v1775_v49  ;;  %2031 = vmatpush.bf16.msra.mxu2 %v1791_v42  ;;  %v6039_v42 = vld [vmem:[#allocation45_spill] sm:$0xff] }
 0x276   : > { %1628 = vrot.lane.b32.xlu2 %v6029_v36, %s3106_s5  ;;  %v1768_v36 = vsel %vm1756_vm7, %v4468_v52, %v6039_v42 }
 0x277   : > { %1676 = vrot.lane.b32.xlu0 %v6030_v62, %s3106_s5  ;;  %1538 = vrot.lane.b32.xlu1 %v6031_v55, %s3106_s5  ;;  %v1147_v62 = vld [vmem:[%s5478_s1 + $0x38] sm:$0xff]  ;;  %v1324_v55 = vunpack.c.h.b16 %v4744_v51 }
 0x278   : > { %v4942_v31 = vpop.permute.xlu2 %1532 }
 0x279   : > { %v1535_v57 = vpop.permute.xlu0 %1534  ;;  %v1637_v11 = vpop.permute.xlu1 %1636  ;;  %v1772_v30 = vsel %vm1756_vm7, %v4522_v35, %v4942_v31  ;;  %v2427_v35 = vld [vmem:[%s5478_s1 + $0x20] sm:$0xf0]  ;;  %v5032_v45 = vpack.c.b16 %v1324_v55, %v1324_v55  ;;  %v6053_v55 = vld [vmem:[#allocation43_spill] sm:$0xff] }
 0x27a   : > { %v1807_v26 = vsel %vm1756_vm7, %v1637_v11, %v4880_v46  ;;  %v5002_v15 = vor.u32 %v2448_v7, %v2427_v35  ;;  %v6040_v11 = vld [vmem:[#allocation75_spill] sm:$0xff]  ;;  %v6049_v7 = vld [vmem:[#allocation89_spill] sm:$0xff] }
 0x27b   : > { %2049 = vmatpush.bf16.msra.mxu3 %v1807_v26  ;;  %v6041_v26 = vld [vmem:[#allocation50_spill] sm:$0xff]  ;;  %6044 = vst [vmem:[#allocation16_spill] sm:$0xff] %v5032_v45 }
 0x27e   : > { %1622 = vrot.lane.b32.xlu2 %v6032_v44, %s3106_s5  ;;  %v6042_v44 = vld [vmem:[#allocation32_spill] sm:$0xff] }
 0x27f   : > { %1670 = vrot.lane.b32.xlu0 %v6033_v21, %s3106_s5  ;;  %1724 = vrot.lane.b32.xlu1 %v6034_v18, %s3106_s5  ;;  %v1766_v52 = vsel %vm1756_vm7, %v4435_v22, %v6042_v44 }
 0x280   : > { %v4964_v63 = vpop.permute.xlu2 %1716 }
 0x281   : > { %v4966_v53 = vpop.permute.xlu0 %1584  ;;  %v4968_v2 = vpop.permute.xlu1 %1536 }
 0x282   : > { %v1773_v48 = vsel %vm1756_vm7, %v1535_v57, %v4968_v2  ;;  %v1789_v13 = vsel %vm1756_vm7, %v1583_v41, %v4966_v53  ;;  %v6037_v41 = vld [vmem:[#allocation54_spill] sm:$0xff]  ;;  %v1325_v57 = vunpack.c.l.b16 %v1147_v62 }
 0x283   : > { %2014 = vmatpush.bf16.msra.mxu1 %v1773_v48  ;;  %2032 = vmatpush.bf16.msra.mxu2 %v1789_v13  ;;  %v6045_v48 = vld [vmem:[#allocation74_spill] sm:$0xff] }
 0x284   : > { %v5034_v22 = vpack.c.b16 %v1325_v57, %v1325_v57  ;;  %v1764_v13 = vsel %vm1756_vm7, %v4410_v38, %v6045_v48  ;;  %v6054_v57 = vld [vmem:[#allocation88_spill] sm:$0xff] }
 0x286   : > { %2015 = vmatmul.bf16.vlgmr.msra.gmra.mxu1 %v4974_v37  ;;  %2033 = vmatmul.bf16.vlgmr.msra.gmra.mxu2 %v4976_v23 }
 0x287   : > { %2097 = vmatpush.bf16.msrb.mxu2 %v1772_v30  ;;  %1664 = vrot.lane.b32.xlu0 %v6036_v16, %s3106_s5  ;;  %v1326_v30 = vunpack.c.h.b16 %v1147_v62  ;;  %v6046_v16 = vld [vmem:[#allocation36_spill] sm:$0xff] }
 0x288   : > { %1616 = vrot.lane.b32.xlu2 %v6037_v41, %s3106_s5  ;;  %1718 = vrot.lane.b32.xlu1 %v6038_v10, %s3106_s5  ;;  %v4998_v5 = vpop.permute.xlu2 %1710  ;;  %v6048_v41 = vld [vmem:[#allocation19_spill] sm:$0xff] }
 0x289   : > { %v1721_v32 = vpop.permute.xlu0 %1720  ;;  %v1631_v14 = vpop.permute.xlu1 %1630 }
 0x28a   : > { %v1805_v49 = vsel %vm1756_vm7, %v1631_v14, %v4925_v3 }
 0x28b   : > { %2098 = vmatpush.bf16.msrb.mxu2 %v1770_v9  ;;  %2050 = vmatpush.bf16.msra.mxu3 %v1805_v49  ;;  %v1762_v9 = vsel %vm1756_vm7, %v4375_v34, %v6048_v41  ;;  %v5059_v49 = vpack.c.b16 %v1326_v30, %v1326_v30  ;;  %v6051_v34 = vld [vmem:[#allocation18_spill] sm:$0xff] }
 0x28d   : > { %6050 = vst [vmem:[#allocation61_spill] sm:$0xff] %v5059_v49 }
 0x28e   : > { %2051 = vmatmul.bf16.vlgmr.msra.gmra.mxu3 %v5002_v15 }
 0x28f   : > { %2099 = vmatpush.bf16.msrb.mxu2 %v1768_v36  ;;  %1658 = vrot.lane.b32.xlu0 %v6040_v11, %s3106_s5  ;;  %v6052_v36 = vld [vmem:[#allocation100_spill] sm:$0xff]  ;;  %v6055_v11 = vld [vmem:[#allocation6_spill] sm:$0xff] }
 0x290   : > { %1610 = vrot.lane.b32.xlu2 %v6041_v26, %s3106_s5  ;;  %1712 = vrot.lane.b32.xlu1 %v6043_v28, %s3106_s5  ;;  %v5021_v60 = vpop.permute.xlu2 %1704  ;;  %v1760_v62 = vsel %vm1756_vm7, %v6052_v36, %v6051_v34  ;;  %v6056_v26 = vld [vmem:[#allocation10_spill] sm:$0xff] }
 0x291   : > { %v5023_v21 = vpop.permute.xlu0 %1580  ;;  %v5025_v51 = vpop.permute.xlu1 %1722 }
 0x292   : > { %v1835_v18 = vsel %vm1756_vm7, %v1721_v32, %v5025_v51  ;;  %v1788_v24 = vsel %vm1756_vm7, %v4640_v4, %v5023_v21  ;;  %v6047_v4 = vld [vmem:[#allocation47_spill] sm:$0xff] }
 0x293   : > { %2100 = vmatpush.bf16.msrb.mxu2 %v1766_v52  ;;  %2061 = vmatpush.bf16.msrb.mxu0 %v1835_v18  ;;  %v6057_v52 = vld [vmem:[#allocation73_spill] sm:$0xff] }
 0x294   : > { %2115 = vmatpush.bf16.msrb.mxu3 %v1788_v24 }
 0x296   : > { %2020 = vmatmul.bf16.gmra.mxu1 %v5032_v45  ;;  %2038 = vmatmul.bf16.gmra.mxu2 %v5034_v22 }
 0x297   : > { %2101 = vmatpush.bf16.msrb.mxu2 %v1764_v13  ;;  %1754 = vrot.lane.b32.xlu0 %v6046_v16, %s3106_s5  ;;  %v6058_v16 = vld [vmem:[#allocation87_spill] sm:$0xff] }
 0x298   : > { %1604 = vrot.lane.b32.xlu2 %v6047_v4, %s3106_s5  ;;  %1706 = vrot.lane.b32.xlu1 %v6049_v7, %s3106_s5  ;;  %v5050_v38 = vpop.permute.xlu2 %1562  ;;  %v6059_v4 = vld [vmem:[#allocation70_spill] sm:$0xff] }
 0x299   : > { %v5052_v35 = vpop.permute.xlu0 %1574  ;;  %v1715_v10 = vpop.permute.xlu1 %1714  ;;  %v6060_v7 = vld [vmem:[#allocation22_spill] sm:$0xff] }
 0x29a   : > { %v1833_v32 = vsel %vm1756_vm7, %v1715_v10, %v4964_v63  ;;  %v1786_v14 = vsel %vm1756_vm7, %v4693_v25, %v5052_v35  ;;  %v1758_v25 = vsel %vm1756_vm7, %v6056_v26, %v6055_v11 }
 0x29b   : > { %2102 = vmatpush.bf16.msrb.mxu2 %v1762_v9  ;;  %2062 = vmatpush.bf16.msrb.mxu0 %v1833_v32  ;;  %v1782_v9 = vsel %vm1756_vm7, %v4792_v61, %v5050_v38  ;;  %v6063_v61 = vld [vmem:[#allocation39_spill] sm:$0xff] }
 0x29c   : > { %2116 = vmatpush.bf16.msrb.mxu3 %v1786_v14 }
 0x29e   : > { %2056 = vmatmul.bf16.gmra.mxu3 %v5059_v49 }
 0x29f   : > { %2103 = vmatpush.bf16.msrb.mxu2 %v1760_v62  ;;  %1598 = vrot.lane.b32.xlu0 %v6053_v55, %s3106_s5  ;;  %v6061_v62 = vld [vmem:[#allocation67_spill] sm:$0xff]  ;;  %v6062_v55 = vld [vmem:[#allocation52_spill] sm:$0xff] }
 0x2a0   : > { %1700 = vrot.lane.b32.xlu2 %v6054_v57, %s3106_s5  ;;  %1652 = vrot.lane.b32.xlu1 %v6057_v52, %s3106_s5  ;;  %v1745_v28 = vpop.permute.xlu2 %1744 }
 0x2a1   : > { %v5074_v18 = vpop.permute.xlu0 %1568  ;;  %v1709_v24 = vpop.permute.xlu1 %1708 }
 0x2a2   : > { %v1831_v13 = vsel %vm1756_vm7, %v1709_v24, %v4998_v5  ;;  %v1784_v30 = vsel %vm1756_vm7, %v4754_v59, %v5074_v18 }
 0x2a3   : > { %2104 = vmatpush.bf16.msrb.mxu2 %v1758_v25  ;;  %2063 = vmatpush.bf16.msrb.mxu0 %v1831_v13  ;;  %v6064_v13 = vld [vmem:[#allocation14_spill] sm:$0xff] }
 0x2a4   : > { %2117 = vmatpush.bf16.msrb.mxu3 %v1784_v30  ;;  %v6065_v30 = vld [vmem:[#allocation35_spill] sm:$0xff] }
 0x2a6   : > { %2105 = vmatmul.bf16.vlgmr.msrb.gmra.mxu2 %v4717_v8 }
 0x2a7   : > { %1694 = vrot.lane.b32.xlu0 %v6058_v16, %s3106_s5  ;;  %v6066_v16 = vld [vmem:[#allocation86_spill] sm:$0xff] }
 0x2a8   : > { %1646 = vrot.lane.b32.xlu2 %v6059_v4, %s3106_s5  ;;  %1748 = vrot.lane.b32.xlu1 %v6060_v7, %s3106_s5  ;;  %v5091_v10 = vpop.f32.mrf.mxu0  ;;  %v1691_v59 = vpop.permute.xlu2 %1690 }
 0x2a9   : > { %2118 = vmatpush.bf16.msrb.mxu3 %v1782_v9  ;;  %v1751_v32 = vpop.permute.xlu0 %1750  ;;  %v1703_v14 = vpop.permute.xlu1 %1702 }
 0x2aa   : > { %v1829_v36 = vsel %vm1756_vm7, %v1703_v14, %v5021_v60 }
 0x2ab   : > { %2064 = vmatpush.bf16.msrb.mxu0 %v1829_v36 }
 0x2af   : > { %1640 = vrot.lane.b32.xlu0 %v6061_v62, %s3106_s5  ;;  %v6067_v62 = vld [vmem:[#allocation44_spill] sm:$0xff] }
 0x2b0   : > { %1742 = vrot.lane.b32.xlu2 %v6062_v55, %s3106_s5  ;;  %1592 = vrot.lane.b32.xlu1 %v6063_v61, %s3106_s5  ;;  %v5101_v57 = vpop.f32.mrf.mxu0  ;;  %v5103_v26 = vpop.permute.xlu2 %1740  ;;  %v6068_v55 = vld [vmem:[#allocation83_spill] sm:$0xff]  ;;  %v6069_v61 = vld [vmem:[#allocation64_spill] sm:$0xff] }
 0x2b1   : > { %v1697_v25 = vpop.permute.xlu0 %1696  ;;  %v5105_v52 = vpop.permute.xlu1 %1752 }
 0x2b2   : > { %v1845_v24 = vsel %vm1756_vm7, %v1751_v32, %v5105_v52 }
 0x2b3   : > { %2082 = vmatpush.bf16.msrb.mxu1 %v1845_v24 }
 0x2b6   : > { %2110 = vmatmul.bf16.gmra.mxu2 %v4774_v47 }
 0x2b7   : > { %1736 = vrot.lane.b32.xlu0 %v6064_v13, %s3106_s5 }
 0x2b8   : > { %1586 = vrot.lane.b32.xlu2 %v6065_v30, %s3106_s5  ;;  %1688 = vrot.lane.b32.xlu1 %v6066_v16, %s3106_s5  ;;  %v5116_v4 = vpop.f32.mrf.mxu0  ;;  %v5118_v9 = vpop.permute.xlu2 %1686 }
 0x2b9   : > { %v5120_v7 = vpop.permute.xlu0 %1746  ;;  %v5122_v14 = vpop.permute.xlu1 %1698 }
 0x2ba   : > { %v1827_v32 = vsel %vm1756_vm7, %v1697_v25, %v5122_v14  ;;  %v1843_v36 = vsel %vm1756_vm7, %v1745_v28, %v5120_v7 }
 0x2bb   : > { %2065 = vmatpush.bf16.msrb.mxu0 %v1827_v32  ;;  %2083 = vmatpush.bf16.msrb.mxu1 %v1843_v36 }
 0x2bf   : > { %1730 = vrot.lane.b32.xlu0 %v6067_v62, %s3106_s5 }
 0x2c0   : > { %1682 = vrot.lane.b32.xlu2 %v6068_v55, %s3106_s5  ;;  %1634 = vrot.lane.b32.xlu1 %v6069_v61, %s3106_s5  ;;  %v5134_v24 = vpop.permute.xlu2 %1544  ;;  %v2005_v13 = vpop.f32.mrf.mxu0 }
 0x2c1   : > { %6070 = vst [vmem:[#allocation72_spill] sm:$0xff] %v5134_v24  ;;  %v5136_v30 = vpop.permute.xlu0 %1692  ;;  %v5138_v25 = vpop.permute.xlu1 %1556 }
 0x2c2   : > { %6071 = vst [vmem:[#allocation71_spill] sm:$0xff] %v5138_v25  ;;  %v1825_v28 = vsel %vm1756_vm7, %v1691_v59, %v5136_v30  ;;  %v1780_v16 = vsel %vm1756_vm7, %v4835_v29, %v5138_v25  ;;  %v1776_v59 = vsel %vm1756_vm7, %v4929_v12, %v5134_v24  ;;  %v2449_v12 = vld [vmem:[%s5478_s1 + $0x14] sm:$0xf] }
 0x2c3   : > { %2066 = vmatpush.bf16.msrb.mxu0 %v1825_v28  ;;  %2119 = vmatpush.bf16.msrb.mxu3 %v1780_v16 }
 0x2c8   : > { %v1727_v32 = vpop.permute.xlu2 %1726 }
 0x2c9   : > { %v5145_v36 = vpop.permute.xlu0 %1550  ;;  %v1739_v62 = vpop.permute.xlu1 %1738 }
 0x2ca   : > { %6072 = vst [vmem:[#allocation30_spill] sm:$0xff] %v5145_v36  ;;  %v1841_v55 = vsel %vm1756_vm7, %v1739_v62, %v5103_v26  ;;  %v1778_v61 = vsel %vm1756_vm7, %v4886_v0, %v5145_v36 }
 0x2cb   : > { %2084 = vmatpush.bf16.msrb.mxu1 %v1841_v55  ;;  %2120 = vmatpush.bf16.msrb.mxu3 %v1778_v61  ;;  %v2435_v55 = vld [vmem:[%s5478_s1 + $0x28] sm:$0xf0]  ;;  %v2433_v61 = vld [vmem:[%s5478_s1 + $0x10] sm:$0xf] }
 0x2cc   : > { %v5185_v24 = vor.u32 %v2449_v12, %v2435_v55  ;;  %v1148_v55 = vld [vmem:[%s5478_s1 + $0x40] sm:$0xff] }
 0x2cf   : > { %2121 = vmatpush.bf16.msrb.mxu3 %v1776_v59  ;;  %v2452_v59 = vld [vmem:[%s5478_s1 + $0x24] sm:$0xf0] }
 0x2d0   : > { %v5155_v29 = vpop.permute.xlu2 %1628  ;;  %v5189_v49 = vor.u32 %v2452_v59, %v2433_v61  ;;  %v1328_v61 = vunpack.c.h.b16 %v1148_v55 }
 0x2d1   : > { %v1733_v13 = vpop.permute.xlu0 %1732  ;;  %v1685_v28 = vpop.permute.xlu1 %1684  ;;  %v1804_v25 = vsel %vm1756_vm7, %v4638_v19, %v5155_v29 }
 0x2d2   : > { %v1823_v16 = vsel %vm1756_vm7, %v1685_v28, %v5118_v9 }
 0x2d3   : > { %2067 = vmatpush.bf16.msrb.mxu0 %v1823_v16 }
 0x2d8   : > { %v5159_v62 = vpop.permute.xlu2 %1622 }
 0x2d9   : > { %v1679_v47 = vpop.permute.xlu0 %1678  ;;  %v5161_v8 = vpop.permute.xlu1 %1734 }
 0x2da   : > { %v1839_v0 = vsel %vm1756_vm7, %v1733_v13, %v5161_v8 }
 0x2db   : > { %2085 = vmatpush.bf16.msrb.mxu1 %v1839_v0 }
 0x2e1   : > { %v5177_v28 = vpop.permute.xlu0 %1728  ;;  %v5181_v16 = vpop.permute.xlu1 %1680 }
 0x2e2   : > { %v5179_v13 = vpop.permute.xlu2 %1616  ;;  %v1837_v0 = vsel %vm1756_vm7, %v1727_v32, %v5177_v28  ;;  %v1821_v36 = vsel %vm1756_vm7, %v1679_v47, %v5181_v16  ;;  %v1802_v32 = vsel %vm1756_vm7, %v4691_v27, %v5159_v62 }
 0x2e3   : > { %2086 = vmatpush.bf16.msrb.mxu1 %v1837_v0  ;;  %2068 = vmatpush.bf16.msrb.mxu0 %v1821_v36  ;;  %v1800_v27 = vsel %vm1756_vm7, %v4752_v33, %v5179_v13 }
 0x2e6   : > { %2439 = vmatmul.msk.bf16.vlgmr.msrb.gmra.mxu1 %vm1982_vm9, %v5185_v24  ;;  %2069 = vmatmul.bf16.vlgmr.msrb.gmra.mxu0 %v5189_v49 }
 0x2e7   : > { %2133 = vmatpush.bf16.msra.mxu0 %v1804_v25 }
 0x2e9   : > { %v5200_v47 = vpop.permute.xlu0 %1676  ;;  %v5207_v36 = vpop.permute.xlu1 %1538 }
 0x2ea   : > { %v5202_v12 = vpop.permute.xlu2 %1610  ;;  %v1820_v19 = vsel %vm1756_vm7, %v4576_v50, %v5200_v47  ;;  %6073 = vst [vmem:[#allocation41_spill] sm:$0xff] %v5207_v36  ;;  %v1774_v25 = vsel %vm1756_vm7, %v4968_v2, %v5207_v36  ;;  %v1327_v50 = vunpack.c.l.b16 %v1148_v55 }
 0x2eb   : > { %2134 = vmatpush.bf16.msra.mxu0 %v1802_v32  ;;  %2151 = vmatpush.bf16.msra.mxu1 %v1820_v19  ;;  %v1798_v59 = vsel %vm1756_vm7, %v4790_v43, %v5202_v12 }
 0x2ec   : > { %2122 = vmatpush.bf16.msrb.mxu3 %v1774_v25  ;;  %v5234_v25 = vpack.c.b16 %v1328_v61, %v1328_v61 }
 0x2ef   : > { %2135 = vmatpush.bf16.msra.mxu0 %v1800_v27  ;;  %2123 = vmatmul.bf16.vlgmr.msrb.gmra.mxu3 %v4974_v37  ;;  %v5239_v27 = vpack.c.b16 %v1327_v50, %v1327_v50  ;;  %v6074_v50 = vld [vmem:[#allocation49_spill] sm:$0xff] }
 0x2f1   : > { %v5222_v2 = vpop.permute.xlu0 %1670  ;;  %v5226_v32 = vpop.permute.xlu1 %1724 }
 0x2f2   : > { %v5224_v0 = vpop.permute.xlu2 %1604  ;;  %v1818_v33 = vsel %vm1756_vm7, %v4631_v1, %v5222_v2  ;;  %v1836_v43 = vsel %vm1756_vm7, %v5025_v51, %v5226_v32 }
 0x2f3   : > { %2136 = vmatpush.bf16.msra.mxu0 %v1798_v59  ;;  %v1796_v19 = vsel %vm1756_vm7, %v4833_v6, %v5224_v0  ;;  %2152 = vmatpush.bf16.msra.mxu1 %v1818_v33  ;;  %v1999_v59 = vadd.f32 %v5091_v10, %v6074_v50  ;;  %v6076_v10 = vld [vmem:[#allocation48_spill] sm:$0xff] }
 0x2f4   : > { %2169 = vmatpush.bf16.msra.mxu2 %v1836_v43  ;;  %v2001_v50 = vadd.f32 %v5101_v57, %v6076_v10 }
 0x2f6   : > { %2440 = vmatmul.msk.bf16.gmra.mxu1 %vm1982_vm9, %v5234_v25  ;;  %2074 = vmatmul.bf16.gmra.mxu0 %v5239_v27 }
 0x2f7   : > { %2137 = vmatpush.bf16.msra.mxu0 %v1796_v19 }
 0x2f9   : > { %v5244_v1 = vpop.permute.xlu0 %1664 }
 0x2fa   : > { %v5246_v55 = vpop.permute.xlu1 %1718  ;;  %v1816_v6 = vsel %vm1756_vm7, %v4683_v40, %v5244_v1  ;;  %v5267_v43 = vpop.permute.xlu2 %1700 }
 0x2fb   : > { %2153 = vmatpush.bf16.msra.mxu1 %v1816_v6  ;;  %v1834_v51 = vsel %vm1756_vm7, %v4964_v63, %v5246_v55 }
 0x2fc   : > { %2170 = vmatpush.bf16.msra.mxu2 %v1834_v51 }
 0x2ff   : > { %2128 = vmatmul.bf16.gmra.mxu3 %v5032_v45 }
 0x301   : > { %v5255_v61 = vpop.permute.xlu0 %1658 }
 0x302   : > { %v5259_v33 = vpop.permute.xlu1 %1712  ;;  %v1814_v19 = vsel %vm1756_vm7, %v4739_v54, %v5255_v61 }
 0x303   : > { %v2016_v40 = vpop.f32.mrf.mxu1  ;;  %2154 = vmatpush.bf16.msra.mxu1 %v1814_v19  ;;  %v1832_v63 = vsel %vm1756_vm7, %v4998_v5, %v5259_v33 }
 0x304   : > { %v2017_v6 = vadd.f32 %v2016_v40, %v1999_v59  ;;  %2171 = vmatpush.bf16.msra.mxu2 %v1832_v63  ;;  %v5281_v40 = vpop.permute.xlu2 %1646 }
 0x309   : > { %v5269_v51 = vpop.permute.xlu0 %1754  ;;  %v2034_v45 = vpop.f32.mrf.mxu2 }
 0x30a   : > { %6075 = vst [vmem:[#allocation42_spill] sm:$0xff] %v5269_v51  ;;  %v2035_v37 = vadd.f32 %v2034_v45, %v2017_v6  ;;  %v5273_v36 = vpop.permute.xlu1 %1706  ;;  %v1846_v54 = vsel %vm1756_vm7, %v5105_v52, %v5269_v51  ;;  %v1828_v45 = vsel %vm1756_vm7, %v5122_v14, %v5267_v43  ;;  %v6077_v6 = vld [vmem:[#allocation25_spill] sm:$0xff] }
 0x30b   : > { %v2018_v19 = vpop.f32.mrf.mxu1  ;;  %v1830_v5 = vsel %vm1756_vm7, %v5021_v60, %v5273_v36  ;;  %2190 = vmatpush.bf16.msra.mxu3 %v1846_v54  ;;  %v2004_v52 = vadd.f32 %v5116_v4, %v6077_v6  ;;  %v1810_v4 = vsel %vm1756_vm7, %v4831_v20, %v5281_v40 }
 0x30c   : > { %v2019_v59 = vadd.f32 %v2018_v19, %v2001_v50  ;;  %2172 = vmatpush.bf16.msra.mxu2 %v1830_v5 }
 0x310   : > { %2173 = vmatpush.bf16.msra.mxu2 %v1828_v45  ;;  %v5300_v45 = vpop.permute.xlu2 %1742 }
 0x311   : > { %v5286_v57 = vpop.permute.xlu0 %1598  ;;  %v2036_v63 = vpop.f32.mrf.mxu2 }
 0x312   : > { %v2037_v10 = vadd.f32 %v2036_v63, %v2019_v59  ;;  %v2052_v51 = vpop.f32.mrf.mxu3  ;;  %v1794_v60 = vsel %vm1756_vm7, %v4884_v56, %v5286_v57  ;;  %v5295_v54 = vpop.permute.xlu1 %1652 }
 0x313   : > { %v5293_v50 = vadd.f32 %v2052_v51, %v2035_v37  ;;  %v2021_v19 = vpop.f32.mrf.mxu1  ;;  %2138 = vmatpush.bf16.msra.mxu0 %v1794_v60  ;;  %v1812_v5 = vsel %vm1756_vm7, %v4788_v58, %v5295_v54 }
 0x314   : > { %v2022_v14 = vadd.f32 %v2021_v19, %v2004_v52  ;;  %2155 = vmatpush.bf16.msra.mxu1 %v1812_v5  ;;  %v1842_v19 = vsel %vm1756_vm7, %v5103_v26, %v5300_v45 }
 0x318   : > { %2156 = vmatpush.bf16.msra.mxu1 %v1810_v4  ;;  %v5325_v4 = vpop.permute.xlu2 %1586 }
 0x319   : > { %v5305_v56 = vpop.permute.xlu0 %1694  ;;  %v2039_v37 = vpop.f32.mrf.mxu2  ;;  %v1790_v26 = vsel %vm1756_vm7, %v4966_v53, %v5325_v4 }
 0x31a   : > { %v2040_v51 = vadd.f32 %v2039_v37, %v2022_v14  ;;  %v2054_v59 = vpop.f32.mrf.mxu3  ;;  %v1826_v63 = vsel %vm1756_vm7, %v5136_v30, %v5305_v56  ;;  %v5312_v58 = vpop.permute.xlu1 %1748 }
 0x31b   : > { %v5310_v52 = vadd.f32 %v2054_v59, %v2037_v10  ;;  %2174 = vmatpush.bf16.msra.mxu2 %v1826_v63  ;;  %v2023_v60 = vpop.f32.mrf.mxu1  ;;  %v1844_v20 = vsel %vm1756_vm7, %v5120_v7, %v5312_v58 }
 0x31c   : > { %2191 = vmatpush.bf16.msra.mxu3 %v1844_v20 }
 0x320   : > { %2192 = vmatpush.bf16.msra.mxu3 %v1842_v19  ;;  %v5348_v53 = vpop.permute.xlu2 %1682 }
 0x321   : > { %v5320_v14 = vpop.permute.xlu0 %1640  ;;  %v2041_v5 = vpop.f32.mrf.mxu2 }
 0x322   : > { %v2057_v30 = vpop.f32.mrf.mxu3  ;;  %v1808_v10 = vsel %vm1756_vm7, %v4880_v46, %v5320_v14  ;;  %v1593_v59 = vpop.permute.xlu1 %1592 }
 0x323   : > { %v5327_v37 = vadd.f32 %v2057_v30, %v2040_v51  ;;  %2157 = vmatpush.bf16.msra.mxu1 %v1808_v10  ;;  %v1792_v7 = vsel %vm1756_vm7, %v4927_v39, %v1593_v59 }
 0x324   : > { %2139 = vmatpush.bf16.msra.mxu0 %v1792_v7 }
 0x328   : > { %2140 = vmatpush.bf16.msra.mxu0 %v1790_v26 }
 0x329   : > { %v5334_v63 = vpop.permute.xlu0 %1736  ;;  %v5336_v60 = vpop.f32.mrf.mxu2 }
 0x32a   : > { %v1840_v46 = vsel %vm1756_vm7, %v5161_v8, %v5334_v63  ;;  %v2059_v51 = vpop.f32.mrf.mxu3  ;;  %v5342_v20 = vpop.permute.xlu1 %1688 }
 0x32b   : > { %2193 = vmatpush.bf16.msra.mxu3 %v1840_v46  ;;  %2141 = vmatmul.bf16.vlgmr.msra.gmra.mxu0 %v4976_v23  ;;  %v1824_v39 = vsel %vm1756_vm7, %v5118_v9, %v5342_v20 }
 0x32c   : > { %2205 = vmatpush.bf16.msrb.mxu0 %v4942_v31  ;;  %2175 = vmatpush.bf16.msra.mxu2 %v1824_v39  ;;  %v1822_v31 = vsel %vm1756_vm7, %v5181_v16, %v5348_v53 }
 0x330   : > { %2206 = vmatpush.bf16.msrb.mxu0 %v4586_v17  ;;  %2176 = vmatpush.bf16.msra.mxu2 %v1822_v31 }
 0x331   : > { %v5354_v8 = vpop.permute.xlu0 %1730  ;;  %v5356_v19 = vpop.f32.mrf.mxu2 }
 0x332   : > { %v1838_v9 = vsel %vm1756_vm7, %v5177_v28, %v5354_v8  ;;  %v1635_v5 = vpop.permute.xlu1 %1634  ;;  %v6087_v28 = vld [vmem:[#allocation16_spill] sm:$0xff] }
 0x333   : > { %2194 = vmatpush.bf16.msra.mxu3 %v1838_v9  ;;  %2177 = vmatmul.bf16.vlgmr.msra.gmra.mxu2 %v5189_v49  ;;  %v1806_v17 = vsel %vm1756_vm7, %v4925_v3, %v1635_v5 }
 0x334   : > { %2207 = vmatpush.bf16.msrb.mxu0 %v6039_v42  ;;  %2241 = vmatpush.bf16.msrb.mxu2 %v5155_v29 }
 0x335   : > { %2158 = vmatpush.bf16.msra.mxu1 %v1806_v17 }
 0x336   : > { %2441 = vmatmul.msk.bf16.vlgmr.msra.gmra.mxu3 %vm1982_vm9, %v5185_v24 }
 0x337   : > { %2259 = vmatpush.bf16.msrb.mxu3 %v5200_v47 }
 0x338   : > { %2208 = vmatpush.bf16.msrb.mxu0 %v6042_v44  ;;  %2242 = vmatpush.bf16.msrb.mxu2 %v5159_v62  ;;  %v6078_v44 = vld [vmem:[#allocation71_spill] sm:$0xff] }
 0x339   : > { %2223 = vmatpush.bf16.msrb.mxu1 %v5023_v21  ;;  %v5374_v42 = vpop.f32.mrf.mxu2  ;;  %v6079_v21 = vld [vmem:[#allocation61_spill] sm:$0xff] }
 0x33a   : > { %2159 = vmatmul.bf16.vlgmr.msra.gmra.mxu1 %v5002_v15 }
 0x33b   : > { %2260 = vmatpush.bf16.msrb.mxu3 %v5222_v2  ;;  %2146 = vmatmul.bf16.gmra.mxu0 %v5034_v22 }
 0x33c   : > { %2209 = vmatpush.bf16.msrb.mxu0 %v6045_v48  ;;  %2243 = vmatpush.bf16.msrb.mxu2 %v5179_v13  ;;  %v6080_v48 = vld [vmem:[#allocation30_spill] sm:$0xff] }
 0x33d   : > { %2224 = vmatpush.bf16.msrb.mxu1 %v5052_v35  ;;  %v6083_v35 = vld [vmem:[#allocation41_spill] sm:$0xff] }
 0x33f   : > { %2261 = vmatpush.bf16.msrb.mxu3 %v5244_v1 }
 0x340   : > { %2210 = vmatpush.bf16.msrb.mxu0 %v6048_v41  ;;  %2244 = vmatpush.bf16.msrb.mxu2 %v5202_v12  ;;  %v6081_v41 = vld [vmem:[#allocation46_spill] sm:$0xff] }
 0x341   : > { %2225 = vmatpush.bf16.msrb.mxu1 %v5074_v18  ;;  %v2113_v3 = vpop.f32.mrf.mxu2 }
 0x343   : > { %2262 = vmatpush.bf16.msrb.mxu3 %v5255_v61  ;;  %2182 = vmatmul.bf16.gmra.mxu2 %v5239_v27 }
 0x344   : > { %2211 = vmatpush.bf16.msrb.mxu0 %v6051_v34  ;;  %2245 = vmatpush.bf16.msrb.mxu2 %v5224_v0  ;;  %v6084_v34 = vld [vmem:[#allocation42_spill] sm:$0xff] }
 0x345   : > { %2226 = vmatpush.bf16.msrb.mxu1 %v5050_v38  ;;  %v6082_v38 = vld [vmem:[#allocation72_spill] sm:$0xff] }
 0x346   : > { %2442 = vmatmul.msk.bf16.gmra.mxu3 %vm1982_vm9, %v5234_v25 }
 0x347   : > { %2263 = vmatpush.bf16.msrb.mxu3 %v5295_v54 }
 0x348   : > { %2212 = vmatpush.bf16.msrb.mxu0 %v6055_v11  ;;  %2246 = vmatpush.bf16.msrb.mxu2 %v5286_v57  ;;  %v6085_v11 = vld [vmem:[#allocation15_spill] sm:$0xff] }
 0x349   : > { %2227 = vmatpush.bf16.msrb.mxu1 %v6078_v44 }
 0x34a   : > { %2164 = vmatmul.bf16.gmra.mxu1 %v6079_v21 }
 0x34b   : > { %2264 = vmatpush.bf16.msrb.mxu3 %v5281_v40  ;;  %2213 = vmatmul.bf16.vlgmr.msrb.gmra.mxu0 %v6081_v41 }
 0x34c   : > { %2277 = vmatpush.bf16.msra.mxu0 %v5226_v32  ;;  %2247 = vmatpush.bf16.msrb.mxu2 %v1593_v59 }
 0x34d   : > { %2228 = vmatpush.bf16.msrb.mxu1 %v6080_v48 }
 0x34f   : > { %2265 = vmatpush.bf16.msrb.mxu3 %v5320_v14 }
 0x350   : > { %2278 = vmatpush.bf16.msra.mxu0 %v5246_v55  ;;  %2248 = vmatpush.bf16.msrb.mxu2 %v5325_v4 }
 0x351   : > { %2229 = vmatpush.bf16.msrb.mxu1 %v6082_v38 }
 0x353   : > { %2266 = vmatpush.bf16.msrb.mxu3 %v1635_v5  ;;  %2249 = vmatmul.bf16.vlgmr.msrb.gmra.mxu2 %v4976_v23  ;;  %v6086_v23 = vld [vmem:[#allocation4_spill] sm:$0xff] }
 0x354   : > { %2279 = vmatpush.bf16.msra.mxu0 %v5259_v33  ;;  %2453 = vmatpush.bf16.msra.mxu2 %v5226_v32 }
 0x355   : > { %2230 = vmatpush.bf16.msrb.mxu1 %v6083_v35 }
 0x356   : > { %2267 = vmatmul.bf16.vlgmr.msrb.gmra.mxu3 %v5002_v15 }
 0x357   : > { %2461 = vmatpush.bf16.msra.mxu3 %v6084_v34 }
 0x358   : > { %2280 = vmatpush.bf16.msra.mxu0 %v5273_v36  ;;  %2454 = vmatpush.bf16.msra.mxu2 %v5246_v55 }
 0x359   : > { %2298 = vmatpush.bf16.msra.mxu1 %v6084_v34 }
 0x35a   : > { %2231 = vmatmul.bf16.vlgmr.msrb.gmra.mxu1 %v6085_v11 }
 0x35b   : > { %2462 = vmatpush.bf16.msra.mxu3 %v5312_v58  ;;  %2218 = vmatmul.bf16.gmra.mxu0 %v6086_v23 }
 0x35c   : > { %2281 = vmatpush.bf16.msra.mxu0 %v5267_v43  ;;  %2455 = vmatpush.bf16.msra.mxu2 %v5259_v33 }
 0x35d   : > { %2299 = vmatpush.bf16.msra.mxu1 %v5312_v58 }
 0x35f   : > { %2463 = vmatpush.bf16.msra.mxu3 %v5300_v45 }
 0x360   : > { %2282 = vmatpush.bf16.msra.mxu0 %v5305_v56  ;;  %2456 = vmatpush.bf16.msra.mxu2 %v5273_v36  ;;  %v6088_v36 = vld [vmem:[#allocation49_spill] sm:$0xff] }
 0x361   : > { %2300 = vmatpush.bf16.msra.mxu1 %v5300_v45 }
 0x363   : > { %2464 = vmatpush.bf16.msra.mxu3 %v5334_v63  ;;  %v2088_v15 = vpop.f32.mrf.mxu1  ;;  %v2070_v18 = vpop.f32.mrf.mxu0  ;;  %2254 = vmatmul.bf16.gmra.mxu2 %v5034_v22  ;;  %v2107_v22 = vadd.f32 %v5336_v60, %v6088_v36 }
 0x364   : > { %2283 = vmatpush.bf16.msra.mxu0 %v5342_v20  ;;  %2457 = vmatpush.bf16.msra.mxu2 %v5267_v43  ;;  %v2071_v29 = vadd.f32 %v2070_v18, %v5293_v50 }
 0x365   : > { %2301 = vmatpush.bf16.msra.mxu1 %v5334_v63 }
 0x366   : > { %v2089_v62 = vadd.f32 %v2088_v15, %v2071_v29  ;;  %2272 = vmatmul.bf16.gmra.mxu3 %v6079_v21 }
 0x367   : > { %2465 = vmatpush.bf16.msra.mxu3 %v5354_v8 }
 0x368   : > { %2284 = vmatpush.bf16.msra.mxu0 %v5348_v53  ;;  %2458 = vmatpush.bf16.msra.mxu2 %v5305_v56  ;;  %v2322_v59 = vmul.f32 0.1, %v2089_v62  ;;  %vm2313_vm10 = vcmp.ge.f32.partialorder %v2089_v62, 0.0 }
 0x369   : > { %2302 = vmatpush.bf16.msra.mxu1 %v5354_v8 }
 0x36a   : > { %2236 = vmatmul.bf16.gmra.mxu1 %v6087_v28  ;;  %v2331_v51 = vsel %vm2313_vm10, %v2089_v62, %v2322_v59 }
 0x36b   : > { %v2090_v13 = vpop.f32.mrf.mxu1  ;;  %2285 = vmatmul.bf16.vlgmr.msra.gmra.mxu0 %v5189_v49  ;;  %v2072_v16 = vpop.f32.mrf.mxu0  ;;  %v6089_v49 = vld [vmem:[#allocation48_spill] sm:$0xff] }
 0x36c   : > { %2459 = vmatpush.bf16.msra.mxu2 %v5342_v20  ;;  %v2073_v47 = vadd.f32 %v2072_v16, %v5310_v52  ;;  %v2109_v33 = vadd.f32 %v5356_v19, %v6089_v49 }
 0x36e   : > { %v2091_v12 = vadd.f32 %v2090_v13, %v2073_v47 }
 0x370   : > { %2460 = vmatpush.bf16.msra.mxu2 %v5348_v53  ;;  %v2325_v9 = vmul.f32 0.1, %v2091_v12  ;;  %vm2316_vm12 = vcmp.ge.f32.partialorder %v2091_v12, 0.0 }
 0x372   : > { %v2124_v2 = vpop.f32.mrf.mxu3  ;;  %v2334_v21 = vsel %vm2316_vm12, %v2091_v12, %v2325_v9 }
 0x373   : > { %v2125_v0 = vadd.f32 %v2124_v2, %v2107_v22  ;;  %v2093_v32 = vpop.f32.mrf.mxu1  ;;  %v2075_v1 = vpop.f32.mrf.mxu0  ;;  %2290 = vmatmul.bf16.vlgmr.msra.gmra.mxu2 %v5239_v27  ;;  %v2112_v27 = vadd.f32 %v5374_v42, %v6077_v6 }
 0x374   : > { %v2076_v55 = vadd.f32 %v2075_v1, %v5327_v37 }
 0x376   : > { %v5443_v61 = vadd.f32 %v2093_v32, %v2076_v55  ;;  %2444 = vmatmul.msk.bf16.vlgmr.msra.gmra.mxu3 %vm1982_vm9, %v5234_v25 }
 0x378   : > { %v2328_v23 = vmul.f32 0.1, %v5443_v61  ;;  %vm2319_vm14 = vcmp.ge.f32.partialorder %v5443_v61, 0.0 }
 0x37a   : > { %2443 = vmatmul.msk.bf16.vlgmr.msra.gmra.mxu1 %vm1982_vm9, %v5185_v24  ;;  %v2126_v43 = vpop.f32.mrf.mxu3  ;;  %v2337_v28 = vsel %vm2319_vm14, %v5443_v61, %v2328_v23 }
 0x37b   : > { %v2127_v40 = vadd.f32 %v2126_v43, %v2109_v33  ;;  %v2095_v57 = vpop.f32.mrf.mxu1  ;;  %v2077_v50 = vpop.f32.mrf.mxu0 }
 0x382   : > { %v2129_v54 = vpop.f32.mrf.mxu3 }
 0x383   : > { %v2130_v45 = vadd.f32 %v2129_v54, %v2112_v27 }
 0x38a   : > { %v2131_v56 = vpop.f32.mrf.mxu3 }
 0x3a8   : > { %v2142_v52 = vpop.f32.mrf.mxu0 }
 0x3a9   : > { %v2143_v24 = vadd.f32 %v2142_v52, %v2125_v0 }
 0x3b0   : > { %v2144_v58 = vpop.f32.mrf.mxu0 }
 0x3b1   : > { %v2145_v26 = vadd.f32 %v2144_v58, %v2127_v40 }
 0x3b6   : > { %v2178_v10 = vpop.f32.mrf.mxu2 }
 0x3b7   : > { %v2160_v14 = vpop.f32.mrf.mxu1 }
 0x3b8   : > { %v2161_v30 = vadd.f32 %v2160_v14, %v2143_v24  ;;  %v2147_v37 = vpop.f32.mrf.mxu0 }
 0x3b9   : > { %v2196_v25 = vpop.f32.mrf.mxu3  ;;  %v2148_v17 = vadd.f32 %v2147_v37, %v2130_v45 }
 0x3ba   : > { %v2179_v4 = vadd.f32 %v2178_v10, %v2161_v30 }
 0x3bc   : > { %v2197_v7 = vadd.f32 %v2196_v25, %v2179_v4 }
 0x3be   : > { %vm2314_vm11 = vcmp.ge.f32.partialorder %v2197_v7, 0.0  ;;  %v2323_v63 = vmul.f32 0.1, %v2197_v7  ;;  %v2180_v39 = vpop.f32.mrf.mxu2 }
 0x3bf   : > { %v2162_v60 = vpop.f32.mrf.mxu1 }
 0x3c0   : > { %v2163_v46 = vadd.f32 %v2162_v60, %v2145_v26  ;;  %v2332_v20 = vsel %vm2314_vm11, %v2197_v7, %v2323_v63  ;;  %v2149_v8 = vpop.f32.mrf.mxu0 }
 0x3c1   : > { %v2340_v53 = vpack.c.bf16 %v2332_v20, %v2331_v51  ;;  %v2198_v19 = vpop.f32.mrf.mxu3 }
 0x3c2   : > { %v2181_v31 = vadd.f32 %v2180_v39, %v2163_v46 }
 0x3c3   : > { %2346 = vst [vmem:[%s5457_s16] sm:$0xff] %v2340_v53 }
 0x3c4   : > { %v2199_v5 = vadd.f32 %v2198_v19, %v2181_v31 }
 0x3c6   : > { %vm2317_vm13 = vcmp.ge.f32.partialorder %v2199_v5, 0.0  ;;  %v2326_v42 = vmul.f32 0.1, %v2199_v5  ;;  %v2183_v41 = vpop.f32.mrf.mxu2 }
 0x3c7   : > { %v2165_v3 = vpop.f32.mrf.mxu1 }
 0x3c8   : > { %v2166_v44 = vadd.f32 %v2165_v3, %v2148_v17  ;;  %v2335_v48 = vsel %vm2317_vm13, %v2199_v5, %v2326_v42  ;;  %v2214_v35 = vpop.f32.mrf.mxu0 }
 0x3c9   : > { %v2342_v38 = vpack.c.bf16 %v2335_v48, %v2334_v21  ;;  %v2201_v11 = vpop.f32.mrf.mxu3  ;;  %v2215_v50 = vadd.f32 %v2214_v35, %v6088_v36 }
 0x3ca   : > { %v2184_v34 = vadd.f32 %v2183_v41, %v2166_v44 }
 0x3cb   : > { %2349 = vst [vmem:[%s5457_s16 + $0xc] sm:$0xff] %v2342_v38 }
 0x3cc   : > { %v2202_v15 = vadd.f32 %v2201_v11, %v2184_v34 }
 0x3ce   : > { %vm2320_vm15 = vcmp.ge.f32.partialorder %v2202_v15, 0.0  ;;  %v2329_v29 = vmul.f32 0.1, %v2202_v15  ;;  %v2185_v62 = vpop.f32.mrf.mxu2 }
 0x3cf   : > { %v2167_v18 = vpop.f32.mrf.mxu1 }
 0x3d0   : > { %v2338_v13 = vsel %vm2320_vm15, %v2202_v15, %v2329_v29  ;;  %v2216_v47 = vpop.f32.mrf.mxu0 }
 0x3d1   : > { %v2344_v16 = vpack.c.bf16 %v2338_v13, %v2337_v28  ;;  %v2203_v12 = vpop.f32.mrf.mxu3  ;;  %v2217_v24 = vadd.f32 %v2216_v47, %v6089_v49 }
 0x3d3   : > { %2351 = vst [vmem:[%s5457_s16 + $0x18] sm:$0xff] %v2344_v16 }
 0x3d6   : > { %v2250_v2 = vpop.f32.mrf.mxu2 }
 0x3d7   : > { %v2232_v22 = vpop.f32.mrf.mxu1 }
 0x3d8   : > { %v2219_v0 = vpop.f32.mrf.mxu0  ;;  %v2233_v27 = vadd.f32 %v2232_v22, %v2215_v50 }
 0x3d9   : > { %v2268_v32 = vpop.f32.mrf.mxu3  ;;  %v2220_v58 = vadd.f32 %v2219_v0, %v6077_v6 }
 0x3da   : > { %v2251_v56 = vadd.f32 %v2250_v2, %v2233_v27 }
 0x3dc   : > { %v2269_v14 = vadd.f32 %v2268_v32, %v2251_v56 }
 0x3de   : > { %v2252_v55 = vpop.f32.mrf.mxu2 }
 0x3df   : > { %v2234_v1 = vpop.f32.mrf.mxu1 }
 0x3e0   : > { %v2221_v33 = vpop.f32.mrf.mxu0  ;;  %v2235_v10 = vadd.f32 %v2234_v1, %v2217_v24 }
 0x3e1   : > { %v2270_v43 = vpop.f32.mrf.mxu3 }
 0x3e2   : > { %v2253_v36 = vadd.f32 %v2252_v55, %v2235_v10 }
 0x3e4   : > { %v2271_v51 = vadd.f32 %v2270_v43, %v2253_v36 }
 0x3e6   : > { %v2255_v57 = vpop.f32.mrf.mxu2 }
 0x3e7   : > { %v2237_v40 = vpop.f32.mrf.mxu1 }
 0x3e8   : > { %v2286_v45 = vpop.f32.mrf.mxu0  ;;  %v2238_v30 = vadd.f32 %v2237_v40, %v2220_v58 }
 0x3e9   : > { %v2273_v54 = vpop.f32.mrf.mxu3  ;;  %v2287_v4 = vadd.f32 %v2286_v45, %v2269_v14 }
 0x3ea   : > { %v2256_v7 = vadd.f32 %v2255_v57, %v2238_v30 }
 0x3ec   : > { %v2274_v60 = vadd.f32 %v2273_v54, %v2256_v7 }
 0x3ee   : > { %v2257_v52 = vpop.f32.mrf.mxu2 }
 0x3ef   : > { %v2239_v61 = vpop.f32.mrf.mxu1 }
 0x3f0   : > { %v2288_v46 = vpop.f32.mrf.mxu0 }
 0x3f1   : > { %v2275_v37 = vpop.f32.mrf.mxu3  ;;  %v2289_v39 = vadd.f32 %v2288_v46, %v2271_v51 }
 0x3f6   : > { %v2291_v63 = vpop.f32.mrf.mxu2 }
 0x3f7   : > { %v2304_v25 = vpop.f32.mrf.mxu1  ;;  %v2292_v49 = vadd.f32 %v2291_v63, %v2274_v60 }
 0x3f8   : > { %v2305_v59 = vadd.f32 %v2304_v25, %v2287_v4 }
 0x3f9   : > { %v2309_v53 = vpop.f32.mrf.mxu3 }
 0x3fa   : > { %vm2315_vm0 = vcmp.ge.f32.partialorder %v2305_v59, 0.0  ;;  %v2324_v26 = vmul.f32 0.1, %v2305_v59  ;;  %v2310_v31 = vadd.f32 %v2309_v53, %v2292_v49 }
 0x3fc   : > { %v2333_v20 = vsel %vm2315_vm0, %v2305_v59, %v2324_v26  ;;  %vm2321_vm2 = vcmp.ge.f32.partialorder %v2310_v31, 0.0  ;;  %v2330_v9 = vmul.f32 0.1, %v2310_v31 }
 0x3fd   : > { %v2341_v6 = vpack.c.bf16 %v2333_v20, %v2333_v20 }
 0x3fe   : > { %v2293_v17 = vpop.f32.mrf.mxu2  ;;  %v2339_v42 = vsel %vm2321_vm2, %v2310_v31, %v2330_v9 }
 0x3ff   : > { %2348 = vst.msk [vmem:[%s5457_s16 + $0x8] sm:$0xf] %vm2347_vm1, %v2341_v6  ;;  %v2306_v8 = vpop.f32.mrf.mxu1  ;;  %v2345_v3 = vpack.c.bf16 %v2339_v42, %v2339_v42 }
 0x400   : > { %v2307_v19 = vadd.f32 %v2306_v8, %v2289_v39 }
 0x401   : > { %2352 = vst.msk [vmem:[%s5457_s16 + $0x20] sm:$0xf] %vm2347_vm1, %v2345_v3  ;;  %v2311_v48 = vpop.f32.mrf.mxu3 }
 0x402   : > { %vm2318_vm3 = vcmp.ge.f32.partialorder %v2307_v19, 0.0  ;;  %v2327_v5 = vmul.f32 0.1, %v2307_v19 }
 0x404   : > { %v2336_v44 = vsel %vm2318_vm3, %v2307_v19, %v2327_v5 }
 0x405   : > { %v2343_v21 = vpack.c.bf16 %v2336_v44, %v2336_v44 }
 0x407   : > { %2350 = vst.msk [vmem:[%s5457_s16 + $0x14] sm:$0xf] %vm2347_vm1, %v2343_v21 }
 0x408 PF: > { %s13_s12 = sadd.s32 1, %s3095_s12  }
 0x409   : > { %p10_p4 = scmp.ge.s32.totalorder %s13_s12, 6  }
 0x40b   :  { %12 = sbr.rel (!%p10_p4) target bundleno = 1 (0x1), region = 62 }

// kernel: sisr_forward.45
= control target key start
LH: loop header
LB: loop body
LE: loop exit
PB: predicated region body
PF: predicated region fallthrough
CT: control target
= control target key end

     0   :  { %s536_s15 = smov 0   ;;  %s593_s0 = inlined_call_operand.vmem [shape: bf16[4,104,256], index: 0, kind: input, shape index: {}]   ;;  %s594_s1 = inlined_call_operand.vmem [shape: bf16[8,104], index: 1, kind: input, shape index: {}]   ;;  %s595_s2 = inlined_call_operand.vmem [shape: f32[8,1], index: 2, kind: input, shape index: {}]   ;;  %s596_s3 = inlined_call_operand.vmem [shape: bf16[4,8,256], index: 3, kind: input, shape index: {}]   ;;  %s597_s4 = inlined_call_operand.vmem [shape: bf16[4,8,256], index: 4, kind: output, shape index: {}]  }
   0x1 LB: > { %s415_s16 = sadd.s32 4294967295, %s508_s15   ;;  %p419_p0 = scmp.ge.s32.totalorder %s508_s15, 1  ;;  %s508_s15 = sphi %s536_s15, %s14_s15  }
   0x2   : > { %p172_p1 = scmp.lt.s32.totalorder %s508_s15, 5 }
   0x4   : > { %p173_p2 = pnand %p419_p0, %p172_p1 }
   0x5   : > { %p203_p3 = scmp.lt.s32.totalorder (!%p173_p2), %s415_s16, 3 }
   0x6   : > { %176 = sbr.rel (%p173_p2) target bundleno = 182 (0xb6), region = 36 }
   0xb   : > { %s599_s16 = smov (!%p203_p3, %s415_s16), 3  ;;  %vm308_vm0 = vcmask 1043456   ;;  %v233_v17 = vld [vmem:[%s595_s2] sm:$0xff]  ;;  %v510_v18 = vmov 0   ;;  %vm304_vm1 = vcmask 850944  }
   0xc   : > { %s491_s17 = smul.u32 104, %s599_s16  ;;  %501 = vset.pattern.permute.xlu0 %v510_v18  ;;  %v232_v45 = vld [vmem:[%s594_s1] sm:$0xf]  ;;  %s477_s25 = sshll.u32 %s599_s16, 3 }
   0xd   : > { %236 = vperm.xlu0 %501, %v233_v17   ;;  %s212_s28 = scalar_lea.vmem %s596_s3, %s477_s25  ;;  %s217_s5 = scalar_lea.vmem %s597_s4, %s477_s25 }
   0xe   : > { %s550_s20 = scalar_lea.vmem %s593_s0, %s491_s17  ;;  %v341_v46 = vld [vmem:[%s212_s28] sm:$0xff] }
   0xf   : > { %v231_v0 = vld [vmem:[%s550_s20 + $0x60] sm:$0xff]  ;;  %v467_v3 = vld [vmem:[%s550_s20 + $0x50] sm:$0xf]  ;;  %v490_v6 = vld [vmem:[%s550_s20 + $0x54] sm:$0xf0]  ;;  %v342_v48 = vunpack.c.l.bf16 %v341_v46  ;;  %v343_v49 = vunpack.c.h.bf16 %v341_v46 }
  0x10   : > { %v276_v1 = vunpack.c.l.b16 %v231_v0  ;;  %v277_v2 = vunpack.c.h.b16 %v231_v0  ;;  %v489_v7 = vld [vmem:[%s550_s20 + $0x54] sm:$0xf]  ;;  %v469_v8 = vld [vmem:[%s550_s20 + $0x58] sm:$0xf0]  ;;  %v468_v11 = vor.u32 %v490_v6, %v467_v3  ;;  %v459_v13 = vld [vmem:[%s550_s20 + $0x40] sm:$0xf] }
  0x11   : > { %v472_v12 = vor.u32 %v489_v7, %v469_v8  ;;  %v488_v14 = vld [vmem:[%s550_s20 + $0x44] sm:$0xf0]  ;;  %v487_v15 = vld [vmem:[%s550_s20 + $0x44] sm:$0xf]  ;;  %v461_v16 = vld [vmem:[%s550_s20 + $0x48] sm:$0xf0] }
  0x12   : > { %v290_v4 = vpack.c.b16 %v276_v1, %v276_v1  ;;  %v291_v5 = vpack.c.b16 %v277_v2, %v277_v2  ;;  %v460_v19 = vor.u32 %v488_v14, %v459_v13  ;;  %v464_v20 = vor.u32 %v487_v15, %v461_v16  ;;  %v451_v21 = vld [vmem:[%s550_s20 + $0x30] sm:$0xf]  ;;  %v486_v22 = vld [vmem:[%s550_s20 + $0x34] sm:$0xf0]  ;;  %v485_v23 = vld [vmem:[%s550_s20 + $0x34] sm:$0xf] }
  0x13   : > { %v453_v24 = vld [vmem:[%s550_s20 + $0x38] sm:$0xf0]  ;;  %v452_v25 = vor.u32 %v486_v22, %v451_v21  ;;  %v443_v27 = vld [vmem:[%s550_s20 + $0x20] sm:$0xf]  ;;  %v484_v28 = vld [vmem:[%s550_s20 + $0x24] sm:$0xf0] }
  0x14   : > { %v310_v9 = vsel %vm308_vm0, %v290_v4, 0  ;;  %v313_v10 = vsel %vm308_vm0, %v291_v5, 0  ;;  %v456_v26 = vor.u32 %v485_v23, %v453_v24  ;;  %v483_v29 = vld [vmem:[%s550_s20 + $0x24] sm:$0xf]  ;;  %v445_v30 = vld [vmem:[%s550_s20 + $0x28] sm:$0xf0]  ;;  %v444_v31 = vor.u32 %v484_v28, %v443_v27 }
  0x15   : > { %316 = vmatpush.bf16.msra.mxu0 %v310_v9  ;;  %329 = vmatpush.bf16.msra.mxu1 %v313_v10  ;;  %v448_v32 = vor.u32 %v483_v29, %v445_v30  ;;  %v435_v33 = vld [vmem:[%s550_s20 + $0x10] sm:$0xf]  ;;  %v482_v34 = vld [vmem:[%s550_s20 + $0x14] sm:$0xf0]  ;;  %v481_v35 = vld [vmem:[%s550_s20 + $0x14] sm:$0xf] }
  0x16   : > { %v437_v36 = vld [vmem:[%s550_s20 + $0x18] sm:$0xf0]  ;;  %v436_v37 = vor.u32 %v482_v34, %v435_v33  ;;  %v427_v39 = vld [vmem:[%s550_s20] sm:$0xf]  ;;  %v480_v40 = vld [vmem:[%s550_s20 + $0x4] sm:$0xf0] }
  0x17   : > { %v440_v38 = vor.u32 %v481_v35, %v437_v36  ;;  %v479_v41 = vld [vmem:[%s550_s20 + $0x4] sm:$0xf]  ;;  %v429_v42 = vld [vmem:[%s550_s20 + $0x8] sm:$0xf0]  ;;  %v428_v43 = vor.u32 %v480_v40, %v427_v39 }
  0x18   : > { %v432_v44 = vor.u32 %v479_v41, %v429_v42 }
  0x19   : > { %317 = vmatpush.bf16.msra.mxu0 %v468_v11  ;;  %330 = vmatpush.bf16.msra.mxu1 %v472_v12 }
  0x1d   : > { %318 = vmatpush.bf16.msra.mxu0 %v460_v19  ;;  %331 = vmatpush.bf16.msra.mxu1 %v464_v20 }
  0x21   : > { %319 = vmatpush.bf16.msra.mxu0 %v452_v25  ;;  %332 = vmatpush.bf16.msra.mxu1 %v456_v26 }
  0x25   : > { %320 = vmatpush.bf16.msra.mxu0 %v444_v31  ;;  %333 = vmatpush.bf16.msra.mxu1 %v448_v32 }
  0x29   : > { %321 = vmatpush.bf16.msra.mxu0 %v436_v37  ;;  %334 = vmatpush.bf16.msra.mxu1 %v440_v38 }
  0x2d   : > { %322 = vmatpush.bf16.msra.mxu0 %v428_v43  ;;  %335 = vmatpush.bf16.msra.mxu1 %v432_v44 }
  0x30   : > { %473 = vmatmul.msk.bf16.vlgmr.msra.gmra.mxu0 %vm304_vm1, %v232_v45  ;;  %474 = vmatmul.msk.bf16.vlgmr.msra.gmra.mxu1 %vm304_vm1, %v232_v45 }
  0x7f   : > { %v237_v47 = vpop.permute.xlu0 %236 }
  0xad   : > { %v324_v50 = vpop.f32.mrf.mxu0  ;;  %v337_v51 = vpop.f32.mrf.mxu1 }
  0xae   : > { %v325_v52 = vadd.f32 %v324_v50, %v237_v47  ;;  %v338_v53 = vadd.f32 %v337_v51, %v237_v47 }
  0xb0   : > { %v344_v54 = vadd.f32 %v342_v48, %v325_v52  ;;  %v345_v55 = vadd.f32 %v343_v49, %v338_v53 }
  0xb2   : > { %v346_v56 = vpack.c.bf16 %v345_v55, %v344_v54 }
  0xb4   : > { %347 = vst [vmem:[%s217_s5] sm:$0xff] %v346_v56 }
  0xb5   : > { %v326_v57 = vpop.f32.mrf.mxu0  ;;  %v339_v58 = vpop.f32.mrf.mxu1 }
  0xb6 PF: > { %s14_s15 = sadd.s32 1, %s508_s15  }
  0xb7   : > { %p11_p4 = scmp.ge.s32.totalorder %s14_s15, 6  }
  0xb9   :  { %13 = sbr.rel (!%p11_p4) target bundleno = 1 (0x1), region = 69 }

// kernel: sisr_forward.61
= control target key start
LH: loop header
LB: loop body
LE: loop exit
PB: predicated region body
PF: predicated region fallthrough
CT: control target
= control target key end

     0   :  { %s364_s12 = smov 0   ;;  %s391_s0 = inlined_call_operand.vmem [shape: bf16[4,32,256], index: 0, kind: input, shape index: {}]   ;;  %s392_s1 = inlined_call_operand.vmem [shape: bf16[8,32], index: 1, kind: input, shape index: {}]   ;;  %s393_s2 = inlined_call_operand.vmem [shape: f32[8,1], index: 2, kind: input, shape index: {}]   ;;  %s394_s3 = inlined_call_operand.vmem [shape: bf16[4,8,256], index: 3, kind: output, shape index: {}]  }
   0x1 LB: > { %s290_s13 = sadd.s32 4294967295, %s341_s12   ;;  %p294_p0 = scmp.ge.s32.totalorder %s341_s12, 1  ;;  %s341_s12 = sphi %s364_s12, %s13_s12  }
   0x2   : > { %p137_p1 = scmp.lt.s32.totalorder %s341_s12, 5 }
   0x4   : > { %p138_p2 = pnand %p294_p0, %p137_p1 }
   0x5   : > { %p161_p3 = scmp.lt.s32.totalorder (!%p138_p2), %s290_s13, 3 }
   0x6   : > { %141 = sbr.rel (%p138_p2) target bundleno = 159 (0x9f), region = 32 }
   0xb   : > { %v177_v0 = vld [vmem:[%s393_s2] sm:$0xff]  ;;  %v343_v1 = vmov 0   ;;  %s396_s13 = smov (!%p161_p3, %s290_s13), 3  ;;  %vm203_vm0 = vcmask 261120  }
   0xc   : > { %334 = vset.pattern.permute.xlu0 %v343_v1  ;;  %s319_s16 = sshll.u32 %s396_s13, 5  ;;  %v176_v14 = vld [vmem:[%s392_s1] sm:$0xf]  ;;  %s320_s22 = sshll.u32 %s396_s13, 3 }
   0xd   : > { %180 = vperm.xlu0 %334, %v177_v0   ;;  %s165_s19 = scalar_lea.vmem %s391_s0, %s319_s16  ;;  %s170_s25 = scalar_lea.vmem %s394_s3, %s320_s22 }
   0xe   : > { %v309_v2 = vld [vmem:[%s165_s19 + $0x10] sm:$0xf]  ;;  %v324_v3 = vld [vmem:[%s165_s19 + $0x14] sm:$0xf0]  ;;  %v323_v4 = vld [vmem:[%s165_s19 + $0x14] sm:$0xf] }
   0xf   : > { %v310_v5 = vor.u32 %v324_v3, %v309_v2  ;;  %v311_v6 = vld [vmem:[%s165_s19 + $0x18] sm:$0xf0]  ;;  %v301_v7 = vld [vmem:[%s165_s19] sm:$0xf]  ;;  %v322_v8 = vld [vmem:[%s165_s19 + $0x4] sm:$0xf0] }
  0x10   : > { %v314_v9 = vor.u32 %v323_v4, %v311_v6  ;;  %v321_v10 = vld [vmem:[%s165_s19 + $0x4] sm:$0xf]  ;;  %v303_v11 = vld [vmem:[%s165_s19 + $0x8] sm:$0xf0]  ;;  %v302_v12 = vor.u32 %v322_v8, %v301_v7 }
  0x11   : > { %213 = vmatpush.bf16.msra.mxu0 %v310_v5  ;;  %v306_v13 = vor.u32 %v321_v10, %v303_v11 }
  0x12   : > { %226 = vmatpush.bf16.msra.mxu1 %v314_v9 }
  0x15   : > { %214 = vmatpush.bf16.msra.mxu0 %v302_v12 }
  0x16   : > { %227 = vmatpush.bf16.msra.mxu1 %v306_v13 }
  0x18   : > { %315 = vmatmul.msk.bf16.vlgmr.msra.gmra.mxu0 %vm203_vm0, %v176_v14 }
  0x19   : > { %316 = vmatmul.msk.bf16.vlgmr.msra.gmra.mxu1 %vm203_vm0, %v176_v14 }
  0x7f   : > { %v181_v15 = vpop.permute.xlu0 %180 }
  0x95   : > { %v216_v16 = vpop.f32.mrf.mxu0 }
  0x96   : > { %v217_v17 = vadd.f32 %v216_v16, %v181_v15  ;;  %v229_v18 = vpop.f32.mrf.mxu1 }
  0x97   : > { %v230_v19 = vadd.f32 %v229_v18, %v181_v15 }
  0x99   : > { %v233_v20 = vpack.c.bf16 %v230_v19, %v217_v17 }
  0x9b   : > { %234 = vst [vmem:[%s170_s25] sm:$0xff] %v233_v20 }
  0x9d   : > { %v218_v21 = vpop.f32.mrf.mxu0 }
  0x9e   : > { %v231_v22 = vpop.f32.mrf.mxu1 }
  0x9f PF: > { %s13_s12 = sadd.s32 1, %s341_s12  }
  0xa0   : > { %p10_p4 = scmp.ge.s32.totalorder %s13_s12, 6  }
  0xa2   :  { %12 = sbr.rel (!%p10_p4) target bundleno = 1 (0x1), region = 62 }

// kernel: sisr_forward.62
= control target key start
LH: loop header
LB: loop body
LE: loop exit
PB: predicated region body
PF: predicated region fallthrough
CT: control target
= control target key end

     0   :  { %s340_s9 = smov 0   ;;  %s363_s0 = inlined_call_operand.vmem [shape: bf16[4,8,256], index: 0, kind: input, shape index: {}]   ;;  %s364_s1 = inlined_call_operand.vmem [shape: bf16[32,8], index: 1, kind: input, shape index: {}]   ;;  %s365_s2 = inlined_call_operand.vmem [shape: bf16[4,32,256], index: 2, kind: output, shape index: {}]  }
   0x1 LB: > { %s280_s10 = sadd.s32 4294967295, %s323_s9   ;;  %p284_p0 = scmp.ge.s32.totalorder %s323_s9, 1  ;;  %s323_s9 = sphi %s340_s9, %s12_s9  }
   0x2   : > { %p112_p1 = scmp.lt.s32.totalorder %s323_s9, 5 }
   0x4   : > { %p113_p2 = pnand %p284_p0, %p112_p1 }
   0x5   : > { %p134_p3 = scmp.lt.s32.totalorder (!%p113_p2), %s280_s10, 3 }
   0x6   : > { %116 = sbr.rel (%p113_p2) target bundleno = 167 (0xa7), region = 28 }
   0xb   : > { %s367_s10 = smov (!%p134_p3, %s280_s10), 3  ;;  %vm172_vm0 = vcmask 1043456   ;;  %v305_v7 = vld [vmem:[%s364_s1] sm:$0xff]  ;;  %v306_v8 = vld [vmem:[%s364_s1 + $0x8] sm:$0xff]  ;;  %vm165_vm1 = vcmask 64512  }
   0xc   : > { %s303_s11 = sshll.u32 %s367_s10, 3  ;;  %s304_s19 = sshll.u32 %s367_s10, 5 }
   0xd   : > { %s138_s14 = scalar_lea.vmem %s363_s0, %s303_s11  ;;  %s143_s22 = scalar_lea.vmem %s365_s2, %s304_s19 }
   0xe   : > { %v145_v0 = vld [vmem:[%s138_s14] sm:$0xff] }
   0xf   : > { %v161_v1 = vunpack.c.l.b16 %v145_v0  ;;  %v162_v2 = vunpack.c.h.b16 %v145_v0 }
  0x11   : > { %v163_v3 = vpack.c.b16 %v161_v1, %v161_v1  ;;  %v164_v4 = vpack.c.b16 %v162_v2, %v162_v2 }
  0x13   : > { %v174_v5 = vsel %vm172_vm0, %v163_v3, 0  ;;  %v177_v6 = vsel %vm172_vm0, %v164_v4, 0 }
  0x14   : > { %186 = vmatpush.bf16.msra.mxu0 %v174_v5  ;;  %307 = vmatpush.bf16.msra.mxu2 %v174_v5 }
  0x15   : > { %205 = vmatpush.bf16.msra.mxu1 %v177_v6  ;;  %308 = vmatpush.bf16.msra.mxu3 %v177_v6 }
  0x17   : > { %297 = vmatmul.msk.bf16.vlgmr.msra.gmra.mxu0 %vm165_vm1, %v305_v7  ;;  %298 = vmatmul.msk.bf16.vlgmr.msra.gmra.mxu2 %vm165_vm1, %v306_v8 }
  0x18   : > { %299 = vmatmul.msk.bf16.vlgmr.msra.gmra.mxu1 %vm165_vm1, %v305_v7  ;;  %300 = vmatmul.msk.bf16.vlgmr.msra.gmra.mxu3 %vm165_vm1, %v306_v8 }
  0x94   : > { %v188_v9 = vpop.f32.mrf.mxu0 }
  0x95   : > { %v207_v10 = vpop.f32.mrf.mxu1 }
  0x96   : > { %v217_v11 = vpack.c.bf16 %v207_v10, %v188_v9 }
  0x98   : > { %221 = vst [vmem:[%s143_s22] sm:$0xff] %v217_v11 }
  0x9a   : > { %v193_v12 = vpop.f32.mrf.mxu2 }
  0x9b   : > { %v212_v13 = vpop.f32.mrf.mxu3 }
  0x9c   : > { %v219_v14 = vpack.c.bf16 %v212_v13, %v193_v12  ;;  %v190_v15 = vpop.f32.mrf.mxu0 }
  0x9d   : > { %v209_v16 = vpop.f32.mrf.mxu1 }
  0x9e   : > { %223 = vst [vmem:[%s143_s22 + $0x10] sm:$0xff] %v219_v14  ;;  %v218_v17 = vpack.c.bf16 %v209_v16, %v190_v15 }
  0xa0   : > { %222 = vst [vmem:[%s143_s22 + $0x8] sm:$0xff] %v218_v17 }
  0xa2   : > { %v195_v18 = vpop.f32.mrf.mxu2 }
  0xa3   : > { %v214_v19 = vpop.f32.mrf.mxu3 }
  0xa4   : > { %v220_v20 = vpack.c.bf16 %v214_v19, %v195_v18 }
  0xa6   : > { %224 = vst [vmem:[%s143_s22 + $0x18] sm:$0xff] %v220_v20 }
  0xa7 PF: > { %s12_s9 = sadd.s32 1, %s323_s9  }
  0xa8   : > { %p9_p4 = scmp.ge.s32.totalorder %s12_s9, 6  }
  0xaa   :  { %11 = sbr.rel (!%p9_p4) target bundleno = 1 (0x1), region = 58 }

// kernel: sisr_forward.63
= control target key start
LH: loop header
LB: loop body
LE: loop exit
PB: predicated region body
PF: predicated region fallthrough
CT: control target
= control target key end

     0   :  { %s434_s9 = smov 0   ;;  %s475_s0 = inlined_call_operand.vmem [shape: bf16[4,8,1024], index: 0, kind: input, shape index: {}]   ;;  %s476_s1 = inlined_call_operand.vmem [shape: bf16[1,8], index: 1, kind: input, shape index: {}]   ;;  %s477_s2 = inlined_call_operand.vmem [shape: f32[4,1,1024], index: 2, kind: output, shape index: {}]  }
   0x1 LB: > { %s384_s10 = sadd.s32 4294967295, %s417_s9   ;;  %p388_p0 = scmp.ge.s32.totalorder %s417_s9, 1  ;;  %s417_s9 = sphi %s434_s9, %s12_s9  }
   0x2   : > { %p112_p1 = scmp.lt.s32.totalorder %s417_s9, 5 }
   0x4   : > { %p113_p2 = pnand %p388_p0, %p112_p1 }
   0x5   : > { %p133_p3 = scmp.lt.s32.totalorder (!%p113_p2), %s384_s10, 3 }
   0x6   : > { %116 = sbr.rel (%p113_p2) target bundleno = 180 (0xb4), region = 28 }
   0xb   : > { %s479_s10 = smov (!%p133_p3, %s384_s10), 3  ;;  %vm172_vm0 = vcmask 1043456   ;;  %v147_v24 = vld [vmem:[%s476_s1] sm:$0x1]  ;;  %vm168_vm1 = vcmask 64512   ;;  %vm318_vm2 = vcmask 1042434  }
   0xc   : > { %s402_s11 = sshll.u32 %s479_s10, 5  ;;  %vm322_vm3 = vcmask 1044484   ;;  %s391_s17 = sshll.u32 %s479_s10, 3  ;;  %vm316_vm4 = vcmask 1040384   ;;  %vm320_vm5 = vcmask 1041408   ;;  %vm324_vm6 = vcmask 1046534  }
   0xd   : > { %s137_s14 = scalar_lea.vmem %s475_s0, %s402_s11  ;;  %vm326_vm7 = vcmask 1045508   ;;  %s141_s20 = scalar_lea.vmem %s477_s2, %s391_s17 }
   0xe   : > { %v143_v0 = vld [vmem:[%s137_s14] sm:$0xff]  ;;  %v144_v1 = vld [vmem:[%s137_s14 + $0x8] sm:$0xff]  ;;  %v146_v2 = vld [vmem:[%s137_s14 + $0x18] sm:$0xff] }
   0xf   : > { %v152_v3 = vunpack.c.l.b16 %v143_v0  ;;  %v153_v4 = vunpack.c.h.b16 %v143_v0  ;;  %v154_v5 = vunpack.c.l.b16 %v144_v1  ;;  %v155_v6 = vunpack.c.h.b16 %v144_v1  ;;  %v145_v7 = vld [vmem:[%s137_s14 + $0x10] sm:$0xff] }
  0x10   : > { %v158_v8 = vunpack.c.l.b16 %v146_v2  ;;  %v159_v9 = vunpack.c.h.b16 %v146_v2  ;;  %v156_v10 = vunpack.c.l.b16 %v145_v7  ;;  %v157_v11 = vunpack.c.h.b16 %v145_v7 }
  0x11   : > { %v160_v12 = vpack.c.b16 %v152_v3, %v152_v3  ;;  %v161_v13 = vpack.c.b16 %v153_v4, %v153_v4  ;;  %v162_v14 = vpack.c.b16 %v154_v5, %v154_v5  ;;  %v163_v15 = vpack.c.b16 %v155_v6, %v155_v6 }
  0x12   : > { %v166_v16 = vpack.c.b16 %v158_v8, %v158_v8  ;;  %v167_v17 = vpack.c.b16 %v159_v9, %v159_v9  ;;  %v164_v18 = vpack.c.b16 %v156_v10, %v156_v10  ;;  %v165_v19 = vpack.c.b16 %v157_v11, %v157_v11 }
  0x13   : > { %v174_v20 = vsel %vm172_vm0, %v160_v12, 0  ;;  %v177_v21 = vsel %vm172_vm0, %v161_v13, 0  ;;  %v180_v22 = vsel %vm172_vm0, %v162_v14, 0  ;;  %v183_v23 = vsel %vm172_vm0, %v163_v15, 0 }
  0x14   : > { %204 = vmatpush.bf16.msra.mxu0 %v174_v20  ;;  %217 = vmatpush.bf16.msra.mxu1 %v177_v21  ;;  %v192_v25 = vsel %vm172_vm0, %v166_v16, 0  ;;  %v195_v26 = vsel %vm172_vm0, %v167_v17, 0  ;;  %v186_v27 = vsel %vm172_vm0, %v164_v18, 0  ;;  %v189_v28 = vsel %vm172_vm0, %v165_v19, 0 }
  0x15   : > { %230 = vmatpush.bf16.msra.mxu2 %v180_v22  ;;  %243 = vmatpush.bf16.msra.mxu3 %v183_v23 }
  0x17   : > { %392 = vmatmul.msk.bf16.vlgmr.msra.gmra.mxu0 %vm168_vm1, %v147_v24  ;;  %393 = vmatmul.msk.bf16.vlgmr.msra.gmra.mxu1 %vm168_vm1, %v147_v24 }
  0x18   : > { %394 = vmatmul.msk.bf16.vlgmr.msra.gmra.mxu2 %vm168_vm1, %v147_v24  ;;  %395 = vmatmul.msk.bf16.vlgmr.msra.gmra.mxu3 %vm168_vm1, %v147_v24 }
  0x19   : > { %282 = vmatpush.bf16.msrb.mxu2 %v192_v25  ;;  %295 = vmatpush.bf16.msrb.mxu3 %v195_v26 }
  0x1a   : > { %256 = vmatpush.bf16.msrb.mxu0 %v186_v27  ;;  %269 = vmatpush.bf16.msrb.mxu1 %v189_v28 }
  0x27   : > { %396 = vmatmul.msk.bf16.vlgmr.msrb.gmra.mxu0 %vm168_vm1, %v147_v24  ;;  %397 = vmatmul.msk.bf16.vlgmr.msrb.gmra.mxu1 %vm168_vm1, %v147_v24 }
  0x28   : > { %398 = vmatmul.msk.bf16.vlgmr.msrb.gmra.mxu2 %vm168_vm1, %v147_v24  ;;  %399 = vmatmul.msk.bf16.vlgmr.msrb.gmra.mxu3 %vm168_vm1, %v147_v24 }
  0x94   : > { %v206_v29 = vpop.f32.mrf.mxu0  ;;  %v219_v30 = vpop.f32.mrf.mxu1 }
  0x95   : > { %v309_v43 = vrot.slane %v219_v30, 7 }
  0x97   : > { %v317_v52 = vsel %vm316_vm4, %v206_v29, %v309_v43 }
  0x9b   : > { %v232_v31 = vpop.f32.mrf.mxu2  ;;  %v245_v32 = vpop.f32.mrf.mxu3 }
  0x9c   : > { %v208_v33 = vpop.f32.mrf.mxu0  ;;  %v221_v34 = vpop.f32.mrf.mxu1  ;;  %v310_v39 = vrot.slane %v232_v31, 6  ;;  %v311_v40 = vrot.slane %v245_v32, 5 }
  0x9e   : > { %v319_v46 = vsel %vm318_vm2, %v310_v39, %v311_v40 }
  0x9f   : > { %v321_v54 = vsel %vm320_vm5, %v317_v52, %v319_v46 }
  0xa3   : > { %v234_v35 = vpop.f32.mrf.mxu2  ;;  %v247_v36 = vpop.f32.mrf.mxu3 }
  0xa4   : > { %v258_v37 = vpop.f32.mrf.mxu0  ;;  %v271_v38 = vpop.f32.mrf.mxu1 }
  0xa5   : > { %v312_v41 = vrot.slane %v258_v37, 4  ;;  %v313_v42 = vrot.slane %v271_v38, 3 }
  0xa7   : > { %v323_v47 = vsel %vm322_vm3, %v312_v41, %v313_v42 }
  0xab   : > { %v284_v44 = vpop.f32.mrf.mxu2  ;;  %v297_v45 = vpop.f32.mrf.mxu3 }
  0xac   : > { %v314_v48 = vrot.slane %v284_v44, 2  ;;  %v315_v49 = vrot.slane %v297_v45, 1  ;;  %v260_v50 = vpop.f32.mrf.mxu0  ;;  %v273_v51 = vpop.f32.mrf.mxu1 }
  0xae   : > { %v325_v53 = vsel %vm324_vm6, %v314_v48, %v315_v49 }
  0xaf   : > { %v327_v55 = vsel %vm326_vm7, %v323_v47, %v325_v53 }
  0xb0   : > { %v328_v56 = vsel %vm172_vm0, %v321_v54, %v327_v55 }
  0xb1   : > { %330 = vst [vmem:[%s141_s20] sm:$0xff] %v328_v56 }
  0xb3   : > { %v286_v57 = vpop.f32.mrf.mxu2  ;;  %v299_v58 = vpop.f32.mrf.mxu3 }
  0xb4 PF: > { %s12_s9 = sadd.s32 1, %s417_s9  }
  0xb5   : > { %p9_p4 = scmp.ge.s32.totalorder %s12_s9, 6  }
  0xb7   :  { %11 = sbr.rel (!%p9_p4) target bundleno = 1 (0x1), region = 58 }

</bundles_post_ra>
